<compile_context>
chip_gen: v5e
topology: v5e:2x2
jax: 0.10.0
libtpu: 0.0.40
codegen_flags: <defaults>
</compile_context>

<pallas_src>
import jax
import jax.numpy as jnp
from jax.experimental import pallas as pl
from jax.experimental.pallas import tpu as pltpu

LEAKY_SLOPE = 0.2
BN_EPS = 0.8


def _round_up(x, m):
    return ((x + m - 1) // m) * m


# ----------------------- in-kernel helpers (traced) -------------------------

def _epilogue(acc, p_ref):
    """acc: [M, Cout] f32. p_ref rows: 0=conv bias, 1=BN scale, 2=BN shift."""
    a = acc + p_ref[0:1, :]
    a = jnp.where(a > 0, a, LEAKY_SLOPE * a)          # LeakyReLU(0.2)
    # Dropout2d(0.25) is identity in eval mode; BatchNorm folded to scale/shift.
    return a * p_ref[1:2, :] + p_ref[2:3, :]


def _store_slab(slab_ref, act2d):
    """Write [Hn*Wn*nb, C] activation into the zero-padded HWNC slab."""
    Hp, Wp, nb, cout = slab_ref.shape
    Hn, Wn = Hp - 2, Wp - 2
    zrow = jnp.zeros((1, Wp, nb, cout), jnp.float32)
    zcol = jnp.zeros((Hp, 1, nb, cout), jnp.float32)
    slab_ref[0:1, :, :, :] = zrow                      # zero borders every step
    slab_ref[Hp - 1:Hp, :, :, :] = zrow                # (megacore-safe, cheap)
    slab_ref[:, 0:1, :, :] = zcol
    slab_ref[:, Wp - 1:Wp, :, :] = zcol
    slab_ref[1:1 + Hn, 1:1 + Wn, :, :] = act2d.reshape(Hn, Wn, nb, cout)


def _conv_from_slab(slab_ref, w_ref, p_ref):
    """3x3 stride-2 conv reading a padded [Hp, Wp, nb, Cin] VMEM slab.

    Nine accumulated MXU matmuls, one per (ky, kx) tap.  The stride-2 gather
    uses leading-dim slices/reshapes only.  Returns [Hn*Wn*nb, Cout] f32 with
    rows ordered (yo, xo, n) -- the order the next slab store expects.
    """
    Hp, Wp, nb, cin = slab_ref.shape
    Hn, Wn = (Hp - 2) // 2, (Wp - 2) // 2
    acc = None
    for t in range(9):
        ky, kx = t // 3, t % 3
        v = slab_ref[ky:ky + 2 * Hn, kx:kx + 2 * Wn, :, :]       # [2Hn,2Wn,nb,cin]
        v = v.reshape(Hn, 2, 2 * Wn, nb, cin)[:, 0:1]            # even rows
        v = v.reshape(Hn, Wn, 2, nb, cin)[:, :, 0:1]             # even cols
        x2d = v.reshape(Hn * Wn * nb, cin).astype(jnp.bfloat16)
        part = jnp.dot(x2d, w_ref[t], preferred_element_type=jnp.float32)
        acc = part if acc is None else acc + part
    return _epilogue(acc, p_ref)


# ------------------------------ fused kernel --------------------------------

def _disc_kernel(p1_ref, w1_ref, pp1_ref, w2_ref, pp2_ref, w3_ref, pp3_ref,
                 w4_ref, pp4_ref, advw_ref, advb_ref, out_ref,
                 slab1, slab2, slab3):
    nb = out_ref.shape[0]

    # ---- block 1: im2col'd patches @ W1, epilogue, write padded slab -------
    S1, _, K1 = p1_ref.shape
    x1 = p1_ref[...].reshape(S1 * nb, K1)                        # bf16
    acc1 = jnp.dot(x1, w1_ref[...], preferred_element_type=jnp.float32)
    _store_slab(slab1, _epilogue(acc1, pp1_ref))

    # ---- blocks 2..4: in-VMEM 9-tap convs -----------------------------------
    _store_slab(slab2, _conv_from_slab(slab1, w2_ref, pp2_ref))
    _store_slab(slab3, _conv_from_slab(slab2, w3_ref, pp3_ref))
    feat = _conv_from_slab(slab3, w4_ref, pp4_ref)               # [ds*ds*nb,128]

    # ---- adv head: Linear(128*ds*ds -> 1) + Sigmoid -------------------------
    P = advw_ref.shape[0]                                        # ds*ds
    cfin = feat.shape[-1]
    f3 = feat.reshape(P, nb, cfin)
    z = None
    for p in range(P):
        fp = f3[p:p + 1].reshape(nb, cfin)
        c = jnp.sum(fp * advw_ref[p:p + 1, :], axis=-1, keepdims=True)
        z = c if z is None else z + c
    z = z + advb_ref[...]
    out_ref[...] = 1.0 / (1.0 + jnp.exp(-z))                     # Sigmoid


# ------------------------------- JAX glue ------------------------------------

def _block1_patches(x_nhwc):
    """NHWC -> [Ho*Wo, N, 9*C] bf16 patches; rows (yo, xo), cols (ky, kx, c)."""
    N, H, W, C = x_nhwc.shape
    Ho, Wo = H // 2, W // 2
    xp = jnp.pad(x_nhwc, ((0, 0), (1, 1), (1, 1), (0, 0)))
    taps = []
    for dy in range(3):
        for dx in range(3):
            taps.append(jax.lax.slice(
                xp, (0, dy, dx, 0),
                (N, dy + 2 * (Ho - 1) + 1, dx + 2 * (Wo - 1) + 1, C),
                (1, 2, 2, 1)))                                   # [N, Ho, Wo, C]
    pat = jnp.concatenate(taps, axis=-1)                         # [N, Ho, Wo, 9C]
    pat = jnp.transpose(pat, (1, 2, 0, 3))                       # [Ho, Wo, N, 9C]
    return pat.reshape(Ho * Wo, N, 9 * C).astype(jnp.bfloat16)


def discriminator_forward(params, img_nchw):
    N, C, H, W = img_nchw.shape
    if H != W or H % 16 != 0:
        raise ValueError("img_size must be square and a multiple of 16")
    ds = H // 16

    # Batch tiling: nb multiple of 16 (bf16 sublane tile), batch padded to a
    # multiple of nb (no partial blocks), >=2 grid steps when batch is large
    # enough so v7x's two TensorCores both get work.
    nb_cap = 64 if H <= 16 else (32 if H <= 32 else 16)
    n16 = _round_up(N, 16)
    nb = min(nb_cap, max(16, _round_up((n16 + 1) // 2, 16)))
    n_pad = _round_up(N, nb)
    grid = (n_pad // nb,)

    x = jnp.transpose(img_nchw, (0, 2, 3, 1)).astype(jnp.float32)   # NHWC
    if n_pad != N:
        x = jnp.pad(x, ((0, n_pad - N), (0, 0), (0, 0), (0, 0)))
    patches = _block1_patches(x)                                    # [S1, n_pad, 9C]

    (w1, b1, s1, t1), (w2, b2, s2, t2), (w3, b3, s3, t3), (w4, b4, s4, t4) = \
        params["blocks"]
    w1m = w1.reshape(9 * C, 16).astype(jnp.bfloat16)
    w2m = w2.reshape(9, 16, 32).astype(jnp.bfloat16)
    w3m = w3.reshape(9, 32, 64).astype(jnp.bfloat16)
    w4m = w4.reshape(9, 64, 128).astype(jnp.bfloat16)
    pp1 = jnp.stack([b1, s1, t1]).astype(jnp.float32)               # [3, 16]
    pp2 = jnp.stack([b2, s2, t2]).astype(jnp.float32)               # [3, 32]
    pp3 = jnp.stack([b3, s3, t3]).astype(jnp.float32)               # [3, 64]
    pp4 = jnp.stack([b4, s4, t4]).astype(jnp.float32)               # [3, 128]
    # PyTorch flattens NCHW -> (c, yo, xo); regroup adv weight to [(yo,xo), c].
    advw = params["adv_w"][:, 0].reshape(128, ds, ds)
    advw = jnp.transpose(advw, (1, 2, 0)).reshape(ds * ds, 128).astype(jnp.float32)
    advb = params["adv_b"].reshape(1, 1).astype(jnp.float32)

    S1 = (H // 2) * (W // 2)
    res = lambda i: (0, 0)
    res3 = lambda i: (0, 0, 0)
    out = pl.pallas_call(
        _disc_kernel,
        out_shape=jax.ShapeDtypeStruct((n_pad, 1), jnp.float32),
        grid=grid,
        in_specs=[
            pl.BlockSpec((S1, nb, 9 * C), lambda i: (0, i, 0)),   # patches: N-tiled
            pl.BlockSpec((9 * C, 16), res),                       # resident weights
            pl.BlockSpec((3, 16), res),
            pl.BlockSpec((9, 16, 32), res3),
            pl.BlockSpec((3, 32), res),
            pl.BlockSpec((9, 32, 64), res3),
            pl.BlockSpec((3, 64), res),
            pl.BlockSpec((9, 64, 128), res3),
            pl.BlockSpec((3, 128), res),
            pl.BlockSpec((ds * ds, 128), res),
            pl.BlockSpec((1, 1), res),
        ],
        out_specs=pl.BlockSpec((nb, 1), lambda i: (i, 0)),
        scratch_shapes=[
            pltpu.VMEM((H // 2 + 2, W // 2 + 2, nb, 16), jnp.float32),
            pltpu.VMEM((H // 4 + 2, W // 4 + 2, nb, 32), jnp.float32),
            pltpu.VMEM((H // 8 + 2, W // 8 + 2, nb, 64), jnp.float32),
        ],
        compiler_params=pltpu.CompilerParams(
            dimension_semantics=("parallel",),
            vmem_limit_bytes=48 * 1024 * 1024,      # fits v7x's 64 MiB VMEM
        ),
    )(patches, w1m, pp1, w2m, pp2, w3m, pp3, w4m, pp4, advw, advb)
    return out[:N]


# ------------------------------ model setup ---------------------------------

def init_params(key, img_size, channels):
    filt = [channels, 16, 32, 64, 128]
    ds_size = img_size // (2 ** 4)
    blocks = []
    for i in range(4):
        cin, cout = filt[i], filt[i + 1]
        key, kw, kb, kg, kbe = jax.random.split(key, 5)
        w = 0.05 * jax.random.normal(kw, (3, 3, cin, cout), dtype=jnp.float32)
        b = 0.05 * jax.random.normal(kb, (cout,), dtype=jnp.float32)
        if i == 0:
            # block 1 has no BatchNorm
            scale = jnp.ones((cout,), jnp.float32)
            shift = jnp.zeros((cout,), jnp.float32)
        else:
            gamma = 1.0 + 0.1 * jax.random.normal(kg, (cout,), dtype=jnp.float32)
            beta = 0.1 * jax.random.normal(kbe, (cout,), dtype=jnp.float32)
            running_mean = jnp.zeros((cout,), jnp.float32)
            running_var = jnp.ones((cout,), jnp.float32)
            scale = gamma / jnp.sqrt(running_var + BN_EPS)
            shift = beta - running_mean * scale
        blocks.append((w, b, scale, shift))
    key, kw, kb = jax.random.split(key, 3)
    din = 128 * ds_size * ds_size
    adv_w = 0.05 * jax.random.normal(kw, (din, 1), dtype=jnp.float32)
    adv_b = 0.05 * jax.random.normal(kb, (1,), dtype=jnp.float32)
    return {"blocks": blocks, "adv_w": adv_w, "adv_b": adv_b}


# --------------------------------- main --------------------------------------

if __name__ == "__main__":
    img_size, channels, batch = 16, 4, 2
    key = jax.random.PRNGKey(0)
    k_img, k_par = jax.random.split(key)
    img = jax.random.normal(k_img, (batch, channels, img_size, img_size),
                            dtype=jnp.float32)
    params = init_params(k_par, img_size, channels)

    fwd = jax.jit(discriminator_forward)
    validity = jax.block_until_ready(fwd(params, img))

    assert validity.shape == (batch, 1), validity.shape
    assert bool(jnp.all(jnp.isfinite(validity)))
    assert bool(jnp.all((validity >= 0.0) & (validity <= 1.0)))
    print("KERNEL_OK")
</pallas_src>

<mosaic_0001>
module attributes {stable_mosaic.version = 11 : i64} {
  func.func @_disc_kernel(%arg0: i32, %arg1: memref<64x16x36xbf16, #tpu.memory_space<vmem>>, %arg2: memref<36x16xbf16, #tpu.memory_space<vmem>>, %arg3: memref<3x16xf32, #tpu.memory_space<vmem>>, %arg4: memref<9x16x32xbf16, #tpu.memory_space<vmem>>, %arg5: memref<3x32xf32, #tpu.memory_space<vmem>>, %arg6: memref<9x32x64xbf16, #tpu.memory_space<vmem>>, %arg7: memref<3x64xf32, #tpu.memory_space<vmem>>, %arg8: memref<9x64x128xbf16, #tpu.memory_space<vmem>>, %arg9: memref<3x128xf32, #tpu.memory_space<vmem>>, %arg10: memref<1x128xf32, #tpu.memory_space<vmem>>, %arg11: memref<1x1xf32, #tpu.memory_space<vmem>>, %arg12: memref<16x1xf32, #tpu.memory_space<vmem>>, %arg13: memref<10x10x16x16xf32, #tpu.memory_space<vmem>>, %arg14: memref<6x6x16x32xf32, #tpu.memory_space<vmem>>, %arg15: memref<4x4x16x64xf32, #tpu.memory_space<vmem>>) attributes {dimension_semantics = [#tpu.dimension_semantics<parallel>], iteration_bounds = array<i64: 1>, scalar_prefetch = 0 : i64, scratch_operands = 3 : i64, tpu.core_type = #tpu.core_type<tc>, window_params = [{transform_indices = @transform_0, window_bounds = array<i64: 64, 16, 36>}, {pipeline_mode = #tpu.pipeline_mode<synchronous>, transform_indices = @transform_1, window_bounds = array<i64: 36, 16>}, {pipeline_mode = #tpu.pipeline_mode<synchronous>, transform_indices = @transform_2, window_bounds = array<i64: 3, 16>}, {pipeline_mode = #tpu.pipeline_mode<synchronous>, transform_indices = @transform_3, window_bounds = array<i64: 9, 16, 32>}, {pipeline_mode = #tpu.pipeline_mode<synchronous>, transform_indices = @transform_4, window_bounds = array<i64: 3, 32>}, {pipeline_mode = #tpu.pipeline_mode<synchronous>, transform_indices = @transform_5, window_bounds = array<i64: 9, 32, 64>}, {pipeline_mode = #tpu.pipeline_mode<synchronous>, transform_indices = @transform_6, window_bounds = array<i64: 3, 64>}, {pipeline_mode = #tpu.pipeline_mode<synchronous>, transform_indices = @transform_7, window_bounds = array<i64: 9, 64, 128>}, {pipeline_mode = #tpu.pipeline_mode<synchronous>, transform_indices = @transform_8, window_bounds = array<i64: 3, 128>}, {pipeline_mode = #tpu.pipeline_mode<synchronous>, transform_indices = @transform_9, window_bounds = array<i64: 1, 128>}, {pipeline_mode = #tpu.pipeline_mode<synchronous>, transform_indices = @transform_10, window_bounds = array<i64: 1, 1>}, {transform_indices = @transform_11, window_bounds = array<i64: 16, 1>}]} {
    %c0 = arith.constant 0 : index
    %c0_0 = arith.constant 0 : index
    %c0_1 = arith.constant 0 : index
    %0 = vector.load %arg1[%c0, %c0_0, %c0_1] : memref<64x16x36xbf16, #tpu.memory_space<vmem>>, vector<64x16x36xbf16>
    %1 = vector.shape_cast %0 : vector<64x16x36xbf16> to vector<1024x36xbf16>
    %c0_2 = arith.constant 0 : index
    %c0_3 = arith.constant 0 : index
    %2 = vector.load %arg2[%c0_2, %c0_3] : memref<36x16xbf16, #tpu.memory_space<vmem>>, vector<36x16xbf16>
    %cst = arith.constant dense<0.000000e+00> : vector<1024x16xf32>
    %3 = tpu.matmul %1, %2, %cst {dimension_numbers = #tpu.dot_dimension_numbers<[1], [0], [0], [1], [0, 0, 1, 1], [], []>} : vector<1024x36xbf16>, vector<36x16xbf16>, vector<1024x16xf32> -> vector<1024x16xf32>
    %c0_4 = arith.constant 0 : index
    %c0_5 = arith.constant 0 : index
    %4 = vector.load %arg3[%c0_4, %c0_5] : memref<3x16xf32, #tpu.memory_space<vmem>>, vector<1x16xf32>
    %5 = vector.broadcast %4 : vector<1x16xf32> to vector<1024x16xf32>
    %6 = arith.addf %3, %5 : vector<1024x16xf32>
    %cst_6 = arith.constant 0.000000e+00 : f32
    %7 = vector.broadcast %cst_6 : f32 to vector<1024x16xf32>
    %8 = arith.cmpf ogt, %6, %7 : vector<1024x16xf32>
    %cst_7 = arith.constant 2.000000e-01 : f32
    %9 = vector.broadcast %cst_7 : f32 to vector<1024x16xf32>
    %10 = arith.mulf %9, %6 : vector<1024x16xf32>
    %11 = arith.select %8, %6, %10 : vector<1024x16xi1>, vector<1024x16xf32>
    %c1 = arith.constant 1 : index
    %c0_8 = arith.constant 0 : index
    %12 = vector.load %arg3[%c1, %c0_8] : memref<3x16xf32, #tpu.memory_space<vmem>>, vector<1x16xf32>
    %13 = vector.broadcast %12 : vector<1x16xf32> to vector<1024x16xf32>
    %14 = arith.mulf %11, %13 : vector<1024x16xf32>
    %c2 = arith.constant 2 : index
    %c0_9 = arith.constant 0 : index
    %15 = vector.load %arg3[%c2, %c0_9] : memref<3x16xf32, #tpu.memory_space<vmem>>, vector<1x16xf32>
    %16 = vector.broadcast %15 : vector<1x16xf32> to vector<1024x16xf32>
    %17 = arith.addf %14, %16 : vector<1024x16xf32>
    %cst_10 = arith.constant 0.000000e+00 : f32
    %18 = vector.broadcast %cst_10 : f32 to vector<1x10x16x16xf32>
    %cst_11 = arith.constant 0.000000e+00 : f32
    %19 = vector.broadcast %cst_11 : f32 to vector<10x1x16x16xf32>
    %c0_12 = arith.constant 0 : index
    %c0_13 = arith.constant 0 : index
    %c0_14 = arith.constant 0 : index
    %c0_15 = arith.constant 0 : index
    %20 = vector.load %arg13[%c0_12, %c0_13, %c0_14, %c0_15] : memref<10x10x16x16xf32, #tpu.memory_space<vmem>>, vector<1x10x16x16xf32>
    tpu.vector_store %arg13[%c0_12, %c0_13, %c0_14, %c0_15], %18 {strides = array<i32>} : memref<10x10x16x16xf32, #tpu.memory_space<vmem>>, vector<1x10x16x16xf32>,
    %c9 = arith.constant 9 : index
    %c0_16 = arith.constant 0 : index
    %c0_17 = arith.constant 0 : index
    %c0_18 = arith.constant 0 : index
    %21 = vector.load %arg13[%c9, %c0_16, %c0_17, %c0_18] : memref<10x10x16x16xf32, #tpu.memory_space<vmem>>, vector<1x10x16x16xf32>
    tpu.vector_store %arg13[%c9, %c0_16, %c0_17, %c0_18], %18 {strides = array<i32>} : memref<10x10x16x16xf32, #tpu.memory_space<vmem>>, vector<1x10x16x16xf32>,
    %c0_19 = arith.constant 0 : index
    %c0_20 = arith.constant 0 : index
    %c0_21 = arith.constant 0 : index
    %c0_22 = arith.constant 0 : index
    %22 = vector.load %arg13[%c0_19, %c0_20, %c0_21, %c0_22] : memref<10x10x16x16xf32, #tpu.memory_space<vmem>>, vector<10x1x16x16xf32>
    tpu.vector_store %arg13[%c0_19, %c0_20, %c0_21, %c0_22], %19 {strides = array<i32>} : memref<10x10x16x16xf32, #tpu.memory_space<vmem>>, vector<10x1x16x16xf32>,
    %c0_23 = arith.constant 0 : index
    %c9_24 = arith.constant 9 : index
    %c0_25 = arith.constant 0 : index
    %c0_26 = arith.constant 0 : index
    %23 = vector.load %arg13[%c0_23, %c9_24, %c0_25, %c0_26] : memref<10x10x16x16xf32, #tpu.memory_space<vmem>>, vector<10x1x16x16xf32>
    tpu.vector_store %arg13[%c0_23, %c9_24, %c0_25, %c0_26], %19 {strides = array<i32>} : memref<10x10x16x16xf32, #tpu.memory_space<vmem>>, vector<10x1x16x16xf32>,
    %24 = vector.shape_cast %17 : vector<1024x16xf32> to vector<8x8x16x16xf32>
    %c1_27 = arith.constant 1 : index
    %c1_28 = arith.constant 1 : index
    %c0_29 = arith.constant 0 : index
    %c0_30 = arith.constant 0 : index
    %25 = vector.load %arg13[%c1_27, %c1_28, %c0_29, %c0_30] : memref<10x10x16x16xf32, #tpu.memory_space<vmem>>, vector<8x8x16x16xf32>
    tpu.vector_store %arg13[%c1_27, %c1_28, %c0_29, %c0_30], %24 {strides = array<i32>} : memref<10x10x16x16xf32, #tpu.memory_space<vmem>>, vector<8x8x16x16xf32>,
    %c0_31 = arith.constant 0 : index
    %c0_32 = arith.constant 0 : index
    %c0_33 = arith.constant 0 : index
    %c0_34 = arith.constant 0 : index
    %26 = vector.load %arg13[%c0_31, %c0_32, %c0_33, %c0_34] : memref<10x10x16x16xf32, #tpu.memory_space<vmem>>, vector<8x8x16x16xf32>
    %27 = vector.shape_cast %26 : vector<8x8x16x16xf32> to vector<4x2x8x16x16xf32>
    %28 = vector.extract_strided_slice %27 {offsets = [0, 0, 0, 0, 0], sizes = [4, 1, 8, 16, 16], strides = [1, 1, 1, 1, 1]} : vector<4x2x8x16x16xf32> to vector<4x1x8x16x16xf32>
    %29 = vector.shape_cast %28 : vector<4x1x8x16x16xf32> to vector<4x4x2x16x16xf32>
    %30 = vector.extract_strided_slice %29 {offsets = [0, 0, 0, 0, 0], sizes = [4, 4, 1, 16, 16], strides = [1, 1, 1, 1, 1]} : vector<4x4x2x16x16xf32> to vector<4x4x1x16x16xf32>
    %31 = vector.shape_cast %30 : vector<4x4x1x16x16xf32> to vector<256x16xf32>
    %32 = arith.truncf %31 : vector<256x16xf32> to vector<256x16xbf16>
    %c0_35 = arith.constant 0 : index
    %c0_36 = arith.constant 0 : index
    %c0_37 = arith.constant 0 : index
    %33 = vector.load %arg4[%c0_35, %c0_36, %c0_37] : memref<9x16x32xbf16, #tpu.memory_space<vmem>>, vector<1x16x32xbf16>
    %34 = vector.shape_cast %33 : vector<1x16x32xbf16> to vector<16x32xbf16>
    %cst_38 = arith.constant dense<0.000000e+00> : vector<256x32xf32>
    %35 = tpu.matmul %32, %34, %cst_38 {dimension_numbers = #tpu.dot_dimension_numbers<[1], [0], [0], [1], [0, 0, 1, 1], [], []>} : vector<256x16xbf16>, vector<16x32xbf16>, vector<256x32xf32> -> vector<256x32xf32>
    %c0_39 = arith.constant 0 : index
    %c1_40 = arith.constant 1 : index
    %c0_41 = arith.constant 0 : index
    %c0_42 = arith.constant 0 : index
    %36 = vector.load %arg13[%c0_39, %c1_40, %c0_41, %c0_42] : memref<10x10x16x16xf32, #tpu.memory_space<vmem>>, vector<8x8x16x16xf32>
    %37 = vector.shape_cast %36 : vector<8x8x16x16xf32> to vector<4x2x8x16x16xf32>
    %38 = vector.extract_strided_slice %37 {offsets = [0, 0, 0, 0, 0], sizes = [4, 1, 8, 16, 16], strides = [1, 1, 1, 1, 1]} : vector<4x2x8x16x16xf32> to vector<4x1x8x16x16xf32>
    %39 = vector.shape_cast %38 : vector<4x1x8x16x16xf32> to vector<4x4x2x16x16xf32>
    %40 = vector.extract_strided_slice %39 {offsets = [0, 0, 0, 0, 0], sizes = [4, 4, 1, 16, 16], strides = [1, 1, 1, 1, 1]} : vector<4x4x2x16x16xf32> to vector<4x4x1x16x16xf32>
    %41 = vector.shape_cast %40 : vector<4x4x1x16x16xf32> to vector<256x16xf32>
    %42 = arith.truncf %41 : vector<256x16xf32> to vector<256x16xbf16>
    %c1_43 = arith.constant 1 : index
    %c0_44 = arith.constant 0 : index
    %c0_45 = arith.constant 0 : index
    %43 = vector.load %arg4[%c1_43, %c0_44, %c0_45] : memref<9x16x32xbf16, #tpu.memory_space<vmem>>, vector<1x16x32xbf16>
    %44 = vector.shape_cast %43 : vector<1x16x32xbf16> to vector<16x32xbf16>
    %cst_46 = arith.constant dense<0.000000e+00> : vector<256x32xf32>
    %45 = tpu.matmul %42, %44, %cst_46 {dimension_numbers = #tpu.dot_dimension_numbers<[1], [0], [0], [1], [0, 0, 1, 1], [], []>} : vector<256x16xbf16>, vector<16x32xbf16>, vector<256x32xf32> -> vector<256x32xf32>
    %46 = arith.addf %35, %45 : vector<256x32xf32>
    %c0_47 = arith.constant 0 : index
    %c2_48 = arith.constant 2 : index
    %c0_49 = arith.constant 0 : index
    %c0_50 = arith.constant 0 : index
    %47 = vector.load %arg13[%c0_47, %c2_48, %c0_49, %c0_50] : memref<10x10x16x16xf32, #tpu.memory_space<vmem>>, vector<8x8x16x16xf32>
    %48 = vector.shape_cast %47 : vector<8x8x16x16xf32> to vector<4x2x8x16x16xf32>
    %49 = vector.extract_strided_slice %48 {offsets = [0, 0, 0, 0, 0], sizes = [4, 1, 8, 16, 16], strides = [1, 1, 1, 1, 1]} : vector<4x2x8x16x16xf32> to vector<4x1x8x16x16xf32>
    %50 = vector.shape_cast %49 : vector<4x1x8x16x16xf32> to vector<4x4x2x16x16xf32>
    %51 = vector.extract_strided_slice %50 {offsets = [0, 0, 0, 0, 0], sizes = [4, 4, 1, 16, 16], strides = [1, 1, 1, 1, 1]} : vector<4x4x2x16x16xf32> to vector<4x4x1x16x16xf32>
    %52 = vector.shape_cast %51 : vector<4x4x1x16x16xf32> to vector<256x16xf32>
    %53 = arith.truncf %52 : vector<256x16xf32> to vector<256x16xbf16>
    %c2_51 = arith.constant 2 : index
    %c0_52 = arith.constant 0 : index
    %c0_53 = arith.constant 0 : index
    %54 = vector.load %arg4[%c2_51, %c0_52, %c0_53] : memref<9x16x32xbf16, #tpu.memory_space<vmem>>, vector<1x16x32xbf16>
    %55 = vector.shape_cast %54 : vector<1x16x32xbf16> to vector<16x32xbf16>
    %cst_54 = arith.constant dense<0.000000e+00> : vector<256x32xf32>
    %56 = tpu.matmul %53, %55, %cst_54 {dimension_numbers = #tpu.dot_dimension_numbers<[1], [0], [0], [1], [0, 0, 1, 1], [], []>} : vector<256x16xbf16>, vector<16x32xbf16>, vector<256x32xf32> -> vector<256x32xf32>
    %57 = arith.addf %46, %56 : vector<256x32xf32>
    %c1_55 = arith.constant 1 : index
    %c0_56 = arith.constant 0 : index
    %c0_57 = arith.constant 0 : index
    %c0_58 = arith.constant 0 : index
    %58 = vector.load %arg13[%c1_55, %c0_56, %c0_57, %c0_58] : memref<10x10x16x16xf32, #tpu.memory_space<vmem>>, vector<8x8x16x16xf32>
    %59 = vector.shape_cast %58 : vector<8x8x16x16xf32> to vector<4x2x8x16x16xf32>
    %60 = vector.extract_strided_slice %59 {offsets = [0, 0, 0, 0, 0], sizes = [4, 1, 8, 16, 16], strides = [1, 1, 1, 1, 1]} : vector<4x2x8x16x16xf32> to vector<4x1x8x16x16xf32>
    %61 = vector.shape_cast %60 : vector<4x1x8x16x16xf32> to vector<4x4x2x16x16xf32>
    %62 = vector.extract_strided_slice %61 {offsets = [0, 0, 0, 0, 0], sizes = [4, 4, 1, 16, 16], strides = [1, 1, 1, 1, 1]} : vector<4x4x2x16x16xf32> to vector<4x4x1x16x16xf32>
    %63 = vector.shape_cast %62 : vector<4x4x1x16x16xf32> to vector<256x16xf32>
    %64 = arith.truncf %63 : vector<256x16xf32> to vector<256x16xbf16>
    %c3 = arith.constant 3 : index
    %c0_59 = arith.constant 0 : index
    %c0_60 = arith.constant 0 : index
    %65 = vector.load %arg4[%c3, %c0_59, %c0_60] : memref<9x16x32xbf16, #tpu.memory_space<vmem>>, vector<1x16x32xbf16>
    %66 = vector.shape_cast %65 : vector<1x16x32xbf16> to vector<16x32xbf16>
    %cst_61 = arith.constant dense<0.000000e+00> : vector<256x32xf32>
    %67 = tpu.matmul %64, %66, %cst_61 {dimension_numbers = #tpu.dot_dimension_numbers<[1], [0], [0], [1], [0, 0, 1, 1], [], []>} : vector<256x16xbf16>, vector<16x32xbf16>, vector<256x32xf32> -> vector<256x32xf32>
    %68 = arith.addf %57, %67 : vector<256x32xf32>
    %c1_62 = arith.constant 1 : index
    %c1_63 = arith.constant 1 : index
    %c0_64 = arith.constant 0 : index
    %c0_65 = arith.constant 0 : index
    %69 = vector.load %arg13[%c1_62, %c1_63, %c0_64, %c0_65] : memref<10x10x16x16xf32, #tpu.memory_space<vmem>>, vector<8x8x16x16xf32>
    %70 = vector.shape_cast %69 : vector<8x8x16x16xf32> to vector<4x2x8x16x16xf32>
    %71 = vector.extract_strided_slice %70 {offsets = [0, 0, 0, 0, 0], sizes = [4, 1, 8, 16, 16], strides = [1, 1, 1, 1, 1]} : vector<4x2x8x16x16xf32> to vector<4x1x8x16x16xf32>
    %72 = vector.shape_cast %71 : vector<4x1x8x16x16xf32> to vector<4x4x2x16x16xf32>
    %73 = vector.extract_strided_slice %72 {offsets = [0, 0, 0, 0, 0], sizes = [4, 4, 1, 16, 16], strides = [1, 1, 1, 1, 1]} : vector<4x4x2x16x16xf32> to vector<4x4x1x16x16xf32>
    %74 = vector.shape_cast %73 : vector<4x4x1x16x16xf32> to vector<256x16xf32>
    %75 = arith.truncf %74 : vector<256x16xf32> to vector<256x16xbf16>
    %c4 = arith.constant 4 : index
    %c0_66 = arith.constant 0 : index
    %c0_67 = arith.constant 0 : index
    %76 = vector.load %arg4[%c4, %c0_66, %c0_67] : memref<9x16x32xbf16, #tpu.memory_space<vmem>>, vector<1x16x32xbf16>
    %77 = vector.shape_cast %76 : vector<1x16x32xbf16> to vector<16x32xbf16>
    %cst_68 = arith.constant dense<0.000000e+00> : vector<256x32xf32>
    %78 = tpu.matmul %75, %77, %cst_68 {dimension_numbers = #tpu.dot_dimension_numbers<[1], [0], [0], [1], [0, 0, 1, 1], [], []>} : vector<256x16xbf16>, vector<16x32xbf16>, vector<256x32xf32> -> vector<256x32xf32>
    %79 = arith.addf %68, %78 : vector<256x32xf32>
    %c1_69 = arith.constant 1 : index
    %c2_70 = arith.constant 2 : index
    %c0_71 = arith.constant 0 : index
    %c0_72 = arith.constant 0 : index
    %80 = vector.load %arg13[%c1_69, %c2_70, %c0_71, %c0_72] : memref<10x10x16x16xf32, #tpu.memory_space<vmem>>, vector<8x8x16x16xf32>
    %81 = vector.shape_cast %80 : vector<8x8x16x16xf32> to vector<4x2x8x16x16xf32>
    %82 = vector.extract_strided_slice %81 {offsets = [0, 0, 0, 0, 0], sizes = [4, 1, 8, 16, 16], strides = [1, 1, 1, 1, 1]} : vector<4x2x8x16x16xf32> to vector<4x1x8x16x16xf32>
    %83 = vector.shape_cast %82 : vector<4x1x8x16x16xf32> to vector<4x4x2x16x16xf32>
    %84 = vector.extract_strided_slice %83 {offsets = [0, 0, 0, 0, 0], sizes = [4, 4, 1, 16, 16], strides = [1, 1, 1, 1, 1]} : vector<4x4x2x16x16xf32> to vector<4x4x1x16x16xf32>
    %85 = vector.shape_cast %84 : vector<4x4x1x16x16xf32> to vector<256x16xf32>
    %86 = arith.truncf %85 : vector<256x16xf32> to vector<256x16xbf16>
    %c5 = arith.constant 5 : index
    %c0_73 = arith.constant 0 : index
    %c0_74 = arith.constant 0 : index
    %87 = vector.load %arg4[%c5, %c0_73, %c0_74] : memref<9x16x32xbf16, #tpu.memory_space<vmem>>, vector<1x16x32xbf16>
    %88 = vector.shape_cast %87 : vector<1x16x32xbf16> to vector<16x32xbf16>
    %cst_75 = arith.constant dense<0.000000e+00> : vector<256x32xf32>
    %89 = tpu.matmul %86, %88, %cst_75 {dimension_numbers = #tpu.dot_dimension_numbers<[1], [0], [0], [1], [0, 0, 1, 1], [], []>} : vector<256x16xbf16>, vector<16x32xbf16>, vector<256x32xf32> -> vector<256x32xf32>
    %90 = arith.addf %79, %89 : vector<256x32xf32>
    %c2_76 = arith.constant 2 : index
    %c0_77 = arith.constant 0 : index
    %c0_78 = arith.constant 0 : index
    %c0_79 = arith.constant 0 : index
    %91 = vector.load %arg13[%c2_76, %c0_77, %c0_78, %c0_79] : memref<10x10x16x16xf32, #tpu.memory_space<vmem>>, vector<8x8x16x16xf32>
    %92 = vector.shape_cast %91 : vector<8x8x16x16xf32> to vector<4x2x8x16x16xf32>
    %93 = vector.extract_strided_slice %92 {offsets = [0, 0, 0, 0, 0], sizes = [4, 1, 8, 16, 16], strides = [1, 1, 1, 1, 1]} : vector<4x2x8x16x16xf32> to vector<4x1x8x16x16xf32>
    %94 = vector.shape_cast %93 : vector<4x1x8x16x16xf32> to vector<4x4x2x16x16xf32>
    %95 = vector.extract_strided_slice %94 {offsets = [0, 0, 0, 0, 0], sizes = [4, 4, 1, 16, 16], strides = [1, 1, 1, 1, 1]} : vector<4x4x2x16x16xf32> to vector<4x4x1x16x16xf32>
    %96 = vector.shape_cast %95 : vector<4x4x1x16x16xf32> to vector<256x16xf32>
    %97 = arith.truncf %96 : vector<256x16xf32> to vector<256x16xbf16>
    %c6 = arith.constant 6 : index
    %c0_80 = arith.constant 0 : index
    %c0_81 = arith.constant 0 : index
    %98 = vector.load %arg4[%c6, %c0_80, %c0_81] : memref<9x16x32xbf16, #tpu.memory_space<vmem>>, vector<1x16x32xbf16>
    %99 = vector.shape_cast %98 : vector<1x16x32xbf16> to vector<16x32xbf16>
    %cst_82 = arith.constant dense<0.000000e+00> : vector<256x32xf32>
    %100 = tpu.matmul %97, %99, %cst_82 {dimension_numbers = #tpu.dot_dimension_numbers<[1], [0], [0], [1], [0, 0, 1, 1], [], []>} : vector<256x16xbf16>, vector<16x32xbf16>, vector<256x32xf32> -> vector<256x32xf32>
    %101 = arith.addf %90, %100 : vector<256x32xf32>
    %c2_83 = arith.constant 2 : index
    %c1_84 = arith.constant 1 : index
    %c0_85 = arith.constant 0 : index
    %c0_86 = arith.constant 0 : index
    %102 = vector.load %arg13[%c2_83, %c1_84, %c0_85, %c0_86] : memref<10x10x16x16xf32, #tpu.memory_space<vmem>>, vector<8x8x16x16xf32>
    %103 = vector.shape_cast %102 : vector<8x8x16x16xf32> to vector<4x2x8x16x16xf32>
    %104 = vector.extract_strided_slice %103 {offsets = [0, 0, 0, 0, 0], sizes = [4, 1, 8, 16, 16], strides = [1, 1, 1, 1, 1]} : vector<4x2x8x16x16xf32> to vector<4x1x8x16x16xf32>
    %105 = vector.shape_cast %104 : vector<4x1x8x16x16xf32> to vector<4x4x2x16x16xf32>
    %106 = vector.extract_strided_slice %105 {offsets = [0, 0, 0, 0, 0], sizes = [4, 4, 1, 16, 16], strides = [1, 1, 1, 1, 1]} : vector<4x4x2x16x16xf32> to vector<4x4x1x16x16xf32>
    %107 = vector.shape_cast %106 : vector<4x4x1x16x16xf32> to vector<256x16xf32>
    %108 = arith.truncf %107 : vector<256x16xf32> to vector<256x16xbf16>
    %c7 = arith.constant 7 : index
    %c0_87 = arith.constant 0 : index
    %c0_88 = arith.constant 0 : index
    %109 = vector.load %arg4[%c7, %c0_87, %c0_88] : memref<9x16x32xbf16, #tpu.memory_space<vmem>>, vector<1x16x32xbf16>
    %110 = vector.shape_cast %109 : vector<1x16x32xbf16> to vector<16x32xbf16>
    %cst_89 = arith.constant dense<0.000000e+00> : vector<256x32xf32>
    %111 = tpu.matmul %108, %110, %cst_89 {dimension_numbers = #tpu.dot_dimension_numbers<[1], [0], [0], [1], [0, 0, 1, 1], [], []>} : vector<256x16xbf16>, vector<16x32xbf16>, vector<256x32xf32> -> vector<256x32xf32>
    %112 = arith.addf %101, %111 : vector<256x32xf32>
    %c2_90 = arith.constant 2 : index
    %c2_91 = arith.constant 2 : index
    %c0_92 = arith.constant 0 : index
    %c0_93 = arith.constant 0 : index
    %113 = vector.load %arg13[%c2_90, %c2_91, %c0_92, %c0_93] : memref<10x10x16x16xf32, #tpu.memory_space<vmem>>, vector<8x8x16x16xf32>
    %114 = vector.shape_cast %113 : vector<8x8x16x16xf32> to vector<4x2x8x16x16xf32>
    %115 = vector.extract_strided_slice %114 {offsets = [0, 0, 0, 0, 0], sizes = [4, 1, 8, 16, 16], strides = [1, 1, 1, 1, 1]} : vector<4x2x8x16x16xf32> to vector<4x1x8x16x16xf32>
    %116 = vector.shape_cast %115 : vector<4x1x8x16x16xf32> to vector<4x4x2x16x16xf32>
    %117 = vector.extract_strided_slice %116 {offsets = [0, 0, 0, 0, 0], sizes = [4, 4, 1, 16, 16], strides = [1, 1, 1, 1, 1]} : vector<4x4x2x16x16xf32> to vector<4x4x1x16x16xf32>
    %118 = vector.shape_cast %117 : vector<4x4x1x16x16xf32> to vector<256x16xf32>
    %119 = arith.truncf %118 : vector<256x16xf32> to vector<256x16xbf16>
    %c8 = arith.constant 8 : index
    %c0_94 = arith.constant 0 : index
    %c0_95 = arith.constant 0 : index
    %120 = vector.load %arg4[%c8, %c0_94, %c0_95] : memref<9x16x32xbf16, #tpu.memory_space<vmem>>, vector<1x16x32xbf16>
    %121 = vector.shape_cast %120 : vector<1x16x32xbf16> to vector<16x32xbf16>
    %cst_96 = arith.constant dense<0.000000e+00> : vector<256x32xf32>
    %122 = tpu.matmul %119, %121, %cst_96 {dimension_numbers = #tpu.dot_dimension_numbers<[1], [0], [0], [1], [0, 0, 1, 1], [], []>} : vector<256x16xbf16>, vector<16x32xbf16>, vector<256x32xf32> -> vector<256x32xf32>
    %123 = arith.addf %112, %122 : vector<256x32xf32>
    %c0_97 = arith.constant 0 : index
    %c0_98 = arith.constant 0 : index
    %124 = vector.load %arg5[%c0_97, %c0_98] : memref<3x32xf32, #tpu.memory_space<vmem>>, vector<1x32xf32>
    %125 = vector.broadcast %124 : vector<1x32xf32> to vector<256x32xf32>
    %126 = arith.addf %123, %125 : vector<256x32xf32>
    %cst_99 = arith.constant 0.000000e+00 : f32
    %127 = vector.broadcast %cst_99 : f32 to vector<256x32xf32>
    %128 = arith.cmpf ogt, %126, %127 : vector<256x32xf32>
    %cst_100 = arith.constant 2.000000e-01 : f32
    %129 = vector.broadcast %cst_100 : f32 to vector<256x32xf32>
    %130 = arith.mulf %129, %126 : vector<256x32xf32>
    %131 = arith.select %128, %126, %130 : vector<256x32xi1>, vector<256x32xf32>
    %c1_101 = arith.constant 1 : index
    %c0_102 = arith.constant 0 : index
    %132 = vector.load %arg5[%c1_101, %c0_102] : memref<3x32xf32, #tpu.memory_space<vmem>>, vector<1x32xf32>
    %133 = vector.broadcast %132 : vector<1x32xf32> to vector<256x32xf32>
    %134 = arith.mulf %131, %133 : vector<256x32xf32>
    %c2_103 = arith.constant 2 : index
    %c0_104 = arith.constant 0 : index
    %135 = vector.load %arg5[%c2_103, %c0_104] : memref<3x32xf32, #tpu.memory_space<vmem>>, vector<1x32xf32>
    %136 = vector.broadcast %135 : vector<1x32xf32> to vector<256x32xf32>
    %137 = arith.addf %134, %136 : vector<256x32xf32>
    %cst_105 = arith.constant 0.000000e+00 : f32
    %138 = vector.broadcast %cst_105 : f32 to vector<1x6x16x32xf32>
    %cst_106 = arith.constant 0.000000e+00 : f32
    %139 = vector.broadcast %cst_106 : f32 to vector<6x1x16x32xf32>
    %c0_107 = arith.constant 0 : index
    %c0_108 = arith.constant 0 : index
    %c0_109 = arith.constant 0 : index
    %c0_110 = arith.constant 0 : index
    %140 = vector.load %arg14[%c0_107, %c0_108, %c0_109, %c0_110] : memref<6x6x16x32xf32, #tpu.memory_space<vmem>>, vector<1x6x16x32xf32>
    tpu.vector_store %arg14[%c0_107, %c0_108, %c0_109, %c0_110], %138 {strides = array<i32>} : memref<6x6x16x32xf32, #tpu.memory_space<vmem>>, vector<1x6x16x32xf32>,
    %c5_111 = arith.constant 5 : index
    %c0_112 = arith.constant 0 : index
    %c0_113 = arith.constant 0 : index
    %c0_114 = arith.constant 0 : index
    %141 = vector.load %arg14[%c5_111, %c0_112, %c0_113, %c0_114] : memref<6x6x16x32xf32, #tpu.memory_space<vmem>>, vector<1x6x16x32xf32>
    tpu.vector_store %arg14[%c5_111, %c0_112, %c0_113, %c0_114], %138 {strides = array<i32>} : memref<6x6x16x32xf32, #tpu.memory_space<vmem>>, vector<1x6x16x32xf32>,
    %c0_115 = arith.constant 0 : index
    %c0_116 = arith.constant 0 : index
    %c0_117 = arith.constant 0 : index
    %c0_118 = arith.constant 0 : index
    %142 = vector.load %arg14[%c0_115, %c0_116, %c0_117, %c0_118] : memref<6x6x16x32xf32, #tpu.memory_space<vmem>>, vector<6x1x16x32xf32>
    tpu.vector_store %arg14[%c0_115, %c0_116, %c0_117, %c0_118], %139 {strides = array<i32>} : memref<6x6x16x32xf32, #tpu.memory_space<vmem>>, vector<6x1x16x32xf32>,
    %c0_119 = arith.constant 0 : index
    %c5_120 = arith.constant 5 : index
    %c0_121 = arith.constant 0 : index
    %c0_122 = arith.constant 0 : index
    %143 = vector.load %arg14[%c0_119, %c5_120, %c0_121, %c0_122] : memref<6x6x16x32xf32, #tpu.memory_space<vmem>>, vector<6x1x16x32xf32>
    tpu.vector_store %arg14[%c0_119, %c5_120, %c0_121, %c0_122], %139 {strides = array<i32>} : memref<6x6x16x32xf32, #tpu.memory_space<vmem>>, vector<6x1x16x32xf32>,
    %144 = vector.shape_cast %137 : vector<256x32xf32> to vector<4x4x16x32xf32>
    %c1_123 = arith.constant 1 : index
    %c1_124 = arith.constant 1 : index
    %c0_125 = arith.constant 0 : index
    %c0_126 = arith.constant 0 : index
    %145 = vector.load %arg14[%c1_123, %c1_124, %c0_125, %c0_126] : memref<6x6x16x32xf32, #tpu.memory_space<vmem>>, vector<4x4x16x32xf32>
    tpu.vector_store %arg14[%c1_123, %c1_124, %c0_125, %c0_126], %144 {strides = array<i32>} : memref<6x6x16x32xf32, #tpu.memory_space<vmem>>, vector<4x4x16x32xf32>,
    %c0_127 = arith.constant 0 : index
    %c0_128 = arith.constant 0 : index
    %c0_129 = arith.constant 0 : index
    %c0_130 = arith.constant 0 : index
    %146 = vector.load %arg14[%c0_127, %c0_128, %c0_129, %c0_130] : memref<6x6x16x32xf32, #tpu.memory_space<vmem>>, vector<4x4x16x32xf32>
    %147 = vector.shape_cast %146 : vector<4x4x16x32xf32> to vector<2x2x4x16x32xf32>
    %148 = vector.extract_strided_slice %147 {offsets = [0, 0, 0, 0, 0], sizes = [2, 1, 4, 16, 32], strides = [1, 1, 1, 1, 1]} : vector<2x2x4x16x32xf32> to vector<2x1x4x16x32xf32>
    %149 = vector.shape_cast %148 : vector<2x1x4x16x32xf32> to vector<2x2x2x16x32xf32>
    %150 = vector.extract_strided_slice %149 {offsets = [0, 0, 0, 0, 0], sizes = [2, 2, 1, 16, 32], strides = [1, 1, 1, 1, 1]} : vector<2x2x2x16x32xf32> to vector<2x2x1x16x32xf32>
    %151 = vector.shape_cast %150 : vector<2x2x1x16x32xf32> to vector<64x32xf32>
    %152 = arith.truncf %151 : vector<64x32xf32> to vector<64x32xbf16>
    %c0_131 = arith.constant 0 : index
    %c0_132 = arith.constant 0 : index
    %c0_133 = arith.constant 0 : index
    %153 = vector.load %arg6[%c0_131, %c0_132, %c0_133] : memref<9x32x64xbf16, #tpu.memory_space<vmem>>, vector<1x32x64xbf16>
    %154 = vector.shape_cast %153 : vector<1x32x64xbf16> to vector<32x64xbf16>
    %cst_134 = arith.constant dense<0.000000e+00> : vector<64x64xf32>
    %155 = tpu.matmul %152, %154, %cst_134 {dimension_numbers = #tpu.dot_dimension_numbers<[1], [0], [0], [1], [0, 0, 1, 1], [], []>} : vector<64x32xbf16>, vector<32x64xbf16>, vector<64x64xf32> -> vector<64x64xf32>
    %c0_135 = arith.constant 0 : index
    %c1_136 = arith.constant 1 : index
    %c0_137 = arith.constant 0 : index
    %c0_138 = arith.constant 0 : index
    %156 = vector.load %arg14[%c0_135, %c1_136, %c0_137, %c0_138] : memref<6x6x16x32xf32, #tpu.memory_space<vmem>>, vector<4x4x16x32xf32>
    %157 = vector.shape_cast %156 : vector<4x4x16x32xf32> to vector<2x2x4x16x32xf32>
    %158 = vector.extract_strided_slice %157 {offsets = [0, 0, 0, 0, 0], sizes = [2, 1, 4, 16, 32], strides = [1, 1, 1, 1, 1]} : vector<2x2x4x16x32xf32> to vector<2x1x4x16x32xf32>
    %159 = vector.shape_cast %158 : vector<2x1x4x16x32xf32> to vector<2x2x2x16x32xf32>
    %160 = vector.extract_strided_slice %159 {offsets = [0, 0, 0, 0, 0], sizes = [2, 2, 1, 16, 32], strides = [1, 1, 1, 1, 1]} : vector<2x2x2x16x32xf32> to vector<2x2x1x16x32xf32>
    %161 = vector.shape_cast %160 : vector<2x2x1x16x32xf32> to vector<64x32xf32>
    %162 = arith.truncf %161 : vector<64x32xf32> to vector<64x32xbf16>
    %c1_139 = arith.constant 1 : index
    %c0_140 = arith.constant 0 : index
    %c0_141 = arith.constant 0 : index
    %163 = vector.load %arg6[%c1_139, %c0_140, %c0_141] : memref<9x32x64xbf16, #tpu.memory_space<vmem>>, vector<1x32x64xbf16>
    %164 = vector.shape_cast %163 : vector<1x32x64xbf16> to vector<32x64xbf16>
    %cst_142 = arith.constant dense<0.000000e+00> : vector<64x64xf32>
    %165 = tpu.matmul %162, %164, %cst_142 {dimension_numbers = #tpu.dot_dimension_numbers<[1], [0], [0], [1], [0, 0, 1, 1], [], []>} : vector<64x32xbf16>, vector<32x64xbf16>, vector<64x64xf32> -> vector<64x64xf32>
    %166 = arith.addf %155, %165 : vector<64x64xf32>
    %c0_143 = arith.constant 0 : index
    %c2_144 = arith.constant 2 : index
    %c0_145 = arith.constant 0 : index
    %c0_146 = arith.constant 0 : index
    %167 = vector.load %arg14[%c0_143, %c2_144, %c0_145, %c0_146] : memref<6x6x16x32xf32, #tpu.memory_space<vmem>>, vector<4x4x16x32xf32>
    %168 = vector.shape_cast %167 : vector<4x4x16x32xf32> to vector<2x2x4x16x32xf32>
    %169 = vector.extract_strided_slice %168 {offsets = [0, 0, 0, 0, 0], sizes = [2, 1, 4, 16, 32], strides = [1, 1, 1, 1, 1]} : vector<2x2x4x16x32xf32> to vector<2x1x4x16x32xf32>
    %170 = vector.shape_cast %169 : vector<2x1x4x16x32xf32> to vector<2x2x2x16x32xf32>
    %171 = vector.extract_strided_slice %170 {offsets = [0, 0, 0, 0, 0], sizes = [2, 2, 1, 16, 32], strides = [1, 1, 1, 1, 1]} : vector<2x2x2x16x32xf32> to vector<2x2x1x16x32xf32>
    %172 = vector.shape_cast %171 : vector<2x2x1x16x32xf32> to vector<64x32xf32>
    %173 = arith.truncf %172 : vector<64x32xf32> to vector<64x32xbf16>
    %c2_147 = arith.constant 2 : index
    %c0_148 = arith.constant 0 : index
    %c0_149 = arith.constant 0 : index
    %174 = vector.load %arg6[%c2_147, %c0_148, %c0_149] : memref<9x32x64xbf16, #tpu.memory_space<vmem>>, vector<1x32x64xbf16>
    %175 = vector.shape_cast %174 : vector<1x32x64xbf16> to vector<32x64xbf16>
    %cst_150 = arith.constant dense<0.000000e+00> : vector<64x64xf32>
    %176 = tpu.matmul %173, %175, %cst_150 {dimension_numbers = #tpu.dot_dimension_numbers<[1], [0], [0], [1], [0, 0, 1, 1], [], []>} : vector<64x32xbf16>, vector<32x64xbf16>, vector<64x64xf32> -> vector<64x64xf32>
    %177 = arith.addf %166, %176 : vector<64x64xf32>
    %c1_151 = arith.constant 1 : index
    %c0_152 = arith.constant 0 : index
    %c0_153 = arith.constant 0 : index
    %c0_154 = arith.constant 0 : index
    %178 = vector.load %arg14[%c1_151, %c0_152, %c0_153, %c0_154] : memref<6x6x16x32xf32, #tpu.memory_space<vmem>>, vector<4x4x16x32xf32>
    %179 = vector.shape_cast %178 : vector<4x4x16x32xf32> to vector<2x2x4x16x32xf32>
    %180 = vector.extract_strided_slice %179 {offsets = [0, 0, 0, 0, 0], sizes = [2, 1, 4, 16, 32], strides = [1, 1, 1, 1, 1]} : vector<2x2x4x16x32xf32> to vector<2x1x4x16x32xf32>
    %181 = vector.shape_cast %180 : vector<2x1x4x16x32xf32> to vector<2x2x2x16x32xf32>
    %182 = vector.extract_strided_slice %181 {offsets = [0, 0, 0, 0, 0], sizes = [2, 2, 1, 16, 32], strides = [1, 1, 1, 1, 1]} : vector<2x2x2x16x32xf32> to vector<2x2x1x16x32xf32>
    %183 = vector.shape_cast %182 : vector<2x2x1x16x32xf32> to vector<64x32xf32>
    %184 = arith.truncf %183 : vector<64x32xf32> to vector<64x32xbf16>
    %c3_155 = arith.constant 3 : index
    %c0_156 = arith.constant 0 : index
    %c0_157 = arith.constant 0 : index
    %185 = vector.load %arg6[%c3_155, %c0_156, %c0_157] : memref<9x32x64xbf16, #tpu.memory_space<vmem>>, vector<1x32x64xbf16>
    %186 = vector.shape_cast %185 : vector<1x32x64xbf16> to vector<32x64xbf16>
    %cst_158 = arith.constant dense<0.000000e+00> : vector<64x64xf32>
    %187 = tpu.matmul %184, %186, %cst_158 {dimension_numbers = #tpu.dot_dimension_numbers<[1], [0], [0], [1], [0, 0, 1, 1], [], []>} : vector<64x32xbf16>, vector<32x64xbf16>, vector<64x64xf32> -> vector<64x64xf32>
    %188 = arith.addf %177, %187 : vector<64x64xf32>
    %c1_159 = arith.constant 1 : index
    %c1_160 = arith.constant 1 : index
    %c0_161 = arith.constant 0 : index
    %c0_162 = arith.constant 0 : index
    %189 = vector.load %arg14[%c1_159, %c1_160, %c0_161, %c0_162] : memref<6x6x16x32xf32, #tpu.memory_space<vmem>>, vector<4x4x16x32xf32>
    %190 = vector.shape_cast %189 : vector<4x4x16x32xf32> to vector<2x2x4x16x32xf32>
    %191 = vector.extract_strided_slice %190 {offsets = [0, 0, 0, 0, 0], sizes = [2, 1, 4, 16, 32], strides = [1, 1, 1, 1, 1]} : vector<2x2x4x16x32xf32> to vector<2x1x4x16x32xf32>
    %192 = vector.shape_cast %191 : vector<2x1x4x16x32xf32> to vector<2x2x2x16x32xf32>
    %193 = vector.extract_strided_slice %192 {offsets = [0, 0, 0, 0, 0], sizes = [2, 2, 1, 16, 32], strides = [1, 1, 1, 1, 1]} : vector<2x2x2x16x32xf32> to vector<2x2x1x16x32xf32>
    %194 = vector.shape_cast %193 : vector<2x2x1x16x32xf32> to vector<64x32xf32>
    %195 = arith.truncf %194 : vector<64x32xf32> to vector<64x32xbf16>
    %c4_163 = arith.constant 4 : index
    %c0_164 = arith.constant 0 : index
    %c0_165 = arith.constant 0 : index
    %196 = vector.load %arg6[%c4_163, %c0_164, %c0_165] : memref<9x32x64xbf16, #tpu.memory_space<vmem>>, vector<1x32x64xbf16>
    %197 = vector.shape_cast %196 : vector<1x32x64xbf16> to vector<32x64xbf16>
    %cst_166 = arith.constant dense<0.000000e+00> : vector<64x64xf32>
    %198 = tpu.matmul %195, %197, %cst_166 {dimension_numbers = #tpu.dot_dimension_numbers<[1], [0], [0], [1], [0, 0, 1, 1], [], []>} : vector<64x32xbf16>, vector<32x64xbf16>, vector<64x64xf32> -> vector<64x64xf32>
    %199 = arith.addf %188, %198 : vector<64x64xf32>
    %c1_167 = arith.constant 1 : index
    %c2_168 = arith.constant 2 : index
    %c0_169 = arith.constant 0 : index
    %c0_170 = arith.constant 0 : index
    %200 = vector.load %arg14[%c1_167, %c2_168, %c0_169, %c0_170] : memref<6x6x16x32xf32, #tpu.memory_space<vmem>>, vector<4x4x16x32xf32>
    %201 = vector.shape_cast %200 : vector<4x4x16x32xf32> to vector<2x2x4x16x32xf32>
    %202 = vector.extract_strided_slice %201 {offsets = [0, 0, 0, 0, 0], sizes = [2, 1, 4, 16, 32], strides = [1, 1, 1, 1, 1]} : vector<2x2x4x16x32xf32> to vector<2x1x4x16x32xf32>
    %203 = vector.shape_cast %202 : vector<2x1x4x16x32xf32> to vector<2x2x2x16x32xf32>
    %204 = vector.extract_strided_slice %203 {offsets = [0, 0, 0, 0, 0], sizes = [2, 2, 1, 16, 32], strides = [1, 1, 1, 1, 1]} : vector<2x2x2x16x32xf32> to vector<2x2x1x16x32xf32>
    %205 = vector.shape_cast %204 : vector<2x2x1x16x32xf32> to vector<64x32xf32>
    %206 = arith.truncf %205 : vector<64x32xf32> to vector<64x32xbf16>
    %c5_171 = arith.constant 5 : index
    %c0_172 = arith.constant 0 : index
    %c0_173 = arith.constant 0 : index
    %207 = vector.load %arg6[%c5_171, %c0_172, %c0_173] : memref<9x32x64xbf16, #tpu.memory_space<vmem>>, vector<1x32x64xbf16>
    %208 = vector.shape_cast %207 : vector<1x32x64xbf16> to vector<32x64xbf16>
    %cst_174 = arith.constant dense<0.000000e+00> : vector<64x64xf32>
    %209 = tpu.matmul %206, %208, %cst_174 {dimension_numbers = #tpu.dot_dimension_numbers<[1], [0], [0], [1], [0, 0, 1, 1], [], []>} : vector<64x32xbf16>, vector<32x64xbf16>, vector<64x64xf32> -> vector<64x64xf32>
    %210 = arith.addf %199, %209 : vector<64x64xf32>
    %c2_175 = arith.constant 2 : index
    %c0_176 = arith.constant 0 : index
    %c0_177 = arith.constant 0 : index
    %c0_178 = arith.constant 0 : index
    %211 = vector.load %arg14[%c2_175, %c0_176, %c0_177, %c0_178] : memref<6x6x16x32xf32, #tpu.memory_space<vmem>>, vector<4x4x16x32xf32>
    %212 = vector.shape_cast %211 : vector<4x4x16x32xf32> to vector<2x2x4x16x32xf32>
    %213 = vector.extract_strided_slice %212 {offsets = [0, 0, 0, 0, 0], sizes = [2, 1, 4, 16, 32], strides = [1, 1, 1, 1, 1]} : vector<2x2x4x16x32xf32> to vector<2x1x4x16x32xf32>
    %214 = vector.shape_cast %213 : vector<2x1x4x16x32xf32> to vector<2x2x2x16x32xf32>
    %215 = vector.extract_strided_slice %214 {offsets = [0, 0, 0, 0, 0], sizes = [2, 2, 1, 16, 32], strides = [1, 1, 1, 1, 1]} : vector<2x2x2x16x32xf32> to vector<2x2x1x16x32xf32>
    %216 = vector.shape_cast %215 : vector<2x2x1x16x32xf32> to vector<64x32xf32>
    %217 = arith.truncf %216 : vector<64x32xf32> to vector<64x32xbf16>
    %c6_179 = arith.constant 6 : index
    %c0_180 = arith.constant 0 : index
    %c0_181 = arith.constant 0 : index
    %218 = vector.load %arg6[%c6_179, %c0_180, %c0_181] : memref<9x32x64xbf16, #tpu.memory_space<vmem>>, vector<1x32x64xbf16>
    %219 = vector.shape_cast %218 : vector<1x32x64xbf16> to vector<32x64xbf16>
    %cst_182 = arith.constant dense<0.000000e+00> : vector<64x64xf32>
    %220 = tpu.matmul %217, %219, %cst_182 {dimension_numbers = #tpu.dot_dimension_numbers<[1], [0], [0], [1], [0, 0, 1, 1], [], []>} : vector<64x32xbf16>, vector<32x64xbf16>, vector<64x64xf32> -> vector<64x64xf32>
    %221 = arith.addf %210, %220 : vector<64x64xf32>
    %c2_183 = arith.constant 2 : index
    %c1_184 = arith.constant 1 : index
    %c0_185 = arith.constant 0 : index
    %c0_186 = arith.constant 0 : index
    %222 = vector.load %arg14[%c2_183, %c1_184, %c0_185, %c0_186] : memref<6x6x16x32xf32, #tpu.memory_space<vmem>>, vector<4x4x16x32xf32>
    %223 = vector.shape_cast %222 : vector<4x4x16x32xf32> to vector<2x2x4x16x32xf32>
    %224 = vector.extract_strided_slice %223 {offsets = [0, 0, 0, 0, 0], sizes = [2, 1, 4, 16, 32], strides = [1, 1, 1, 1, 1]} : vector<2x2x4x16x32xf32> to vector<2x1x4x16x32xf32>
    %225 = vector.shape_cast %224 : vector<2x1x4x16x32xf32> to vector<2x2x2x16x32xf32>
    %226 = vector.extract_strided_slice %225 {offsets = [0, 0, 0, 0, 0], sizes = [2, 2, 1, 16, 32], strides = [1, 1, 1, 1, 1]} : vector<2x2x2x16x32xf32> to vector<2x2x1x16x32xf32>
    %227 = vector.shape_cast %226 : vector<2x2x1x16x32xf32> to vector<64x32xf32>
    %228 = arith.truncf %227 : vector<64x32xf32> to vector<64x32xbf16>
    %c7_187 = arith.constant 7 : index
    %c0_188 = arith.constant 0 : index
    %c0_189 = arith.constant 0 : index
    %229 = vector.load %arg6[%c7_187, %c0_188, %c0_189] : memref<9x32x64xbf16, #tpu.memory_space<vmem>>, vector<1x32x64xbf16>
    %230 = vector.shape_cast %229 : vector<1x32x64xbf16> to vector<32x64xbf16>
    %cst_190 = arith.constant dense<0.000000e+00> : vector<64x64xf32>
    %231 = tpu.matmul %228, %230, %cst_190 {dimension_numbers = #tpu.dot_dimension_numbers<[1], [0], [0], [1], [0, 0, 1, 1], [], []>} : vector<64x32xbf16>, vector<32x64xbf16>, vector<64x64xf32> -> vector<64x64xf32>
    %232 = arith.addf %221, %231 : vector<64x64xf32>
    %c2_191 = arith.constant 2 : index
    %c2_192 = arith.constant 2 : index
    %c0_193 = arith.constant 0 : index
    %c0_194 = arith.constant 0 : index
    %233 = vector.load %arg14[%c2_191, %c2_192, %c0_193, %c0_194] : memref<6x6x16x32xf32, #tpu.memory_space<vmem>>, vector<4x4x16x32xf32>
    %234 = vector.shape_cast %233 : vector<4x4x16x32xf32> to vector<2x2x4x16x32xf32>
    %235 = vector.extract_strided_slice %234 {offsets = [0, 0, 0, 0, 0], sizes = [2, 1, 4, 16, 32], strides = [1, 1, 1, 1, 1]} : vector<2x2x4x16x32xf32> to vector<2x1x4x16x32xf32>
    %236 = vector.shape_cast %235 : vector<2x1x4x16x32xf32> to vector<2x2x2x16x32xf32>
    %237 = vector.extract_strided_slice %236 {offsets = [0, 0, 0, 0, 0], sizes = [2, 2, 1, 16, 32], strides = [1, 1, 1, 1, 1]} : vector<2x2x2x16x32xf32> to vector<2x2x1x16x32xf32>
    %238 = vector.shape_cast %237 : vector<2x2x1x16x32xf32> to vector<64x32xf32>
    %239 = arith.truncf %238 : vector<64x32xf32> to vector<64x32xbf16>
    %c8_195 = arith.constant 8 : index
    %c0_196 = arith.constant 0 : index
    %c0_197 = arith.constant 0 : index
    %240 = vector.load %arg6[%c8_195, %c0_196, %c0_197] : memref<9x32x64xbf16, #tpu.memory_space<vmem>>, vector<1x32x64xbf16>
    %241 = vector.shape_cast %240 : vector<1x32x64xbf16> to vector<32x64xbf16>
    %cst_198 = arith.constant dense<0.000000e+00> : vector<64x64xf32>
    %242 = tpu.matmul %239, %241, %cst_198 {dimension_numbers = #tpu.dot_dimension_numbers<[1], [0], [0], [1], [0, 0, 1, 1], [], []>} : vector<64x32xbf16>, vector<32x64xbf16>, vector<64x64xf32> -> vector<64x64xf32>
    %243 = arith.addf %232, %242 : vector<64x64xf32>
    %c0_199 = arith.constant 0 : index
    %c0_200 = arith.constant 0 : index
    %244 = vector.load %arg7[%c0_199, %c0_200] : memref<3x64xf32, #tpu.memory_space<vmem>>, vector<1x64xf32>
    %245 = vector.broadcast %244 : vector<1x64xf32> to vector<64x64xf32>
    %246 = arith.addf %243, %245 : vector<64x64xf32>
    %cst_201 = arith.constant 0.000000e+00 : f32
    %247 = vector.broadcast %cst_201 : f32 to vector<64x64xf32>
    %248 = arith.cmpf ogt, %246, %247 : vector<64x64xf32>
    %cst_202 = arith.constant 2.000000e-01 : f32
    %249 = vector.broadcast %cst_202 : f32 to vector<64x64xf32>
    %250 = arith.mulf %249, %246 : vector<64x64xf32>
    %251 = arith.select %248, %246, %250 : vector<64x64xi1>, vector<64x64xf32>
    %c1_203 = arith.constant 1 : index
    %c0_204 = arith.constant 0 : index
    %252 = vector.load %arg7[%c1_203, %c0_204] : memref<3x64xf32, #tpu.memory_space<vmem>>, vector<1x64xf32>
    %253 = vector.broadcast %252 : vector<1x64xf32> to vector<64x64xf32>
    %254 = arith.mulf %251, %253 : vector<64x64xf32>
    %c2_205 = arith.constant 2 : index
    %c0_206 = arith.constant 0 : index
    %255 = vector.load %arg7[%c2_205, %c0_206] : memref<3x64xf32, #tpu.memory_space<vmem>>, vector<1x64xf32>
    %256 = vector.broadcast %255 : vector<1x64xf32> to vector<64x64xf32>
    %257 = arith.addf %254, %256 : vector<64x64xf32>
    %cst_207 = arith.constant 0.000000e+00 : f32
    %258 = vector.broadcast %cst_207 : f32 to vector<1x4x16x64xf32>
    %cst_208 = arith.constant 0.000000e+00 : f32
    %259 = vector.broadcast %cst_208 : f32 to vector<4x1x16x64xf32>
    %c0_209 = arith.constant 0 : index
    %c0_210 = arith.constant 0 : index
    %c0_211 = arith.constant 0 : index
    %c0_212 = arith.constant 0 : index
    %260 = vector.load %arg15[%c0_209, %c0_210, %c0_211, %c0_212] : memref<4x4x16x64xf32, #tpu.memory_space<vmem>>, vector<1x4x16x64xf32>
    tpu.vector_store %arg15[%c0_209, %c0_210, %c0_211, %c0_212], %258 {strides = array<i32>} : memref<4x4x16x64xf32, #tpu.memory_space<vmem>>, vector<1x4x16x64xf32>,
    %c3_213 = arith.constant 3 : index
    %c0_214 = arith.constant 0 : index
    %c0_215 = arith.constant 0 : index
    %c0_216 = arith.constant 0 : index
    %261 = vector.load %arg15[%c3_213, %c0_214, %c0_215, %c0_216] : memref<4x4x16x64xf32, #tpu.memory_space<vmem>>, vector<1x4x16x64xf32>
    tpu.vector_store %arg15[%c3_213, %c0_214, %c0_215, %c0_216], %258 {strides = array<i32>} : memref<4x4x16x64xf32, #tpu.memory_space<vmem>>, vector<1x4x16x64xf32>,
    %c0_217 = arith.constant 0 : index
    %c0_218 = arith.constant 0 : index
    %c0_219 = arith.constant 0 : index
    %c0_220 = arith.constant 0 : index
    %262 = vector.load %arg15[%c0_217, %c0_218, %c0_219, %c0_220] : memref<4x4x16x64xf32, #tpu.memory_space<vmem>>, vector<4x1x16x64xf32>
    tpu.vector_store %arg15[%c0_217, %c0_218, %c0_219, %c0_220], %259 {strides = array<i32>} : memref<4x4x16x64xf32, #tpu.memory_space<vmem>>, vector<4x1x16x64xf32>,
    %c0_221 = arith.constant 0 : index
    %c3_222 = arith.constant 3 : index
    %c0_223 = arith.constant 0 : index
    %c0_224 = arith.constant 0 : index
    %263 = vector.load %arg15[%c0_221, %c3_222, %c0_223, %c0_224] : memref<4x4x16x64xf32, #tpu.memory_space<vmem>>, vector<4x1x16x64xf32>
    tpu.vector_store %arg15[%c0_221, %c3_222, %c0_223, %c0_224], %259 {strides = array<i32>} : memref<4x4x16x64xf32, #tpu.memory_space<vmem>>, vector<4x1x16x64xf32>,
    %264 = vector.shape_cast %257 : vector<64x64xf32> to vector<2x2x16x64xf32>
    %c1_225 = arith.constant 1 : index
    %c1_226 = arith.constant 1 : index
    %c0_227 = arith.constant 0 : index
    %c0_228 = arith.constant 0 : index
    %265 = vector.load %arg15[%c1_225, %c1_226, %c0_227, %c0_228] : memref<4x4x16x64xf32, #tpu.memory_space<vmem>>, vector<2x2x16x64xf32>
    tpu.vector_store %arg15[%c1_225, %c1_226, %c0_227, %c0_228], %264 {strides = array<i32>} : memref<4x4x16x64xf32, #tpu.memory_space<vmem>>, vector<2x2x16x64xf32>,
    %c0_229 = arith.constant 0 : index
    %c0_230 = arith.constant 0 : index
    %c0_231 = arith.constant 0 : index
    %c0_232 = arith.constant 0 : index
    %266 = vector.load %arg15[%c0_229, %c0_230, %c0_231, %c0_232] : memref<4x4x16x64xf32, #tpu.memory_space<vmem>>, vector<2x2x16x64xf32>
    %267 = vector.shape_cast %266 : vector<2x2x16x64xf32> to vector<1x2x2x16x64xf32>
    %268 = vector.extract_strided_slice %267 {offsets = [0, 0, 0, 0, 0], sizes = [1, 1, 2, 16, 64], strides = [1, 1, 1, 1, 1]} : vector<1x2x2x16x64xf32> to vector<1x1x2x16x64xf32>
    %269 = vector.extract_strided_slice %268 {offsets = [0, 0, 0, 0, 0], sizes = [1, 1, 1, 16, 64], strides = [1, 1, 1, 1, 1]} : vector<1x1x2x16x64xf32> to vector<1x1x1x16x64xf32>
    %270 = vector.shape_cast %269 : vector<1x1x1x16x64xf32> to vector<16x64xf32>
    %271 = arith.truncf %270 : vector<16x64xf32> to vector<16x64xbf16>
    %c0_233 = arith.constant 0 : index
    %c0_234 = arith.constant 0 : index
    %c0_235 = arith.constant 0 : index
    %272 = vector.load %arg8[%c0_233, %c0_234, %c0_235] : memref<9x64x128xbf16, #tpu.memory_space<vmem>>, vector<1x64x128xbf16>
    %273 = vector.shape_cast %272 : vector<1x64x128xbf16> to vector<64x128xbf16>
    %cst_236 = arith.constant dense<0.000000e+00> : vector<16x128xf32>
    %274 = tpu.matmul %271, %273, %cst_236 {dimension_numbers = #tpu.dot_dimension_numbers<[1], [0], [0], [1], [0, 0, 1, 1], [], []>} : vector<16x64xbf16>, vector<64x128xbf16>, vector<16x128xf32> -> vector<16x128xf32>
    %c0_237 = arith.constant 0 : index
    %c1_238 = arith.constant 1 : index
    %c0_239 = arith.constant 0 : index
    %c0_240 = arith.constant 0 : index
    %275 = vector.load %arg15[%c0_237, %c1_238, %c0_239, %c0_240] : memref<4x4x16x64xf32, #tpu.memory_space<vmem>>, vector<2x2x16x64xf32>
    %276 = vector.shape_cast %275 : vector<2x2x16x64xf32> to vector<1x2x2x16x64xf32>
    %277 = vector.extract_strided_slice %276 {offsets = [0, 0, 0, 0, 0], sizes = [1, 1, 2, 16, 64], strides = [1, 1, 1, 1, 1]} : vector<1x2x2x16x64xf32> to vector<1x1x2x16x64xf32>
    %278 = vector.extract_strided_slice %277 {offsets = [0, 0, 0, 0, 0], sizes = [1, 1, 1, 16, 64], strides = [1, 1, 1, 1, 1]} : vector<1x1x2x16x64xf32> to vector<1x1x1x16x64xf32>
    %279 = vector.shape_cast %278 : vector<1x1x1x16x64xf32> to vector<16x64xf32>
    %280 = arith.truncf %279 : vector<16x64xf32> to vector<16x64xbf16>
    %c1_241 = arith.constant 1 : index
    %c0_242 = arith.constant 0 : index
    %c0_243 = arith.constant 0 : index
    %281 = vector.load %arg8[%c1_241, %c0_242, %c0_243] : memref<9x64x128xbf16, #tpu.memory_space<vmem>>, vector<1x64x128xbf16>
    %282 = vector.shape_cast %281 : vector<1x64x128xbf16> to vector<64x128xbf16>
    %cst_244 = arith.constant dense<0.000000e+00> : vector<16x128xf32>
    %283 = tpu.matmul %280, %282, %cst_244 {dimension_numbers = #tpu.dot_dimension_numbers<[1], [0], [0], [1], [0, 0, 1, 1], [], []>} : vector<16x64xbf16>, vector<64x128xbf16>, vector<16x128xf32> -> vector<16x128xf32>
    %284 = arith.addf %274, %283 : vector<16x128xf32>
    %c0_245 = arith.constant 0 : index
    %c2_246 = arith.constant 2 : index
    %c0_247 = arith.constant 0 : index
    %c0_248 = arith.constant 0 : index
    %285 = vector.load %arg15[%c0_245, %c2_246, %c0_247, %c0_248] : memref<4x4x16x64xf32, #tpu.memory_space<vmem>>, vector<2x2x16x64xf32>
    %286 = vector.shape_cast %285 : vector<2x2x16x64xf32> to vector<1x2x2x16x64xf32>
    %287 = vector.extract_strided_slice %286 {offsets = [0, 0, 0, 0, 0], sizes = [1, 1, 2, 16, 64], strides = [1, 1, 1, 1, 1]} : vector<1x2x2x16x64xf32> to vector<1x1x2x16x64xf32>
    %288 = vector.extract_strided_slice %287 {offsets = [0, 0, 0, 0, 0], sizes = [1, 1, 1, 16, 64], strides = [1, 1, 1, 1, 1]} : vector<1x1x2x16x64xf32> to vector<1x1x1x16x64xf32>
    %289 = vector.shape_cast %288 : vector<1x1x1x16x64xf32> to vector<16x64xf32>
    %290 = arith.truncf %289 : vector<16x64xf32> to vector<16x64xbf16>
    %c2_249 = arith.constant 2 : index
    %c0_250 = arith.constant 0 : index
    %c0_251 = arith.constant 0 : index
    %291 = vector.load %arg8[%c2_249, %c0_250, %c0_251] : memref<9x64x128xbf16, #tpu.memory_space<vmem>>, vector<1x64x128xbf16>
    %292 = vector.shape_cast %291 : vector<1x64x128xbf16> to vector<64x128xbf16>
    %cst_252 = arith.constant dense<0.000000e+00> : vector<16x128xf32>
    %293 = tpu.matmul %290, %292, %cst_252 {dimension_numbers = #tpu.dot_dimension_numbers<[1], [0], [0], [1], [0, 0, 1, 1], [], []>} : vector<16x64xbf16>, vector<64x128xbf16>, vector<16x128xf32> -> vector<16x128xf32>
    %294 = arith.addf %284, %293 : vector<16x128xf32>
    %c1_253 = arith.constant 1 : index
    %c0_254 = arith.constant 0 : index
    %c0_255 = arith.constant 0 : index
    %c0_256 = arith.constant 0 : index
    %295 = vector.load %arg15[%c1_253, %c0_254, %c0_255, %c0_256] : memref<4x4x16x64xf32, #tpu.memory_space<vmem>>, vector<2x2x16x64xf32>
    %296 = vector.shape_cast %295 : vector<2x2x16x64xf32> to vector<1x2x2x16x64xf32>
    %297 = vector.extract_strided_slice %296 {offsets = [0, 0, 0, 0, 0], sizes = [1, 1, 2, 16, 64], strides = [1, 1, 1, 1, 1]} : vector<1x2x2x16x64xf32> to vector<1x1x2x16x64xf32>
    %298 = vector.extract_strided_slice %297 {offsets = [0, 0, 0, 0, 0], sizes = [1, 1, 1, 16, 64], strides = [1, 1, 1, 1, 1]} : vector<1x1x2x16x64xf32> to vector<1x1x1x16x64xf32>
    %299 = vector.shape_cast %298 : vector<1x1x1x16x64xf32> to vector<16x64xf32>
    %300 = arith.truncf %299 : vector<16x64xf32> to vector<16x64xbf16>
    %c3_257 = arith.constant 3 : index
    %c0_258 = arith.constant 0 : index
    %c0_259 = arith.constant 0 : index
    %301 = vector.load %arg8[%c3_257, %c0_258, %c0_259] : memref<9x64x128xbf16, #tpu.memory_space<vmem>>, vector<1x64x128xbf16>
    %302 = vector.shape_cast %301 : vector<1x64x128xbf16> to vector<64x128xbf16>
    %cst_260 = arith.constant dense<0.000000e+00> : vector<16x128xf32>
    %303 = tpu.matmul %300, %302, %cst_260 {dimension_numbers = #tpu.dot_dimension_numbers<[1], [0], [0], [1], [0, 0, 1, 1], [], []>} : vector<16x64xbf16>, vector<64x128xbf16>, vector<16x128xf32> -> vector<16x128xf32>
    %304 = arith.addf %294, %303 : vector<16x128xf32>
    %c1_261 = arith.constant 1 : index
    %c1_262 = arith.constant 1 : index
    %c0_263 = arith.constant 0 : index
    %c0_264 = arith.constant 0 : index
    %305 = vector.load %arg15[%c1_261, %c1_262, %c0_263, %c0_264] : memref<4x4x16x64xf32, #tpu.memory_space<vmem>>, vector<2x2x16x64xf32>
    %306 = vector.shape_cast %305 : vector<2x2x16x64xf32> to vector<1x2x2x16x64xf32>
    %307 = vector.extract_strided_slice %306 {offsets = [0, 0, 0, 0, 0], sizes = [1, 1, 2, 16, 64], strides = [1, 1, 1, 1, 1]} : vector<1x2x2x16x64xf32> to vector<1x1x2x16x64xf32>
    %308 = vector.extract_strided_slice %307 {offsets = [0, 0, 0, 0, 0], sizes = [1, 1, 1, 16, 64], strides = [1, 1, 1, 1, 1]} : vector<1x1x2x16x64xf32> to vector<1x1x1x16x64xf32>
    %309 = vector.shape_cast %308 : vector<1x1x1x16x64xf32> to vector<16x64xf32>
    %310 = arith.truncf %309 : vector<16x64xf32> to vector<16x64xbf16>
    %c4_265 = arith.constant 4 : index
    %c0_266 = arith.constant 0 : index
    %c0_267 = arith.constant 0 : index
    %311 = vector.load %arg8[%c4_265, %c0_266, %c0_267] : memref<9x64x128xbf16, #tpu.memory_space<vmem>>, vector<1x64x128xbf16>
    %312 = vector.shape_cast %311 : vector<1x64x128xbf16> to vector<64x128xbf16>
    %cst_268 = arith.constant dense<0.000000e+00> : vector<16x128xf32>
    %313 = tpu.matmul %310, %312, %cst_268 {dimension_numbers = #tpu.dot_dimension_numbers<[1], [0], [0], [1], [0, 0, 1, 1], [], []>} : vector<16x64xbf16>, vector<64x128xbf16>, vector<16x128xf32> -> vector<16x128xf32>
    %314 = arith.addf %304, %313 : vector<16x128xf32>
    %c1_269 = arith.constant 1 : index
    %c2_270 = arith.constant 2 : index
    %c0_271 = arith.constant 0 : index
    %c0_272 = arith.constant 0 : index
    %315 = vector.load %arg15[%c1_269, %c2_270, %c0_271, %c0_272] : memref<4x4x16x64xf32, #tpu.memory_space<vmem>>, vector<2x2x16x64xf32>
    %316 = vector.shape_cast %315 : vector<2x2x16x64xf32> to vector<1x2x2x16x64xf32>
    %317 = vector.extract_strided_slice %316 {offsets = [0, 0, 0, 0, 0], sizes = [1, 1, 2, 16, 64], strides = [1, 1, 1, 1, 1]} : vector<1x2x2x16x64xf32> to vector<1x1x2x16x64xf32>
    %318 = vector.extract_strided_slice %317 {offsets = [0, 0, 0, 0, 0], sizes = [1, 1, 1, 16, 64], strides = [1, 1, 1, 1, 1]} : vector<1x1x2x16x64xf32> to vector<1x1x1x16x64xf32>
    %319 = vector.shape_cast %318 : vector<1x1x1x16x64xf32> to vector<16x64xf32>
    %320 = arith.truncf %319 : vector<16x64xf32> to vector<16x64xbf16>
    %c5_273 = arith.constant 5 : index
    %c0_274 = arith.constant 0 : index
    %c0_275 = arith.constant 0 : index
    %321 = vector.load %arg8[%c5_273, %c0_274, %c0_275] : memref<9x64x128xbf16, #tpu.memory_space<vmem>>, vector<1x64x128xbf16>
    %322 = vector.shape_cast %321 : vector<1x64x128xbf16> to vector<64x128xbf16>
    %cst_276 = arith.constant dense<0.000000e+00> : vector<16x128xf32>
    %323 = tpu.matmul %320, %322, %cst_276 {dimension_numbers = #tpu.dot_dimension_numbers<[1], [0], [0], [1], [0, 0, 1, 1], [], []>} : vector<16x64xbf16>, vector<64x128xbf16>, vector<16x128xf32> -> vector<16x128xf32>
    %324 = arith.addf %314, %323 : vector<16x128xf32>
    %c2_277 = arith.constant 2 : index
    %c0_278 = arith.constant 0 : index
    %c0_279 = arith.constant 0 : index
    %c0_280 = arith.constant 0 : index
    %325 = vector.load %arg15[%c2_277, %c0_278, %c0_279, %c0_280] : memref<4x4x16x64xf32, #tpu.memory_space<vmem>>, vector<2x2x16x64xf32>
    %326 = vector.shape_cast %325 : vector<2x2x16x64xf32> to vector<1x2x2x16x64xf32>
    %327 = vector.extract_strided_slice %326 {offsets = [0, 0, 0, 0, 0], sizes = [1, 1, 2, 16, 64], strides = [1, 1, 1, 1, 1]} : vector<1x2x2x16x64xf32> to vector<1x1x2x16x64xf32>
    %328 = vector.extract_strided_slice %327 {offsets = [0, 0, 0, 0, 0], sizes = [1, 1, 1, 16, 64], strides = [1, 1, 1, 1, 1]} : vector<1x1x2x16x64xf32> to vector<1x1x1x16x64xf32>
    %329 = vector.shape_cast %328 : vector<1x1x1x16x64xf32> to vector<16x64xf32>
    %330 = arith.truncf %329 : vector<16x64xf32> to vector<16x64xbf16>
    %c6_281 = arith.constant 6 : index
    %c0_282 = arith.constant 0 : index
    %c0_283 = arith.constant 0 : index
    %331 = vector.load %arg8[%c6_281, %c0_282, %c0_283] : memref<9x64x128xbf16, #tpu.memory_space<vmem>>, vector<1x64x128xbf16>
    %332 = vector.shape_cast %331 : vector<1x64x128xbf16> to vector<64x128xbf16>
    %cst_284 = arith.constant dense<0.000000e+00> : vector<16x128xf32>
    %333 = tpu.matmul %330, %332, %cst_284 {dimension_numbers = #tpu.dot_dimension_numbers<[1], [0], [0], [1], [0, 0, 1, 1], [], []>} : vector<16x64xbf16>, vector<64x128xbf16>, vector<16x128xf32> -> vector<16x128xf32>
    %334 = arith.addf %324, %333 : vector<16x128xf32>
    %c2_285 = arith.constant 2 : index
    %c1_286 = arith.constant 1 : index
    %c0_287 = arith.constant 0 : index
    %c0_288 = arith.constant 0 : index
    %335 = vector.load %arg15[%c2_285, %c1_286, %c0_287, %c0_288] : memref<4x4x16x64xf32, #tpu.memory_space<vmem>>, vector<2x2x16x64xf32>
    %336 = vector.shape_cast %335 : vector<2x2x16x64xf32> to vector<1x2x2x16x64xf32>
    %337 = vector.extract_strided_slice %336 {offsets = [0, 0, 0, 0, 0], sizes = [1, 1, 2, 16, 64], strides = [1, 1, 1, 1, 1]} : vector<1x2x2x16x64xf32> to vector<1x1x2x16x64xf32>
    %338 = vector.extract_strided_slice %337 {offsets = [0, 0, 0, 0, 0], sizes = [1, 1, 1, 16, 64], strides = [1, 1, 1, 1, 1]} : vector<1x1x2x16x64xf32> to vector<1x1x1x16x64xf32>
    %339 = vector.shape_cast %338 : vector<1x1x1x16x64xf32> to vector<16x64xf32>
    %340 = arith.truncf %339 : vector<16x64xf32> to vector<16x64xbf16>
    %c7_289 = arith.constant 7 : index
    %c0_290 = arith.constant 0 : index
    %c0_291 = arith.constant 0 : index
    %341 = vector.load %arg8[%c7_289, %c0_290, %c0_291] : memref<9x64x128xbf16, #tpu.memory_space<vmem>>, vector<1x64x128xbf16>
    %342 = vector.shape_cast %341 : vector<1x64x128xbf16> to vector<64x128xbf16>
    %cst_292 = arith.constant dense<0.000000e+00> : vector<16x128xf32>
    %343 = tpu.matmul %340, %342, %cst_292 {dimension_numbers = #tpu.dot_dimension_numbers<[1], [0], [0], [1], [0, 0, 1, 1], [], []>} : vector<16x64xbf16>, vector<64x128xbf16>, vector<16x128xf32> -> vector<16x128xf32>
    %344 = arith.addf %334, %343 : vector<16x128xf32>
    %c2_293 = arith.constant 2 : index
    %c2_294 = arith.constant 2 : index
    %c0_295 = arith.constant 0 : index
    %c0_296 = arith.constant 0 : index
    %345 = vector.load %arg15[%c2_293, %c2_294, %c0_295, %c0_296] : memref<4x4x16x64xf32, #tpu.memory_space<vmem>>, vector<2x2x16x64xf32>
    %346 = vector.shape_cast %345 : vector<2x2x16x64xf32> to vector<1x2x2x16x64xf32>
    %347 = vector.extract_strided_slice %346 {offsets = [0, 0, 0, 0, 0], sizes = [1, 1, 2, 16, 64], strides = [1, 1, 1, 1, 1]} : vector<1x2x2x16x64xf32> to vector<1x1x2x16x64xf32>
    %348 = vector.extract_strided_slice %347 {offsets = [0, 0, 0, 0, 0], sizes = [1, 1, 1, 16, 64], strides = [1, 1, 1, 1, 1]} : vector<1x1x2x16x64xf32> to vector<1x1x1x16x64xf32>
    %349 = vector.shape_cast %348 : vector<1x1x1x16x64xf32> to vector<16x64xf32>
    %350 = arith.truncf %349 : vector<16x64xf32> to vector<16x64xbf16>
    %c8_297 = arith.constant 8 : index
    %c0_298 = arith.constant 0 : index
    %c0_299 = arith.constant 0 : index
    %351 = vector.load %arg8[%c8_297, %c0_298, %c0_299] : memref<9x64x128xbf16, #tpu.memory_space<vmem>>, vector<1x64x128xbf16>
    %352 = vector.shape_cast %351 : vector<1x64x128xbf16> to vector<64x128xbf16>
    %cst_300 = arith.constant dense<0.000000e+00> : vector<16x128xf32>
    %353 = tpu.matmul %350, %352, %cst_300 {dimension_numbers = #tpu.dot_dimension_numbers<[1], [0], [0], [1], [0, 0, 1, 1], [], []>} : vector<16x64xbf16>, vector<64x128xbf16>, vector<16x128xf32> -> vector<16x128xf32>
    %354 = arith.addf %344, %353 : vector<16x128xf32>
    %c0_301 = arith.constant 0 : index
    %c0_302 = arith.constant 0 : index
    %355 = vector.load %arg9[%c0_301, %c0_302] : memref<3x128xf32, #tpu.memory_space<vmem>>, vector<1x128xf32>
    %356 = vector.broadcast %355 : vector<1x128xf32> to vector<16x128xf32>
    %357 = arith.addf %354, %356 : vector<16x128xf32>
    %cst_303 = arith.constant 0.000000e+00 : f32
    %358 = vector.broadcast %cst_303 : f32 to vector<16x128xf32>
    %359 = arith.cmpf ogt, %357, %358 : vector<16x128xf32>
    %cst_304 = arith.constant 2.000000e-01 : f32
    %360 = vector.broadcast %cst_304 : f32 to vector<16x128xf32>
    %361 = arith.mulf %360, %357 : vector<16x128xf32>
    %362 = arith.select %359, %357, %361 : vector<16x128xi1>, vector<16x128xf32>
    %c1_305 = arith.constant 1 : index
    %c0_306 = arith.constant 0 : index
    %363 = vector.load %arg9[%c1_305, %c0_306] : memref<3x128xf32, #tpu.memory_space<vmem>>, vector<1x128xf32>
    %364 = vector.broadcast %363 : vector<1x128xf32> to vector<16x128xf32>
    %365 = arith.mulf %362, %364 : vector<16x128xf32>
    %c2_307 = arith.constant 2 : index
    %c0_308 = arith.constant 0 : index
    %366 = vector.load %arg9[%c2_307, %c0_308] : memref<3x128xf32, #tpu.memory_space<vmem>>, vector<1x128xf32>
    %367 = vector.broadcast %366 : vector<1x128xf32> to vector<16x128xf32>
    %368 = arith.addf %365, %367 : vector<16x128xf32>
    %369 = vector.shape_cast %368 : vector<16x128xf32> to vector<1x16x128xf32>
    %370 = vector.shape_cast %369 : vector<1x16x128xf32> to vector<16x128xf32>
    %c0_309 = arith.constant 0 : index
    %c0_310 = arith.constant 0 : index
    %371 = vector.load %arg10[%c0_309, %c0_310] : memref<1x128xf32, #tpu.memory_space<vmem>>, vector<1x128xf32>
    %372 = vector.broadcast %371 : vector<1x128xf32> to vector<16x128xf32>
    %373 = arith.mulf %370, %372 : vector<16x128xf32>
    %cst_311 = arith.constant dense<0.000000e+00> : vector<16xf32>
    %374 = vector.multi_reduction <add>, %373, %cst_311 [1] : vector<16x128xf32> to vector<16xf32>
    %375 = vector.shape_cast %374 : vector<16xf32> to vector<16x1xf32>
    %c0_312 = arith.constant 0 : index
    %c0_313 = arith.constant 0 : index
    %376 = vector.load %arg11[%c0_312, %c0_313] : memref<1x1xf32, #tpu.memory_space<vmem>>, vector<1x1xf32>
    %377 = vector.broadcast %376 : vector<1x1xf32> to vector<16x1xf32>
    %378 = arith.addf %375, %377 : vector<16x1xf32>
    %cst_314 = arith.constant 0.000000e+00 : f32
    %379 = vector.broadcast %cst_314 : f32 to vector<16x1xf32>
    %380 = arith.subf %379, %378 : vector<16x1xf32>
    %381 = math.exp %380 : vector<16x1xf32>
    %cst_315 = arith.constant 1.000000e+00 : f32
    %382 = vector.broadcast %cst_315 : f32 to vector<16x1xf32>
    %383 = arith.addf %382, %381 : vector<16x1xf32>
    %cst_316 = arith.constant 1.000000e+00 : f32
    %384 = vector.broadcast %cst_316 : f32 to vector<16x1xf32>
    %385 = arith.divf %384, %383 : vector<16x1xf32>
    %c0_317 = arith.constant 0 : index
    %c0_318 = arith.constant 0 : index
    %386 = vector.load %arg12[%c0_317, %c0_318] : memref<16x1xf32, #tpu.memory_space<vmem>>, vector<16x1xf32>
    tpu.vector_store %arg12[%c0_317, %c0_318], %385 {strides = array<i32>} : memref<16x1xf32, #tpu.memory_space<vmem>>, vector<16x1xf32>,
    return
  }
  func.func @transform_0(%arg0: i32) -> (i32, i32, i32) {
    %c0_i32 = arith.constant 0 : i32
    %c0_i32_0 = arith.constant 0 : i32
    %c0_i32_1 = arith.constant 0 : i32
    return %c0_i32, %arg0, %c0_i32_0 : i32, i32, i32
  }
  func.func @transform_1(%arg0: i32) -> (i32, i32) {
    %c0_i32 = arith.constant 0 : i32
    %c0_i32_0 = arith.constant 0 : i32
    %c0_i32_1 = arith.constant 0 : i32
    return %c0_i32, %c0_i32_0 : i32, i32
  }
  func.func @transform_2(%arg0: i32) -> (i32, i32) {
    %c0_i32 = arith.constant 0 : i32
    %c0_i32_0 = arith.constant 0 : i32
    %c0_i32_1 = arith.constant 0 : i32
    return %c0_i32, %c0_i32_0 : i32, i32
  }
  func.func @transform_3(%arg0: i32) -> (i32, i32, i32) {
    %c0_i32 = arith.constant 0 : i32
    %c0_i32_0 = arith.constant 0 : i32
    %c0_i32_1 = arith.constant 0 : i32
    %c0_i32_2 = arith.constant 0 : i32
    return %c0_i32, %c0_i32_0, %c0_i32_1 : i32, i32, i32
  }
  func.func @transform_4(%arg0: i32) -> (i32, i32) {
    %c0_i32 = arith.constant 0 : i32
    %c0_i32_0 = arith.constant 0 : i32
    %c0_i32_1 = arith.constant 0 : i32
    return %c0_i32, %c0_i32_0 : i32, i32
  }
  func.func @transform_5(%arg0: i32) -> (i32, i32, i32) {
    %c0_i32 = arith.constant 0 : i32
    %c0_i32_0 = arith.constant 0 : i32
    %c0_i32_1 = arith.constant 0 : i32
    %c0_i32_2 = arith.constant 0 : i32
    return %c0_i32, %c0_i32_0, %c0_i32_1 : i32, i32, i32
  }
  func.func @transform_6(%arg0: i32) -> (i32, i32) {
    %c0_i32 = arith.constant 0 : i32
    %c0_i32_0 = arith.constant 0 : i32
    %c0_i32_1 = arith.constant 0 : i32
    return %c0_i32, %c0_i32_0 : i32, i32
  }
  func.func @transform_7(%arg0: i32) -> (i32, i32, i32) {
    %c0_i32 = arith.constant 0 : i32
    %c0_i32_0 = arith.constant 0 : i32
    %c0_i32_1 = arith.constant 0 : i32
    %c0_i32_2 = arith.constant 0 : i32
    return %c0_i32, %c0_i32_0, %c0_i32_1 : i32, i32, i32
  }
  func.func @transform_8(%arg0: i32) -> (i32, i32) {
    %c0_i32 = arith.constant 0 : i32
    %c0_i32_0 = arith.constant 0 : i32
    %c0_i32_1 = arith.constant 0 : i32
    return %c0_i32, %c0_i32_0 : i32, i32
  }
  func.func @transform_9(%arg0: i32) -> (i32, i32) {
    %c0_i32 = arith.constant 0 : i32
    %c0_i32_0 = arith.constant 0 : i32
    %c0_i32_1 = arith.constant 0 : i32
    return %c0_i32, %c0_i32_0 : i32, i32
  }
  func.func @transform_10(%arg0: i32) -> (i32, i32) {
    %c0_i32 = arith.constant 0 : i32
    %c0_i32_0 = arith.constant 0 : i32
    %c0_i32_1 = arith.constant 0 : i32
    return %c0_i32, %c0_i32_0 : i32, i32
  }
  func.func @transform_11(%arg0: i32) -> (i32, i32) {
    %c0_i32 = arith.constant 0 : i32
    %c0_i32_0 = arith.constant 0 : i32
    return %arg0, %c0_i32 : i32, i32
  }
}

</mosaic_0001>

<bundles_post_ra>
// kernel: discriminator_forward.1
= control target key start
LH: loop header
LB: loop body
LE: loop exit
PB: predicated region body
PF: predicated region fallthrough
CT: control target
= control target key end

     0   :  { %vm704_vm0 = vcmask 1041408   ;;  %vm511_vm1 = vcmask 293888   ;;  %vm1681_vm3 = vcmask 130048   ;;  %v8743_v53 = vmov 0.0   ;;  %s8731_s1 = inlined_call_operand.vmem [shape: bf16[36,16], index: 1, kind: input, shape index: {}]   ;;  %s8732_s2 = inlined_call_operand.vmem [shape: f32[3,16], index: 2, kind: input, shape index: {}]   ;;  %s8733_s0 = inlined_call_operand.vmem [shape: bf16[64,16,36], index: 0, kind: input, shape index: {}]   ;;  %s8734_s3 = inlined_call_operand.vmem [shape: bf16[9,16,32], index: 3, kind: input, shape index: {}]   ;;  %s8735_s5 = inlined_call_operand.vmem [shape: bf16[9,32,64], index: 5, kind: input, shape index: {}]   ;;  %s8736_s4 = inlined_call_operand.vmem [shape: f32[3,32], index: 4, kind: input, shape index: {}]   ;;  %s8737_s6 = inlined_call_operand.vmem [shape: f32[3,64], index: 6, kind: input, shape index: {}]   ;;  %s8738_s7 = inlined_call_operand.vmem [shape: bf16[9,64,128], index: 7, kind: input, shape index: {}]   ;;  %s8739_s8 = inlined_call_operand.vmem [shape: f32[3,128], index: 8, kind: input, shape index: {}]   ;;  %s8740_s9 = inlined_call_operand.vmem [shape: f32[1,128], index: 9, kind: input, shape index: {}]   ;;  %s8741_s10 = inlined_call_operand.<no memory space> [shape: f32[1,1], index: 10, kind: input, shape index: {}]   ;;  %s8742_s11 = inlined_call_operand.vmem [shape: f32[16,1], index: 11, kind: output, shape index: {}]  }
   0x1   :  { %v173_v0 = vld [vmem:[%s8731_s1 + $0x10] sm:$0x3]  ;;  %v6463_v4 = vld [vmem:[%s8731_s1 + $0x8] sm:$0xff]  ;;  %v6462_v5 = vld [vmem:[%s8731_s1] sm:$0xff]  ;;  %1682 = vst.msk [vmem:[#allocation2] sm:$0xff] %vm1681_vm3, %v8743_v53 }
   0x2   :  { %v505_v1 = vunpack.c.l.b16 %v173_v0  ;;  %v6398_v6 = vld [vmem:[%s8733_s0] sm:$0xff]  ;;  %v6399_v7 = vld [vmem:[%s8733_s0 + $0x8] sm:$0xff]  ;;  %v6400_v8 = vld [vmem:[%s8733_s0 + $0x10] sm:$0xff]  ;;  %1683 = vst.msk [vmem:[#allocation2 + $0x8] sm:$0xff] %vm1681_vm3, %v8743_v53 }
   0x3   :  { %v6401_v9 = vld [vmem:[%s8733_s0 + $0x18] sm:$0xff]  ;;  %v6402_v10 = vld [vmem:[%s8733_s0 + $0x20] sm:$0xff]  ;;  %v6403_v11 = vld [vmem:[%s8733_s0 + $0x28] sm:$0xff]  ;;  %1723 = vst.msk [vmem:[#allocation2] sm:$0xff] %vm1681_vm3, %v8743_v53 }
   0x4   :  { %v508_v2 = vpack.c.b16 %v505_v1, %v505_v1  ;;  %v6404_v12 = vld [vmem:[%s8733_s0 + $0x30] sm:$0xff]  ;;  %v6405_v13 = vld [vmem:[%s8733_s0 + $0x38] sm:$0xff]  ;;  %v6670_v14 = vld [vmem:[%s8732_s2] ss:$0 sm:$0xff]  ;;  %1724 = vst.msk [vmem:[#allocation2 + $0x8] sm:$0xff] %vm1681_vm3, %v8743_v53 }
   0x5   :  { %v6406_v15 = vld [vmem:[%s8733_s0 + $0x40] sm:$0xff]  ;;  %v6407_v29 = vld [vmem:[%s8733_s0 + $0x48] sm:$0xff]  ;;  %v6408_v42 = vld [vmem:[%s8733_s0 + $0x50] sm:$0xff]  ;;  %1684 = vst.msk [vmem:[#allocation2 + $0x10] sm:$0xff] %vm1681_vm3, %v8743_v53 }
   0x6   :  { %v706_v3 = vsel %vm704_vm0, %v508_v2, 0  ;;  %v6679_v18 = vld [vmem:[%s8732_s2 + $0x1] ss:$0 sm:$0xff]  ;;  %v6685_v20 = vld [vmem:[%s8732_s2 + $0x2] ss:$0 sm:$0xff]  ;;  %v6409_v56 = vld [vmem:[%s8733_s0 + $0x58] sm:$0xff] }
   0x7   :  { %713 = vmatpush.bf16.msra.mxu0 %v706_v3  ;;  %1685 = vst.msk [vmem:[#allocation2 + $0x18] sm:$0xff] %vm1681_vm3, %v8743_v53  ;;  %v6464_v60 = vld [vmem:[%s8734_s3] sm:$0xff] }
   0x8   :  { %1686 = vst.msk [vmem:[#allocation2 + $0x20] sm:$0xff] %vm1681_vm3, %v8743_v53  ;;  %2199 = vmatpush.bf16.msra.mxu2 %v6464_v60 }
   0x9   :  { %1687 = vst.msk [vmem:[#allocation2 + $0x28] sm:$0xff] %vm1681_vm3, %v8743_v53 }
   0xa   :  { %v1893_v62 = vld [vmem:[#allocation2] sm:$0xff]  ;;  %1688 = vst.msk [vmem:[#allocation2 + $0x30] sm:$0xff] %vm1681_vm3, %v8743_v53 }
   0xb   :  { %714 = vmatpush.bf16.msra.mxu0 %v6463_v4  ;;  %v1894_v0 = vld [vmem:[#allocation2 + $0x8] sm:$0xff]  ;;  %1689 = vst.msk [vmem:[#allocation2 + $0x38] sm:$0xff] %vm1681_vm3, %v8743_v53 }
   0xc   :  { %v1925_v2 = vpack.c.bf16 %v1894_v0, %v1893_v62  ;;  %1690 = vst.msk [vmem:[#allocation2 + $0x40] sm:$0xff] %vm1681_vm3, %v8743_v53 }
   0xd   :  { %1691 = vst.msk [vmem:[#allocation2 + $0x48] sm:$0xff] %vm1681_vm3, %v8743_v53 }
   0xe   :  { %5871 = vmatmul.msk.bf16.vlgmr.msra.gmra.mxu2 %vm1681_vm3, %v1925_v2  ;;  %1692 = vst.msk [vmem:[#allocation2 + $0x50] sm:$0xff] %vm1681_vm3, %v8743_v53 }
   0xf   :  { %715 = vmatpush.bf16.msra.mxu0 %v6462_v5  ;;  %1693 = vst.msk [vmem:[#allocation2 + $0x58] sm:$0xff] %vm1681_vm3, %v8743_v53 }
  0x10   :  { %1694 = vst.msk [vmem:[#allocation2 + $0x60] sm:$0xff] %vm1681_vm3, %v8743_v53 }
  0x11   :  { %1695 = vst.msk [vmem:[#allocation2 + $0x68] sm:$0xff] %vm1681_vm3, %v8743_v53 }
  0x12   :  { %5781 = vmatmul.msk.bf16.vlgmr.msra.gmra.mxu0 %vm511_vm1, %v6398_v6  ;;  %1696 = vst.msk [vmem:[#allocation2 + $0x70] sm:$0xff] %vm1681_vm3, %v8743_v53 }
  0x13   :  { %1697 = vst.msk [vmem:[#allocation2 + $0x78] sm:$0xff] %vm1681_vm3, %v8743_v53 }
  0x14   :  { %1698 = vst.msk [vmem:[#allocation2 + $0x80] sm:$0xff] %vm1681_vm3, %v8743_v53 }
  0x15   :  { %1699 = vst.msk [vmem:[#allocation2 + $0x88] sm:$0xff] %vm1681_vm3, %v8743_v53 }
  0x16   :  { %1725 = vst.msk [vmem:[#allocation2 + $0xa0] sm:$0xff] %vm1681_vm3, %v8743_v53 }
  0x17   :  { %1726 = vst.msk [vmem:[#allocation2 + $0xa8] sm:$0xff] %vm1681_vm3, %v8743_v53 }
  0x18   :  { %1727 = vst.msk [vmem:[#allocation2 + $0x140] sm:$0xff] %vm1681_vm3, %v8743_v53 }
  0x19   :  { %1728 = vst.msk [vmem:[#allocation2 + $0x148] sm:$0xff] %vm1681_vm3, %v8743_v53 }
  0x1a   :  { %1729 = vst.msk [vmem:[#allocation2 + $0x1e0] sm:$0xff] %vm1681_vm3, %v8743_v53 }
  0x1b   :  { %1730 = vst.msk [vmem:[#allocation2 + $0x1e8] sm:$0xff] %vm1681_vm3, %v8743_v53 }
  0x1c   :  { %1731 = vst.msk [vmem:[#allocation2 + $0x280] sm:$0xff] %vm1681_vm3, %v8743_v53 }
  0x1d   :  { %1732 = vst.msk [vmem:[#allocation2 + $0x288] sm:$0xff] %vm1681_vm3, %v8743_v53 }
  0x1e   :  { %1733 = vst.msk [vmem:[#allocation2 + $0x320] sm:$0xff] %vm1681_vm3, %v8743_v53 }
  0x1f   :  { %1734 = vst.msk [vmem:[#allocation2 + $0x328] sm:$0xff] %vm1681_vm3, %v8743_v53 }
  0x20   :  { %1735 = vst.msk [vmem:[#allocation2 + $0x3c0] sm:$0xff] %vm1681_vm3, %v8743_v53 }
  0x21   :  { %1736 = vst.msk [vmem:[#allocation2 + $0x3c8] sm:$0xff] %vm1681_vm3, %v8743_v53 }
  0x22   :  { %5782 = vmatmul.msk.bf16.gmra.mxu0 %vm511_vm1, %v6399_v7  ;;  %1737 = vst.msk [vmem:[#allocation2 + $0x460] sm:$0xff] %vm1681_vm3, %v8743_v53 }
  0x23   :  { %1738 = vst.msk [vmem:[#allocation2 + $0x468] sm:$0xff] %vm1681_vm3, %v8743_v53 }
  0x24   :  { %1739 = vst.msk [vmem:[#allocation2 + $0x500] sm:$0xff] %vm1681_vm3, %v8743_v53 }
  0x25   :  { %1740 = vst.msk [vmem:[#allocation2 + $0x508] sm:$0xff] %vm1681_vm3, %v8743_v53 }
  0x32   :  { %5783 = vmatmul.msk.bf16.gmra.mxu0 %vm511_vm1, %v6400_v8 }
  0x42   :  { %5784 = vmatmul.msk.bf16.gmra.mxu0 %vm511_vm1, %v6401_v9  ;;  %v6410_v9 = vld [vmem:[%s8733_s0 + $0x60] sm:$0xff] }
  0x52   :  { %5785 = vmatmul.msk.bf16.gmra.mxu0 %vm511_vm1, %v6402_v10 }
  0x62   :  { %5786 = vmatmul.msk.bf16.gmra.mxu0 %vm511_vm1, %v6403_v11 }
  0x72   :  { %5787 = vmatmul.msk.bf16.gmra.mxu0 %vm511_vm1, %v6404_v12 }
  0x82   :  { %5788 = vmatmul.msk.bf16.gmra.mxu0 %vm511_vm1, %v6405_v13 }
  0x8f   :  { %v717_v16 = vpop.f32.mrf.mxu0 }
  0x90   :  { %v718_v17 = vadd.f32 %v6670_v14, %v717_v16 }
  0x92   :  { %vm1037_vm2 = vcmp.gt.f32.partialorder %v718_v17, 0.0  ;;  %v1165_v19 = vmul.f32 0.2, %v718_v17  ;;  %5789 = vmatmul.msk.bf16.gmra.mxu0 %vm511_vm1, %v6406_v15 }
  0x94   :  { %v1293_v21 = vsel %vm1037_vm2, %v718_v17, %v1165_v19 }
  0x95   :  { %v1423_v22 = vmul.f32 %v6679_v18, %v1293_v21 }
  0x97   :  { %v1553_v23 = vadd.f32 %v6685_v20, %v1423_v22  ;;  %v719_v24 = vpop.f32.mrf.mxu0 }
  0x98   :  { %v720_v25 = vadd.f32 %v6670_v14, %v719_v24 }
  0x99   :  { %1765 = vst.msk [vmem:[#allocation2 + $0xb0] sm:$0xff] %vm1681_vm3, %v1553_v23 }
  0x9a   :  { %vm1038_vm4 = vcmp.gt.f32.partialorder %v720_v25, 0.0  ;;  %v1166_v26 = vmul.f32 0.2, %v720_v25 }
  0x9c   :  { %v1294_v27 = vsel %vm1038_vm4, %v720_v25, %v1166_v26  ;;  %v6411_v25 = vld [vmem:[%s8733_s0 + $0x68] sm:$0xff] }
  0x9d   :  { %v1424_v28 = vmul.f32 %v6679_v18, %v1294_v27 }
  0x9f   :  { %v1554_v30 = vadd.f32 %v6685_v20, %v1424_v28  ;;  %v722_v31 = vpop.f32.mrf.mxu0  ;;  %v6465_v28 = vld [vmem:[%s8734_s3 + $0x8] sm:$0xff] }
  0xa0   :  { %v723_v32 = vadd.f32 %v6670_v14, %v722_v31  ;;  %2056 = vmatpush.bf16.msra.mxu1 %v6465_v28  ;;  %v1945_v31 = vld [vmem:[#allocation2 + $0x18] sm:$0xff] }
  0xa1   :  { %1766 = vst.msk [vmem:[#allocation2 + $0xb8] sm:$0xff] %vm1681_vm3, %v1554_v30  ;;  %v1944_v30 = vld [vmem:[#allocation2 + $0x10] sm:$0xff] }
  0xa2   :  { %vm1039_vm5 = vcmp.gt.f32.partialorder %v723_v32, 0.0  ;;  %v1167_v33 = vmul.f32 0.2, %v723_v32  ;;  %5790 = vmatmul.msk.bf16.gmra.mxu0 %vm511_vm1, %v6407_v29 }
  0xa4   :  { %v1295_v34 = vsel %vm1039_vm5, %v723_v32, %v1167_v33  ;;  %v1976_v33 = vpack.c.bf16 %v1945_v31, %v1944_v30 }
  0xa5   :  { %v1425_v35 = vmul.f32 %v6679_v18, %v1295_v34 }
  0xa6   :  { %5851 = vmatmul.msk.bf16.vlgmr.msra.gmra.mxu1 %vm1681_vm3, %v1976_v33 }
  0xa7   :  { %v1555_v36 = vadd.f32 %v6685_v20, %v1425_v35  ;;  %v724_v37 = vpop.f32.mrf.mxu0 }
  0xa8   :  { %v725_v38 = vadd.f32 %v6670_v14, %v724_v37 }
  0xa9   :  { %1767 = vst.msk [vmem:[#allocation2 + $0xc0] sm:$0xff] %vm1681_vm3, %v1555_v36 }
  0xaa   :  { %vm1040_vm6 = vcmp.gt.f32.partialorder %v725_v38, 0.0  ;;  %v1168_v39 = vmul.f32 0.2, %v725_v38 }
  0xac   :  { %v1296_v40 = vsel %vm1040_vm6, %v725_v38, %v1168_v39  ;;  %v1895_v38 = vld [vmem:[#allocation2 + $0x20] sm:$0xff]  ;;  %v1896_v39 = vld [vmem:[#allocation2 + $0x28] sm:$0xff] }
  0xad   :  { %v1426_v41 = vmul.f32 %v6679_v18, %v1296_v40  ;;  %v1926_v40 = vpack.c.bf16 %v1896_v39, %v1895_v38 }
  0xaf   :  { %v1556_v43 = vadd.f32 %v6685_v20, %v1426_v41  ;;  %v727_v44 = vpop.f32.mrf.mxu0  ;;  %v6412_v41 = vld [vmem:[%s8733_s0 + $0x70] sm:$0xff]  ;;  %5872 = vmatmul.msk.bf16.gmra.mxu2 %vm1681_vm3, %v1926_v40 }
  0xb0   :  { %v728_v45 = vadd.f32 %v6670_v14, %v727_v44  ;;  %v1946_v44 = vld [vmem:[#allocation2 + $0x30] sm:$0xff] }
  0xb1   :  { %1768 = vst.msk [vmem:[#allocation2 + $0xc8] sm:$0xff] %vm1681_vm3, %v1556_v43  ;;  %v6466_v43 = vld [vmem:[%s8734_s3 + $0x10] sm:$0xff] }
  0xb2   :  { %vm1041_vm7 = vcmp.gt.f32.partialorder %v728_v45, 0.0  ;;  %v1169_v46 = vmul.f32 0.2, %v728_v45  ;;  %5791 = vmatmul.msk.bf16.gmra.mxu0 %vm511_vm1, %v6408_v42  ;;  %2394 = vmatpush.bf16.msra.mxu3 %v6466_v43  ;;  %v2288_v43 = vld [vmem:[#allocation2 + $0x80] sm:$0xff] }
  0xb4   :  { %v1297_v47 = vsel %vm1041_vm7, %v728_v45, %v1169_v46  ;;  %v1947_v45 = vld [vmem:[#allocation2 + $0x38] sm:$0xff] }
  0xb5   :  { %v1427_v48 = vmul.f32 %v6679_v18, %v1297_v47  ;;  %v1977_v46 = vpack.c.bf16 %v1947_v45, %v1946_v44  ;;  %5893 = vmatmul.msk.bf16.vlgmr.msra.gmra.mxu3 %vm1681_vm3, %v1926_v40  ;;  %v2289_v44 = vld [vmem:[#allocation2 + $0x88] sm:$0xff] }
  0xb6   :  { %v6415_v45 = vld [vmem:[%s8733_s0 + $0x88] sm:$0xff] }
  0xb7   :  { %v1557_v49 = vadd.f32 %v6685_v20, %v1427_v48  ;;  %v729_v50 = vpop.f32.mrf.mxu0  ;;  %5852 = vmatmul.msk.bf16.gmra.mxu1 %vm1681_vm3, %v1977_v46 }
  0xb8   :  { %v730_v51 = vadd.f32 %v6670_v14, %v729_v50  ;;  %v1898_v50 = vld [vmem:[#allocation2 + $0x48] sm:$0xff] }
  0xb9   :  { %1769 = vst.msk [vmem:[#allocation2 + $0xd0] sm:$0xff] %vm1681_vm3, %v1557_v49  ;;  %v1897_v49 = vld [vmem:[#allocation2 + $0x40] sm:$0xff] }
  0xba   :  { %vm1042_vm8 = vcmp.gt.f32.partialorder %v730_v51, 0.0  ;;  %v1170_v52 = vmul.f32 0.2, %v730_v51 }
  0xbc   :  { %v1298_v54 = vsel %vm1042_vm8, %v730_v51, %v1170_v52  ;;  %v1927_v51 = vpack.c.bf16 %v1898_v50, %v1897_v49  ;;  %v2317_v49 = vpack.c.bf16 %v2289_v44, %v2288_v43 }
  0xbd   :  { %v1428_v55 = vmul.f32 %v6679_v18, %v1298_v54  ;;  %v1948_v54 = vld [vmem:[#allocation2 + $0x50] sm:$0xff] }
  0xbf   :  { %v1558_v57 = vadd.f32 %v6685_v20, %v1428_v55  ;;  %v732_v58 = vpop.f32.mrf.mxu0  ;;  %v1949_v55 = vld [vmem:[#allocation2 + $0x58] sm:$0xff]  ;;  %5873 = vmatmul.msk.bf16.gmra.mxu2 %vm1681_vm3, %v1927_v51 }
  0xc0   :  { %v733_v59 = vadd.f32 %v6670_v14, %v732_v58  ;;  %v1978_v62 = vpack.c.bf16 %v1949_v55, %v1948_v54 }
  0xc1   :  { %1770 = vst.msk [vmem:[#allocation2 + $0xd8] sm:$0xff] %vm1681_vm3, %v1558_v57  ;;  %v6413_v57 = vld [vmem:[%s8733_s0 + $0x78] sm:$0xff] }
  0xc2   :  { %vm1043_vm9 = vcmp.gt.f32.partialorder %v733_v59, 0.0  ;;  %v1171_v61 = vmul.f32 0.2, %v733_v59  ;;  %5792 = vmatmul.msk.bf16.gmra.mxu0 %vm511_vm1, %v6409_v56 }
  0xc4   :  { %v1299_v63 = vsel %vm1043_vm9, %v733_v59, %v1171_v61 }
  0xc5   :  { %v1429_v1 = vmul.f32 %v6679_v18, %v1299_v63  ;;  %5894 = vmatmul.msk.bf16.gmra.mxu3 %vm1681_vm3, %v1927_v51 }
  0xc7   :  { %v1559_v3 = vadd.f32 %v6685_v20, %v1429_v1  ;;  %v734_v4 = vpop.f32.mrf.mxu0  ;;  %5853 = vmatmul.msk.bf16.gmra.mxu1 %vm1681_vm3, %v1978_v62 }
  0xc8   :  { %v735_v5 = vadd.f32 %v6670_v14, %v734_v4 }
  0xc9   :  { %1771 = vst.msk [vmem:[#allocation2 + $0xe0] sm:$0xff] %vm1681_vm3, %v1559_v3 }
  0xca   :  { %vm1044_vm10 = vcmp.gt.f32.partialorder %v735_v5, 0.0  ;;  %v1172_v6 = vmul.f32 0.2, %v735_v5 }
  0xcc   :  { %v1300_v7 = vsel %vm1044_vm10, %v735_v5, %v1172_v6 }
  0xcd   :  { %v1430_v8 = vmul.f32 %v6679_v18, %v1300_v7  ;;  %v1899_v7 = vld [vmem:[#allocation2 + $0x60] sm:$0xff] }
  0xcf   :  { %v1560_v10 = vadd.f32 %v6685_v20, %v1430_v8  ;;  %v737_v11 = vpop.f32.mrf.mxu0  ;;  %v1900_v8 = vld [vmem:[#allocation2 + $0x68] sm:$0xff] }
  0xd0   :  { %v738_v12 = vadd.f32 %v6670_v14, %v737_v11  ;;  %v2513_v53 = vld [vmem:[#allocation2 + $0xe0] sm:$0xff] }
  0xd1   :  { %1772 = vst.msk [vmem:[#allocation2 + $0xe8] sm:$0xff] %vm1681_vm3, %v1560_v10 }
  0xd2   :  { %vm1045_vm11 = vcmp.gt.f32.partialorder %v738_v12, 0.0  ;;  %v1173_v13 = vmul.f32 0.2, %v738_v12  ;;  %5793 = vmatmul.msk.bf16.gmra.mxu0 %vm511_vm1, %v6410_v9 }
  0xd4   :  { %v1301_v15 = vsel %vm1045_vm11, %v738_v12, %v1173_v13 }
  0xd5   :  { %v1431_v16 = vmul.f32 %v6679_v18, %v1301_v15  ;;  %v1928_v15 = vpack.c.bf16 %v1900_v8, %v1899_v7 }
  0xd7   :  { %v1561_v17 = vadd.f32 %v6685_v20, %v1431_v16  ;;  %v739_v19 = vpop.f32.mrf.mxu0  ;;  %5874 = vmatmul.msk.bf16.gmra.mxu2 %vm1681_vm3, %v1928_v15  ;;  %5895 = vmatmul.msk.bf16.gmra.mxu3 %vm1681_vm3, %v1928_v15 }
  0xd8   :  { %v740_v21 = vadd.f32 %v6670_v14, %v739_v19 }
  0xd9   :  { %1773 = vst.msk [vmem:[#allocation2 + $0xf0] sm:$0xff] %vm1681_vm3, %v1561_v17 }
  0xda   :  { %vm1046_vm12 = vcmp.gt.f32.partialorder %v740_v21, 0.0  ;;  %v1174_v22 = vmul.f32 0.2, %v740_v21 }
  0xdc   :  { %v1302_v23 = vsel %vm1046_vm12, %v740_v21, %v1174_v22  ;;  %v1950_v22 = vld [vmem:[#allocation2 + $0x70] sm:$0xff] }
  0xdd   :  { %v1432_v24 = vmul.f32 %v6679_v18, %v1302_v23  ;;  %v1951_v23 = vld [vmem:[#allocation2 + $0x78] sm:$0xff] }
  0xde   :  { %v1979_v30 = vpack.c.bf16 %v1951_v23, %v1950_v22 }
  0xdf   :  { %v1562_v26 = vadd.f32 %v6685_v20, %v1432_v24  ;;  %v742_v27 = vpop.f32.mrf.mxu0 }
  0xe0   :  { %v743_v29 = vadd.f32 %v6670_v14, %v742_v27  ;;  %5854 = vmatmul.msk.bf16.gmra.mxu1 %vm1681_vm3, %v1979_v30 }
  0xe1   :  { %1774 = vst.msk [vmem:[#allocation2 + $0xf8] sm:$0xff] %vm1681_vm3, %v1562_v26 }
  0xe2   :  { %vm1047_vm13 = vcmp.gt.f32.partialorder %v743_v29, 0.0  ;;  %v1175_v32 = vmul.f32 0.2, %v743_v29  ;;  %5794 = vmatmul.msk.bf16.gmra.mxu0 %vm511_vm1, %v6411_v25  ;;  %v6414_v25 = vld [vmem:[%s8733_s0 + $0x80] sm:$0xff] }
  0xe4   :  { %v1303_v34 = vsel %vm1047_vm13, %v743_v29, %v1175_v32 }
  0xe5   :  { %v1433_v35 = vmul.f32 %v6679_v18, %v1303_v34 }
  0xe7   :  { %v1563_v36 = vadd.f32 %v6685_v20, %v1433_v35  ;;  %v744_v37 = vpop.f32.mrf.mxu0  ;;  %5896 = vmatmul.msk.bf16.gmra.mxu3 %vm1681_vm3, %v2317_v49 }
  0xe8   :  { %v745_v47 = vadd.f32 %v6670_v14, %v744_v37  ;;  %v1902_v37 = vld [vmem:[#allocation2 + $0x148] sm:$0xff] }
  0xe9   :  { %1775 = vst.msk [vmem:[#allocation2 + $0x100] sm:$0xff] %vm1681_vm3, %v1563_v36  ;;  %v1901_v36 = vld [vmem:[#allocation2 + $0x140] sm:$0xff] }
  0xea   :  { %v1176_v52 = vmul.f32 0.2, %v745_v47  ;;  %vm1048_vm14 = vcmp.gt.f32.partialorder %v745_v47, 0.0  ;;  %v1929_v40 = vpack.c.bf16 %v1902_v37, %v1901_v36 }
  0xec   :  { %v1304_v58 = vsel %vm1048_vm14, %v745_v47, %v1176_v52  ;;  %5875 = vmatmul.msk.bf16.gmra.mxu2 %vm1681_vm3, %v1929_v40 }
  0xed   :  { %v1434_v63 = vmul.f32 %v6679_v18, %v1304_v58 }
  0xef   :  { %v747_v42 = vpop.f32.mrf.mxu0  ;;  %v1564_v3 = vadd.f32 %v6685_v20, %v1434_v63  ;;  %v6416_v63 = vld [vmem:[%s8733_s0 + $0x90] sm:$0xff] }
  0xf0   :  { %v748_v56 = vadd.f32 %v6670_v14, %v747_v42 }
  0xf1   :  { %1776 = vst.msk [vmem:[#allocation2 + $0x108] sm:$0xff] %vm1681_vm3, %v1564_v3 }
  0xf2   :  { %5795 = vmatmul.msk.bf16.gmra.mxu0 %vm511_vm1, %v6412_v41  ;;  %v1177_v0 = vmul.f32 0.2, %v748_v56  ;;  %vm1049_vm15 = vcmp.gt.f32.partialorder %v748_v56, 0.0 }
  0xf4   :  { %v1305_v4 = vsel %vm1049_vm15, %v748_v56, %v1177_v0 }
  0xf5   :  { %v1435_v11 = vmul.f32 %v6679_v18, %v1305_v4 }
  0xf7   :  { %v749_v48 = vpop.f32.mrf.mxu0  ;;  %v1565_v19 = vadd.f32 %v6685_v20, %v1435_v11 }
  0xf8   :  { %v750_v59 = vadd.f32 %v6670_v14, %v749_v48 }
  0xf9   :  { %1777 = vst.msk [vmem:[#allocation2 + $0x110] sm:$0xff] %vm1681_vm3, %v1565_v19 }
  0xfa   :  { %v1178_v1 = vmul.f32 0.2, %v750_v59  ;;  %vm1050_vm0 = vcmp.gt.f32.partialorder %v750_v59, 0.0 }
  0xfc   :  { %v1306_v5 = vsel %vm1050_vm0, %v750_v59, %v1178_v1 }
  0xfd   :  { %v1436_v12 = vmul.f32 %v6679_v18, %v1306_v5 }
  0xff   :  { %v752_v60 = vpop.f32.mrf.mxu0  ;;  %v1566_v24 = vadd.f32 %v6685_v20, %v1436_v12 }
 0x100   :  { %v753_v61 = vadd.f32 %v6670_v14, %v752_v60 }
 0x101   :  { %1778 = vst.msk [vmem:[#allocation2 + $0x118] sm:$0xff] %vm1681_vm3, %v1566_v24 }
 0x102   :  { %5796 = vmatmul.msk.bf16.gmra.mxu0 %vm511_vm1, %v6413_v57  ;;  %v1179_v2 = vmul.f32 0.2, %v753_v61  ;;  %vm1051_vm2 = vcmp.gt.f32.partialorder %v753_v61, 0.0 }
 0x104   :  { %v1307_v9 = vsel %vm1051_vm2, %v753_v61, %v1179_v2 }
 0x105   :  { %v1437_v16 = vmul.f32 %v6679_v18, %v1307_v9 }
 0x107   :  { %v754_v6 = vpop.f32.mrf.mxu0  ;;  %v1567_v26 = vadd.f32 %v6685_v20, %v1437_v16  ;;  %v6417_v16 = vld [vmem:[%s8733_s0 + $0x98] sm:$0xff] }
 0x108   :  { %v755_v10 = vadd.f32 %v6670_v14, %v754_v6 }
 0x109   :  { %1779 = vst.msk [vmem:[#allocation2 + $0x120] sm:$0xff] %vm1681_vm3, %v1567_v26 }
 0x10a   :  { %vm1052_vm4 = vcmp.gt.f32.partialorder %v755_v10, 0.0  ;;  %v1180_v13 = vmul.f32 0.2, %v755_v10 }
 0x10c   :  { %v1308_v17 = vsel %vm1052_vm4, %v755_v10, %v1180_v13 }
 0x10d   :  { %v1438_v21 = vmul.f32 %v6679_v18, %v1308_v17 }
 0x10f   :  { %v757_v27 = vpop.f32.mrf.mxu0  ;;  %v1568_v28 = vadd.f32 %v6685_v20, %v1438_v21 }
 0x110   :  { %v758_v29 = vadd.f32 %v6670_v14, %v757_v27 }
 0x111   :  { %1780 = vst.msk [vmem:[#allocation2 + $0x128] sm:$0xff] %vm1681_vm3, %v1568_v28 }
 0x112   :  { %vm1053_vm5 = vcmp.gt.f32.partialorder %v758_v29, 0.0  ;;  %v1181_v31 = vmul.f32 0.2, %v758_v29  ;;  %5797 = vmatmul.msk.bf16.gmra.mxu0 %vm511_vm1, %v6414_v25 }
 0x114   :  { %v1309_v32 = vsel %vm1053_vm5, %v758_v29, %v1181_v31 }
 0x115   :  { %v1439_v33 = vmul.f32 %v6679_v18, %v1309_v32 }
 0x117   :  { %v1569_v34 = vadd.f32 %v6685_v20, %v1439_v33  ;;  %v759_v35 = vpop.f32.mrf.mxu0 }
 0x118   :  { %v760_v38 = vadd.f32 %v6670_v14, %v759_v35 }
 0x119   :  { %1781 = vst.msk [vmem:[#allocation2 + $0x150] sm:$0xff] %vm1681_vm3, %v1569_v34  ;;  %v6418_v34 = vld [vmem:[%s8733_s0 + $0xa0] sm:$0xff] }
 0x11a   :  { %vm1054_vm6 = vcmp.gt.f32.partialorder %v760_v38, 0.0  ;;  %v1182_v39 = vmul.f32 0.2, %v760_v38 }
 0x11c   :  { %v1310_v41 = vsel %vm1054_vm6, %v760_v38, %v1182_v39 }
 0x11d   :  { %v1440_v42 = vmul.f32 %v6679_v18, %v1310_v41 }
 0x11f   :  { %v1570_v46 = vadd.f32 %v6685_v20, %v1440_v42  ;;  %v762_v47 = vpop.f32.mrf.mxu0 }
 0x120   :  { %v763_v48 = vadd.f32 %v6670_v14, %v762_v47  ;;  %v1952_v57 = vld [vmem:[#allocation2 + $0x150] sm:$0xff] }
 0x121   :  { %1782 = vst.msk [vmem:[#allocation2 + $0x158] sm:$0xff] %vm1681_vm3, %v1570_v46 }
 0x122   :  { %vm1055_vm7 = vcmp.gt.f32.partialorder %v763_v48, 0.0  ;;  %v1183_v50 = vmul.f32 0.2, %v763_v48  ;;  %5798 = vmatmul.msk.bf16.gmra.mxu0 %vm511_vm1, %v6415_v45 }
 0x124   :  { %v1311_v51 = vsel %vm1055_vm7, %v763_v48, %v1183_v50  ;;  %v2201_v50 = vpop.f32.mrf.mxu2 }
 0x125   :  { %v1441_v52 = vmul.f32 %v6679_v18, %v1311_v51  ;;  %v6419_v51 = vld [vmem:[%s8733_s0 + $0xa8] sm:$0xff] }
 0x127   :  { %v1571_v54 = vadd.f32 %v6685_v20, %v1441_v52  ;;  %v764_v55 = vpop.f32.mrf.mxu0 }
 0x128   :  { %v765_v56 = vadd.f32 %v6670_v14, %v764_v55  ;;  %v1953_v58 = vld [vmem:[#allocation2 + $0x158] sm:$0xff] }
 0x129   :  { %1783 = vst.msk [vmem:[#allocation2 + $0x160] sm:$0xff] %vm1681_vm3, %v1571_v54  ;;  %v1980_v59 = vpack.c.bf16 %v1953_v58, %v1952_v57 }
 0x12a   :  { %vm1056_vm8 = vcmp.gt.f32.partialorder %v765_v56, 0.0  ;;  %v1184_v60 = vmul.f32 0.2, %v765_v56 }
 0x12b   :  { %5855 = vmatmul.msk.bf16.gmra.mxu1 %vm1681_vm3, %v1980_v59 }
 0x12c   :  { %v1312_v61 = vsel %vm1056_vm8, %v765_v56, %v1184_v60  ;;  %v2058_v56 = vpop.f32.mrf.mxu1 }
 0x12d   :  { %v1442_v62 = vmul.f32 %v6679_v18, %v1312_v61  ;;  %v2202_v58 = vadd.f32 %v2201_v50, %v2058_v56 }
 0x12f   :  { %v1572_v0 = vadd.f32 %v6685_v20, %v1442_v62  ;;  %v767_v1 = vpop.f32.mrf.mxu0 }
 0x130   :  { %v768_v2 = vadd.f32 %v6670_v14, %v767_v1  ;;  %v1903_v9 = vld [vmem:[#allocation2 + $0x160] sm:$0xff] }
 0x131   :  { %1784 = vst.msk [vmem:[#allocation2 + $0x168] sm:$0xff] %vm1681_vm3, %v1572_v0 }
 0x132   :  { %vm1057_vm9 = vcmp.gt.f32.partialorder %v768_v2, 0.0  ;;  %v1185_v3 = vmul.f32 0.2, %v768_v2  ;;  %5799 = vmatmul.msk.bf16.gmra.mxu0 %vm511_vm1, %v6416_v63  ;;  %v6945_v63 = vpop.f32.mrf.mxu2 }
 0x134   :  { %v1313_v4 = vsel %vm1057_vm9, %v768_v2, %v1185_v3 }
 0x135   :  { %v1443_v5 = vmul.f32 %v6679_v18, %v1313_v4  ;;  %v6949_v4 = vpop.f32.mrf.mxu1 }
 0x137   :  { %v1573_v6 = vadd.f32 %v6685_v20, %v1443_v5  ;;  %v769_v7 = vpop.f32.mrf.mxu0 }
 0x138   :  { %v770_v8 = vadd.f32 %v6670_v14, %v769_v7  ;;  %v1904_v10 = vld [vmem:[#allocation2 + $0x168] sm:$0xff] }
 0x139   :  { %1785 = vst.msk [vmem:[#allocation2 + $0x170] sm:$0xff] %vm1681_vm3, %v1573_v6  ;;  %v1930_v11 = vpack.c.bf16 %v1904_v10, %v1903_v9 }
 0x13a   :  { %vm1058_vm10 = vcmp.gt.f32.partialorder %v770_v8, 0.0  ;;  %v1186_v12 = vmul.f32 0.2, %v770_v8 }
 0x13b   :  { %5876 = vmatmul.msk.bf16.gmra.mxu2 %vm1681_vm3, %v1930_v11  ;;  %5897 = vmatmul.msk.bf16.gmra.mxu3 %vm1681_vm3, %v1930_v11 }
 0x13c   :  { %v1314_v13 = vsel %vm1058_vm10, %v770_v8, %v1186_v12  ;;  %v6420_v8 = vld [vmem:[%s8733_s0 + $0xb0] sm:$0xff] }
 0x13d   :  { %v1444_v15 = vmul.f32 %v6679_v18, %v1314_v13  ;;  %v2063_v12 = vpop.f32.mrf.mxu1  ;;  %v2206_v13 = vpop.f32.mrf.mxu2 }
 0x13f   :  { %v1574_v17 = vadd.f32 %v6685_v20, %v1444_v15  ;;  %v772_v19 = vpop.f32.mrf.mxu0 }
 0x140   :  { %v773_v21 = vadd.f32 %v6670_v14, %v772_v19  ;;  %v1954_v28 = vld [vmem:[#allocation2 + $0x170] sm:$0xff] }
 0x141   :  { %1786 = vst.msk [vmem:[#allocation2 + $0x178] sm:$0xff] %vm1681_vm3, %v1574_v17 }
 0x142   :  { %vm1059_vm11 = vcmp.gt.f32.partialorder %v773_v21, 0.0  ;;  %v1187_v22 = vmul.f32 0.2, %v773_v21  ;;  %5800 = vmatmul.msk.bf16.gmra.mxu0 %vm511_vm1, %v6417_v16  ;;  %v2207_v16 = vadd.f32 %v2206_v13, %v2063_v12 }
 0x144   :  { %v1315_v23 = vsel %vm1059_vm11, %v773_v21, %v1187_v22 }
 0x145   :  { %v1445_v24 = vmul.f32 %v6679_v18, %v1315_v23  ;;  %v2396_v23 = vpop.f32.mrf.mxu3 }
 0x147   :  { %v1575_v25 = vadd.f32 %v6685_v20, %v1445_v24  ;;  %v774_v26 = vpop.f32.mrf.mxu0 }
 0x148   :  { %v775_v27 = vadd.f32 %v6670_v14, %v774_v26  ;;  %v1955_v29 = vld [vmem:[#allocation2 + $0x178] sm:$0xff] }
 0x149   :  { %1787 = vst.msk [vmem:[#allocation2 + $0x180] sm:$0xff] %vm1681_vm3, %v1575_v25  ;;  %v1981_v30 = vpack.c.bf16 %v1955_v29, %v1954_v28  ;;  %v6966_v29 = vpop.f32.mrf.mxu1 }
 0x14a   :  { %vm1060_vm12 = vcmp.gt.f32.partialorder %v775_v27, 0.0  ;;  %v1188_v31 = vmul.f32 0.2, %v775_v27 }
 0x14b   :  { %5856 = vmatmul.msk.bf16.gmra.mxu1 %vm1681_vm3, %v1981_v30  ;;  %v6968_v30 = vpop.f32.mrf.mxu2 }
 0x14c   :  { %v1316_v32 = vsel %vm1060_vm12, %v775_v27, %v1188_v31  ;;  %v6963_v27 = vadd.f32 %v2396_v23, %v2202_v58 }
 0x14d   :  { %v1446_v33 = vmul.f32 %v6679_v18, %v1316_v32 }
 0x14f   :  { %v1576_v35 = vadd.f32 %v6685_v20, %v1446_v33  ;;  %v777_v36 = vpop.f32.mrf.mxu0 }
 0x150   :  { %v778_v37 = vadd.f32 %v6670_v14, %v777_v36  ;;  %v1905_v44 = vld [vmem:[#allocation2 + $0x180] sm:$0xff] }
 0x151   :  { %1788 = vst.msk [vmem:[#allocation2 + $0x188] sm:$0xff] %vm1681_vm3, %v1576_v35 }
 0x152   :  { %vm1061_vm13 = vcmp.gt.f32.partialorder %v778_v37, 0.0  ;;  %v1189_v38 = vmul.f32 0.2, %v778_v37  ;;  %5801 = vmatmul.msk.bf16.gmra.mxu0 %vm511_vm1, %v6418_v34  ;;  %v6421_v34 = vld [vmem:[%s8733_s0 + $0xb8] sm:$0xff] }
 0x154   :  { %v1317_v39 = vsel %vm1061_vm13, %v778_v37, %v1189_v38  ;;  %v6977_v37 = vpop.f32.mrf.mxu3 }
 0x155   :  { %v1447_v40 = vmul.f32 %v6679_v18, %v1317_v39  ;;  %v2068_v39 = vpop.f32.mrf.mxu1 }
 0x157   :  { %v1577_v41 = vadd.f32 %v6685_v20, %v1447_v40  ;;  %v779_v42 = vpop.f32.mrf.mxu0  ;;  %v2211_v40 = vpop.f32.mrf.mxu2 }
 0x158   :  { %v780_v43 = vadd.f32 %v6670_v14, %v779_v42  ;;  %v1906_v45 = vld [vmem:[#allocation2 + $0x188] sm:$0xff]  ;;  %v2212_v42 = vadd.f32 %v2211_v40, %v2068_v39  ;;  %v7029_v40 = vld [vmem:[%s8732_s2] ss:$0 sm:$0xff] }
 0x159   :  { %1789 = vst.msk [vmem:[#allocation2 + $0x190] sm:$0xff] %vm1681_vm3, %v1577_v41  ;;  %v1931_v46 = vpack.c.bf16 %v1906_v45, %v1905_v44 }
 0x15a   :  { %vm1062_vm14 = vcmp.gt.f32.partialorder %v780_v43, 0.0  ;;  %v1190_v47 = vmul.f32 0.2, %v780_v43 }
 0x15b   :  { %5877 = vmatmul.msk.bf16.gmra.mxu2 %vm1681_vm3, %v1931_v46  ;;  %5898 = vmatmul.msk.bf16.gmra.mxu3 %vm1681_vm3, %v1931_v46 }
 0x15c   :  { %v1318_v48 = vsel %vm1062_vm14, %v780_v43, %v1190_v47  ;;  %v2401_v47 = vpop.f32.mrf.mxu3 }
 0x15d   :  { %v1448_v49 = vmul.f32 %v6679_v18, %v1318_v48 }
 0x15f   :  { %v1578_v52 = vadd.f32 %v6685_v20, %v1448_v49  ;;  %v782_v54 = vpop.f32.mrf.mxu0 }
 0x160   :  { %v783_v55 = vadd.f32 %v6670_v14, %v782_v54  ;;  %v1956_v1 = vld [vmem:[#allocation2 + $0x190] sm:$0xff]  ;;  %v6988_v54 = vpop.f32.mrf.mxu1 }
 0x161   :  { %1790 = vst.msk [vmem:[#allocation2 + $0x198] sm:$0xff] %vm1681_vm3, %v1578_v52 }
 0x162   :  { %vm1063_vm15 = vcmp.gt.f32.partialorder %v783_v55, 0.0  ;;  %v1191_v57 = vmul.f32 0.2, %v783_v55  ;;  %5802 = vmatmul.msk.bf16.gmra.mxu0 %vm511_vm1, %v6419_v51  ;;  %v6985_v51 = vadd.f32 %v2401_v47, %v2207_v16  ;;  %v7047_v47 = vld [vmem:[%s8732_s2 + $0x2] ss:$0 sm:$0xff] }
 0x164   :  { %v1319_v59 = vsel %vm1063_vm15, %v783_v55, %v1191_v57  ;;  %v6990_v55 = vpop.f32.mrf.mxu2 }
 0x165   :  { %v1449_v60 = vmul.f32 %v6679_v18, %v1319_v59  ;;  %v6422_v59 = vld [vmem:[%s8733_s0 + $0xc0] sm:$0xff] }
 0x167   :  { %v1579_v61 = vadd.f32 %v6685_v20, %v1449_v60  ;;  %v784_v62 = vpop.f32.mrf.mxu0 }
 0x168   :  { %v785_v0 = vadd.f32 %v6670_v14, %v784_v62  ;;  %v1957_v2 = vld [vmem:[#allocation2 + $0x198] sm:$0xff]  ;;  %v6998_v62 = vpop.f32.mrf.mxu3 }
 0x169   :  { %1791 = vst.msk [vmem:[#allocation2 + $0x1a0] sm:$0xff] %vm1681_vm3, %v1579_v61  ;;  %v1982_v3 = vpack.c.bf16 %v1957_v2, %v1956_v1  ;;  %v2073_v1 = vpop.f32.mrf.mxu1 }
 0x16a   :  { %vm1064_vm0 = vcmp.gt.f32.partialorder %v785_v0, 0.0  ;;  %v1192_v5 = vmul.f32 0.2, %v785_v0 }
 0x16b   :  { %5857 = vmatmul.msk.bf16.gmra.mxu1 %vm1681_vm3, %v1982_v3 }
 0x16c   :  { %v1320_v6 = vsel %vm1064_vm0, %v785_v0, %v1192_v5  ;;  %v2216_v2 = vpop.f32.mrf.mxu2 }
 0x16d   :  { %v1450_v7 = vmul.f32 %v6679_v18, %v1320_v6  ;;  %v2217_v5 = vadd.f32 %v2216_v2, %v2073_v1 }
 0x16f   :  { %v1580_v9 = vadd.f32 %v6685_v20, %v1450_v7  ;;  %v787_v10 = vpop.f32.mrf.mxu0 }
 0x170   :  { %v788_v11 = vadd.f32 %v6670_v14, %v787_v10  ;;  %v1907_v25 = vld [vmem:[#allocation2 + $0x1a0] sm:$0xff]  ;;  %v2406_v10 = vpop.f32.mrf.mxu3 }
 0x171   :  { %1792 = vst.msk [vmem:[#allocation2 + $0x1a8] sm:$0xff] %vm1681_vm3, %v1580_v9  ;;  %v7013_v23 = vpop.f32.mrf.mxu1 }
 0x172   :  { %vm1065_vm2 = vcmp.gt.f32.partialorder %v788_v11, 0.0  ;;  %v1193_v15 = vmul.f32 0.2, %v788_v11  ;;  %5803 = vmatmul.msk.bf16.gmra.mxu0 %vm511_vm1, %v6420_v8 }
 0x174   :  { %v1321_v17 = vsel %vm1065_vm2, %v788_v11, %v1193_v15  ;;  %v7006_v15 = vadd.f32 %v2406_v10, %v2212_v42 }
 0x175   :  { %v1451_v19 = vmul.f32 %v6679_v18, %v1321_v17 }
 0x177   :  { %v1581_v21 = vadd.f32 %v6685_v20, %v1451_v19  ;;  %v789_v22 = vpop.f32.mrf.mxu0 }
 0x178   :  { %v790_v24 = vadd.f32 %v6670_v14, %v789_v22  ;;  %v1908_v26 = vld [vmem:[#allocation2 + $0x1a8] sm:$0xff] }
 0x179   :  { %1793 = vst.msk [vmem:[#allocation2 + $0x1b0] sm:$0xff] %vm1681_vm3, %v1581_v21  ;;  %v1932_v28 = vpack.c.bf16 %v1908_v26, %v1907_v25  ;;  %v7010_v21 = vpop.f32.mrf.mxu2 }
 0x17a   :  { %vm1066_vm4 = vcmp.gt.f32.partialorder %v790_v24, 0.0  ;;  %v1194_v31 = vmul.f32 0.2, %v790_v24 }
 0x17b   :  { %5878 = vmatmul.msk.bf16.gmra.mxu2 %vm1681_vm3, %v1932_v28  ;;  %5899 = vmatmul.msk.bf16.gmra.mxu3 %vm1681_vm3, %v1932_v28  ;;  %v7019_v28 = vpop.f32.mrf.mxu3 }
 0x17c   :  { %v1322_v32 = vsel %vm1066_vm4, %v790_v24, %v1194_v31  ;;  %v6423_v24 = vld [vmem:[%s8733_s0 + $0xc8] sm:$0xff] }
 0x17d   :  { %v1452_v33 = vmul.f32 %v6679_v18, %v1322_v32 }
 0x17f   :  { %v1582_v35 = vadd.f32 %v6685_v20, %v1452_v33  ;;  %v792_v36 = vpop.f32.mrf.mxu0 }
 0x180   :  { %v793_v38 = vadd.f32 %v6670_v14, %v792_v36  ;;  %v1958_v49 = vld [vmem:[#allocation2 + $0x1b0] sm:$0xff] }
 0x181   :  { %1794 = vst.msk [vmem:[#allocation2 + $0x1b8] sm:$0xff] %vm1681_vm3, %v1582_v35  ;;  %v2221_v35 = vpop.f32.mrf.mxu2 }
 0x182   :  { %vm1067_vm5 = vcmp.gt.f32.partialorder %v793_v38, 0.0  ;;  %v1195_v41 = vmul.f32 0.2, %v793_v38  ;;  %5804 = vmatmul.msk.bf16.gmra.mxu0 %vm511_vm1, %v6421_v34 }
 0x183   :  { %v2411_v39 = vpop.f32.mrf.mxu3 }
 0x184   :  { %v1323_v43 = vsel %vm1067_vm5, %v793_v38, %v1195_v41  ;;  %v7032_v42 = vadd.f32 %v2411_v39, %v2217_v5  ;;  %v6425_v5 = vld [vmem:[%s8733_s0 + $0xd8] sm:$0xff] }
 0x185   :  { %v1453_v44 = vmul.f32 %v6679_v18, %v1323_v43 }
 0x187   :  { %v1583_v45 = vadd.f32 %v6685_v20, %v1453_v44  ;;  %v794_v46 = vpop.f32.mrf.mxu0 }
 0x188   :  { %v795_v48 = vadd.f32 %v6670_v14, %v794_v46  ;;  %v1959_v50 = vld [vmem:[#allocation2 + $0x1b8] sm:$0xff]  ;;  %v6424_v46 = vld [vmem:[%s8733_s0 + $0xd0] sm:$0xff] }
 0x189   :  { %1795 = vst.msk [vmem:[#allocation2 + $0x1c0] sm:$0xff] %vm1681_vm3, %v1583_v45  ;;  %v1983_v52 = vpack.c.bf16 %v1959_v50, %v1958_v49  ;;  %v7068_v10 = vpop.f32.mrf.mxu2 }
 0x18a   :  { %vm1068_vm6 = vcmp.gt.f32.partialorder %v795_v48, 0.0  ;;  %v1196_v56 = vmul.f32 0.2, %v795_v48 }
 0x18b   :  { %5858 = vmatmul.msk.bf16.gmra.mxu1 %vm1681_vm3, %v1983_v52 }
 0x18c   :  { %v1324_v57 = vsel %vm1068_vm6, %v795_v48, %v1196_v56 }
 0x18d   :  { %v1454_v58 = vmul.f32 %v6679_v18, %v1324_v57  ;;  %v7053_v57 = vpop.f32.mrf.mxu3 }
 0x18f   :  { %v1584_v60 = vadd.f32 %v6685_v20, %v1454_v58  ;;  %v797_v61 = vpop.f32.mrf.mxu0 }
 0x190   :  { %v798_v0 = vadd.f32 %v6670_v14, %v797_v61  ;;  %v2296_v12 = vld [vmem:[#allocation2 + $0x1c0] sm:$0xff] }
 0x191   :  { %1796 = vst.msk [vmem:[#allocation2 + $0x1c8] sm:$0xff] %vm1681_vm3, %v1584_v60 }
 0x192   :  { %vm1069_vm7 = vcmp.gt.f32.partialorder %v798_v0, 0.0  ;;  %v1197_v3 = vmul.f32 0.2, %v798_v0  ;;  %5805 = vmatmul.msk.bf16.gmra.mxu0 %vm511_vm1, %v6422_v59 }
 0x194   :  { %v1325_v6 = vsel %vm1069_vm7, %v798_v0, %v1197_v3 }
 0x195   :  { %v1455_v7 = vmul.f32 %v6679_v18, %v1325_v6 }
 0x197   :  { %v1585_v8 = vadd.f32 %v6685_v20, %v1455_v7  ;;  %v799_v9 = vpop.f32.mrf.mxu0 }
 0x198   :  { %v800_v11 = vadd.f32 %v6670_v14, %v799_v9  ;;  %v2297_v13 = vld [vmem:[#allocation2 + $0x1c8] sm:$0xff] }
 0x199   :  { %1797 = vst.msk [vmem:[#allocation2 + $0x1f0] sm:$0xff] %vm1681_vm3, %v1585_v8  ;;  %v2321_v16 = vpack.c.bf16 %v2297_v13, %v2296_v12 }
 0x19a   :  { %vm1070_vm8 = vcmp.gt.f32.partialorder %v800_v11, 0.0  ;;  %v1198_v17 = vmul.f32 0.2, %v800_v11 }
 0x19b   :  { %5900 = vmatmul.msk.bf16.gmra.mxu3 %vm1681_vm3, %v2321_v16 }
 0x19c   :  { %v1326_v19 = vsel %vm1070_vm8, %v800_v11, %v1198_v17 }
 0x19d   :  { %v1456_v22 = vmul.f32 %v6679_v18, %v1326_v19 }
 0x19f   :  { %v1586_v25 = vadd.f32 %v6685_v20, %v1456_v22  ;;  %v802_v26 = vpop.f32.mrf.mxu0 }
 0x1a0   :  { %v803_v31 = vadd.f32 %v6670_v14, %v802_v26 }
 0x1a1   :  { %1798 = vst.msk [vmem:[#allocation2 + $0x1f8] sm:$0xff] %vm1681_vm3, %v1586_v25 }
 0x1a2   :  { %vm1071_vm9 = vcmp.gt.f32.partialorder %v803_v31, 0.0  ;;  %v1199_v32 = vmul.f32 0.2, %v803_v31  ;;  %5806 = vmatmul.msk.bf16.gmra.mxu0 %vm511_vm1, %v6423_v24 }
 0x1a4   :  { %v1327_v33 = vsel %vm1071_vm9, %v803_v31, %v1199_v32 }
 0x1a5   :  { %v1457_v34 = vmul.f32 %v6679_v18, %v1327_v33 }
 0x1a7   :  { %v1587_v36 = vadd.f32 %v6685_v20, %v1457_v34  ;;  %v804_v38 = vpop.f32.mrf.mxu0  ;;  %v7038_v20 = vld [vmem:[%s8732_s2 + $0x1] ss:$0 sm:$0xff] }
 0x1a8   :  { %v805_v14 = vadd.f32 %v7029_v40, %v804_v38  ;;  %v2078_v41 = vpop.f32.mrf.mxu1  ;;  %v6426_v34 = vld [vmem:[%s8733_s0 + $0xe0] sm:$0xff] }
 0x1a9   :  { %1799 = vst.msk [vmem:[#allocation2 + $0x200] sm:$0xff] %vm1681_vm3, %v1587_v36  ;;  %v2222_v43 = vadd.f32 %v2221_v35, %v2078_v41 }
 0x1aa   :  { %vm1072_vm10 = vcmp.gt.f32.partialorder %v805_v14, 0.0  ;;  %v1200_v18 = vmul.f32 0.2, %v805_v14 }
 0x1ac   :  { %v1328_v44 = vsel %vm1072_vm10, %v805_v14, %v1200_v18 }
 0x1ad   :  { %v1458_v45 = vmul.f32 %v7038_v20, %v1328_v44 }
 0x1af   :  { %v1588_v48 = vadd.f32 %v7047_v47, %v1458_v45  ;;  %v807_v49 = vpop.f32.mrf.mxu0 }
 0x1b0   :  { %v808_v50 = vadd.f32 %v7029_v40, %v807_v49  ;;  %v7066_v9 = vpop.f32.mrf.mxu1 }
 0x1b1   :  { %1800 = vst.msk [vmem:[#allocation2 + $0x208] sm:$0xff] %vm1681_vm3, %v1588_v48 }
 0x1b2   :  { %vm1073_vm11 = vcmp.gt.f32.partialorder %v808_v50, 0.0  ;;  %v1201_v52 = vmul.f32 0.2, %v808_v50  ;;  %5807 = vmatmul.msk.bf16.gmra.mxu0 %vm511_vm1, %v6424_v46 }
 0x1b4   :  { %v1329_v56 = vsel %vm1073_vm11, %v808_v50, %v1201_v52  ;;  %v6427_v52 = vld [vmem:[%s8733_s0 + $0xe8] sm:$0xff] }
 0x1b5   :  { %v1459_v58 = vmul.f32 %v7038_v20, %v1329_v56 }
 0x1b7   :  { %v1589_v59 = vadd.f32 %v7047_v47, %v1459_v58  ;;  %v809_v60 = vpop.f32.mrf.mxu0 }
 0x1b8   :  { %v810_v61 = vadd.f32 %v7029_v40, %v809_v60 }
 0x1b9   :  { %1801 = vst.msk [vmem:[#allocation2 + $0x210] sm:$0xff] %vm1681_vm3, %v1589_v59 }
 0x1ba   :  { %vm1074_vm12 = vcmp.gt.f32.partialorder %v810_v61, 0.0  ;;  %v1202_v0 = vmul.f32 0.2, %v810_v61 }
 0x1bc   :  { %v1330_v1 = vsel %vm1074_vm12, %v810_v61, %v1202_v0 }
 0x1bd   :  { %v1460_v2 = vmul.f32 %v7038_v20, %v1330_v1 }
 0x1be   :  { %v2416_v3 = vpop.f32.mrf.mxu3  ;;  %v2226_v22 = vpop.f32.mrf.mxu2 }
 0x1bf   :  { %v1590_v6 = vadd.f32 %v7047_v47, %v1460_v2  ;;  %v7064_v7 = vadd.f32 %v2416_v3, %v2222_v43  ;;  %v812_v8 = vpop.f32.mrf.mxu0 }
 0x1c0   :  { %v813_v11 = vadd.f32 %v7029_v40, %v812_v8 }
 0x1c1   :  { %1802 = vst.msk [vmem:[#allocation2 + $0x218] sm:$0xff] %vm1681_vm3, %v1590_v6 }
 0x1c2   :  { %vm1075_vm13 = vcmp.gt.f32.partialorder %v813_v11, 0.0  ;;  %v1203_v12 = vmul.f32 0.2, %v813_v11  ;;  %5808 = vmatmul.msk.bf16.gmra.mxu0 %vm511_vm1, %v6425_v5 }
 0x1c4   :  { %v1331_v13 = vsel %vm1075_vm13, %v813_v11, %v1203_v12 }
 0x1c5   :  { %v1461_v16 = vmul.f32 %v7038_v20, %v1331_v13 }
 0x1c6   :  { %v7086_v43 = vpop.f32.mrf.mxu3  ;;  %v7098_v60 = vpop.f32.mrf.mxu2 }
 0x1c7   :  { %v1591_v17 = vadd.f32 %v7047_v47, %v1461_v16  ;;  %v814_v19 = vpop.f32.mrf.mxu0 }
 0x1c8   :  { %v815_v24 = vadd.f32 %v7029_v40, %v814_v19  ;;  %v2083_v25 = vpop.f32.mrf.mxu1 }
 0x1c9   :  { %1803 = vst.msk [vmem:[#allocation2 + $0x220] sm:$0xff] %vm1681_vm3, %v1591_v17  ;;  %v2227_v26 = vadd.f32 %v2226_v22, %v2083_v25  ;;  %v6428_v22 = vld [vmem:[%s8733_s0 + $0xf0] sm:$0xff] }
 0x1ca   :  { %vm1076_vm14 = vcmp.gt.f32.partialorder %v815_v24, 0.0  ;;  %v1204_v31 = vmul.f32 0.2, %v815_v24 }
 0x1cc   :  { %v1332_v32 = vsel %vm1076_vm14, %v815_v24, %v1204_v31 }
 0x1cd   :  { %v1462_v33 = vmul.f32 %v7038_v20, %v1332_v32 }
 0x1cf   :  { %v1592_v35 = vadd.f32 %v7047_v47, %v1462_v33  ;;  %v817_v36 = vpop.f32.mrf.mxu0 }
 0x1d0   :  { %v818_v38 = vadd.f32 %v7029_v40, %v817_v36  ;;  %v7100_v61 = vpop.f32.mrf.mxu1 }
 0x1d1   :  { %1804 = vst.msk [vmem:[#allocation2 + $0x228] sm:$0xff] %vm1681_vm3, %v1592_v35 }
 0x1d2   :  { %vm1077_vm15 = vcmp.gt.f32.partialorder %v818_v38, 0.0  ;;  %v1205_v39 = vmul.f32 0.2, %v818_v38  ;;  %5809 = vmatmul.msk.bf16.gmra.mxu0 %vm511_vm1, %v6426_v34 }
 0x1d4   :  { %v1333_v14 = vsel %vm1077_vm15, %v818_v38, %v1205_v39 }
 0x1d5   :  { %v1463_v41 = vmul.f32 %v7038_v20, %v1333_v14 }
 0x1d7   :  { %v1593_v18 = vadd.f32 %v7047_v47, %v1463_v41  ;;  %v819_v44 = vpop.f32.mrf.mxu0 }
 0x1d8   :  { %v820_v45 = vadd.f32 %v7029_v40, %v819_v44  ;;  %v6429_v44 = vld [vmem:[%s8733_s0 + $0xf8] sm:$0xff] }
 0x1d9   :  { %1805 = vst.msk [vmem:[#allocation2 + $0x230] sm:$0xff] %vm1681_vm3, %v1593_v18 }
 0x1da   :  { %vm1078_vm0 = vcmp.gt.f32.partialorder %v820_v45, 0.0  ;;  %v1206_v46 = vmul.f32 0.2, %v820_v45 }
 0x1dc   :  { %v1334_v48 = vsel %vm1078_vm0, %v820_v45, %v1206_v46 }
 0x1dd   :  { %v1464_v49 = vmul.f32 %v7038_v20, %v1334_v48 }
 0x1de   :  { %v2421_v50 = vpop.f32.mrf.mxu3  ;;  %v2231_v8 = vpop.f32.mrf.mxu2 }
 0x1df   :  { %v1594_v56 = vadd.f32 %v7047_v47, %v1464_v49  ;;  %v7096_v58 = vadd.f32 %v2421_v50, %v2227_v26  ;;  %v822_v59 = vpop.f32.mrf.mxu0 }
 0x1e0   :  { %v823_v0 = vadd.f32 %v7029_v40, %v822_v59 }
 0x1e1   :  { %1806 = vst.msk [vmem:[#allocation2 + $0x238] sm:$0xff] %vm1681_vm3, %v1594_v56 }
 0x1e2   :  { %vm1079_vm2 = vcmp.gt.f32.partialorder %v823_v0, 0.0  ;;  %v1207_v1 = vmul.f32 0.2, %v823_v0  ;;  %5810 = vmatmul.msk.bf16.gmra.mxu0 %vm511_vm1, %v6427_v52 }
 0x1e4   :  { %v1335_v2 = vsel %vm1079_vm2, %v823_v0, %v1207_v1 }
 0x1e5   :  { %v1465_v3 = vmul.f32 %v7038_v20, %v1335_v2 }
 0x1e6   :  { %v7118_v34 = vpop.f32.mrf.mxu3  ;;  %v7130_v49 = vpop.f32.mrf.mxu2 }
 0x1e7   :  { %v1595_v5 = vadd.f32 %v7047_v47, %v1465_v3  ;;  %v824_v6 = vpop.f32.mrf.mxu0 }
 0x1e8   :  { %v825_v11 = vadd.f32 %v7029_v40, %v824_v6  ;;  %v2088_v12 = vpop.f32.mrf.mxu1 }
 0x1e9   :  { %1807 = vst.msk [vmem:[#allocation2 + $0x240] sm:$0xff] %vm1681_vm3, %v1595_v5  ;;  %v2232_v13 = vadd.f32 %v2231_v8, %v2088_v12  ;;  %v1910_v12 = vld [vmem:[#allocation2 + $0x288] sm:$0xff] }
 0x1ea   :  { %vm1080_vm4 = vcmp.gt.f32.partialorder %v825_v11, 0.0  ;;  %v1208_v16 = vmul.f32 0.2, %v825_v11 }
 0x1ec   :  { %v1336_v17 = vsel %vm1080_vm4, %v825_v11, %v1208_v16  ;;  %v1909_v11 = vld [vmem:[#allocation2 + $0x280] sm:$0xff] }
 0x1ed   :  { %v1466_v19 = vmul.f32 %v7038_v20, %v1336_v17  ;;  %v1933_v16 = vpack.c.bf16 %v1910_v12, %v1909_v11 }
 0x1ef   :  { %v1596_v24 = vadd.f32 %v7047_v47, %v1466_v19  ;;  %v827_v25 = vpop.f32.mrf.mxu0  ;;  %5879 = vmatmul.msk.bf16.gmra.mxu2 %vm1681_vm3, %v1933_v16 }
 0x1f0   :  { %v828_v26 = vadd.f32 %v7029_v40, %v827_v25  ;;  %v7132_v50 = vpop.f32.mrf.mxu1 }
 0x1f1   :  { %1808 = vst.msk [vmem:[#allocation2 + $0x248] sm:$0xff] %vm1681_vm3, %v1596_v24 }
 0x1f2   :  { %vm1081_vm5 = vcmp.gt.f32.partialorder %v828_v26, 0.0  ;;  %v1209_v31 = vmul.f32 0.2, %v828_v26  ;;  %5811 = vmatmul.msk.bf16.gmra.mxu0 %vm511_vm1, %v6428_v22  ;;  %v6430_v22 = vld [vmem:[%s8733_s0 + $0x100] sm:$0xff] }
 0x1f4   :  { %v1337_v32 = vsel %vm1081_vm5, %v828_v26, %v1209_v31 }
 0x1f5   :  { %v1467_v33 = vmul.f32 %v7038_v20, %v1337_v32 }
 0x1f7   :  { %v1597_v35 = vadd.f32 %v7047_v47, %v1467_v33  ;;  %v829_v36 = vpop.f32.mrf.mxu0 }
 0x1f8   :  { %v830_v38 = vadd.f32 %v7029_v40, %v829_v36 }
 0x1f9   :  { %1809 = vst.msk [vmem:[#allocation2 + $0x250] sm:$0xff] %vm1681_vm3, %v1597_v35 }
 0x1fa   :  { %vm1082_vm6 = vcmp.gt.f32.partialorder %v830_v38, 0.0  ;;  %v1210_v39 = vmul.f32 0.2, %v830_v38 }
 0x1fc   :  { %v1338_v14 = vsel %vm1082_vm6, %v830_v38, %v1210_v39 }
 0x1fd   :  { %v1468_v41 = vmul.f32 %v7038_v20, %v1338_v14 }
 0x1fe   :  { %v2426_v18 = vpop.f32.mrf.mxu3  ;;  %v2236_v3 = vpop.f32.mrf.mxu2 }
 0x1ff   :  { %v1598_v45 = vadd.f32 %v7047_v47, %v1468_v41  ;;  %v7128_v46 = vadd.f32 %v2426_v18, %v2232_v13  ;;  %v832_v48 = vpop.f32.mrf.mxu0 }
 0x200   :  { %v833_v52 = vadd.f32 %v7029_v40, %v832_v48 }
 0x201   :  { %1810 = vst.msk [vmem:[#allocation2 + $0x258] sm:$0xff] %vm1681_vm3, %v1598_v45  ;;  %v6431_v45 = vld [vmem:[%s8733_s0 + $0x108] sm:$0xff] }
 0x202   :  { %vm1083_vm7 = vcmp.gt.f32.partialorder %v833_v52, 0.0  ;;  %v1211_v56 = vmul.f32 0.2, %v833_v52  ;;  %5812 = vmatmul.msk.bf16.gmra.mxu0 %vm511_vm1, %v6429_v44 }
 0x204   :  { %v1339_v59 = vsel %vm1083_vm7, %v833_v52, %v1211_v56 }
 0x205   :  { %v1469_v0 = vmul.f32 %v7038_v20, %v1339_v59 }
 0x206   :  { %v7151_v35 = vpop.f32.mrf.mxu3 }
 0x207   :  { %v1599_v1 = vadd.f32 %v7047_v47, %v1469_v0  ;;  %v834_v2 = vpop.f32.mrf.mxu0 }
 0x208   :  { %v835_v5 = vadd.f32 %v7029_v40, %v834_v2  ;;  %v2093_v6 = vpop.f32.mrf.mxu1 }
 0x209   :  { %1811 = vst.msk [vmem:[#allocation2 + $0x260] sm:$0xff] %vm1681_vm3, %v1599_v1  ;;  %v2237_v8 = vadd.f32 %v2236_v3, %v2093_v6 }
 0x20a   :  { %vm1084_vm8 = vcmp.gt.f32.partialorder %v835_v5, 0.0  ;;  %v1212_v13 = vmul.f32 0.2, %v835_v5 }
 0x20c   :  { %v1340_v17 = vsel %vm1084_vm8, %v835_v5, %v1212_v13 }
 0x20d   :  { %v1470_v19 = vmul.f32 %v7038_v20, %v1340_v17 }
 0x20f   :  { %v1600_v24 = vadd.f32 %v7047_v47, %v1470_v19  ;;  %v837_v25 = vpop.f32.mrf.mxu0  ;;  %v6432_v19 = vld [vmem:[%s8733_s0 + $0x110] sm:$0xff] }
 0x210   :  { %v838_v26 = vadd.f32 %v7029_v40, %v837_v25 }
 0x211   :  { %1812 = vst.msk [vmem:[#allocation2 + $0x268] sm:$0xff] %vm1681_vm3, %v1600_v24 }
 0x212   :  { %vm1085_vm9 = vcmp.gt.f32.partialorder %v838_v26, 0.0  ;;  %v1213_v31 = vmul.f32 0.2, %v838_v26  ;;  %5813 = vmatmul.msk.bf16.gmra.mxu0 %vm511_vm1, %v6430_v22 }
 0x214   :  { %v1341_v32 = vsel %vm1085_vm9, %v838_v26, %v1213_v31 }
 0x215   :  { %v1471_v33 = vmul.f32 %v7038_v20, %v1341_v32 }
 0x217   :  { %v1601_v36 = vadd.f32 %v7047_v47, %v1471_v33  ;;  %v839_v38 = vpop.f32.mrf.mxu0 }
 0x218   :  { %v840_v39 = vadd.f32 %v7029_v40, %v839_v38 }
 0x219   :  { %1813 = vst.msk [vmem:[#allocation2 + $0x290] sm:$0xff] %vm1681_vm3, %v1601_v36 }
 0x21a   :  { %vm1086_vm10 = vcmp.gt.f32.partialorder %v840_v39, 0.0  ;;  %v1214_v14 = vmul.f32 0.2, %v840_v39 }
 0x21c   :  { %v1342_v41 = vsel %vm1086_vm10, %v840_v39, %v1214_v14 }
 0x21d   :  { %v1472_v18 = vmul.f32 %v7038_v20, %v1342_v41 }
 0x21e   :  { %v2431_v44 = vpop.f32.mrf.mxu3 }
 0x21f   :  { %v1602_v48 = vadd.f32 %v7047_v47, %v1472_v18  ;;  %v7161_v52 = vadd.f32 %v2431_v44, %v2237_v8  ;;  %v842_v56 = vpop.f32.mrf.mxu0 }
 0x220   :  { %v843_v59 = vadd.f32 %v7029_v40, %v842_v56  ;;  %v1960_v11 = vld [vmem:[#allocation2 + $0x290] sm:$0xff] }
 0x221   :  { %1814 = vst.msk [vmem:[#allocation2 + $0x298] sm:$0xff] %vm1681_vm3, %v1602_v48  ;;  %v6433_v48 = vld [vmem:[%s8733_s0 + $0x118] sm:$0xff] }
 0x222   :  { %vm1087_vm11 = vcmp.gt.f32.partialorder %v843_v59, 0.0  ;;  %v1215_v0 = vmul.f32 0.2, %v843_v59  ;;  %5814 = vmatmul.msk.bf16.gmra.mxu0 %vm511_vm1, %v6431_v45 }
 0x224   :  { %v1343_v1 = vsel %vm1087_vm11, %v843_v59, %v1215_v0 }
 0x225   :  { %v1473_v2 = vmul.f32 %v7038_v20, %v1343_v1 }
 0x227   :  { %v1603_v3 = vadd.f32 %v7047_v47, %v1473_v2  ;;  %v844_v5 = vpop.f32.mrf.mxu0 }
 0x228   :  { %v845_v6 = vadd.f32 %v7029_v40, %v844_v5  ;;  %v1961_v8 = vld [vmem:[#allocation2 + $0x298] sm:$0xff] }
 0x229   :  { %1815 = vst.msk [vmem:[#allocation2 + $0x2a0] sm:$0xff] %vm1681_vm3, %v1603_v3  ;;  %v1984_v12 = vpack.c.bf16 %v1961_v8, %v1960_v11 }
 0x22a   :  { %vm1088_vm12 = vcmp.gt.f32.partialorder %v845_v6, 0.0  ;;  %v1216_v13 = vmul.f32 0.2, %v845_v6 }
 0x22b   :  { %5859 = vmatmul.msk.bf16.gmra.mxu1 %vm1681_vm3, %v1984_v12 }
 0x22c   :  { %v1344_v16 = vsel %vm1088_vm12, %v845_v6, %v1216_v13 }
 0x22d   :  { %v1474_v17 = vmul.f32 %v7038_v20, %v1344_v16 }
 0x22f   :  { %v1604_v22 = vadd.f32 %v7047_v47, %v1474_v17  ;;  %v847_v24 = vpop.f32.mrf.mxu0 }
 0x230   :  { %v848_v25 = vadd.f32 %v7029_v40, %v847_v24  ;;  %v1911_v39 = vld [vmem:[#allocation2 + $0x2a0] sm:$0xff] }
 0x231   :  { %1816 = vst.msk [vmem:[#allocation2 + $0x2a8] sm:$0xff] %vm1681_vm3, %v1604_v22  ;;  %v6434_v22 = vld [vmem:[%s8733_s0 + $0x120] sm:$0xff] }
 0x232   :  { %vm1089_vm13 = vcmp.gt.f32.partialorder %v848_v25, 0.0  ;;  %v1217_v26 = vmul.f32 0.2, %v848_v25  ;;  %5815 = vmatmul.msk.bf16.gmra.mxu0 %vm511_vm1, %v6432_v19 }
 0x234   :  { %v1345_v31 = vsel %vm1089_vm13, %v848_v25, %v1217_v26 }
 0x235   :  { %v1475_v32 = vmul.f32 %v7038_v20, %v1345_v31 }
 0x237   :  { %v1605_v33 = vadd.f32 %v7047_v47, %v1475_v32  ;;  %v849_v36 = vpop.f32.mrf.mxu0 }
 0x238   :  { %v850_v38 = vadd.f32 %v7029_v40, %v849_v36  ;;  %v1912_v14 = vld [vmem:[#allocation2 + $0x2a8] sm:$0xff] }
 0x239   :  { %1817 = vst.msk [vmem:[#allocation2 + $0x2b0] sm:$0xff] %vm1681_vm3, %v1605_v33  ;;  %v1934_v41 = vpack.c.bf16 %v1912_v14, %v1911_v39 }
 0x23a   :  { %vm1090_vm14 = vcmp.gt.f32.partialorder %v850_v38, 0.0  ;;  %v1218_v18 = vmul.f32 0.2, %v850_v38 }
 0x23b   :  { %5880 = vmatmul.msk.bf16.gmra.mxu2 %vm1681_vm3, %v1934_v41  ;;  %5901 = vmatmul.msk.bf16.gmra.mxu3 %vm1681_vm3, %v1934_v41 }
 0x23c   :  { %v1346_v44 = vsel %vm1090_vm14, %v850_v38, %v1218_v18 }
 0x23d   :  { %v1476_v45 = vmul.f32 %v7038_v20, %v1346_v44 }
 0x23f   :  { %v1606_v56 = vadd.f32 %v7047_v47, %v1476_v45  ;;  %v852_v59 = vpop.f32.mrf.mxu0 }
 0x240   :  { %v853_v0 = vadd.f32 %v7029_v40, %v852_v59  ;;  %v1962_v8 = vld [vmem:[#allocation2 + $0x2b0] sm:$0xff] }
 0x241   :  { %1818 = vst.msk [vmem:[#allocation2 + $0x2b8] sm:$0xff] %vm1681_vm3, %v1606_v56  ;;  %v6435_v56 = vld [vmem:[%s8733_s0 + $0x128] sm:$0xff] }
 0x242   :  { %vm1091_vm15 = vcmp.gt.f32.partialorder %v853_v0, 0.0  ;;  %v1219_v1 = vmul.f32 0.2, %v853_v0  ;;  %5816 = vmatmul.msk.bf16.gmra.mxu0 %vm511_vm1, %v6433_v48 }
 0x244   :  { %v1347_v2 = vsel %vm1091_vm15, %v853_v0, %v1219_v1 }
 0x245   :  { %v1477_v3 = vmul.f32 %v7038_v20, %v1347_v2 }
 0x247   :  { %v1607_v5 = vadd.f32 %v7047_v47, %v1477_v3  ;;  %v854_v6 = vpop.f32.mrf.mxu0 }
 0x248   :  { %v855_v11 = vadd.f32 %v7029_v40, %v854_v6  ;;  %v1963_v12 = vld [vmem:[#allocation2 + $0x2b8] sm:$0xff] }
 0x249   :  { %1819 = vst.msk [vmem:[#allocation2 + $0x2c0] sm:$0xff] %vm1681_vm3, %v1607_v5  ;;  %v1985_v13 = vpack.c.bf16 %v1963_v12, %v1962_v8 }
 0x24a   :  { %vm1092_vm0 = vcmp.gt.f32.partialorder %v855_v11, 0.0  ;;  %v1220_v16 = vmul.f32 0.2, %v855_v11 }
 0x24b   :  { %5860 = vmatmul.msk.bf16.gmra.mxu1 %vm1681_vm3, %v1985_v13 }
 0x24c   :  { %v1348_v17 = vsel %vm1092_vm0, %v855_v11, %v1220_v16 }
 0x24d   :  { %v1478_v19 = vmul.f32 %v7038_v20, %v1348_v17 }
 0x24f   :  { %v1608_v24 = vadd.f32 %v7047_v47, %v1478_v19  ;;  %v857_v25 = vpop.f32.mrf.mxu0 }
 0x250   :  { %v858_v26 = vadd.f32 %v7029_v40, %v857_v25  ;;  %v1913_v14 = vld [vmem:[#allocation2 + $0x2c0] sm:$0xff] }
 0x251   :  { %1820 = vst.msk [vmem:[#allocation2 + $0x2c8] sm:$0xff] %vm1681_vm3, %v1608_v24  ;;  %v6436_v24 = vld [vmem:[%s8733_s0 + $0x130] sm:$0xff] }
 0x252   :  { %vm1093_vm2 = vcmp.gt.f32.partialorder %v858_v26, 0.0  ;;  %v1221_v31 = vmul.f32 0.2, %v858_v26  ;;  %5817 = vmatmul.msk.bf16.gmra.mxu0 %vm511_vm1, %v6434_v22 }
 0x254   :  { %v1349_v32 = vsel %vm1093_vm2, %v858_v26, %v1221_v31 }
 0x255   :  { %v1479_v33 = vmul.f32 %v7038_v20, %v1349_v32 }
 0x257   :  { %v1609_v36 = vadd.f32 %v7047_v47, %v1479_v33  ;;  %v859_v38 = vpop.f32.mrf.mxu0 }
 0x258   :  { %v860_v39 = vadd.f32 %v7029_v40, %v859_v38  ;;  %v1914_v41 = vld [vmem:[#allocation2 + $0x2c8] sm:$0xff] }
 0x259   :  { %1821 = vst.msk [vmem:[#allocation2 + $0x2d0] sm:$0xff] %vm1681_vm3, %v1609_v36  ;;  %v1935_v18 = vpack.c.bf16 %v1914_v41, %v1913_v14 }
 0x25a   :  { %vm1094_vm4 = vcmp.gt.f32.partialorder %v860_v39, 0.0  ;;  %v1222_v44 = vmul.f32 0.2, %v860_v39 }
 0x25b   :  { %5881 = vmatmul.msk.bf16.gmra.mxu2 %vm1681_vm3, %v1935_v18  ;;  %5902 = vmatmul.msk.bf16.gmra.mxu3 %vm1681_vm3, %v1935_v18 }
 0x25c   :  { %v1350_v45 = vsel %vm1094_vm4, %v860_v39, %v1222_v44 }
 0x25d   :  { %v1480_v48 = vmul.f32 %v7038_v20, %v1350_v45 }
 0x25f   :  { %v1610_v59 = vadd.f32 %v7047_v47, %v1480_v48  ;;  %v862_v0 = vpop.f32.mrf.mxu0 }
 0x260   :  { %v863_v1 = vadd.f32 %v7029_v40, %v862_v0  ;;  %v1964_v12 = vld [vmem:[#allocation2 + $0x2d0] sm:$0xff] }
 0x261   :  { %1822 = vst.msk [vmem:[#allocation2 + $0x2d8] sm:$0xff] %vm1681_vm3, %v1610_v59  ;;  %v6437_v59 = vld [vmem:[%s8733_s0 + $0x138] sm:$0xff] }
 0x262   :  { %vm1095_vm5 = vcmp.gt.f32.partialorder %v863_v1, 0.0  ;;  %v1223_v2 = vmul.f32 0.2, %v863_v1  ;;  %5818 = vmatmul.msk.bf16.gmra.mxu0 %vm511_vm1, %v6435_v56 }
 0x264   :  { %v1351_v3 = vsel %vm1095_vm5, %v863_v1, %v1223_v2 }
 0x265   :  { %v1481_v5 = vmul.f32 %v7038_v20, %v1351_v3 }
 0x267   :  { %v1611_v6 = vadd.f32 %v7047_v47, %v1481_v5  ;;  %v864_v11 = vpop.f32.mrf.mxu0 }
 0x268   :  { %v865_v8 = vadd.f32 %v7029_v40, %v864_v11  ;;  %v1965_v13 = vld [vmem:[#allocation2 + $0x2d8] sm:$0xff] }
 0x269   :  { %1823 = vst.msk [vmem:[#allocation2 + $0x2e0] sm:$0xff] %vm1681_vm3, %v1611_v6  ;;  %v1986_v16 = vpack.c.bf16 %v1965_v13, %v1964_v12 }
 0x26a   :  { %vm1096_vm6 = vcmp.gt.f32.partialorder %v865_v8, 0.0  ;;  %v1224_v17 = vmul.f32 0.2, %v865_v8 }
 0x26b   :  { %5861 = vmatmul.msk.bf16.gmra.mxu1 %vm1681_vm3, %v1986_v16 }
 0x26c   :  { %v1352_v19 = vsel %vm1096_vm6, %v865_v8, %v1224_v17 }
 0x26d   :  { %v1482_v22 = vmul.f32 %v7038_v20, %v1352_v19 }
 0x26f   :  { %v1612_v25 = vadd.f32 %v7047_v47, %v1482_v22  ;;  %v867_v26 = vpop.f32.mrf.mxu0 }
 0x270   :  { %v868_v31 = vadd.f32 %v7029_v40, %v867_v26  ;;  %v1915_v41 = vld [vmem:[#allocation2 + $0x2e0] sm:$0xff] }
 0x271   :  { %1824 = vst.msk [vmem:[#allocation2 + $0x2e8] sm:$0xff] %vm1681_vm3, %v1612_v25  ;;  %v6438_v25 = vld [vmem:[%s8733_s0 + $0x140] sm:$0xff] }
 0x272   :  { %vm1097_vm7 = vcmp.gt.f32.partialorder %v868_v31, 0.0  ;;  %v1225_v32 = vmul.f32 0.2, %v868_v31  ;;  %5819 = vmatmul.msk.bf16.gmra.mxu0 %vm511_vm1, %v6436_v24 }
 0x274   :  { %v1353_v33 = vsel %vm1097_vm7, %v868_v31, %v1225_v32 }
 0x275   :  { %v1483_v36 = vmul.f32 %v7038_v20, %v1353_v33  ;;  %v6468_v33 = vld [vmem:[%s8734_s3 + $0x20] sm:$0xff] }
 0x276   :  { %2847 = vmatpush.bf16.msrb.mxu2 %v6468_v33 }
 0x277   :  { %v1613_v38 = vadd.f32 %v7047_v47, %v1483_v36  ;;  %v869_v39 = vpop.f32.mrf.mxu0  ;;  %v6469_v36 = vld [vmem:[%s8734_s3 + $0x28] sm:$0xff] }
 0x278   :  { %v870_v14 = vadd.f32 %v7029_v40, %v869_v39  ;;  %v1916_v18 = vld [vmem:[#allocation2 + $0x2e8] sm:$0xff]  ;;  %3074 = vmatpush.bf16.msrb.mxu3 %v6469_v36 }
 0x279   :  { %1825 = vst.msk [vmem:[#allocation2 + $0x2f0] sm:$0xff] %vm1681_vm3, %v1613_v38  ;;  %v1936_v44 = vpack.c.bf16 %v1916_v18, %v1915_v41  ;;  %v6467_v38 = vld [vmem:[%s8734_s3 + $0x18] sm:$0xff] }
 0x27a   :  { %vm1098_vm8 = vcmp.gt.f32.partialorder %v870_v14, 0.0  ;;  %v1226_v45 = vmul.f32 0.2, %v870_v14  ;;  %2621 = vmatpush.bf16.msrb.mxu1 %v6467_v38  ;;  %v6440_v38 = vld [vmem:[%s8733_s0 + $0x150] sm:$0xff] }
 0x27b   :  { %5882 = vmatmul.msk.bf16.gmra.mxu2 %vm1681_vm3, %v1936_v44  ;;  %5903 = vmatmul.msk.bf16.gmra.mxu3 %vm1681_vm3, %v1936_v44 }
 0x27c   :  { %v1354_v48 = vsel %vm1098_vm8, %v870_v14, %v1226_v45 }
 0x27d   :  { %v1484_v56 = vmul.f32 %v7038_v20, %v1354_v48 }
 0x27f   :  { %v1614_v0 = vadd.f32 %v7047_v47, %v1484_v56  ;;  %v872_v1 = vpop.f32.mrf.mxu0 }
 0x280   :  { %v873_v2 = vadd.f32 %v7029_v40, %v872_v1  ;;  %v1966_v13 = vld [vmem:[#allocation2 + $0x2f0] sm:$0xff] }
 0x281   :  { %1826 = vst.msk [vmem:[#allocation2 + $0x2f8] sm:$0xff] %vm1681_vm3, %v1614_v0 }
 0x282   :  { %vm1099_vm9 = vcmp.gt.f32.partialorder %v873_v2, 0.0  ;;  %v1227_v3 = vmul.f32 0.2, %v873_v2  ;;  %5820 = vmatmul.msk.bf16.gmra.mxu0 %vm511_vm1, %v6437_v59 }
 0x284   :  { %v1355_v5 = vsel %vm1099_vm9, %v873_v2, %v1227_v3  ;;  %v7275_v3 = vpop.f32.mrf.mxu2 }
 0x285   :  { %v1485_v6 = vmul.f32 %v7038_v20, %v1355_v5  ;;  %v6439_v5 = vld [vmem:[%s8733_s0 + $0x148] sm:$0xff] }
 0x287   :  { %v1615_v11 = vadd.f32 %v7047_v47, %v1485_v6  ;;  %v874_v8 = vpop.f32.mrf.mxu0 }
 0x288   :  { %v875_v12 = vadd.f32 %v7029_v40, %v874_v8  ;;  %v1967_v16 = vld [vmem:[#allocation2 + $0x2f8] sm:$0xff]  ;;  %v7281_v8 = vpop.f32.mrf.mxu1 }
 0x289   :  { %1827 = vst.msk [vmem:[#allocation2 + $0x300] sm:$0xff] %vm1681_vm3, %v1615_v11  ;;  %v1987_v17 = vpack.c.bf16 %v1967_v16, %v1966_v13 }
 0x28a   :  { %vm1100_vm10 = vcmp.gt.f32.partialorder %v875_v12, 0.0  ;;  %v1228_v19 = vmul.f32 0.2, %v875_v12 }
 0x28b   :  { %5862 = vmatmul.msk.bf16.gmra.mxu1 %vm1681_vm3, %v1987_v17 }
 0x28c   :  { %v1356_v22 = vsel %vm1100_vm10, %v875_v12, %v1228_v19  ;;  %v2241_v19 = vpop.f32.mrf.mxu2 }
 0x28d   :  { %v1486_v24 = vmul.f32 %v7038_v20, %v1356_v22 }
 0x28f   :  { %v1616_v26 = vadd.f32 %v7047_v47, %v1486_v24  ;;  %v877_v31 = vpop.f32.mrf.mxu0 }
 0x290   :  { %v878_v32 = vadd.f32 %v7029_v40, %v877_v31  ;;  %v2304_v48 = vld [vmem:[#allocation2 + $0x300] sm:$0xff] }
 0x291   :  { %1828 = vst.msk [vmem:[#allocation2 + $0x308] sm:$0xff] %vm1681_vm3, %v1616_v26 }
 0x292   :  { %vm1101_vm11 = vcmp.gt.f32.partialorder %v878_v32, 0.0  ;;  %v1229_v39 = vmul.f32 0.2, %v878_v32  ;;  %5821 = vmatmul.msk.bf16.gmra.mxu0 %vm511_vm1, %v6438_v25 }
 0x294   :  { %v1357_v14 = vsel %vm1101_vm11, %v878_v32, %v1229_v39 }
 0x295   :  { %v1487_v41 = vmul.f32 %v7038_v20, %v1357_v14 }
 0x297   :  { %v1617_v18 = vadd.f32 %v7047_v47, %v1487_v41  ;;  %v879_v44 = vpop.f32.mrf.mxu0 }
 0x298   :  { %v880_v45 = vadd.f32 %v7029_v40, %v879_v44  ;;  %v2305_v56 = vld [vmem:[#allocation2 + $0x308] sm:$0xff] }
 0x299   :  { %1829 = vst.msk [vmem:[#allocation2 + $0x330] sm:$0xff] %vm1681_vm3, %v1617_v18  ;;  %v2325_v59 = vpack.c.bf16 %v2305_v56, %v2304_v48  ;;  %v7299_v48 = vpop.f32.mrf.mxu3 }
 0x29a   :  { %vm1102_vm12 = vcmp.gt.f32.partialorder %v880_v45, 0.0  ;;  %v1230_v0 = vmul.f32 0.2, %v880_v45 }
 0x29b   :  { %5904 = vmatmul.msk.bf16.gmra.mxu3 %vm1681_vm3, %v2325_v59 }
 0x29c   :  { %v1358_v1 = vsel %vm1102_vm12, %v880_v45, %v1230_v0 }
 0x29d   :  { %v1488_v2 = vmul.f32 %v7038_v20, %v1358_v1 }
 0x29f   :  { %v1618_v6 = vadd.f32 %v7047_v47, %v1488_v2  ;;  %v882_v11 = vpop.f32.mrf.mxu0 }
 0x2a0   :  { %v883_v12 = vadd.f32 %v7029_v40, %v882_v11  ;;  %v6441_v11 = vld [vmem:[%s8733_s0 + $0x158] sm:$0xff] }
 0x2a1   :  { %1830 = vst.msk [vmem:[#allocation2 + $0x338] sm:$0xff] %vm1681_vm3, %v1618_v6 }
 0x2a2   :  { %vm1103_vm13 = vcmp.gt.f32.partialorder %v883_v12, 0.0  ;;  %v1231_v13 = vmul.f32 0.2, %v883_v12  ;;  %5822 = vmatmul.msk.bf16.gmra.mxu0 %vm511_vm1, %v6439_v5 }
 0x2a4   :  { %v1359_v16 = vsel %vm1103_vm13, %v883_v12, %v1231_v13 }
 0x2a5   :  { %v1489_v17 = vmul.f32 %v7038_v20, %v1359_v16 }
 0x2a7   :  { %v1619_v22 = vadd.f32 %v7047_v47, %v1489_v17  ;;  %v884_v24 = vpop.f32.mrf.mxu0 }
 0x2a8   :  { %v885_v25 = vadd.f32 %v7029_v40, %v884_v24  ;;  %v2098_v26 = vpop.f32.mrf.mxu1 }
 0x2a9   :  { %1831 = vst.msk [vmem:[#allocation2 + $0x340] sm:$0xff] %vm1681_vm3, %v1619_v22  ;;  %v2242_v31 = vadd.f32 %v2241_v19, %v2098_v26  ;;  %v7313_v19 = vpop.f32.mrf.mxu2 }
 0x2aa   :  { %vm1104_vm14 = vcmp.gt.f32.partialorder %v885_v25, 0.0  ;;  %v1232_v32 = vmul.f32 0.2, %v885_v25 }
 0x2ac   :  { %v1360_v33 = vsel %vm1104_vm14, %v885_v25, %v1232_v32 }
 0x2ad   :  { %v1490_v36 = vmul.f32 %v7038_v20, %v1360_v33 }
 0x2af   :  { %v1620_v39 = vadd.f32 %v7047_v47, %v1490_v36  ;;  %v887_v14 = vpop.f32.mrf.mxu0 }
 0x2b0   :  { %v888_v41 = vadd.f32 %v7029_v40, %v887_v14  ;;  %v7311_v17 = vpop.f32.mrf.mxu1 }
 0x2b1   :  { %1832 = vst.msk [vmem:[#allocation2 + $0x348] sm:$0xff] %vm1681_vm3, %v1620_v39 }
 0x2b2   :  { %vm1105_vm15 = vcmp.gt.f32.partialorder %v888_v41, 0.0  ;;  %v1233_v18 = vmul.f32 0.2, %v888_v41  ;;  %5823 = vmatmul.msk.bf16.gmra.mxu0 %vm511_vm1, %v6440_v38 }
 0x2b4   :  { %v1361_v44 = vsel %vm1105_vm15, %v888_v41, %v1233_v18 }
 0x2b5   :  { %v1491_v45 = vmul.f32 %v7038_v20, %v1361_v44  ;;  %v6442_v44 = vld [vmem:[%s8733_s0 + $0x160] sm:$0xff] }
 0x2b7   :  { %v1621_v56 = vadd.f32 %v7047_v47, %v1491_v45  ;;  %v889_v59 = vpop.f32.mrf.mxu0 }
 0x2b8   :  { %v890_v0 = vadd.f32 %v7029_v40, %v889_v59 }
 0x2b9   :  { %1833 = vst.msk [vmem:[#allocation2 + $0x350] sm:$0xff] %vm1681_vm3, %v1621_v56 }
 0x2ba   :  { %vm1106_vm0 = vcmp.gt.f32.partialorder %v890_v0, 0.0  ;;  %v1234_v1 = vmul.f32 0.2, %v890_v0 }
 0x2bc   :  { %v1362_v2 = vsel %vm1106_vm0, %v890_v0, %v1234_v1 }
 0x2bd   :  { %v1492_v5 = vmul.f32 %v7038_v20, %v1362_v2 }
 0x2be   :  { %v2436_v6 = vpop.f32.mrf.mxu3  ;;  %v2246_v33 = vpop.f32.mrf.mxu2 }
 0x2bf   :  { %v1622_v12 = vadd.f32 %v7047_v47, %v1492_v5  ;;  %v7309_v13 = vadd.f32 %v2436_v6, %v2242_v31  ;;  %v892_v16 = vpop.f32.mrf.mxu0 }
 0x2c0   :  { %v893_v22 = vadd.f32 %v7029_v40, %v892_v16 }
 0x2c1   :  { %1834 = vst.msk [vmem:[#allocation2 + $0x358] sm:$0xff] %vm1681_vm3, %v1622_v12 }
 0x2c2   :  { %vm1107_vm2 = vcmp.gt.f32.partialorder %v893_v22, 0.0  ;;  %v1235_v24 = vmul.f32 0.2, %v893_v22  ;;  %5824 = vmatmul.msk.bf16.gmra.mxu0 %vm511_vm1, %v6441_v11 }
 0x2c4   :  { %v1363_v25 = vsel %vm1107_vm2, %v893_v22, %v1235_v24 }
 0x2c5   :  { %v1493_v26 = vmul.f32 %v7038_v20, %v1363_v25 }
 0x2c6   :  { %v7331_v5 = vpop.f32.mrf.mxu3 }
 0x2c7   :  { %v1623_v32 = vadd.f32 %v7047_v47, %v1493_v26  ;;  %v894_v31 = vpop.f32.mrf.mxu0  ;;  %v6443_v26 = vld [vmem:[%s8733_s0 + $0x168] sm:$0xff] }
 0x2c8   :  { %v895_v36 = vadd.f32 %v7029_v40, %v894_v31  ;;  %v2103_v38 = vpop.f32.mrf.mxu1 }
 0x2c9   :  { %1835 = vst.msk [vmem:[#allocation2 + $0x360] sm:$0xff] %vm1681_vm3, %v1623_v32  ;;  %v2247_v39 = vadd.f32 %v2246_v33, %v2103_v38 }
 0x2ca   :  { %vm1108_vm4 = vcmp.gt.f32.partialorder %v895_v36, 0.0  ;;  %v1236_v14 = vmul.f32 0.2, %v895_v36 }
 0x2cc   :  { %v1364_v41 = vsel %vm1108_vm4, %v895_v36, %v1236_v14  ;;  %v7343_v36 = vpop.f32.mrf.mxu2 }
 0x2cd   :  { %v1494_v18 = vmul.f32 %v7038_v20, %v1364_v41  ;;  %8745 = vst [vmem:[#allocation6_spill] sm:$0xff] %v7343_v36 }
 0x2cf   :  { %v1624_v45 = vadd.f32 %v7047_v47, %v1494_v18  ;;  %v897_v56 = vpop.f32.mrf.mxu0 }
 0x2d0   :  { %v898_v59 = vadd.f32 %v7029_v40, %v897_v56  ;;  %v7345_v38 = vpop.f32.mrf.mxu1 }
 0x2d1   :  { %1836 = vst.msk [vmem:[#allocation2 + $0x368] sm:$0xff] %vm1681_vm3, %v1624_v45 }
 0x2d2   :  { %vm1109_vm5 = vcmp.gt.f32.partialorder %v898_v59, 0.0  ;;  %v1237_v0 = vmul.f32 0.2, %v898_v59  ;;  %5825 = vmatmul.msk.bf16.gmra.mxu0 %vm511_vm1, %v6442_v44 }
 0x2d4   :  { %v1365_v1 = vsel %vm1109_vm5, %v898_v59, %v1237_v0 }
 0x2d5   :  { %v1495_v2 = vmul.f32 %v7038_v20, %v1365_v1 }
 0x2d7   :  { %v1625_v6 = vadd.f32 %v7047_v47, %v1495_v2  ;;  %v899_v11 = vpop.f32.mrf.mxu0 }
 0x2d8   :  { %v900_v12 = vadd.f32 %v7029_v40, %v899_v11 }
 0x2d9   :  { %1837 = vst.msk [vmem:[#allocation2 + $0x370] sm:$0xff] %vm1681_vm3, %v1625_v6 }
 0x2da   :  { %vm1110_vm6 = vcmp.gt.f32.partialorder %v900_v12, 0.0  ;;  %v1238_v16 = vmul.f32 0.2, %v900_v12 }
 0x2dc   :  { %v1366_v22 = vsel %vm1110_vm6, %v900_v12, %v1238_v16  ;;  %v6444_v12 = vld [vmem:[%s8733_s0 + $0x170] sm:$0xff] }
 0x2dd   :  { %v1496_v24 = vmul.f32 %v7038_v20, %v1366_v22 }
 0x2de   :  { %v2441_v25 = vpop.f32.mrf.mxu3  ;;  %v2251_v56 = vpop.f32.mrf.mxu2 }
 0x2df   :  { %v1626_v32 = vadd.f32 %v7047_v47, %v1496_v24  ;;  %v7341_v31 = vadd.f32 %v2441_v25, %v2247_v39  ;;  %v902_v33 = vpop.f32.mrf.mxu0 }
 0x2e0   :  { %v903_v14 = vadd.f32 %v7029_v40, %v902_v33 }
 0x2e1   :  { %1838 = vst.msk [vmem:[#allocation2 + $0x378] sm:$0xff] %vm1681_vm3, %v1626_v32 }
 0x2e2   :  { %vm1111_vm7 = vcmp.gt.f32.partialorder %v903_v14, 0.0  ;;  %v1239_v41 = vmul.f32 0.2, %v903_v14  ;;  %5826 = vmatmul.msk.bf16.gmra.mxu0 %vm511_vm1, %v6443_v26 }
 0x2e4   :  { %v1367_v18 = vsel %vm1111_vm7, %v903_v14, %v1239_v41 }
 0x2e5   :  { %v1497_v44 = vmul.f32 %v7038_v20, %v1367_v18 }
 0x2e6   :  { %v7363_v33 = vpop.f32.mrf.mxu3 }
 0x2e7   :  { %v1627_v45 = vadd.f32 %v7047_v47, %v1497_v44  ;;  %v904_v39 = vpop.f32.mrf.mxu0  ;;  %8746 = vst [vmem:[#allocation7_spill] sm:$0xff] %v7363_v33 }
 0x2e8   :  { %v905_v59 = vadd.f32 %v7029_v40, %v904_v39  ;;  %v2108_v0 = vpop.f32.mrf.mxu1 }
 0x2e9   :  { %1839 = vst.msk [vmem:[#allocation2 + $0x380] sm:$0xff] %vm1681_vm3, %v1627_v45  ;;  %v2252_v1 = vadd.f32 %v2251_v56, %v2108_v0 }
 0x2ea   :  { %vm1112_vm8 = vcmp.gt.f32.partialorder %v905_v59, 0.0  ;;  %v1240_v2 = vmul.f32 0.2, %v905_v59 }
 0x2ec   :  { %v1368_v6 = vsel %vm1112_vm8, %v905_v59, %v1240_v2  ;;  %v6445_v59 = vld [vmem:[%s8733_s0 + $0x178] sm:$0xff] }
 0x2ed   :  { %v1498_v11 = vmul.f32 %v7038_v20, %v1368_v6 }
 0x2ef   :  { %v1628_v16 = vadd.f32 %v7047_v47, %v1498_v11  ;;  %v907_v22 = vpop.f32.mrf.mxu0  ;;  %v7375_v11 = vpop.f32.mrf.mxu2 }
 0x2f0   :  { %v908_v24 = vadd.f32 %v7029_v40, %v907_v22  ;;  %8748 = vst [vmem:[#allocation9_spill] sm:$0xff] %v7375_v11 }
 0x2f1   :  { %1840 = vst.msk [vmem:[#allocation2 + $0x388] sm:$0xff] %vm1681_vm3, %v1628_v16 }
 0x2f2   :  { %vm1113_vm9 = vcmp.gt.f32.partialorder %v908_v24, 0.0  ;;  %v1241_v25 = vmul.f32 0.2, %v908_v24  ;;  %5827 = vmatmul.msk.bf16.gmra.mxu0 %vm511_vm1, %v6444_v12  ;;  %v7377_v12 = vpop.f32.mrf.mxu1 }
 0x2f3   :  { %8749 = vst [vmem:[#allocation10_spill] sm:$0xff] %v7377_v12 }
 0x2f4   :  { %v1369_v26 = vsel %vm1113_vm9, %v908_v24, %v1241_v25 }
 0x2f5   :  { %v1499_v32 = vmul.f32 %v7038_v20, %v1369_v26 }
 0x2f7   :  { %v1629_v14 = vadd.f32 %v7047_v47, %v1499_v32  ;;  %v909_v41 = vpop.f32.mrf.mxu0 }
 0x2f8   :  { %v910_v18 = vadd.f32 %v7029_v40, %v909_v41 }
 0x2f9   :  { %1841 = vst.msk [vmem:[#allocation2 + $0x390] sm:$0xff] %vm1681_vm3, %v1629_v14 }
 0x2fa   :  { %vm1114_vm10 = vcmp.gt.f32.partialorder %v910_v18, 0.0  ;;  %v1242_v44 = vmul.f32 0.2, %v910_v18 }
 0x2fc   :  { %v1370_v45 = vsel %vm1114_vm10, %v910_v18, %v1242_v44  ;;  %v1917_v44 = vld [vmem:[#allocation2 + $0x3c0] sm:$0xff] }
 0x2fd   :  { %v1500_v39 = vmul.f32 %v7038_v20, %v1370_v45  ;;  %v1918_v45 = vld [vmem:[#allocation2 + $0x3c8] sm:$0xff] }
 0x2fe   :  { %v2446_v56 = vpop.f32.mrf.mxu3  ;;  %v2256_v32 = vpop.f32.mrf.mxu2 }
 0x2ff   :  { %v1630_v0 = vadd.f32 %v7047_v47, %v1500_v39  ;;  %v7373_v2 = vadd.f32 %v2446_v56, %v2252_v1  ;;  %v912_v6 = vpop.f32.mrf.mxu0  ;;  %v1937_v56 = vpack.c.bf16 %v1918_v45, %v1917_v44 }
 0x300   :  { %v913_v16 = vadd.f32 %v7029_v40, %v912_v6 }
 0x301   :  { %8747 = vst [vmem:[#allocation8_spill] sm:$0xff] %v7373_v2  ;;  %5883 = vmatmul.msk.bf16.gmra.mxu2 %vm1681_vm3, %v1937_v56 }
 0x302   :  { %1842 = vst.msk [vmem:[#allocation2 + $0x398] sm:$0xff] %vm1681_vm3, %v1630_v0  ;;  %vm1115_vm11 = vcmp.gt.f32.partialorder %v913_v16, 0.0  ;;  %v1243_v22 = vmul.f32 0.2, %v913_v16  ;;  %5828 = vmatmul.msk.bf16.gmra.mxu0 %vm511_vm1, %v6445_v59 }
 0x304   :  { %v1371_v24 = vsel %vm1115_vm11, %v913_v16, %v1243_v22 }
 0x305   :  { %v1501_v25 = vmul.f32 %v7038_v20, %v1371_v24 }
 0x307   :  { %v1631_v26 = vadd.f32 %v7047_v47, %v1501_v25  ;;  %v914_v1 = vpop.f32.mrf.mxu0 }
 0x308   :  { %v915_v14 = vadd.f32 %v7029_v40, %v914_v1  ;;  %v2113_v41 = vpop.f32.mrf.mxu1  ;;  %v7392_v40 = vld [vmem:[%s8732_s2] ss:$0 sm:$0xff]  ;;  %v7397_v1 = vpop.f32.mrf.mxu3 }
 0x309   :  { %1843 = vst.msk [vmem:[#allocation2 + $0x3a0] sm:$0xff] %vm1681_vm3, %v1631_v26  ;;  %v2257_v18 = vadd.f32 %v2256_v32, %v2113_v41 }
 0x30a   :  { %vm1116_vm12 = vcmp.gt.f32.partialorder %v915_v14, 0.0  ;;  %v1244_v39 = vmul.f32 0.2, %v915_v14  ;;  %8750 = vst [vmem:[#allocation11_spill] sm:$0xff] %v7397_v1 }
 0x30c   :  { %v1372_v0 = vsel %vm1116_vm12, %v915_v14, %v1244_v39  ;;  %v7405_v39 = vld [vmem:[%s8732_s2 + $0x1] ss:$0 sm:$0xff] }
 0x30d   :  { %v1502_v59 = vmul.f32 %v7038_v20, %v1372_v0 }
 0x30f   :  { %v1632_v6 = vadd.f32 %v7047_v47, %v1502_v59  ;;  %v917_v16 = vpop.f32.mrf.mxu0 }
 0x310   :  { %v918_v22 = vadd.f32 %v7392_v40, %v917_v16 }
 0x311   :  { %1844 = vst.msk [vmem:[#allocation2 + $0x3a8] sm:$0xff] %vm1681_vm3, %v1632_v6 }
 0x312   :  { %vm1117_vm13 = vcmp.gt.f32.partialorder %v918_v22, 0.0  ;;  %v1245_v24 = vmul.f32 0.2, %v918_v22 }
 0x314   :  { %v1373_v25 = vsel %vm1117_vm13, %v918_v22, %v1245_v24 }
 0x315   :  { %v1503_v26 = vmul.f32 %v7038_v20, %v1373_v25 }
 0x317   :  { %v1633_v32 = vadd.f32 %v7047_v47, %v1503_v26  ;;  %v919_v14 = vpop.f32.mrf.mxu0  ;;  %v7411_v47 = vld [vmem:[%s8732_s2 + $0x2] ss:$0 sm:$0xff] }
 0x318   :  { %v920_v41 = vadd.f32 %v7392_v40, %v919_v14 }
 0x319   :  { %1845 = vst.msk [vmem:[#allocation2 + $0x3d0] sm:$0xff] %vm1681_vm3, %v1633_v32 }
 0x31a   :  { %vm1118_vm14 = vcmp.gt.f32.partialorder %v920_v41, 0.0  ;;  %v1246_v44 = vmul.f32 0.2, %v920_v41 }
 0x31c   :  { %v1374_v45 = vsel %vm1118_vm14, %v920_v41, %v1246_v44 }
 0x31d   :  { %v1504_v56 = vmul.f32 %v7405_v39, %v1374_v45 }
 0x31e   :  { %v2451_v20 = vpop.f32.mrf.mxu3 }
 0x31f   :  { %v1634_v0 = vadd.f32 %v7411_v47, %v1504_v56  ;;  %v7414_v59 = vadd.f32 %v2451_v20, %v2257_v18  ;;  %v922_v6 = vpop.f32.mrf.mxu0 }
 0x320   :  { %v923_v16 = vadd.f32 %v7392_v40, %v922_v6  ;;  %v1968_v41 = vld [vmem:[#allocation2 + $0x3d0] sm:$0xff] }
 0x321   :  { %8751 = vst [vmem:[#allocation12_spill] sm:$0xff] %v7414_v59  ;;  %v2968_v59 = vld [vmem:[#allocation2 + $0x120] sm:$0xff] }
 0x322   :  { %1846 = vst.msk [vmem:[#allocation2 + $0x3d8] sm:$0xff] %vm1681_vm3, %v1634_v0  ;;  %vm1119_vm15 = vcmp.gt.f32.partialorder %v923_v16, 0.0  ;;  %v1247_v22 = vmul.f32 0.2, %v923_v16 }
 0x324   :  { %v1375_v24 = vsel %vm1119_vm15, %v923_v16, %v1247_v22 }
 0x325   :  { %v1505_v25 = vmul.f32 %v7405_v39, %v1375_v24 }
 0x327   :  { %v1635_v26 = vadd.f32 %v7411_v47, %v1505_v25  ;;  %v924_v32 = vpop.f32.mrf.mxu0 }
 0x328   :  { %v925_v14 = vadd.f32 %v7392_v40, %v924_v32 }
 0x329   :  { %v1969_v44 = vld [vmem:[#allocation2 + $0x3d8] sm:$0xff]  ;;  %1847 = vst.msk [vmem:[#allocation2 + $0x3e0] sm:$0xff] %vm1681_vm3, %v1635_v26 }
 0x32a   :  { %v1988_v18 = vpack.c.bf16 %v1969_v44, %v1968_v41  ;;  %vm1120_vm0 = vcmp.gt.f32.partialorder %v925_v14, 0.0  ;;  %v1248_v45 = vmul.f32 0.2, %v925_v14 }
 0x32c   :  { %5863 = vmatmul.msk.bf16.gmra.mxu1 %vm1681_vm3, %v1988_v18  ;;  %v1376_v56 = vsel %vm1120_vm0, %v925_v14, %v1248_v45 }
 0x32d   :  { %v1506_v20 = vmul.f32 %v7405_v39, %v1376_v56 }
 0x32f   :  { %v1636_v0 = vadd.f32 %v7411_v47, %v1506_v20  ;;  %v927_v6 = vpop.f32.mrf.mxu0 }
 0x330   :  { %v928_v16 = vadd.f32 %v7392_v40, %v927_v6  ;;  %v1919_v14 = vld [vmem:[#allocation2 + $0x3e0] sm:$0xff] }
 0x331   :  { %1848 = vst.msk [vmem:[#allocation2 + $0x3e8] sm:$0xff] %vm1681_vm3, %v1636_v0 }
 0x332   :  { %vm1121_vm2 = vcmp.gt.f32.partialorder %v928_v16, 0.0  ;;  %v1249_v22 = vmul.f32 0.2, %v928_v16 }
 0x334   :  { %v1377_v24 = vsel %vm1121_vm2, %v928_v16, %v1249_v22 }
 0x335   :  { %v1507_v25 = vmul.f32 %v7405_v39, %v1377_v24 }
 0x337   :  { %v1637_v26 = vadd.f32 %v7411_v47, %v1507_v25  ;;  %v929_v32 = vpop.f32.mrf.mxu0 }
 0x338   :  { %v930_v41 = vadd.f32 %v7392_v40, %v929_v32  ;;  %v1920_v44 = vld [vmem:[#allocation2 + $0x3e8] sm:$0xff] }
 0x339   :  { %1849 = vst.msk [vmem:[#allocation2 + $0x3f0] sm:$0xff] %vm1681_vm3, %v1637_v26  ;;  %v1938_v18 = vpack.c.bf16 %v1920_v44, %v1919_v14 }
 0x33a   :  { %vm1122_vm4 = vcmp.gt.f32.partialorder %v930_v41, 0.0  ;;  %v1250_v45 = vmul.f32 0.2, %v930_v41 }
 0x33b   :  { %5884 = vmatmul.msk.bf16.gmra.mxu2 %vm1681_vm3, %v1938_v18  ;;  %5905 = vmatmul.msk.bf16.gmra.mxu3 %vm1681_vm3, %v1938_v18 }
 0x33c   :  { %v1378_v56 = vsel %vm1122_vm4, %v930_v41, %v1250_v45 }
 0x33d   :  { %v1508_v20 = vmul.f32 %v7405_v39, %v1378_v56 }
 0x33f   :  { %v1638_v0 = vadd.f32 %v7411_v47, %v1508_v20  ;;  %v932_v6 = vpop.f32.mrf.mxu0 }
 0x340   :  { %v933_v16 = vadd.f32 %v7392_v40, %v932_v6  ;;  %v1970_v41 = vld [vmem:[#allocation2 + $0x3f0] sm:$0xff] }
 0x341   :  { %1850 = vst.msk [vmem:[#allocation2 + $0x3f8] sm:$0xff] %vm1681_vm3, %v1638_v0 }
 0x342   :  { %vm1123_vm5 = vcmp.gt.f32.partialorder %v933_v16, 0.0  ;;  %v1251_v22 = vmul.f32 0.2, %v933_v16 }
 0x344   :  { %v1379_v24 = vsel %vm1123_vm5, %v933_v16, %v1251_v22 }
 0x345   :  { %v1509_v25 = vmul.f32 %v7405_v39, %v1379_v24 }
 0x347   :  { %v1639_v26 = vadd.f32 %v7411_v47, %v1509_v25  ;;  %v934_v32 = vpop.f32.mrf.mxu0 }
 0x348   :  { %v935_v14 = vadd.f32 %v7392_v40, %v934_v32  ;;  %v1971_v44 = vld [vmem:[#allocation2 + $0x3f8] sm:$0xff] }
 0x349   :  { %1851 = vst.msk [vmem:[#allocation2 + $0x400] sm:$0xff] %vm1681_vm3, %v1639_v26  ;;  %v1989_v18 = vpack.c.bf16 %v1971_v44, %v1970_v41 }
 0x34a   :  { %vm1124_vm6 = vcmp.gt.f32.partialorder %v935_v14, 0.0  ;;  %v1252_v45 = vmul.f32 0.2, %v935_v14 }
 0x34b   :  { %5864 = vmatmul.msk.bf16.gmra.mxu1 %vm1681_vm3, %v1989_v18 }
 0x34c   :  { %v1380_v56 = vsel %vm1124_vm6, %v935_v14, %v1252_v45 }
 0x34d   :  { %v1510_v20 = vmul.f32 %v7405_v39, %v1380_v56 }
 0x34f   :  { %v1640_v0 = vadd.f32 %v7411_v47, %v1510_v20  ;;  %v937_v6 = vpop.f32.mrf.mxu0 }
 0x350   :  { %v938_v16 = vadd.f32 %v7392_v40, %v937_v6  ;;  %v1921_v14 = vld [vmem:[#allocation2 + $0x400] sm:$0xff] }
 0x351   :  { %1852 = vst.msk [vmem:[#allocation2 + $0x408] sm:$0xff] %vm1681_vm3, %v1640_v0 }
 0x352   :  { %vm1125_vm7 = vcmp.gt.f32.partialorder %v938_v16, 0.0  ;;  %v1253_v22 = vmul.f32 0.2, %v938_v16 }
 0x354   :  { %v1381_v24 = vsel %vm1125_vm7, %v938_v16, %v1253_v22 }
 0x355   :  { %v1511_v25 = vmul.f32 %v7405_v39, %v1381_v24 }
 0x357   :  { %v1641_v26 = vadd.f32 %v7411_v47, %v1511_v25  ;;  %v939_v32 = vpop.f32.mrf.mxu0 }
 0x358   :  { %v940_v41 = vadd.f32 %v7392_v40, %v939_v32  ;;  %v1922_v44 = vld [vmem:[#allocation2 + $0x408] sm:$0xff] }
 0x359   :  { %1853 = vst.msk [vmem:[#allocation2 + $0x410] sm:$0xff] %vm1681_vm3, %v1641_v26  ;;  %v1939_v18 = vpack.c.bf16 %v1922_v44, %v1921_v14 }
 0x35a   :  { %vm1126_vm8 = vcmp.gt.f32.partialorder %v940_v41, 0.0  ;;  %v1254_v45 = vmul.f32 0.2, %v940_v41 }
 0x35b   :  { %5885 = vmatmul.msk.bf16.gmra.mxu2 %vm1681_vm3, %v1939_v18  ;;  %5906 = vmatmul.msk.bf16.gmra.mxu3 %vm1681_vm3, %v1939_v18 }
 0x35c   :  { %v1382_v56 = vsel %vm1126_vm8, %v940_v41, %v1254_v45  ;;  %v6446_v45 = vld [vmem:[%s8733_s0 + $0x180] sm:$0xff] }
 0x35d   :  { %v1512_v20 = vmul.f32 %v7405_v39, %v1382_v56  ;;  %5829 = vmatmul.msk.bf16.gmra.mxu0 %vm511_vm1, %v6446_v45  ;;  %v6447_v45 = vld [vmem:[%s8733_s0 + $0x188] sm:$0xff] }
 0x35f   :  { %v1642_v0 = vadd.f32 %v7411_v47, %v1512_v20  ;;  %v942_v6 = vpop.f32.mrf.mxu0 }
 0x360   :  { %v943_v16 = vadd.f32 %v7392_v40, %v942_v6  ;;  %v1972_v41 = vld [vmem:[#allocation2 + $0x410] sm:$0xff] }
 0x361   :  { %1854 = vst.msk [vmem:[#allocation2 + $0x418] sm:$0xff] %vm1681_vm3, %v1642_v0 }
 0x362   :  { %vm1127_vm9 = vcmp.gt.f32.partialorder %v943_v16, 0.0  ;;  %v1255_v22 = vmul.f32 0.2, %v943_v16 }
 0x364   :  { %v1383_v24 = vsel %vm1127_vm9, %v943_v16, %v1255_v22 }
 0x365   :  { %v1513_v25 = vmul.f32 %v7405_v39, %v1383_v24 }
 0x367   :  { %v1643_v26 = vadd.f32 %v7411_v47, %v1513_v25  ;;  %v944_v32 = vpop.f32.mrf.mxu0 }
 0x368   :  { %v945_v14 = vadd.f32 %v7392_v40, %v944_v32  ;;  %v1973_v44 = vld [vmem:[#allocation2 + $0x418] sm:$0xff] }
 0x369   :  { %1855 = vst.msk [vmem:[#allocation2 + $0x420] sm:$0xff] %vm1681_vm3, %v1643_v26  ;;  %v1990_v18 = vpack.c.bf16 %v1973_v44, %v1972_v41 }
 0x36a   :  { %vm1128_vm10 = vcmp.gt.f32.partialorder %v945_v14, 0.0  ;;  %v1256_v56 = vmul.f32 0.2, %v945_v14 }
 0x36b   :  { %5865 = vmatmul.msk.bf16.gmra.mxu1 %vm1681_vm3, %v1990_v18 }
 0x36c   :  { %v1384_v20 = vsel %vm1128_vm10, %v945_v14, %v1256_v56 }
 0x36d   :  { %v1514_v0 = vmul.f32 %v7405_v39, %v1384_v20  ;;  %5830 = vmatmul.msk.bf16.gmra.mxu0 %vm511_vm1, %v6447_v45 }
 0x36f   :  { %v1644_v6 = vadd.f32 %v7411_v47, %v1514_v0  ;;  %v947_v16 = vpop.f32.mrf.mxu0 }
 0x370   :  { %v948_v22 = vadd.f32 %v7392_v40, %v947_v16  ;;  %v1923_v14 = vld [vmem:[#allocation2 + $0x420] sm:$0xff] }
 0x371   :  { %1856 = vst.msk [vmem:[#allocation2 + $0x428] sm:$0xff] %vm1681_vm3, %v1644_v6 }
 0x372   :  { %vm1129_vm11 = vcmp.gt.f32.partialorder %v948_v22, 0.0  ;;  %v1257_v24 = vmul.f32 0.2, %v948_v22 }
 0x374   :  { %v1385_v25 = vsel %vm1129_vm11, %v948_v22, %v1257_v24 }
 0x375   :  { %v1515_v26 = vmul.f32 %v7405_v39, %v1385_v25 }
 0x377   :  { %v1645_v32 = vadd.f32 %v7411_v47, %v1515_v26  ;;  %v949_v41 = vpop.f32.mrf.mxu0 }
 0x378   :  { %v950_v44 = vadd.f32 %v7392_v40, %v949_v41  ;;  %v1924_v18 = vld [vmem:[#allocation2 + $0x428] sm:$0xff]  ;;  %v2736_v41 = vld [vmem:[#allocation2 + $0xb8] sm:$0xff] }
 0x379   :  { %1857 = vst.msk [vmem:[#allocation2 + $0x430] sm:$0xff] %vm1681_vm3, %v1645_v32  ;;  %v1940_v56 = vpack.c.bf16 %v1924_v18, %v1923_v14  ;;  %v2735_v18 = vld [vmem:[#allocation2 + $0xb0] sm:$0xff] }
 0x37a   :  { %vm1130_vm12 = vcmp.gt.f32.partialorder %v950_v44, 0.0  ;;  %v1258_v20 = vmul.f32 0.2, %v950_v44 }
 0x37b   :  { %5886 = vmatmul.msk.bf16.gmra.mxu2 %vm1681_vm3, %v1940_v56  ;;  %5907 = vmatmul.msk.bf16.gmra.mxu3 %vm1681_vm3, %v1940_v56 }
 0x37c   :  { %v1386_v0 = vsel %vm1130_vm12, %v950_v44, %v1258_v20 }
 0x37d   :  { %v1516_v6 = vmul.f32 %v7405_v39, %v1386_v0  ;;  %v6448_v0 = vld [vmem:[%s8733_s0 + $0x190] sm:$0xff] }
 0x37e   :  { %5831 = vmatmul.msk.bf16.gmra.mxu0 %vm511_vm1, %v6448_v0 }
 0x37f   :  { %v1646_v16 = vadd.f32 %v7411_v47, %v1516_v6  ;;  %v952_v22 = vpop.f32.mrf.mxu0 }
 0x380   :  { %v953_v24 = vadd.f32 %v7392_v40, %v952_v22  ;;  %v1974_v56 = vld [vmem:[#allocation2 + $0x430] sm:$0xff]  ;;  %v6471_v22 = vld [vmem:[%s8734_s3 + $0x38] sm:$0xff] }
 0x381   :  { %1858 = vst.msk [vmem:[#allocation2 + $0x438] sm:$0xff] %vm1681_vm3, %v1646_v16  ;;  %v2767_v16 = vpack.c.bf16 %v2736_v41, %v2735_v18  ;;  %3528 = vmatpush.bf16.msra.mxu2 %v6471_v22  ;;  %v2510_v18 = vld [vmem:[#allocation2 + $0xa8] sm:$0xff]  ;;  %v2737_v22 = vld [vmem:[#allocation2 + $0xd0] sm:$0xff] }
 0x382   :  { %vm1131_vm13 = vcmp.gt.f32.partialorder %v953_v24, 0.0  ;;  %v1259_v25 = vmul.f32 0.2, %v953_v24 }
 0x384   :  { %v1387_v26 = vsel %vm1131_vm13, %v953_v24, %v1259_v25 }
 0x385   :  { %v1517_v32 = vmul.f32 %v7405_v39, %v1387_v26  ;;  %v6472_v26 = vld [vmem:[%s8734_s3 + $0x40] sm:$0xff] }
 0x386   :  { %3755 = vmatpush.bf16.msra.mxu3 %v6472_v26  ;;  %v7514_v26 = vpop.f32.mrf.mxu1 }
 0x387   :  { %v1647_v14 = vadd.f32 %v7411_v47, %v1517_v32  ;;  %v954_v44 = vpop.f32.mrf.mxu0  ;;  %v6470_v32 = vld [vmem:[%s8734_s3 + $0x30] sm:$0xff]  ;;  %8753 = vst [vmem:[#allocation14_spill] sm:$0xff] %v7514_v26  ;;  %v2746_v26 = vld [vmem:[#allocation2 + $0x218] sm:$0xff] }
 0x388   :  { %v955_v45 = vadd.f32 %v7392_v40, %v954_v44  ;;  %v1975_v20 = vld [vmem:[#allocation2 + $0x438] sm:$0xff]  ;;  %3301 = vmatpush.bf16.msra.mxu1 %v6470_v32  ;;  %v2509_v44 = vld [vmem:[#allocation2 + $0xa0] sm:$0xff] }
 0x389   :  { %1859 = vst.msk [vmem:[#allocation2 + $0x440] sm:$0xff] %vm1681_vm3, %v1647_v14  ;;  %v1991_v6 = vpack.c.bf16 %v1975_v20, %v1974_v56  ;;  %v2738_v56 = vld [vmem:[#allocation2 + $0xd8] sm:$0xff] }
 0x38a   :  { %vm1132_vm14 = vcmp.gt.f32.partialorder %v955_v45, 0.0  ;;  %v1260_v24 = vmul.f32 0.2, %v955_v45 }
 0x38b   :  { %5866 = vmatmul.msk.bf16.gmra.mxu1 %vm1681_vm3, %v1991_v6  ;;  %5937 = vmatmul.msk.bf16.vlgmr.msrb.gmra.mxu2 %vm1681_vm3, %v2767_v16  ;;  %v6449_v6 = vld [vmem:[%s8733_s0 + $0x198] sm:$0xff] }
 0x38c   :  { %v1388_v25 = vsel %vm1132_vm14, %v955_v45, %v1260_v24  ;;  %v2541_v45 = vpack.c.bf16 %v2510_v18, %v2509_v44  ;;  %v2768_v24 = vpack.c.bf16 %v2738_v56, %v2737_v22  ;;  %v2511_v18 = vld [vmem:[#allocation2 + $0xc0] sm:$0xff]  ;;  %v2514_v22 = vld [vmem:[#allocation2 + $0xe8] sm:$0xff] }
 0x38d   :  { %v1518_v41 = vmul.f32 %v7405_v39, %v1388_v25  ;;  %v7512_v25 = vpop.f32.mrf.mxu2  ;;  %v6450_v56 = vld [vmem:[%s8733_s0 + $0x1a0] sm:$0xff] }
 0x38e   :  { %5832 = vmatmul.msk.bf16.gmra.mxu0 %vm511_vm1, %v6449_v6  ;;  %8752 = vst [vmem:[#allocation13_spill] sm:$0xff] %v7512_v25  ;;  %v7523_v6 = vpop.f32.mrf.mxu3  ;;  %v2743_v25 = vld [vmem:[#allocation2 + $0x1f0] sm:$0xff] }
 0x38f   :  { %v1648_v14 = vadd.f32 %v7411_v47, %v1518_v41  ;;  %v2512_v41 = vld [vmem:[#allocation2 + $0xc8] sm:$0xff]  ;;  %8754 = vst [vmem:[#allocation15_spill] sm:$0xff] %v7523_v6  ;;  %v2744_v6 = vld [vmem:[#allocation2 + $0x1f8] sm:$0xff] }
 0x390   :  { %v2312_v20 = vld [vmem:[#allocation2 + $0x440] sm:$0xff] }
 0x391   :  { %1860 = vst.msk [vmem:[#allocation2 + $0x448] sm:$0xff] %vm1681_vm3, %v1648_v14  ;;  %v2740_v14 = vld [vmem:[#allocation2 + $0xf8] sm:$0xff] }
 0x395   :  { %v2261_v32 = vpop.f32.mrf.mxu2 }
 0x398   :  { %v2313_v0 = vld [vmem:[#allocation2 + $0x448] sm:$0xff] }
 0x399   :  { %v2329_v16 = vpack.c.bf16 %v2313_v0, %v2312_v20  ;;  %v2542_v0 = vpack.c.bf16 %v2512_v41, %v2511_v18  ;;  %v2543_v41 = vpack.c.bf16 %v2514_v22, %v2513_v53 }
 0x39b   :  { %5908 = vmatmul.msk.bf16.gmra.mxu3 %vm1681_vm3, %v2329_v16  ;;  %5915 = vmatmul.msk.bf16.vlgmr.msrb.gmra.mxu1 %vm1681_vm3, %v2541_v45  ;;  %v2739_v45 = vld [vmem:[#allocation2 + $0xf0] sm:$0xff] }
 0x39c   :  { %5938 = vmatmul.msk.bf16.gmra.mxu2 %vm1681_vm3, %v2768_v24  ;;  %v2769_v16 = vpack.c.bf16 %v2740_v14, %v2739_v45  ;;  %v2742_v24 = vld [vmem:[#allocation2 + $0x118] sm:$0xff] }
 0x39d   :  { %v7536_v45 = vpop.f32.mrf.mxu2 }
 0x39e   :  { %5833 = vmatmul.msk.bf16.gmra.mxu0 %vm511_vm1, %v6450_v56  ;;  %8757 = vst [vmem:[#allocation18_spill] sm:$0xff] %v7536_v45 }
 0x3a9   :  { %v2118_v44 = vpop.f32.mrf.mxu1 }
 0x3aa   :  { %v2262_v20 = vadd.f32 %v2261_v32, %v2118_v44  ;;  %v6451_v32 = vld [vmem:[%s8733_s0 + $0x1a8] sm:$0xff]  ;;  %v2741_v44 = vld [vmem:[#allocation2 + $0x110] sm:$0xff] }
 0x3ab   :  { %5916 = vmatmul.msk.bf16.gmra.mxu1 %vm1681_vm3, %v2542_v0  ;;  %5959 = vmatmul.msk.bf16.vlgmr.msrb.gmra.mxu3 %vm1681_vm3, %v2542_v0  ;;  %v2770_v14 = vpack.c.bf16 %v2742_v24, %v2741_v44  ;;  %v2515_v24 = vld [vmem:[#allocation2 + $0x100] sm:$0xff] }
 0x3ac   :  { %5939 = vmatmul.msk.bf16.gmra.mxu2 %vm1681_vm3, %v2769_v16  ;;  %v2516_v16 = vld [vmem:[#allocation2 + $0x108] sm:$0xff] }
 0x3ae   :  { %5834 = vmatmul.msk.bf16.gmra.mxu0 %vm511_vm1, %v6451_v32  ;;  %v2771_v32 = vpack.c.bf16 %v2744_v6, %v2743_v25  ;;  %v6453_v25 = vld [vmem:[%s8733_s0 + $0x1b8] sm:$0xff]  ;;  %v2745_v6 = vld [vmem:[#allocation2 + $0x210] sm:$0xff] }
 0x3b1   :  { %v7534_v0 = vpop.f32.mrf.mxu1 }
 0x3b2   :  { %8756 = vst [vmem:[#allocation17_spill] sm:$0xff] %v7534_v0  ;;  %v2969_v0 = vld [vmem:[#allocation2 + $0x128] sm:$0xff] }
 0x3bb   :  { %5917 = vmatmul.msk.bf16.gmra.mxu1 %vm1681_vm3, %v2543_v41  ;;  %5960 = vmatmul.msk.bf16.gmra.mxu3 %vm1681_vm3, %v2543_v41  ;;  %v6452_v41 = vld [vmem:[%s8733_s0 + $0x1b0] sm:$0xff] }
 0x3bc   :  { %5940 = vmatmul.msk.bf16.gmra.mxu2 %vm1681_vm3, %v2770_v14  ;;  %v2544_v14 = vpack.c.bf16 %v2516_v16, %v2515_v24  ;;  %v2997_v16 = vpack.c.bf16 %v2969_v0, %v2968_v59 }
 0x3be   :  { %v2456_v18 = vpop.f32.mrf.mxu3  ;;  %v2266_v53 = vpop.f32.mrf.mxu2  ;;  %5835 = vmatmul.msk.bf16.gmra.mxu0 %vm511_vm1, %v6452_v41 }
 0x3bf   :  { %v7532_v56 = vadd.f32 %v2456_v18, %v2262_v20  ;;  %v2517_v20 = vld [vmem:[#allocation2 + $0x1e0] sm:$0xff]  ;;  %v2518_v18 = vld [vmem:[#allocation2 + $0x1e8] sm:$0xff] }
 0x3c1   :  { %8755 = vst [vmem:[#allocation16_spill] sm:$0xff] %v7532_v56  ;;  %v2545_v56 = vpack.c.bf16 %v2518_v18, %v2517_v20  ;;  %v2748_v18 = vld [vmem:[#allocation2 + $0x238] sm:$0xff] }
 0x3c6   :  { %v7545_v45 = vpop.f32.mrf.mxu3  ;;  %v7554_v24 = vpop.f32.mrf.mxu2 }
 0x3c7   :  { %8758 = vst [vmem:[#allocation19_spill] sm:$0xff] %v7545_v45 }
 0x3c8   :  { %v2123_v22 = vpop.f32.mrf.mxu1  ;;  %8759 = vst [vmem:[#allocation20_spill] sm:$0xff] %v7554_v24 }
 0x3c9   :  { %v2267_v44 = vadd.f32 %v2266_v53, %v2123_v22  ;;  %v2772_v53 = vpack.c.bf16 %v2746_v26, %v2745_v6  ;;  %v2519_v26 = vld [vmem:[#allocation2 + $0x200] sm:$0xff] }
 0x3cb   :  { %5918 = vmatmul.msk.bf16.gmra.mxu1 %vm1681_vm3, %v2544_v14  ;;  %5961 = vmatmul.msk.bf16.gmra.mxu3 %vm1681_vm3, %v2544_v14 }
 0x3cc   :  { %5941 = vmatmul.msk.bf16.gmra.mxu2 %vm1681_vm3, %v2771_v32  ;;  %v2520_v32 = vld [vmem:[#allocation2 + $0x208] sm:$0xff] }
 0x3cd   :  { %v2546_v6 = vpack.c.bf16 %v2520_v32, %v2519_v26 }
 0x3ce   :  { %5836 = vmatmul.msk.bf16.gmra.mxu0 %vm511_vm1, %v6453_v25 }
 0x3d0   :  { %v7558_v14 = vpop.f32.mrf.mxu1 }
 0x3d1   :  { %8761 = vst [vmem:[#allocation22_spill] sm:$0xff] %v7558_v14 }
 0x3da   :  { %v957_v0 = vpop.f32.mrf.mxu0 }
 0x3db   :  { %5919 = vmatmul.msk.bf16.gmra.mxu1 %vm1681_vm3, %v2545_v56  ;;  %5962 = vmatmul.msk.bf16.gmra.mxu3 %vm1681_vm3, %v2997_v16  ;;  %v2747_v16 = vld [vmem:[#allocation2 + $0x230] sm:$0xff] }
 0x3dc   :  { %5942 = vmatmul.msk.bf16.gmra.mxu2 %vm1681_vm3, %v2772_v53  ;;  %v958_v53 = vadd.f32 %v7392_v40, %v957_v0  ;;  %v2773_v45 = vpack.c.bf16 %v2748_v18, %v2747_v16  ;;  %v2522_v0 = vld [vmem:[#allocation2 + $0x228] sm:$0xff]  ;;  %v2521_v16 = vld [vmem:[#allocation2 + $0x220] sm:$0xff] }
 0x3de   :  { %v2461_v22 = vpop.f32.mrf.mxu3  ;;  %v2271_v20 = vpop.f32.mrf.mxu2  ;;  %vm1133_vm15 = vcmp.gt.f32.partialorder %v958_v53, 0.0 }
 0x3df   :  { %v7556_v41 = vadd.f32 %v2461_v22, %v2267_v44  ;;  %v1261_v44 = vmul.f32 0.2, %v958_v53 }
 0x3e1   :  { %8760 = vst [vmem:[#allocation21_spill] sm:$0xff] %v7556_v41  ;;  %v1389_v25 = vsel %vm1133_vm15, %v958_v53, %v1261_v44  ;;  %v2547_v44 = vpack.c.bf16 %v2522_v0, %v2521_v16  ;;  %v2752_v41 = vld [vmem:[#allocation2 + $0x338] sm:$0xff] }
 0x3e2   :  { %v1519_v22 = vmul.f32 %v7405_v39, %v1389_v25  ;;  %v959_v14 = vpop.f32.mrf.mxu0  ;;  %v2749_v25 = vld [vmem:[#allocation2 + $0x250] sm:$0xff] }
 0x3e3   :  { %v960_v32 = vadd.f32 %v7392_v40, %v959_v14 }
 0x3e4   :  { %v1649_v24 = vadd.f32 %v7411_v47, %v1519_v22 }
 0x3e5   :  { %vm1134_vm0 = vcmp.gt.f32.partialorder %v960_v32, 0.0 }
 0x3e6   :  { %1861 = vst.msk [vmem:[#allocation2 + $0x470] sm:$0xff] %vm1681_vm3, %v1649_v24  ;;  %v7570_v26 = vpop.f32.mrf.mxu3 }
 0x3e7   :  { %8763 = vst [vmem:[#allocation24_spill] sm:$0xff] %v7570_v26 }
 0x3e8   :  { %v2128_v59 = vpop.f32.mrf.mxu1 }
 0x3e9   :  { %v2272_v56 = vadd.f32 %v2271_v20, %v2128_v59  ;;  %v1262_v20 = vmul.f32 0.2, %v960_v32  ;;  %v7568_v59 = vpop.f32.mrf.mxu2 }
 0x3ea   :  { %8762 = vst [vmem:[#allocation23_spill] sm:$0xff] %v7568_v59  ;;  %v962_v22 = vpop.f32.mrf.mxu0 }
 0x3eb   :  { %5920 = vmatmul.msk.bf16.gmra.mxu1 %vm1681_vm3, %v2546_v6  ;;  %5963 = vmatmul.msk.bf16.gmra.mxu3 %vm1681_vm3, %v2546_v6  ;;  %v1390_v18 = vsel %vm1134_vm0, %v960_v32, %v1262_v20  ;;  %v2750_v6 = vld [vmem:[#allocation2 + $0x258] sm:$0xff]  ;;  %v963_v24 = vadd.f32 %v7392_v40, %v962_v22 }
 0x3ec   :  { %5943 = vmatmul.msk.bf16.gmra.mxu2 %vm1681_vm3, %v2773_v45  ;;  %v1520_v45 = vmul.f32 %v7405_v39, %v1390_v18  ;;  %v2774_v14 = vpack.c.bf16 %v2750_v6, %v2749_v25 }
 0x3ed   :  { %vm1135_vm2 = vcmp.gt.f32.partialorder %v963_v24, 0.0  ;;  %v1263_v32 = vmul.f32 0.2, %v963_v24 }
 0x3ee   :  { %v1650_v53 = vadd.f32 %v7411_v47, %v1520_v45 }
 0x3ef   :  { %v1391_v59 = vsel %vm1135_vm2, %v963_v24, %v1263_v32  ;;  %v2523_v32 = vld [vmem:[#allocation2 + $0x240] sm:$0xff] }
 0x3f0   :  { %1862 = vst.msk [vmem:[#allocation2 + $0x478] sm:$0xff] %vm1681_vm3, %v1650_v53  ;;  %v1521_v0 = vmul.f32 %v7405_v39, %v1391_v59  ;;  %v7582_v6 = vpop.f32.mrf.mxu1 }
 0x3f1   :  { %8765 = vst [vmem:[#allocation26_spill] sm:$0xff] %v7582_v6  ;;  %v2751_v6 = vld [vmem:[#allocation2 + $0x330] sm:$0xff] }
 0x3f2   :  { %v1651_v16 = vadd.f32 %v7411_v47, %v1521_v0  ;;  %v964_v53 = vpop.f32.mrf.mxu0  ;;  %v2775_v1 = vpack.c.bf16 %v2752_v41, %v2751_v6 }
 0x3f3   :  { %v965_v25 = vadd.f32 %v7392_v40, %v964_v53 }
 0x3f4   :  { %1863 = vst.msk [vmem:[#allocation2 + $0x480] sm:$0xff] %vm1681_vm3, %v1651_v16 }
 0x3f5   :  { %vm1136_vm4 = vcmp.gt.f32.partialorder %v965_v25, 0.0 }
 0x3fb   :  { %5921 = vmatmul.msk.bf16.gmra.mxu1 %vm1681_vm3, %v2547_v44  ;;  %5964 = vmatmul.msk.bf16.gmra.mxu3 %vm1681_vm3, %v2547_v44  ;;  %v1264_v44 = vmul.f32 0.2, %v965_v25 }
 0x3fc   :  { %5944 = vmatmul.msk.bf16.gmra.mxu2 %vm1681_vm3, %v2774_v14  ;;  %v2524_v14 = vld [vmem:[#allocation2 + $0x248] sm:$0xff] }
 0x3fd   :  { %v1392_v26 = vsel %vm1136_vm4, %v965_v25, %v1264_v44 }
 0x3fe   :  { %v2276_v20 = vpop.f32.mrf.mxu2  ;;  %v2466_v18 = vpop.f32.mrf.mxu3 }
 0x3ff   :  { %v7579_v45 = vadd.f32 %v2466_v18, %v2272_v56  ;;  %v1522_v56 = vmul.f32 %v7405_v39, %v1392_v26  ;;  %v2548_v18 = vpack.c.bf16 %v2524_v14, %v2523_v32 }
 0x401   :  { %8764 = vst [vmem:[#allocation25_spill] sm:$0xff] %v7579_v45  ;;  %v1652_v0 = vadd.f32 %v7411_v47, %v1522_v56  ;;  %v967_v45 = vpop.f32.mrf.mxu0  ;;  %v2525_v56 = vld [vmem:[#allocation2 + $0x320] sm:$0xff] }
 0x402   :  { %v968_v53 = vadd.f32 %v7392_v40, %v967_v45 }
 0x403   :  { %1864 = vst.msk [vmem:[#allocation2 + $0x488] sm:$0xff] %vm1681_vm3, %v1652_v0  ;;  %v2977_v0 = vld [vmem:[#allocation2 + $0x268] sm:$0xff] }
 0x404   :  { %vm1137_vm5 = vcmp.gt.f32.partialorder %v968_v53, 0.0  ;;  %v1265_v26 = vmul.f32 0.2, %v968_v53 }
 0x406   :  { %v2278_v22 = vpop.f32.mrf.mxu2 }
 0x408   :  { %v2133_v24 = vpop.f32.mrf.mxu1 }
 0x409   :  { %v2277_v59 = vadd.f32 %v2276_v20, %v2133_v24  ;;  %v1393_v20 = vsel %vm1137_vm5, %v968_v53, %v1265_v26  ;;  %v969_v6 = vpop.f32.mrf.mxu0  ;;  %v2526_v24 = vld [vmem:[#allocation2 + $0x328] sm:$0xff] }
 0x40a   :  { %v1523_v25 = vmul.f32 %v7405_v39, %v1393_v20  ;;  %v970_v45 = vadd.f32 %v7392_v40, %v969_v6  ;;  %v2549_v26 = vpack.c.bf16 %v2526_v24, %v2525_v56  ;;  %v2754_v20 = vld [vmem:[#allocation2 + $0x358] sm:$0xff]  ;;  %v2753_v6 = vld [vmem:[#allocation2 + $0x350] sm:$0xff] }
 0x40b   :  { %5922 = vmatmul.msk.bf16.gmra.mxu1 %vm1681_vm3, %v2548_v18  ;;  %5965 = vmatmul.msk.bf16.gmra.mxu3 %vm1681_vm3, %v2548_v18  ;;  %v2776_v33 = vpack.c.bf16 %v2754_v20, %v2753_v6  ;;  %v2528_v20 = vld [vmem:[#allocation2 + $0x348] sm:$0xff]  ;;  %v2527_v6 = vld [vmem:[#allocation2 + $0x340] sm:$0xff] }
 0x40c   :  { %5945 = vmatmul.msk.bf16.gmra.mxu2 %vm1681_vm3, %v2775_v1  ;;  %v1653_v41 = vadd.f32 %v7411_v47, %v1523_v25  ;;  %vm1138_vm6 = vcmp.gt.f32.partialorder %v970_v45, 0.0  ;;  %v1266_v32 = vmul.f32 0.2, %v970_v45  ;;  %v7598_v1 = vpop.f32.mrf.mxu3  ;;  %v2976_v25 = vld [vmem:[#allocation2 + $0x260] sm:$0xff] }
 0x40d   :  { %8766 = vst [vmem:[#allocation27_spill] sm:$0xff] %v7598_v1  ;;  %v3001_v12 = vpack.c.bf16 %v2977_v0, %v2976_v25  ;;  %v2204_v1 = vadd.f32 %v6945_v63, %v6949_v4 }
 0x40e   :  { %v2849_v16 = vpop.f32.mrf.mxu2  ;;  %1865 = vst.msk [vmem:[#allocation2 + $0x490] sm:$0xff] %vm1681_vm3, %v1653_v41  ;;  %v1394_v53 = vsel %vm1138_vm6, %v970_v45, %v1266_v32 }
 0x40f   :  { %v2477_v32 = vadd.f32 %v6977_v37, %v2204_v1 }
 0x410   :  { %v2135_v44 = vpop.f32.mrf.mxu1 }
 0x411   :  { %v2279_v14 = vadd.f32 %v2278_v22, %v2135_v44  ;;  %v1524_v22 = vmul.f32 %v7405_v39, %v1394_v53  ;;  %v972_v2 = vpop.f32.mrf.mxu0 }
 0x412   :  { %v973_v36 = vadd.f32 %v7392_v40, %v972_v2 }
 0x413   :  { %v1654_v41 = vadd.f32 %v7411_v47, %v1524_v22  ;;  %v2756_v22 = vld [vmem:[#allocation2 + $0x378] sm:$0xff] }
 0x414   :  { %vm1139_vm7 = vcmp.gt.f32.partialorder %v973_v36, 0.0 }
 0x415   :  { %1866 = vst.msk [vmem:[#allocation2 + $0x498] sm:$0xff] %vm1681_vm3, %v1654_v41 }
 0x416   :  { %v2851_v18 = vpop.f32.mrf.mxu2 }
 0x418   :  { %v2623_v44 = vpop.f32.mrf.mxu1 }
 0x419   :  { %v2703_v11 = vadd.f32 %v2623_v44, %v6963_v27  ;;  %v1267_v27 = vmul.f32 0.2, %v973_v36 }
 0x41b   :  { %5923 = vmatmul.msk.bf16.gmra.mxu1 %vm1681_vm3, %v2549_v26  ;;  %5966 = vmatmul.msk.bf16.gmra.mxu3 %vm1681_vm3, %v3001_v12  ;;  %v2929_v45 = vadd.f32 %v2849_v16, %v2703_v11  ;;  %v1395_v24 = vsel %vm1139_vm7, %v973_v36, %v1267_v27  ;;  %v974_v26 = vpop.f32.mrf.mxu0  ;;  %v2550_v27 = vpack.c.bf16 %v2528_v20, %v2527_v6  ;;  %v2530_v6 = vld [vmem:[#allocation2 + $0x368] sm:$0xff] }
 0x41c   :  { %5946 = vmatmul.msk.bf16.gmra.mxu2 %vm1681_vm3, %v2776_v33  ;;  %v1525_v63 = vmul.f32 %v7405_v39, %v1395_v24  ;;  %v975_v11 = vadd.f32 %v7392_v40, %v974_v26 }
 0x41e   :  { %v2471_v56 = vpop.f32.mrf.mxu3  ;;  %v1655_v12 = vadd.f32 %v7411_v47, %v1525_v63  ;;  %vm1140_vm8 = vcmp.gt.f32.partialorder %v975_v11, 0.0  ;;  %v1268_v16 = vmul.f32 0.2, %v975_v11 }
 0x41f   :  { %v7611_v0 = vadd.f32 %v2471_v56, %v2277_v59  ;;  %v2854_v2 = vpop.f32.mrf.mxu2  ;;  %v2755_v56 = vld [vmem:[#allocation2 + $0x370] sm:$0xff] }
 0x420   :  { %v2625_v4 = vpop.f32.mrf.mxu1  ;;  %1867 = vst.msk [vmem:[#allocation2 + $0x4a0] sm:$0xff] %vm1681_vm3, %v1655_v12  ;;  %v1396_v37 = vsel %vm1140_vm8, %v975_v11, %v1268_v16  ;;  %vm4067_vm8 = vcmask 261120  }
 0x421   :  { %v2704_v53 = vadd.f32 %v2625_v4, %v2477_v32  ;;  %v1526_v44 = vmul.f32 %v7405_v39, %v1396_v37  ;;  %v2777_v32 = vpack.c.bf16 %v2756_v22, %v2755_v56 }
 0x423   :  { %v2930_v33 = vadd.f32 %v2851_v18, %v2704_v53  ;;  %v1656_v24 = vadd.f32 %v7411_v47, %v1526_v44  ;;  %v977_v18 = vpop.f32.mrf.mxu0 }
 0x424   :  { %v978_v63 = vadd.f32 %v7392_v40, %v977_v18  ;;  %v2529_v18 = vld [vmem:[#allocation2 + $0x360] sm:$0xff] }
 0x425   :  { %1868 = vst.msk [vmem:[#allocation2 + $0x4a8] sm:$0xff] %vm1681_vm3, %v1656_v24 }
 0x426   :  { %v2473_v36 = vpop.f32.mrf.mxu3  ;;  %vm1141_vm9 = vcmp.gt.f32.partialorder %v978_v63, 0.0 }
 0x427   :  { %v7617_v59 = vadd.f32 %v2473_v36, %v2279_v14  ;;  %v2856_v1 = vpop.f32.mrf.mxu2  ;;  %v2209_v14 = vadd.f32 %v6968_v30, %v6966_v29 }
 0x428   :  { %v2628_v25 = vpop.f32.mrf.mxu1 }
 0x429   :  { %v2705_v41 = vadd.f32 %v2628_v25, %v6985_v51  ;;  %v1269_v51 = vmul.f32 0.2, %v978_v63  ;;  %v2479_v26 = vadd.f32 %v6998_v62, %v2209_v14  ;;  %v2757_v14 = vld [vmem:[#allocation2 + $0x390] sm:$0xff] }
 0x42b   :  { %5924 = vmatmul.msk.bf16.gmra.mxu1 %vm1681_vm3, %v2550_v27  ;;  %5967 = vmatmul.msk.bf16.gmra.mxu3 %vm1681_vm3, %v2550_v27  ;;  %v2931_v4 = vadd.f32 %v2854_v2, %v2705_v41  ;;  %v1397_v12 = vsel %vm1141_vm9, %v978_v63, %v1269_v51  ;;  %v979_v37 = vpop.f32.mrf.mxu0  ;;  %v2758_v27 = vld [vmem:[#allocation2 + $0x398] sm:$0xff]  ;;  %v2551_v63 = vpack.c.bf16 %v2530_v6, %v2529_v18  ;;  %v2759_v18 = vld [vmem:[#allocation2 + $0x470] sm:$0xff] }
 0x42c   :  { %5947 = vmatmul.msk.bf16.gmra.mxu2 %vm1681_vm3, %v2777_v32  ;;  %v1527_v29 = vmul.f32 %v7405_v39, %v1397_v12  ;;  %v980_v2 = vadd.f32 %v7392_v40, %v979_v37 }
 0x42e   :  { %v3076_v53 = vpop.f32.mrf.mxu3  ;;  %v1657_v20 = vadd.f32 %v7411_v47, %v1527_v29  ;;  %vm1142_vm10 = vcmp.gt.f32.partialorder %v980_v2, 0.0  ;;  %v1270_v44 = vmul.f32 0.2, %v980_v2 }
 0x42f   :  { %v2859_v11 = vpop.f32.mrf.mxu2  ;;  %v7630_v16 = vadd.f32 %v3076_v53, %v2929_v45  ;;  %v2778_v53 = vpack.c.bf16 %v2758_v27, %v2757_v14 }
 0x430   :  { %v2630_v30 = vpop.f32.mrf.mxu1  ;;  %1869 = vst.msk [vmem:[#allocation2 + $0x4b0] sm:$0xff] %vm1681_vm3, %v1657_v20  ;;  %v1398_v62 = vsel %vm1142_vm10, %v980_v2, %v1270_v44 }
 0x431   :  { %v2706_v36 = vadd.f32 %v2630_v30, %v2479_v26  ;;  %v1528_v56 = vmul.f32 %v7405_v39, %v1398_v62  ;;  %v2214_v26 = vadd.f32 %v6990_v55, %v6988_v54 }
 0x433   :  { %v2932_v22 = vadd.f32 %v2856_v1, %v2706_v36  ;;  %v1658_v51 = vadd.f32 %v7411_v47, %v1528_v56  ;;  %v982_v1 = vpop.f32.mrf.mxu0  ;;  %v2481_v36 = vadd.f32 %v7019_v28, %v2214_v26  ;;  %v2532_v56 = vld [vmem:[#allocation2 + $0x388] sm:$0xff] }
 0x434   :  { %v983_v12 = vadd.f32 %v7392_v40, %v982_v1 }
 0x435   :  { %1870 = vst.msk [vmem:[#allocation2 + $0x4b8] sm:$0xff] %vm1681_vm3, %v1658_v51  ;;  %v2531_v51 = vld [vmem:[#allocation2 + $0x380] sm:$0xff] }
 0x436   :  { %v3078_v25 = vpop.f32.mrf.mxu3  ;;  %vm1143_vm11 = vcmp.gt.f32.partialorder %v983_v12, 0.0 }
 0x437   :  { %v2861_v41 = vpop.f32.mrf.mxu2  ;;  %v7636_v45 = vadd.f32 %v3078_v25, %v2930_v33 }
 0x438   :  { %v2633_v24 = vpop.f32.mrf.mxu1 }
 0x439   :  { %v2707_v32 = vadd.f32 %v2633_v24, %v7006_v15  ;;  %v1271_v15 = vmul.f32 0.2, %v983_v12 }
 0x43b   :  { %5925 = vmatmul.msk.bf16.gmra.mxu1 %vm1681_vm3, %v2551_v63  ;;  %5968 = vmatmul.msk.bf16.gmra.mxu3 %vm1681_vm3, %v2551_v63  ;;  %v2933_v33 = vadd.f32 %v2859_v11, %v2707_v32  ;;  %v1399_v30 = vsel %vm1143_vm11, %v983_v12, %v1271_v15  ;;  %v984_v25 = vpop.f32.mrf.mxu0  ;;  %v2760_v32 = vld [vmem:[#allocation2 + $0x478] sm:$0xff] }
 0x43c   :  { %5948 = vmatmul.msk.bf16.gmra.mxu2 %vm1681_vm3, %v2778_v53  ;;  %v1529_v54 = vmul.f32 %v7405_v39, %v1399_v30  ;;  %v985_v11 = vadd.f32 %v7392_v40, %v984_v25  ;;  %v2552_v53 = vpack.c.bf16 %v2532_v56, %v2531_v51  ;;  %v2779_v26 = vpack.c.bf16 %v2760_v32, %v2759_v18  ;;  %v2534_v56 = vld [vmem:[#allocation2 + $0x468] sm:$0xff]  ;;  %v2761_v51 = vld [vmem:[#allocation2 + $0x490] sm:$0xff] }
 0x43d   :  { %v2985_v18 = vld [vmem:[#allocation2 + $0x3a8] sm:$0xff] }
 0x43e   :  { %v3081_v29 = vpop.f32.mrf.mxu3  ;;  %v1659_v44 = vadd.f32 %v7411_v47, %v1529_v54  ;;  %vm1144_vm12 = vcmp.gt.f32.partialorder %v985_v11, 0.0  ;;  %v1272_v62 = vmul.f32 0.2, %v985_v11 }
 0x43f   :  { %v2864_v20 = vpop.f32.mrf.mxu2  ;;  %v7649_v37 = vadd.f32 %v3081_v29, %v2931_v4  ;;  %v2219_v29 = vadd.f32 %v7010_v21, %v7013_v23 }
 0x440   :  { %v2635_v55 = vpop.f32.mrf.mxu1  ;;  %1871 = vst.msk [vmem:[#allocation2 + $0x4c0] sm:$0xff] %vm1681_vm3, %v1659_v44  ;;  %v1400_v28 = vsel %vm1144_vm12, %v985_v11, %v1272_v62 }
 0x441   :  { %v2708_v2 = vadd.f32 %v2635_v55, %v2481_v36  ;;  %v1530_v63 = vmul.f32 %v7405_v39, %v1400_v28  ;;  %v2483_v54 = vadd.f32 %v7053_v57, %v2219_v29 }
 0x443   :  { %v2934_v6 = vadd.f32 %v2861_v41, %v2708_v2  ;;  %v1660_v12 = vadd.f32 %v7411_v47, %v1530_v63  ;;  %v987_v41 = vpop.f32.mrf.mxu0 }
 0x444   :  { %v988_v15 = vadd.f32 %v7392_v40, %v987_v41 }
 0x445   :  { %1872 = vst.msk [vmem:[#allocation2 + $0x4c8] sm:$0xff] %vm1681_vm3, %v1660_v12 }
 0x446   :  { %v3083_v27 = vpop.f32.mrf.mxu3  ;;  %vm1145_vm13 = vcmp.gt.f32.partialorder %v988_v15, 0.0 }
 0x447   :  { %v2866_v24 = vpop.f32.mrf.mxu2  ;;  %v7655_v4 = vadd.f32 %v3083_v27, %v2932_v22  ;;  %v2533_v27 = vld [vmem:[#allocation2 + $0x460] sm:$0xff] }
 0x448   :  { %v2638_v14 = vpop.f32.mrf.mxu1 }
 0x449   :  { %v2709_v1 = vadd.f32 %v2638_v14, %v7032_v42  ;;  %v1273_v42 = vmul.f32 0.2, %v988_v15  ;;  %v2553_v14 = vpack.c.bf16 %v2534_v56, %v2533_v27 }
 0x44b   :  { %5926 = vmatmul.msk.bf16.gmra.mxu1 %vm1681_vm3, %v2552_v53  ;;  %5969 = vmatmul.msk.bf16.gmra.mxu3 %vm1681_vm3, %v2552_v53  ;;  %v2935_v22 = vadd.f32 %v2864_v20, %v2709_v1  ;;  %v1401_v36 = vsel %vm1145_vm13, %v988_v15, %v1273_v42  ;;  %v989_v11 = vpop.f32.mrf.mxu0  ;;  %v2762_v1 = vld [vmem:[#allocation2 + $0x498] sm:$0xff]  ;;  %v7682_v42 = vld [vmem:[%s8732_s2] ss:$0 sm:$0xff] }
 0x44c   :  { %5949 = vmatmul.msk.bf16.gmra.mxu2 %vm1681_vm3, %v2779_v26  ;;  %v1531_v21 = vmul.f32 %v7405_v39, %v1401_v36  ;;  %v990_v20 = vadd.f32 %v7392_v40, %v989_v11  ;;  %v2984_v40 = vld [vmem:[#allocation2 + $0x3a0] sm:$0xff]  ;;  %v2780_v29 = vpack.c.bf16 %v2762_v1, %v2761_v51  ;;  %v2763_v1 = vld [vmem:[#allocation2 + $0x4b0] sm:$0xff] }
 0x44e   :  { %v3086_v30 = vpop.f32.mrf.mxu3  ;;  %v1661_v25 = vadd.f32 %v7411_v47, %v1531_v21  ;;  %vm1146_vm14 = vcmp.gt.f32.partialorder %v990_v20, 0.0  ;;  %v1274_v28 = vmul.f32 0.2, %v990_v20 }
 0x44f   :  { %v2869_v55 = vpop.f32.mrf.mxu2  ;;  %v7668_v2 = vadd.f32 %v3086_v30, %v2933_v33 }
 0x450   :  { %v2640_v23 = vpop.f32.mrf.mxu1  ;;  %1873 = vst.msk [vmem:[#allocation2 + $0x4d0] sm:$0xff] %vm1681_vm3, %v1661_v25  ;;  %v1402_v33 = vsel %vm1146_vm14, %v990_v20, %v1274_v28 }
 0x451   :  { %v2710_v44 = vadd.f32 %v2640_v23, %v2483_v54  ;;  %v1532_v53 = vmul.f32 %v7405_v39, %v1402_v33 }
 0x453   :  { %v2936_v62 = vadd.f32 %v2866_v24, %v2710_v44  ;;  %v3005_v24 = vpack.c.bf16 %v2985_v18, %v2984_v40  ;;  %v1662_v26 = vadd.f32 %v7411_v47, %v1532_v53  ;;  %v992_v15 = vpop.f32.mrf.mxu0  ;;  %v2224_v47 = vadd.f32 %v7068_v10, %v7066_v9  ;;  %v7697_v44 = vld [vmem:[%s8732_s2 + $0x1] ss:$0 sm:$0xff]  ;;  %v7703_v9 = vld [vmem:[%s8732_s2 + $0x2] ss:$0 sm:$0xff]  ;;  %v2536_v18 = vld [vmem:[#allocation2 + $0x488] sm:$0xff] }
 0x454   :  { %v2764_v53 = vld [vmem:[#allocation2 + $0x4b8] sm:$0xff] }
 0x455   :  { %1874 = vst.msk [vmem:[#allocation2 + $0x4d8] sm:$0xff] %vm1681_vm3, %v1662_v26  ;;  %v2485_v54 = vadd.f32 %v7086_v43, %v2224_v47  ;;  %v2781_v26 = vpack.c.bf16 %v2764_v53, %v2763_v1 }
 0x456   :  { %v3088_v57 = vpop.f32.mrf.mxu3 }
 0x457   :  { %v2871_v32 = vpop.f32.mrf.mxu2  ;;  %v7674_v63 = vadd.f32 %v3088_v57, %v2934_v6  ;;  %v993_v6 = vadd.f32 %v7682_v42, %v992_v15  ;;  %v2535_v57 = vld [vmem:[#allocation2 + $0x480] sm:$0xff] }
 0x458   :  { %v2643_v12 = vpop.f32.mrf.mxu1 }
 0x459   :  { %v2711_v41 = vadd.f32 %v2643_v12, %v7064_v7  ;;  %vm1147_vm15 = vcmp.gt.f32.partialorder %v993_v6, 0.0  ;;  %v1275_v7 = vmul.f32 0.2, %v993_v6 }
 0x45b   :  { %5927 = vmatmul.msk.bf16.gmra.mxu1 %vm1681_vm3, %v2553_v14  ;;  %5970 = vmatmul.msk.bf16.gmra.mxu3 %vm1681_vm3, %v3005_v24  ;;  %v2937_v39 = vadd.f32 %v2869_v55, %v2711_v41  ;;  %v1403_v36 = vsel %vm1147_vm15, %v993_v6, %v1275_v7  ;;  %v994_v43 = vpop.f32.mrf.mxu0  ;;  %v2554_v24 = vpack.c.bf16 %v2536_v18, %v2535_v57 }
 0x45c   :  { %5950 = vmatmul.msk.bf16.gmra.mxu2 %vm1681_vm3, %v2780_v29  ;;  %v1533_v55 = vmul.f32 %v7697_v44, %v1403_v36  ;;  %v995_v20 = vadd.f32 %v7682_v42, %v994_v43  ;;  %v6455_v36 = vld [vmem:[%s8733_s0 + $0x1c8] sm:$0xff] }
 0x45e   :  { %v3091_v30 = vpop.f32.mrf.mxu3  ;;  %v1663_v10 = vadd.f32 %v7703_v9, %v1533_v55  ;;  %vm1148_vm0 = vcmp.gt.f32.partialorder %v995_v20, 0.0  ;;  %v1276_v56 = vmul.f32 0.2, %v995_v20  ;;  %v2766_v55 = vld [vmem:[#allocation2 + $0x4d8] sm:$0xff] }
 0x45f   :  { %v2874_v21 = vpop.f32.mrf.mxu2  ;;  %v7692_v23 = vadd.f32 %v3091_v30, %v2935_v22  ;;  %v6454_v22 = vld [vmem:[%s8733_s0 + $0x1c0] sm:$0xff] }
 0x460   :  { %v2645_v25 = vpop.f32.mrf.mxu1  ;;  %1875 = vst.msk [vmem:[#allocation2 + $0x4e0] sm:$0xff] %vm1681_vm3, %v1663_v10  ;;  %5837 = vmatmul.msk.bf16.gmra.mxu0 %vm511_vm1, %v6454_v22  ;;  %v1404_v33 = vsel %vm1148_vm0, %v995_v20, %v1276_v56  ;;  %v2234_v56 = vadd.f32 %v7130_v49, %v7132_v50  ;;  %v3417_v50 = vld [vmem:[#allocation2 + $0x158] sm:$0xff] }
 0x461   :  { %v2712_v11 = vadd.f32 %v2645_v25, %v2485_v54  ;;  %v1534_v12 = vmul.f32 %v7697_v44, %v1404_v33 }
 0x462   :  { %v2489_v57 = vadd.f32 %v7151_v35, %v2234_v56 }
 0x463   :  { %v2938_v27 = vadd.f32 %v2871_v32, %v2712_v11  ;;  %v1664_v32 = vadd.f32 %v7703_v9, %v1534_v12  ;;  %v2537_v11 = vld [vmem:[#allocation2 + $0x4a0] sm:$0xff] }
 0x464   :  { %v2539_v12 = vld [vmem:[#allocation2 + $0x4c0] sm:$0xff] }
 0x465   :  { %1876 = vst.msk [vmem:[#allocation2 + $0x4e8] sm:$0xff] %vm1681_vm3, %v1664_v32 }
 0x466   :  { %v3093_v28 = vpop.f32.mrf.mxu3 }
 0x467   :  { %v2876_v14 = vpop.f32.mrf.mxu2  ;;  %v7712_v51 = vadd.f32 %v3093_v28, %v2936_v62  ;;  %v2229_v62 = vadd.f32 %v7098_v60, %v7100_v61  ;;  %v2538_v60 = vld [vmem:[#allocation2 + $0x4a8] sm:$0xff] }
 0x468   :  { %v2648_v40 = vpop.f32.mrf.mxu1  ;;  %v2555_v22 = vpack.c.bf16 %v2538_v60, %v2537_v11  ;;  %v3189_v60 = vld [vmem:[#allocation2 + $0x140] sm:$0xff] }
 0x469   :  { %v2713_v41 = vadd.f32 %v2648_v40, %v7096_v58  ;;  %v2487_v6 = vadd.f32 %v7118_v34, %v2229_v62  ;;  %v2540_v40 = vld [vmem:[#allocation2 + $0x4c8] sm:$0xff] }
 0x46a   :  { %v2556_v32 = vpack.c.bf16 %v2540_v40, %v2539_v12 }
 0x46b   :  { %5928 = vmatmul.msk.bf16.gmra.mxu1 %vm1681_vm3, %v2554_v24  ;;  %5971 = vmatmul.msk.bf16.gmra.mxu3 %vm1681_vm3, %v2554_v24  ;;  %v2939_v15 = vadd.f32 %v2874_v21, %v2713_v41  ;;  %v2765_v21 = vld [vmem:[#allocation2 + $0x4d0] sm:$0xff] }
 0x46c   :  { %5951 = vmatmul.msk.bf16.gmra.mxu2 %vm1681_vm3, %v2781_v26  ;;  %v3416_v26 = vld [vmem:[#allocation2 + $0x150] sm:$0xff] }
 0x46d   :  { %v3448_v62 = vpack.c.bf16 %v3417_v50, %v3416_v26 }
 0x46e   :  { %v3096_v29 = vpop.f32.mrf.mxu3 }
 0x46f   :  { %v2879_v58 = vpop.f32.mrf.mxu2  ;;  %v7724_v7 = vadd.f32 %v3096_v29, %v2937_v39  ;;  %v2782_v39 = vpack.c.bf16 %v2766_v55, %v2765_v21 }
 0x470   :  { %v2650_v47 = vpop.f32.mrf.mxu1  ;;  %5838 = vmatmul.msk.bf16.gmra.mxu0 %vm511_vm1, %v6455_v36 }
 0x471   :  { %v2714_v30 = vadd.f32 %v2650_v47, %v2487_v6  ;;  %v6478_v6 = vld [vmem:[%s8735_s5 + $0x28] sm:$0xff] }
 0x472   :  { %4339 = vmatpush.bf16.msrb.mxu3 %v6478_v6 }
 0x473   :  { %v2940_v54 = vadd.f32 %v2876_v14, %v2714_v30 }
 0x476   :  { %v3098_v25 = vpop.f32.mrf.mxu3 }
 0x477   :  { %v2881_v61 = vpop.f32.mrf.mxu2  ;;  %v7730_v10 = vadd.f32 %v3098_v25, %v2938_v27  ;;  %v6457_v25 = vld [vmem:[%s8733_s0 + $0x1d8] sm:$0xff] }
 0x478   :  { %v2653_v34 = vpop.f32.mrf.mxu1 }
 0x479   :  { %v2715_v43 = vadd.f32 %v2653_v34, %v7128_v46  ;;  %v6456_v46 = vld [vmem:[%s8733_s0 + $0x1d0] sm:$0xff]  ;;  %v2993_v34 = vld [vmem:[#allocation2 + $0x4e8] sm:$0xff] }
 0x47b   :  { %5929 = vmatmul.msk.bf16.gmra.mxu1 %vm1681_vm3, %v2555_v22  ;;  %5972 = vmatmul.msk.bf16.gmra.mxu3 %vm1681_vm3, %v2555_v22  ;;  %v2941_v20 = vadd.f32 %v2879_v58, %v2715_v43  ;;  %v2239_v58 = vadd.f32 %v7275_v3, %v7281_v8  ;;  %v3190_v3 = vld [vmem:[#allocation2 + $0x148] sm:$0xff]  ;;  %v3419_v22 = vld [vmem:[#allocation2 + $0x178] sm:$0xff] }
 0x47c   :  { %5952 = vmatmul.msk.bf16.gmra.mxu2 %vm1681_vm3, %v2782_v39 }
 0x47d   :  { %v2491_v30 = vadd.f32 %v7299_v48, %v2239_v58  ;;  %v3221_v48 = vpack.c.bf16 %v3190_v3, %v3189_v60  ;;  %v8767_v58 = vld [vmem:[#allocation6_spill] sm:$0xff] }
 0x47e   :  { %v3101_v28 = vpop.f32.mrf.mxu3  ;;  %v6459_v60 = vld [vmem:[%s8733_s0 + $0x1e8] sm:$0xff] }
 0x47f   :  { %v2884_v27 = vpop.f32.mrf.mxu2  ;;  %v7739_v18 = vadd.f32 %v3101_v28, %v2939_v15  ;;  %v6474_v15 = vld [vmem:[%s8735_s5 + $0x8] sm:$0xff] }
 0x480   :  { %v2655_v33 = vpop.f32.mrf.mxu1  ;;  %5839 = vmatmul.msk.bf16.gmra.mxu0 %vm511_vm1, %v6456_v46  ;;  %4268 = vmatpush.bf16.msrb.mxu2 %v6474_v15 }
 0x481   :  { %v2716_v14 = vadd.f32 %v2655_v33, %v2489_v57  ;;  %v3418_v57 = vld [vmem:[#allocation2 + $0x170] sm:$0xff] }
 0x483   :  { %v2942_v1 = vadd.f32 %v2881_v61, %v2716_v14  ;;  %v2992_v61 = vld [vmem:[#allocation2 + $0x4e0] sm:$0xff]  ;;  %v2244_v14 = vadd.f32 %v7313_v19, %v7311_v17  ;;  %v3421_v17 = vld [vmem:[#allocation2 + $0x198] sm:$0xff] }
 0x484   :  { %v3009_v28 = vpack.c.bf16 %v2993_v34, %v2992_v61  ;;  %v3194_v61 = vld [vmem:[#allocation2 + $0x188] sm:$0xff] }
 0x486   :  { %v3103_v53 = vpop.f32.mrf.mxu3 }
 0x487   :  { %v2886_v41 = vpop.f32.mrf.mxu2  ;;  %v7745_v49 = vadd.f32 %v3103_v53, %v2940_v54 }
 0x488   :  { %v2658_v35 = vpop.f32.mrf.mxu1 }
 0x489   :  { %v2717_v24 = vadd.f32 %v2658_v35, %v7161_v52  ;;  %v6476_v52 = vld [vmem:[%s8735_s5 + $0x18] sm:$0xff] }
 0x48a   :  { %4215 = vmatpush.bf16.msrb.mxu1 %v6476_v52 }
 0x48b   :  { %5930 = vmatmul.msk.bf16.gmra.mxu1 %vm1681_vm3, %v2556_v32  ;;  %5973 = vmatmul.msk.bf16.gmra.mxu3 %vm1681_vm3, %v2556_v32  ;;  %v2943_v29 = vadd.f32 %v2884_v27, %v2717_v24  ;;  %v3449_v27 = vpack.c.bf16 %v3419_v22, %v3418_v57  ;;  %v3192_v24 = vld [vmem:[#allocation2 + $0x168] sm:$0xff]  ;;  %v3193_v22 = vld [vmem:[#allocation2 + $0x180] sm:$0xff]  ;;  %v3422_v57 = vld [vmem:[#allocation2 + $0x1b0] sm:$0xff] }
 0x48c   :  { %6003 = vmatmul.msk.bf16.vlgmr.msra.gmra.mxu2 %vm1681_vm3, %v3448_v62 }
 0x48e   :  { %v3106_v47 = vpop.f32.mrf.mxu3 }
 0x48f   :  { %v2889_v36 = vpop.f32.mrf.mxu2  ;;  %v7763_v54 = vadd.f32 %v3106_v47, %v2941_v20  ;;  %v2249_v47 = vadd.f32 %v8767_v58, %v7345_v38  ;;  %v3423_v38 = vld [vmem:[#allocation2 + $0x1b8] sm:$0xff]  ;;  %v3195_v58 = vld [vmem:[#allocation2 + $0x1a0] sm:$0xff] }
 0x490   :  { %v2660_v21 = vpop.f32.mrf.mxu1  ;;  %5840 = vmatmul.msk.bf16.gmra.mxu0 %vm511_vm1, %v6457_v25 }
 0x491   :  { %v2718_v55 = vadd.f32 %v2660_v21, %v2491_v30 }
 0x493   :  { %v2944_v11 = vadd.f32 %v2886_v41, %v2718_v55  ;;  %v6458_v41 = vld [vmem:[%s8733_s0 + $0x1e0] sm:$0xff] }
 0x496   :  { %v3108_v8 = vpop.f32.mrf.mxu3 }
 0x497   :  { %v2891_v39 = vpop.f32.mrf.mxu2  ;;  %v7769_v43 = vadd.f32 %v3108_v8, %v2942_v1  ;;  %v2493_v1 = vadd.f32 %v7331_v5, %v2244_v14  ;;  %v3191_v5 = vld [vmem:[#allocation2 + $0x160] sm:$0xff] }
 0x498   :  { %v2663_v20 = vpop.f32.mrf.mxu1  ;;  %v3222_v62 = vpack.c.bf16 %v3192_v24, %v3191_v5  ;;  %v8770_v14 = vld [vmem:[#allocation10_spill] sm:$0xff] }
 0x499   :  { %v2719_v56 = vadd.f32 %v2663_v20, %v7309_v13  ;;  %v8769_v20 = vld [vmem:[#allocation8_spill] sm:$0xff]  ;;  %v3196_v5 = vld [vmem:[#allocation2 + $0x1a8] sm:$0xff] }
 0x49b   :  { %5974 = vmatmul.msk.bf16.gmra.mxu3 %vm1681_vm3, %v3009_v28  ;;  %5981 = vmatmul.msk.bf16.vlgmr.msra.gmra.mxu1 %vm1681_vm3, %v3221_v48  ;;  %v2945_v33 = vadd.f32 %v2889_v36, %v2719_v56  ;;  %v8768_v36 = vld [vmem:[#allocation7_spill] sm:$0xff]  ;;  %v3223_v28 = vpack.c.bf16 %v3194_v61, %v3193_v22 }
 0x49c   :  { %6004 = vmatmul.msk.bf16.gmra.mxu2 %vm1681_vm3, %v3449_v27  ;;  %v2495_v21 = vadd.f32 %v8768_v36, %v2249_v47  ;;  %v3451_v27 = vpack.c.bf16 %v3423_v38, %v3422_v57  ;;  %v8773_v47 = vld [vmem:[#allocation12_spill] sm:$0xff] }
 0x49d   :  { %v3424_v36 = vld [vmem:[#allocation2 + $0x290] sm:$0xff] }
 0x49e   :  { %v3111_v46 = vpop.f32.mrf.mxu3 }
 0x49f   :  { %v2894_v53 = vpop.f32.mrf.mxu2  ;;  %v7778_v12 = vadd.f32 %v3111_v46, %v2943_v29  ;;  %v3420_v29 = vld [vmem:[#allocation2 + $0x190] sm:$0xff]  ;;  %v8771_v46 = vld [vmem:[#allocation9_spill] sm:$0xff] }
 0x4a0   :  { %v2665_v13 = vpop.f32.mrf.mxu1  ;;  %5841 = vmatmul.msk.bf16.gmra.mxu0 %vm511_vm1, %v6458_v41  ;;  %v3450_v6 = vpack.c.bf16 %v3421_v17, %v3420_v29  ;;  %v3425_v29 = vld [vmem:[#allocation2 + $0x298] sm:$0xff] }
 0x4a1   :  { %v2720_v40 = vadd.f32 %v2665_v13, %v2493_v1  ;;  %v2254_v1 = vadd.f32 %v8771_v46, %v8770_v14  ;;  %v8772_v13 = vld [vmem:[#allocation11_spill] sm:$0xff] }
 0x4a3   :  { %v2946_v50 = vadd.f32 %v2891_v39, %v2720_v40  ;;  %v2497_v40 = vadd.f32 %v8772_v13, %v2254_v1  ;;  %v6461_v13 = vld [vmem:[%s8733_s0 + $0x1f8] sm:$0xff] }
 0x4a6   :  { %v3113_v35 = vpop.f32.mrf.mxu3 }
 0x4a7   :  { %v2896_v32 = vpop.f32.mrf.mxu2  ;;  %v7784_v26 = vadd.f32 %v3113_v35, %v2944_v11 }
 0x4a8   :  { %v2668_v19 = vpop.f32.mrf.mxu1 }
 0x4a9   :  { %v2721_v15 = vadd.f32 %v2668_v19, %v7341_v31 }
 0x4ab   :  { %5982 = vmatmul.msk.bf16.gmra.mxu1 %vm1681_vm3, %v3222_v62  ;;  %6025 = vmatmul.msk.bf16.vlgmr.msra.gmra.mxu3 %vm1681_vm3, %v3222_v62  ;;  %v2947_v52 = vadd.f32 %v2894_v53, %v2721_v15 }
 0x4ac   :  { %6005 = vmatmul.msk.bf16.gmra.mxu2 %vm1681_vm3, %v3450_v6 }
 0x4ae   :  { %v3116_v30 = vpop.f32.mrf.mxu3 }
 0x4af   :  { %v2899_v55 = vpop.f32.mrf.mxu2  ;;  %v7793_v25 = vadd.f32 %v3116_v30, %v2945_v33  ;;  %v3224_v30 = vpack.c.bf16 %v3196_v5, %v3195_v58  ;;  %v8778_v5 = vld [vmem:[#allocation17_spill] sm:$0xff]  ;;  %v8780_v58 = vld [vmem:[#allocation19_spill] sm:$0xff] }
 0x4b0   :  { %v2670_v31 = vpop.f32.mrf.mxu1  ;;  %5842 = vmatmul.msk.bf16.gmra.mxu0 %vm511_vm1, %v6459_v60 }
 0x4b1   :  { %v2722_v11 = vadd.f32 %v2670_v31, %v2495_v21  ;;  %v3452_v21 = vpack.c.bf16 %v3425_v29, %v3424_v36  ;;  %v8774_v31 = vld [vmem:[#allocation14_spill] sm:$0xff] }
 0x4b3   :  { %v2948_v3 = vadd.f32 %v2896_v32, %v2722_v11  ;;  %v6460_v32 = vld [vmem:[%s8733_s0 + $0x1f0] sm:$0xff]  ;;  %v8775_v11 = vld [vmem:[#allocation13_spill] sm:$0xff] }
 0x4b4   :  { %v2259_v60 = vadd.f32 %v8775_v11, %v8774_v31 }
 0x4b6   :  { %v3118_v8 = vpop.f32.mrf.mxu3 }
 0x4b7   :  { %v2901_v34 = vpop.f32.mrf.mxu2  ;;  %v7799_v39 = vadd.f32 %v3118_v8, %v2946_v50  ;;  %v8776_v8 = vld [vmem:[#allocation15_spill] sm:$0xff] }
 0x4b8   :  { %v2673_v48 = vpop.f32.mrf.mxu1  ;;  %v2499_v61 = vadd.f32 %v8776_v8, %v2259_v60 }
 0x4b9   :  { %v2723_v56 = vadd.f32 %v2673_v48, %v8769_v20 }
 0x4bb   :  { %5983 = vmatmul.msk.bf16.gmra.mxu1 %vm1681_vm3, %v3223_v28  ;;  %6026 = vmatmul.msk.bf16.gmra.mxu3 %vm1681_vm3, %v3223_v28  ;;  %v2949_v33 = vadd.f32 %v2899_v55, %v2723_v56  ;;  %v3197_v56 = vld [vmem:[#allocation2 + $0x280] sm:$0xff]  ;;  %v3198_v28 = vld [vmem:[#allocation2 + $0x288] sm:$0xff] }
 0x4bc   :  { %6006 = vmatmul.msk.bf16.gmra.mxu2 %vm1681_vm3, %v3451_v27  ;;  %v3650_v27 = vld [vmem:[#allocation2 + $0x1c8] sm:$0xff]  ;;  %v3225_v1 = vpack.c.bf16 %v3198_v28, %v3197_v56  ;;  %v3429_v28 = vld [vmem:[#allocation2 + $0x2d8] sm:$0xff] }
 0x4be   :  { %v3121_v53 = vpop.f32.mrf.mxu3 }
 0x4bf   :  { %v2904_v41 = vpop.f32.mrf.mxu2  ;;  %v7808_v50 = vadd.f32 %v3121_v53, %v2947_v52  ;;  %v3427_v53 = vld [vmem:[#allocation2 + $0x2b8] sm:$0xff] }
 0x4c0   :  { %v2675_v35 = vpop.f32.mrf.mxu1  ;;  %5843 = vmatmul.msk.bf16.gmra.mxu0 %vm511_vm1, %v6460_v32 }
 0x4c1   :  { %v2724_v24 = vadd.f32 %v2675_v35, %v2497_v40 }
 0x4c3   :  { %v2950_v17 = vadd.f32 %v2901_v34, %v2724_v24  ;;  %v3426_v24 = vld [vmem:[#allocation2 + $0x2b0] sm:$0xff] }
 0x4c6   :  { %v3123_v19 = vpop.f32.mrf.mxu3 }
 0x4c7   :  { %v2906_v15 = vpop.f32.mrf.mxu2  ;;  %v7814_v62 = vadd.f32 %v3123_v19, %v2948_v3  ;;  %v3453_v19 = vpack.c.bf16 %v3427_v53, %v3426_v24  ;;  %v8781_v53 = vld [vmem:[#allocation21_spill] sm:$0xff]  ;;  %v8782_v24 = vld [vmem:[#allocation22_spill] sm:$0xff] }
 0x4c8   :  { %v2678_v6 = vpop.f32.mrf.mxu1 }
 0x4c9   :  { %v2725_v52 = vadd.f32 %v2678_v6, %v8773_v47 }
 0x4cb   :  { %5984 = vmatmul.msk.bf16.gmra.mxu1 %vm1681_vm3, %v3224_v30  ;;  %6027 = vmatmul.msk.bf16.gmra.mxu3 %vm1681_vm3, %v3224_v30  ;;  %v2951_v55 = vadd.f32 %v2904_v41, %v2725_v52  ;;  %v3649_v41 = vld [vmem:[#allocation2 + $0x1c0] sm:$0xff] }
 0x4cc   :  { %6007 = vmatmul.msk.bf16.gmra.mxu2 %vm1681_vm3, %v3452_v21  ;;  %v3678_v32 = vpack.c.bf16 %v3650_v27, %v3649_v41 }
 0x4ce   :  { %v3126_v3 = vpop.f32.mrf.mxu3 }
 0x4cf   :  { %v2909_v34 = vpop.f32.mrf.mxu2  ;;  %v7823_v38 = vadd.f32 %v3126_v3, %v2949_v33  ;;  %v8777_v33 = vld [vmem:[#allocation16_spill] sm:$0xff] }
 0x4d0   :  { %v2680_v48 = vpop.f32.mrf.mxu1  ;;  %5844 = vmatmul.msk.bf16.gmra.mxu0 %vm511_vm1, %v6461_v13 }
 0x4d1   :  { %v2726_v22 = vadd.f32 %v2680_v48, %v2499_v61 }
 0x4d3   :  { %v2952_v20 = vadd.f32 %v2906_v15, %v2726_v22  ;;  %v8779_v15 = vld [vmem:[#allocation18_spill] sm:$0xff] }
 0x4d4   :  { %v2264_v29 = vadd.f32 %v8779_v15, %v8778_v5 }
 0x4d6   :  { %v3128_v57 = vpop.f32.mrf.mxu3  ;;  %v2501_v47 = vadd.f32 %v8780_v58, %v2264_v29 }
 0x4d7   :  { %v2911_v14 = vpop.f32.mrf.mxu2  ;;  %v7825_v46 = vadd.f32 %v3128_v57, %v2950_v17 }
 0x4d8   :  { %v2683_v40 = vpop.f32.mrf.mxu1 }
 0x4d9   :  { %v2727_v35 = vadd.f32 %v2683_v40, %v8777_v33 }
 0x4db   :  { %5985 = vmatmul.msk.bf16.gmra.mxu1 %vm1681_vm3, %v3225_v1  ;;  %6028 = vmatmul.msk.bf16.gmra.mxu3 %vm1681_vm3, %v3678_v32  ;;  %v2953_v17 = vadd.f32 %v2909_v34, %v2727_v35  ;;  %v3200_v34 = vld [vmem:[#allocation2 + $0x2a8] sm:$0xff]  ;;  %v8783_v32 = vld [vmem:[#allocation20_spill] sm:$0xff] }
 0x4dc   :  { %6008 = vmatmul.msk.bf16.gmra.mxu2 %vm1681_vm3, %v3453_v19  ;;  %v2269_v19 = vadd.f32 %v8783_v32, %v8782_v24 }
 0x4dd   :  { %v997_v21 = vpop.f32.mrf.mxu0 }
 0x4de   :  { %v3131_v6 = vpop.f32.mrf.mxu3  ;;  %v998_v11 = vadd.f32 %v7682_v42, %v997_v21 }
 0x4df   :  { %v2914_v52 = vpop.f32.mrf.mxu2  ;;  %v7838_v30 = vadd.f32 %v3131_v6, %v2951_v55  ;;  %v3199_v55 = vld [vmem:[#allocation2 + $0x2a0] sm:$0xff]  ;;  %v8784_v6 = vld [vmem:[#allocation24_spill] sm:$0xff] }
 0x4e0   :  { %v2685_v36 = vpop.f32.mrf.mxu1  ;;  %vm1149_vm1 = vcmp.gt.f32.partialorder %v998_v11, 0.0  ;;  %v1277_v3 = vmul.f32 0.2, %v998_v11  ;;  %v3226_v40 = vpack.c.bf16 %v3200_v34, %v3199_v55  ;;  %v2503_v58 = vadd.f32 %v8784_v6, %v2269_v19  ;;  %v8786_v19 = vld [vmem:[#allocation26_spill] sm:$0xff] }
 0x4e1   :  { %v2728_v31 = vadd.f32 %v2685_v36, %v2501_v47 }
 0x4e2   :  { %v1405_v8 = vsel %vm1149_vm1, %v998_v11, %v1277_v3 }
 0x4e3   :  { %v2954_v60 = vadd.f32 %v2911_v14, %v2728_v31  ;;  %v1535_v48 = vmul.f32 %v7697_v44, %v1405_v8  ;;  %v3428_v14 = vld [vmem:[#allocation2 + $0x2d0] sm:$0xff] }
 0x4e4   :  { %v3454_v33 = vpack.c.bf16 %v3429_v28, %v3428_v14  ;;  %v3202_v28 = vld [vmem:[#allocation2 + $0x2c8] sm:$0xff]  ;;  %v8785_v14 = vld [vmem:[#allocation25_spill] sm:$0xff] }
 0x4e5   :  { %v1665_v27 = vadd.f32 %v7703_v9, %v1535_v48  ;;  %v999_v1 = vpop.f32.mrf.mxu0 }
 0x4e6   :  { %v3133_v61 = vpop.f32.mrf.mxu3  ;;  %v1000_v41 = vadd.f32 %v7682_v42, %v999_v1 }
 0x4e7   :  { %v2916_v22 = vpop.f32.mrf.mxu2  ;;  %v7842_v56 = vadd.f32 %v3133_v61, %v2952_v20  ;;  %1877 = vst.msk [vmem:[#allocation2 + $0x510] sm:$0xff] %vm1681_vm3, %v1665_v27  ;;  %v3431_v27 = vld [vmem:[#allocation2 + $0x2f8] sm:$0xff] }
 0x4e8   :  { %v2688_v57 = vpop.f32.mrf.mxu1  ;;  %vm1150_vm2 = vcmp.gt.f32.partialorder %v1000_v41, 0.0  ;;  %v1278_v35 = vmul.f32 0.2, %v1000_v41 }
 0x4e9   :  { %v2729_v13 = vadd.f32 %v2688_v57, %v8781_v53  ;;  %v3201_v53 = vld [vmem:[#allocation2 + $0x2c0] sm:$0xff] }
 0x4ea   :  { %v1406_v5 = vsel %vm1150_vm2, %v1000_v41, %v1278_v35 }
 0x4eb   :  { %5986 = vmatmul.msk.bf16.gmra.mxu1 %vm1681_vm3, %v3226_v40  ;;  %6029 = vmatmul.msk.bf16.gmra.mxu3 %vm1681_vm3, %v3226_v40  ;;  %v2955_v20 = vadd.f32 %v2914_v52, %v2729_v13  ;;  %v1536_v29 = vmul.f32 %v7697_v44, %v1406_v5  ;;  %v8787_v5 = vld [vmem:[#allocation23_spill] sm:$0xff] }
 0x4ec   :  { %6009 = vmatmul.msk.bf16.gmra.mxu2 %vm1681_vm3, %v3454_v33  ;;  %v3227_v33 = vpack.c.bf16 %v3202_v28, %v3201_v53  ;;  %v3204_v53 = vld [vmem:[#allocation2 + $0x2e8] sm:$0xff] }
 0x4ed   :  { %v1666_v31 = vadd.f32 %v7703_v9, %v1536_v29  ;;  %v1002_v52 = vpop.f32.mrf.mxu0 }
 0x4ee   :  { %v3136_v15 = vpop.f32.mrf.mxu3  ;;  %v1003_v3 = vadd.f32 %v7682_v42, %v1002_v52 }
 0x4ef   :  { %v2919_v47 = vpop.f32.mrf.mxu2  ;;  %v7855_v36 = vadd.f32 %v3136_v15, %v2953_v17  ;;  %1878 = vst.msk [vmem:[#allocation2 + $0x518] sm:$0xff] %vm1681_vm3, %v1666_v31  ;;  %v2274_v15 = vadd.f32 %v8787_v5, %v8786_v19  ;;  %v6473_v5 = vld [vmem:[%s8735_s5] sm:$0xff] }
 0x4f0   :  { %v2690_v21 = vpop.f32.mrf.mxu1  ;;  %vm1151_vm4 = vcmp.gt.f32.partialorder %v1003_v3, 0.0  ;;  %v1279_v61 = vmul.f32 0.2, %v1003_v3  ;;  %4269 = vmatpush.bf16.msrb.mxu2 %v6473_v5 }
 0x4f1   :  { %v2730_v11 = vadd.f32 %v2690_v21, %v2503_v58  ;;  %v8788_v21 = vld [vmem:[#allocation27_spill] sm:$0xff] }
 0x4f2   :  { %v1407_v34 = vsel %vm1151_vm4, %v1003_v3, %v1279_v61  ;;  %v2505_v31 = vadd.f32 %v8788_v21, %v2274_v15 }
 0x4f3   :  { %v2956_v8 = vadd.f32 %v2916_v22, %v2730_v11  ;;  %v1537_v57 = vmul.f32 %v7697_v44, %v1407_v34  ;;  %v3430_v22 = vld [vmem:[#allocation2 + $0x2f0] sm:$0xff] }
 0x4f4   :  { %v3455_v24 = vpack.c.bf16 %v3431_v27, %v3430_v22 }
 0x4f5   :  { %v1667_v13 = vadd.f32 %v7703_v9, %v1537_v57  ;;  %v1004_v40 = vpop.f32.mrf.mxu0 }
 0x4f6   :  { %v3138_v48 = vpop.f32.mrf.mxu3  ;;  %v1005_v35 = vadd.f32 %v7682_v42, %v1004_v40 }
 0x4f7   :  { %v2921_v55 = vpop.f32.mrf.mxu2  ;;  %v7861_v17 = vadd.f32 %v3138_v48, %v2954_v60  ;;  %1879 = vst.msk [vmem:[#allocation2 + $0x520] sm:$0xff] %vm1681_vm3, %v1667_v13 }
 0x4f8   :  { %v2693_v1 = vpop.f32.mrf.mxu1  ;;  %vm1152_vm5 = vcmp.gt.f32.partialorder %v1005_v35, 0.0  ;;  %v1280_v32 = vmul.f32 0.2, %v1005_v35 }
 0x4f9   :  { %v2731_v41 = vadd.f32 %v2693_v1, %v8785_v14  ;;  %v3433_v14 = vld [vmem:[#allocation2 + $0x3d8] sm:$0xff] }
 0x4fa   :  { %v1408_v29 = vsel %vm1152_vm5, %v1005_v35, %v1280_v32 }
 0x4fb   :  { %5987 = vmatmul.msk.bf16.gmra.mxu1 %vm1681_vm3, %v3227_v33  ;;  %6030 = vmatmul.msk.bf16.gmra.mxu3 %vm1681_vm3, %v3227_v33  ;;  %v2957_v60 = vadd.f32 %v2919_v47, %v2731_v41  ;;  %v1538_v58 = vmul.f32 %v7697_v44, %v1408_v29  ;;  %v3203_v33 = vld [vmem:[#allocation2 + $0x2e0] sm:$0xff] }
 0x4fc   :  { %6010 = vmatmul.msk.bf16.gmra.mxu2 %vm1681_vm3, %v3455_v24  ;;  %v3228_v32 = vpack.c.bf16 %v3204_v53, %v3203_v33  ;;  %v3658_v53 = vld [vmem:[#allocation2 + $0x308] sm:$0xff] }
 0x4fd   :  { %v1668_v61 = vadd.f32 %v7703_v9, %v1538_v58  ;;  %v1007_v47 = vpop.f32.mrf.mxu0 }
 0x4fe   :  { %v3141_v6 = vpop.f32.mrf.mxu3  ;;  %v1008_v48 = vadd.f32 %v7682_v42, %v1007_v47 }
 0x4ff   :  { %v2924_v52 = vpop.f32.mrf.mxu2  ;;  %v7874_v11 = vadd.f32 %v3141_v6, %v2955_v20  ;;  %1880 = vst.msk [vmem:[#allocation2 + $0x528] sm:$0xff] %vm1681_vm3, %v1668_v61  ;;  %v6475_v6 = vld [vmem:[%s8735_s5 + $0x10] sm:$0xff] }
 0x500   :  { %v2695_v3 = vpop.f32.mrf.mxu1  ;;  %vm1153_vm6 = vcmp.gt.f32.partialorder %v1008_v48, 0.0  ;;  %v1281_v57 = vmul.f32 0.2, %v1008_v48  ;;  %4216 = vmatpush.bf16.msrb.mxu1 %v6475_v6  ;;  %v3437_v6 = vld [vmem:[#allocation2 + $0x418] sm:$0xff] }
 0x501   :  { %v2732_v34 = vadd.f32 %v2695_v3, %v2505_v31 }
 0x502   :  { %v1409_v27 = vsel %vm1153_vm6, %v1008_v48, %v1281_v57  ;;  %v3205_v57 = vld [vmem:[#allocation2 + $0x3c0] sm:$0xff] }
 0x503   :  { %v2958_v28 = vadd.f32 %v2921_v55, %v2732_v34  ;;  %v1539_v13 = vmul.f32 %v7697_v44, %v1409_v27  ;;  %v3432_v55 = vld [vmem:[#allocation2 + $0x3d0] sm:$0xff]  ;;  %v3206_v27 = vld [vmem:[#allocation2 + $0x3c8] sm:$0xff] }
 0x504   :  { %v3456_v15 = vpack.c.bf16 %v3433_v14, %v3432_v55 }
 0x505   :  { %v1669_v22 = vadd.f32 %v7703_v9, %v1539_v13  ;;  %v1009_v35 = vpop.f32.mrf.mxu0 }
 0x506   :  { %v3143_v1 = vpop.f32.mrf.mxu3  ;;  %v1010_v19 = vadd.f32 %v7682_v42, %v1009_v35  ;;  %v3434_v35 = vld [vmem:[#allocation2 + $0x3f0] sm:$0xff] }
 0x507   :  { %v2926_v40 = vpop.f32.mrf.mxu2  ;;  %v7880_v20 = vadd.f32 %v3143_v1, %v2956_v8  ;;  %1881 = vst.msk [vmem:[#allocation2 + $0x530] sm:$0xff] %vm1681_vm3, %v1669_v22  ;;  %v3657_v22 = vld [vmem:[#allocation2 + $0x300] sm:$0xff] }
 0x508   :  { %v2698_v41 = vpop.f32.mrf.mxu1  ;;  %vm1154_vm7 = vcmp.gt.f32.partialorder %v1010_v19, 0.0  ;;  %v1282_v29 = vmul.f32 0.2, %v1010_v19 }
 0x509   :  { %v2733_v24 = vadd.f32 %v2698_v41, %v7611_v0  ;;  %v6477_v0 = vld [vmem:[%s8735_s5 + $0x20] sm:$0xff]  ;;  %v3229_v41 = vpack.c.bf16 %v3206_v27, %v3205_v57 }
 0x50a   :  { %v1410_v58 = vsel %vm1154_vm7, %v1010_v19, %v1282_v29  ;;  %4340 = vmatpush.bf16.msrb.mxu3 %v6477_v0  ;;  %v3208_v29 = vld [vmem:[#allocation2 + $0x3e8] sm:$0xff] }
 0x50b   :  { %5988 = vmatmul.msk.bf16.gmra.mxu1 %vm1681_vm3, %v3228_v32  ;;  %6031 = vmatmul.msk.bf16.gmra.mxu3 %vm1681_vm3, %v3228_v32  ;;  %v2959_v8 = vadd.f32 %v2924_v52, %v2733_v24  ;;  %v1540_v31 = vmul.f32 %v7697_v44, %v1410_v58  ;;  %v3682_v24 = vpack.c.bf16 %v3658_v53, %v3657_v22  ;;  %v8789_v32 = vmov 0.0  }
 0x50c   :  { %6011 = vmatmul.msk.bf16.gmra.mxu2 %vm1681_vm3, %v3456_v15  ;;  %4068 = vst.msk [vmem:[#allocation3] sm:$0xff] %vm4067_vm8, %v8789_v32 }
 0x50d   :  { %v1670_v47 = vadd.f32 %v7703_v9, %v1540_v31  ;;  %4069 = vst.msk [vmem:[#allocation3 + $0x8] sm:$0xff] %vm4067_vm8, %v8789_v32  ;;  %v1012_v5 = vpop.f32.mrf.mxu0 }
 0x50e   :  { %v3146_v21 = vpop.f32.mrf.mxu3  ;;  %4070 = vst.msk [vmem:[#allocation3 + $0x10] sm:$0xff] %vm4067_vm8, %v8789_v32 }
 0x50f   :  { %v7899_v52 = vadd.f32 %v3146_v21, %v2957_v60  ;;  %v3530_v3 = vpop.f32.mrf.mxu2  ;;  %1882 = vst.msk [vmem:[#allocation2 + $0x538] sm:$0xff] %vm1681_vm3, %v1670_v47  ;;  %v3435_v60 = vld [vmem:[#allocation2 + $0x3f8] sm:$0xff]  ;;  %v3207_v21 = vld [vmem:[#allocation2 + $0x3e0] sm:$0xff]  ;;  %v3436_v47 = vld [vmem:[#allocation2 + $0x410] sm:$0xff] }
 0x510   :  { %v2700_v61 = vpop.f32.mrf.mxu1  ;;  %4071 = vst.msk [vmem:[#allocation3 + $0x18] sm:$0xff] %vm4067_vm8, %v8789_v32 }
 0x511   :  { %v2734_v34 = vadd.f32 %v2700_v61, %v7617_v59  ;;  %v3457_v59 = vpack.c.bf16 %v3435_v60, %v3434_v35  ;;  %4072 = vst.msk [vmem:[#allocation3 + $0x20] sm:$0xff] %vm4067_vm8, %v8789_v32  ;;  %v3230_v61 = vpack.c.bf16 %v3208_v29, %v3207_v21  ;;  %v3210_v29 = vld [vmem:[#allocation2 + $0x408] sm:$0xff] }
 0x512   :  { %4073 = vst.msk [vmem:[#allocation3 + $0x28] sm:$0xff] %vm4067_vm8, %v8789_v32 }
 0x513   :  { %v2960_v48 = vadd.f32 %v2926_v40, %v2734_v34  ;;  %4074 = vst.msk [vmem:[#allocation3 + $0x30] sm:$0xff] %vm4067_vm8, %v8789_v32  ;;  %v3458_v34 = vpack.c.bf16 %v3437_v6, %v3436_v47 }
 0x514   :  { %4075 = vst.msk [vmem:[#allocation3 + $0x38] sm:$0xff] %vm4067_vm8, %v8789_v32 }
 0x515   :  { %4076 = vst.msk [vmem:[#allocation3 + $0x40] sm:$0xff] %vm4067_vm8, %v8789_v32  ;;  %v1014_v57 = vpop.f32.mrf.mxu0 }
 0x516   :  { %v3148_v1 = vpop.f32.mrf.mxu3  ;;  %4077 = vst.msk [vmem:[#allocation3 + $0x48] sm:$0xff] %vm4067_vm8, %v8789_v32 }
 0x517   :  { %v7904_v13 = vadd.f32 %v3148_v1, %v2958_v28  ;;  %v7906_v14 = vpop.f32.mrf.mxu2  ;;  %4095 = vst.msk [vmem:[#allocation3 + $0x60] sm:$0xff] %vm4067_vm8, %v8789_v32 }
 0x518   :  { %v3303_v33 = vpop.f32.mrf.mxu1  ;;  %4096 = vst.msk [vmem:[#allocation3 + $0x68] sm:$0xff] %vm4067_vm8, %v8789_v32 }
 0x519   :  { %v3383_v31 = vadd.f32 %v3303_v33, %v7630_v16  ;;  %4097 = vst.msk [vmem:[#allocation3 + $0xc0] sm:$0xff] %vm4067_vm8, %v8789_v32 }
 0x51a   :  { %4098 = vst.msk [vmem:[#allocation3 + $0xc8] sm:$0xff] %vm4067_vm8, %v8789_v32 }
 0x51b   :  { %5989 = vmatmul.msk.bf16.gmra.mxu1 %vm1681_vm3, %v3229_v41  ;;  %6032 = vmatmul.msk.bf16.gmra.mxu3 %vm1681_vm3, %v3682_v24  ;;  %v3610_v27 = vadd.f32 %v3530_v3, %v3383_v31  ;;  %v1013_v41 = vadd.f32 %v7682_v42, %v1012_v5  ;;  %v7958_v3 = vld [vmem:[%s8736_s4 + $0x1] ss:$0 sm:$0xff]  ;;  %4099 = vst.msk [vmem:[#allocation3 + $0x120] sm:$0xff] %vm4067_vm8, %v8789_v32 }
 0x51c   :  { %6012 = vmatmul.msk.bf16.gmra.mxu2 %vm1681_vm3, %v3457_v59  ;;  %v7967_v59 = vld [vmem:[%s8736_s4 + $0x2] ss:$0 sm:$0xff]  ;;  %4100 = vst.msk [vmem:[#allocation3 + $0x128] sm:$0xff] %vm4067_vm8, %v8789_v32 }
 0x51d   :  { %v1283_v24 = vmul.f32 0.2, %v1013_v41  ;;  %vm1155_vm10 = vcmp.gt.f32.partialorder %v1013_v41, 0.0  ;;  %4101 = vst.msk [vmem:[#allocation3 + $0x180] sm:$0xff] %vm4067_vm8, %v8789_v32 }
 0x51e   :  { %v3151_v28 = vpop.f32.mrf.mxu3  ;;  %4102 = vst.msk [vmem:[#allocation3 + $0x188] sm:$0xff] %vm4067_vm8, %v8789_v32 }
 0x51f   :  { %v7923_v40 = vadd.f32 %v3151_v28, %v2959_v8  ;;  %v7925_v55 = vpop.f32.mrf.mxu2  ;;  %v1411_v6 = vsel %vm1155_vm10, %v1013_v41, %v1283_v24  ;;  %v3438_v41 = vld [vmem:[#allocation2 + $0x430] sm:$0xff]  ;;  %4093 = vst.msk [vmem:[#allocation3] sm:$0xff] %vm4067_vm8, %v8789_v32 }
 0x520   :  { %v3305_v19 = vpop.f32.mrf.mxu1  ;;  %4094 = vst.msk [vmem:[#allocation3 + $0x8] sm:$0xff] %vm4067_vm8, %v8789_v32 }
 0x521   :  { %v3384_v33 = vadd.f32 %v3305_v19, %v7636_v45  ;;  %v1017_v45 = vpop.f32.mrf.mxu0 }
 0x522   :  { %v1018_v24 = vadd.f32 %v7682_v42, %v1017_v45 }
 0x523   :  { %v3611_v19 = vadd.f32 %v7906_v14, %v3384_v33 }
 0x524   :  { %vm1157_vm13 = vcmp.gt.f32.partialorder %v1018_v24, 0.0 }
 0x526   :  { %v3153_v15 = vpop.f32.mrf.mxu3 }
 0x527   :  { %v7935_v8 = vadd.f32 %v3153_v15, %v2960_v48  ;;  %v7937_v0 = vpop.f32.mrf.mxu2  ;;  %v7946_v48 = vld [vmem:[%s8736_s4] ss:$0 sm:$0xff] }
 0x528   :  { %v3308_v58 = vpop.f32.mrf.mxu1 }
 0x52b   :  { %5990 = vmatmul.msk.bf16.gmra.mxu1 %vm1681_vm3, %v3230_v61  ;;  %6033 = vmatmul.msk.bf16.gmra.mxu3 %vm1681_vm3, %v3230_v61  ;;  %v3439_v61 = vld [vmem:[#allocation2 + $0x438] sm:$0xff] }
 0x52c   :  { %6013 = vmatmul.msk.bf16.gmra.mxu2 %vm1681_vm3, %v3458_v34  ;;  %v3209_v34 = vld [vmem:[#allocation2 + $0x400] sm:$0xff] }
 0x52d   :  { %v3231_v33 = vpack.c.bf16 %v3210_v29, %v3209_v34 }
 0x52e   :  { %v3757_v1 = vpop.f32.mrf.mxu3 }
 0x52f   :  { %v7948_v53 = vpop.f32.mrf.mxu2  ;;  %v3837_v16 = vadd.f32 %v3757_v1, %v3610_v27  ;;  %v3385_v27 = vadd.f32 %v3308_v58, %v7649_v37 }
 0x530   :  { %v3310_v60 = vpop.f32.mrf.mxu1 }
 0x531   :  { %v3871_v22 = vadd.f32 %v7946_v48, %v3837_v16  ;;  %v1015_v16 = vadd.f32 %v7682_v42, %v1014_v57  ;;  %v3612_v57 = vadd.f32 %v7925_v55, %v3385_v27  ;;  %v3386_v34 = vadd.f32 %v3310_v60, %v7655_v4 }
 0x533   :  { %vm3903_vm9 = vcmp.gt.f32.partialorder %v3871_v22, 0.0  ;;  %v3935_v35 = vmul.f32 0.2, %v3871_v22  ;;  %v1284_v58 = vmul.f32 0.2, %v1015_v16  ;;  %vm1156_vm12 = vcmp.gt.f32.partialorder %v1015_v16, 0.0 }
 0x535   :  { %v3967_v28 = vsel %vm3903_vm9, %v3871_v22, %v3935_v35  ;;  %v1541_v22 = vmul.f32 %v7697_v44, %v1411_v6  ;;  %v3459_v35 = vpack.c.bf16 %v3439_v61, %v3438_v41 }
 0x536   :  { %v4001_v5 = vmul.f32 %v7958_v3, %v3967_v28  ;;  %v3759_v15 = vpop.f32.mrf.mxu3  ;;  %v1019_v28 = vpop.f32.mrf.mxu0 }
 0x537   :  { %v7979_v21 = vpop.f32.mrf.mxu2  ;;  %v3838_v31 = vadd.f32 %v3759_v15, %v3611_v19  ;;  %v1020_v37 = vadd.f32 %v7682_v42, %v1019_v28  ;;  %v1412_v42 = vsel %vm1156_vm12, %v1015_v16, %v1284_v58  ;;  %v8014_v16 = vld [vmem:[%s8732_s2] ss:$0 sm:$0xff]  ;;  %v3212_v28 = vld [vmem:[#allocation2 + $0x428] sm:$0xff] }
 0x538   :  { %v4035_v47 = vadd.f32 %v7967_v59, %v4001_v5  ;;  %v7984_v14 = vpop.f32.mrf.mxu1  ;;  %v1671_v5 = vadd.f32 %v7703_v9, %v1541_v22  ;;  %v1542_v4 = vmul.f32 %v7697_v44, %v1412_v42 }
 0x539   :  { %v3872_v1 = vadd.f32 %v7946_v48, %v3838_v31  ;;  %v1285_v31 = vmul.f32 0.2, %v1018_v24  ;;  %vm1158_vm14 = vcmp.gt.f32.partialorder %v1020_v37, 0.0 }
 0x53a   :  { %4119 = vst.msk [vmem:[#allocation3 + $0x70] sm:$0xff] %vm4067_vm8, %v4035_v47  ;;  %v1286_v47 = vmul.f32 0.2, %v1020_v37 }
 0x53b   :  { %5991 = vmatmul.msk.bf16.gmra.mxu1 %vm1681_vm3, %v3231_v33  ;;  %6034 = vmatmul.msk.bf16.gmra.mxu3 %vm1681_vm3, %v3231_v33  ;;  %v3936_v19 = vmul.f32 0.2, %v3872_v1  ;;  %vm3904_vm11 = vcmp.gt.f32.partialorder %v3872_v1, 0.0  ;;  %1883 = vst.msk [vmem:[#allocation2 + $0x540] sm:$0xff] %vm1681_vm3, %v1671_v5  ;;  %v1413_v27 = vsel %vm1157_vm13, %v1018_v24, %v1285_v31  ;;  %v3211_v31 = vld [vmem:[#allocation2 + $0x420] sm:$0xff] }
 0x53c   :  { %6014 = vmatmul.msk.bf16.gmra.mxu2 %vm1681_vm3, %v3459_v35  ;;  %v1414_v60 = vsel %vm1158_vm14, %v1020_v37, %v1286_v47  ;;  %v3613_v35 = vadd.f32 %v7937_v0, %v3386_v34  ;;  %v3441_v47 = vld [vmem:[#allocation2 + $0x518] sm:$0xff] }
 0x53d   :  { %v3968_v61 = vsel %vm3904_vm11, %v3872_v1, %v3936_v19  ;;  %v1543_v19 = vmul.f32 %v7697_v44, %v1413_v27  ;;  %v8032_v44 = vld [vmem:[%s8732_s2 + $0x2] ss:$0 sm:$0xff] }
 0x53e   :  { %v3762_v15 = vpop.f32.mrf.mxu3  ;;  %v4002_v9 = vmul.f32 %v7958_v3, %v3968_v61  ;;  %v1022_v1 = vpop.f32.mrf.mxu0  ;;  %v3440_v61 = vld [vmem:[#allocation2 + $0x510] sm:$0xff]  ;;  %v1672_v34 = vadd.f32 %v8032_v44, %v1542_v4 }
 0x53f   :  { %v7998_v29 = vpop.f32.mrf.mxu2  ;;  %v3839_v6 = vadd.f32 %v3762_v15, %v3612_v57  ;;  %v1023_v41 = vadd.f32 %v8014_v16, %v1022_v1 }
 0x540   :  { %v8000_v45 = vpop.f32.mrf.mxu1  ;;  %v4036_v37 = vadd.f32 %v7967_v59, %v4002_v9  ;;  %1884 = vst.msk [vmem:[#allocation2 + $0x548] sm:$0xff] %vm1681_vm3, %v1672_v34 }
 0x541   :  { %v3873_v33 = vadd.f32 %v7946_v48, %v3839_v6  ;;  %vm1159_vm0 = vcmp.gt.f32.partialorder %v1023_v41, 0.0  ;;  %v1287_v57 = vmul.f32 0.2, %v1023_v41  ;;  %v8026_v6 = vld [vmem:[%s8732_s2 + $0x1] ss:$0 sm:$0xff] }
 0x542   :  { %v1544_v0 = vmul.f32 %v8026_v6, %v1414_v60  ;;  %4120 = vst.msk [vmem:[#allocation3 + $0x78] sm:$0xff] %vm4067_vm8, %v4036_v37 }
 0x543   :  { %vm3905_vm15 = vcmp.gt.f32.partialorder %v3873_v33, 0.0  ;;  %v3937_v55 = vmul.f32 0.2, %v3873_v33  ;;  %v1415_v9 = vsel %vm1159_vm0, %v1023_v41, %v1287_v57 }
 0x544   :  { %v1545_v60 = vmul.f32 %v8026_v6, %v1415_v9 }
 0x545   :  { %v3969_v22 = vsel %vm3905_vm15, %v3873_v33, %v3937_v55  ;;  %v3232_v33 = vpack.c.bf16 %v3212_v28, %v3211_v31  ;;  %v3387_v55 = vadd.f32 %v7984_v14, %v7668_v2 }
 0x546   :  { %v4003_v24 = vmul.f32 %v7958_v3, %v3969_v22  ;;  %v3764_v58 = vpop.f32.mrf.mxu3  ;;  %v1673_v22 = vadd.f32 %v8032_v44, %v1543_v19  ;;  %v1024_v2 = vpop.f32.mrf.mxu0  ;;  %v1675_v14 = vadd.f32 %v8032_v44, %v1545_v60  ;;  %v3214_v60 = vld [vmem:[#allocation2 + $0x508] sm:$0xff] }
 0x547   :  { %v8021_v5 = vpop.f32.mrf.mxu2  ;;  %v3840_v15 = vadd.f32 %v3764_v58, %v3613_v35  ;;  %v3460_v35 = vpack.c.bf16 %v3441_v47, %v3440_v61  ;;  %v1674_v58 = vadd.f32 %v8032_v44, %v1544_v0  ;;  %v1025_v41 = vadd.f32 %v8014_v16, %v1024_v2 }
 0x548   :  { %v8035_v42 = vpop.f32.mrf.mxu1  ;;  %v4037_v27 = vadd.f32 %v7967_v59, %v4003_v24  ;;  %v3614_v24 = vadd.f32 %v7948_v53, %v3387_v55  ;;  %1885 = vst.msk [vmem:[#allocation2 + $0x550] sm:$0xff] %vm1681_vm3, %v1673_v22  ;;  %v3388_v53 = vadd.f32 %v8000_v45, %v7674_v63 }
 0x549   :  { %v3874_v1 = vadd.f32 %v7946_v48, %v3840_v15  ;;  %vm1160_vm2 = vcmp.gt.f32.partialorder %v1025_v41, 0.0  ;;  %v1288_v37 = vmul.f32 0.2, %v1025_v41  ;;  %1886 = vst.msk [vmem:[#allocation2 + $0x558] sm:$0xff] %vm1681_vm3, %v1674_v58  ;;  %v3666_v58 = vld [vmem:[#allocation2 + $0x448] sm:$0xff] }
 0x54a   :  { %4121 = vst.msk [vmem:[#allocation3 + $0x80] sm:$0xff] %vm4067_vm8, %v4037_v27 }
 0x54b   :  { %vm3906_vm1 = vcmp.gt.f32.partialorder %v3874_v1, 0.0  ;;  %v3938_v4 = vmul.f32 0.2, %v3874_v1  ;;  %5992 = vmatmul.msk.bf16.gmra.mxu1 %vm1681_vm3, %v3232_v33  ;;  %6035 = vmatmul.msk.bf16.gmra.mxu3 %vm1681_vm3, %v3232_v33  ;;  %1887 = vst.msk [vmem:[#allocation2 + $0x560] sm:$0xff] %vm1681_vm3, %v1675_v14  ;;  %v1416_v47 = vsel %vm1160_vm2, %v1025_v41, %v1288_v37 }
 0x54c   :  { %6015 = vmatmul.msk.bf16.gmra.mxu2 %vm1681_vm3, %v3460_v35  ;;  %v1546_v33 = vmul.f32 %v8026_v6, %v1416_v47 }
 0x54d   :  { %v3970_v28 = vsel %vm3906_vm1, %v3874_v1, %v3938_v4  ;;  %v3213_v1 = vld [vmem:[#allocation2 + $0x500] sm:$0xff]  ;;  %v3615_v4 = vadd.f32 %v7979_v21, %v3388_v53  ;;  %v3389_v21 = vadd.f32 %v8035_v42, %v7692_v23 }
 0x54e   :  { %v4004_v19 = vmul.f32 %v7958_v3, %v3970_v28  ;;  %v3767_v57 = vpop.f32.mrf.mxu3  ;;  %v1676_v55 = vadd.f32 %v8032_v44, %v1546_v33  ;;  %v1027_v27 = vpop.f32.mrf.mxu0  ;;  %v3233_v28 = vpack.c.bf16 %v3214_v60, %v3213_v1 }
 0x54f   :  { %v8056_v15 = vpop.f32.mrf.mxu2  ;;  %v3841_v0 = vadd.f32 %v3767_v57, %v3614_v24  ;;  %v1028_v22 = vadd.f32 %v8014_v16, %v1027_v27  ;;  %v3442_v24 = vld [vmem:[#allocation2 + $0x530] sm:$0xff]  ;;  %v3616_v1 = vadd.f32 %v7998_v29, %v3389_v21 }
 0x550   :  { %v4038_v31 = vadd.f32 %v7967_v59, %v4004_v19  ;;  %v3320_v61 = vpop.f32.mrf.mxu1  ;;  %1888 = vst.msk [vmem:[#allocation2 + $0x568] sm:$0xff] %vm1681_vm3, %v1676_v55  ;;  %v3443_v19 = vld [vmem:[#allocation2 + $0x538] sm:$0xff] }
 0x551   :  { %v3875_v34 = vadd.f32 %v7946_v48, %v3841_v0  ;;  %vm1161_vm5 = vcmp.gt.f32.partialorder %v1028_v22, 0.0  ;;  %v1289_v2 = vmul.f32 0.2, %v1028_v22  ;;  %v3665_v0 = vld [vmem:[#allocation2 + $0x440] sm:$0xff]  ;;  %v3461_v33 = vpack.c.bf16 %v3443_v19, %v3442_v24 }
 0x552   :  { %4122 = vst.msk [vmem:[#allocation3 + $0x88] sm:$0xff] %vm4067_vm8, %v4038_v31  ;;  %v3686_v53 = vpack.c.bf16 %v3666_v58, %v3665_v0 }
 0x553   :  { %vm3907_vm4 = vcmp.gt.f32.partialorder %v3875_v34, 0.0  ;;  %v3939_v9 = vmul.f32 0.2, %v3875_v34  ;;  %v1417_v31 = vsel %vm1161_vm5, %v1028_v22, %v1289_v2 }
 0x555   :  { %v3971_v35 = vsel %vm3907_vm4, %v3875_v34, %v3939_v9  ;;  %v1547_v34 = vmul.f32 %v8026_v6, %v1417_v31 }
 0x556   :  { %v4005_v63 = vmul.f32 %v7958_v3, %v3971_v35  ;;  %v3769_v45 = vpop.f32.mrf.mxu3  ;;  %v1029_v27 = vpop.f32.mrf.mxu0 }
 0x557   :  { %v8070_v14 = vpop.f32.mrf.mxu2  ;;  %v3842_v41 = vadd.f32 %v3769_v45, %v3615_v4  ;;  %v1677_v55 = vadd.f32 %v8032_v44, %v1547_v34  ;;  %v1030_v23 = vadd.f32 %v8014_v16, %v1029_v27  ;;  %v3445_v27 = vld [vmem:[#allocation2 + $0x558] sm:$0xff] }
 0x558   :  { %v4039_v57 = vadd.f32 %v7967_v59, %v4005_v63  ;;  %v3323_v37 = vpop.f32.mrf.mxu1 }
 0x559   :  { %v3876_v47 = vadd.f32 %v7946_v48, %v3842_v41  ;;  %1889 = vst.msk [vmem:[#allocation2 + $0x570] sm:$0xff] %vm1681_vm3, %v1677_v55  ;;  %vm1162_vm7 = vcmp.gt.f32.partialorder %v1030_v23, 0.0  ;;  %v1290_v35 = vmul.f32 0.2, %v1030_v23  ;;  %v3390_v41 = vadd.f32 %v3320_v61, %v7712_v51  ;;  %v3444_v55 = vld [vmem:[#allocation2 + $0x550] sm:$0xff] }
 0x55a   :  { %4123 = vst.msk [vmem:[#allocation3 + $0x90] sm:$0xff] %vm4067_vm8, %v4039_v57 }
 0x55b   :  { %vm3908_vm6 = vcmp.gt.f32.partialorder %v3876_v47, 0.0  ;;  %v3940_v9 = vmul.f32 0.2, %v3876_v47  ;;  %5993 = vmatmul.msk.bf16.gmra.mxu1 %vm1681_vm3, %v3233_v28  ;;  %6036 = vmatmul.msk.bf16.gmra.mxu3 %vm1681_vm3, %v3686_v53  ;;  %v1418_v2 = vsel %vm1162_vm7, %v1030_v23, %v1290_v35  ;;  %v3617_v21 = vadd.f32 %v8021_v5, %v3390_v41  ;;  %v3216_v53 = vld [vmem:[#allocation2 + $0x528] sm:$0xff] }
 0x55c   :  { %6016 = vmatmul.msk.bf16.gmra.mxu2 %vm1681_vm3, %v3461_v33  ;;  %v1548_v29 = vmul.f32 %v8026_v6, %v1418_v2  ;;  %v3391_v5 = vadd.f32 %v3323_v37, %v7724_v7 }
 0x55d   :  { %v3972_v42 = vsel %vm3908_vm6, %v3876_v47, %v3940_v9  ;;  %v3215_v47 = vld [vmem:[#allocation2 + $0x520] sm:$0xff] }
 0x55e   :  { %v4006_v60 = vmul.f32 %v7958_v3, %v3972_v42  ;;  %v3772_v22 = vpop.f32.mrf.mxu3  ;;  %v1678_v19 = vadd.f32 %v8032_v44, %v1548_v29  ;;  %v1032_v57 = vpop.f32.mrf.mxu0 }
 0x55f   :  { %v8086_v4 = vpop.f32.mrf.mxu2  ;;  %v3843_v63 = vadd.f32 %v3772_v22, %v3616_v1  ;;  %v1033_v0 = vadd.f32 %v8014_v16, %v1032_v57  ;;  %v3234_v22 = vpack.c.bf16 %v3216_v53, %v3215_v47 }
 0x560   :  { %v4040_v45 = vadd.f32 %v7967_v59, %v4006_v60  ;;  %v3325_v58 = vpop.f32.mrf.mxu1  ;;  %1890 = vst.msk [vmem:[#allocation2 + $0x578] sm:$0xff] %vm1681_vm3, %v1678_v19 }
 0x561   :  { %v3877_v28 = vadd.f32 %v7946_v48, %v3843_v63  ;;  %vm1163_vm10 = vcmp.gt.f32.partialorder %v1033_v0, 0.0  ;;  %v1291_v34 = vmul.f32 0.2, %v1033_v0  ;;  %v3462_v63 = vpack.c.bf16 %v3445_v27, %v3444_v55  ;;  %v3446_v55 = vld [vmem:[#allocation2 + $0x570] sm:$0xff] }
 0x562   :  { %4124 = vst.msk [vmem:[#allocation3 + $0x98] sm:$0xff] %vm4067_vm8, %v4040_v45 }
 0x563   :  { %vm3909_vm9 = vcmp.gt.f32.partialorder %v3877_v28, 0.0  ;;  %v3941_v24 = vmul.f32 0.2, %v3877_v28  ;;  %v1419_v1 = vsel %vm1163_vm10, %v1033_v0, %v1291_v34 }
 0x564   :  { %v1549_v35 = vmul.f32 %v8026_v6, %v1419_v1  ;;  %v3218_v1 = vld [vmem:[#allocation2 + $0x548] sm:$0xff] }
 0x565   :  { %v3973_v31 = vsel %vm3909_vm9, %v3877_v28, %v3941_v24  ;;  %v3618_v28 = vadd.f32 %v8056_v15, %v3391_v5 }
 0x566   :  { %v4007_v51 = vmul.f32 %v7958_v3, %v3973_v31  ;;  %v3774_v61 = vpop.f32.mrf.mxu3  ;;  %v1679_v2 = vadd.f32 %v8032_v44, %v1549_v35  ;;  %v1034_v41 = vpop.f32.mrf.mxu0 }
 0x567   :  { %v8098_v33 = vpop.f32.mrf.mxu2  ;;  %v3844_v9 = vadd.f32 %v3774_v61, %v3617_v21  ;;  %v1035_v7 = vadd.f32 %v8014_v16, %v1034_v41  ;;  %v3392_v61 = vadd.f32 %v3325_v58, %v7730_v10  ;;  %v3447_v27 = vld [vmem:[#allocation2 + $0x578] sm:$0xff]  ;;  %v3217_v58 = vld [vmem:[#allocation2 + $0x540] sm:$0xff] }
 0x568   :  { %v4041_v23 = vadd.f32 %v7967_v59, %v4007_v51  ;;  %v3328_v42 = vpop.f32.mrf.mxu1  ;;  %1891 = vst.msk [vmem:[#allocation2 + $0x580] sm:$0xff] %vm1681_vm3, %v1679_v2  ;;  %v3463_v35 = vpack.c.bf16 %v3447_v27, %v3446_v55 }
 0x569   :  { %v3878_v60 = vadd.f32 %v7946_v48, %v3844_v9  ;;  %vm1164_vm12 = vcmp.gt.f32.partialorder %v1035_v7, 0.0  ;;  %v1292_v19 = vmul.f32 0.2, %v1035_v7  ;;  %v3619_v9 = vadd.f32 %v8070_v14, %v3392_v61  ;;  %v4152_v61 = vld [vmem:[#allocation3 + $0x8] sm:$0xff] }
 0x56a   :  { %4125 = vst.msk [vmem:[#allocation3 + $0xa0] sm:$0xff] %vm4067_vm8, %v4041_v23 }
 0x56b   :  { %vm3910_vm11 = vcmp.gt.f32.partialorder %v3878_v60, 0.0  ;;  %v3942_v45 = vmul.f32 0.2, %v3878_v60  ;;  %5994 = vmatmul.msk.bf16.gmra.mxu1 %vm1681_vm3, %v3234_v22  ;;  %6037 = vmatmul.msk.bf16.gmra.mxu3 %vm1681_vm3, %v3234_v22  ;;  %v1420_v51 = vsel %vm1164_vm12, %v1035_v7, %v1292_v19 }
 0x56c   :  { %6017 = vmatmul.msk.bf16.gmra.mxu2 %vm1681_vm3, %v3462_v63  ;;  %v1550_v15 = vmul.f32 %v8026_v6, %v1420_v51  ;;  %v3235_v63 = vpack.c.bf16 %v3218_v1, %v3217_v58  ;;  %v4151_v51 = vld [vmem:[#allocation3] sm:$0xff] }
 0x56d   :  { %v3974_v37 = vsel %vm3910_vm11, %v3878_v60, %v3942_v45  ;;  %v4159_v55 = vpack.c.bf16 %v4152_v61, %v4151_v51 }
 0x56e   :  { %v4008_v29 = vmul.f32 %v7958_v3, %v3974_v37  ;;  %v3777_v24 = vpop.f32.mrf.mxu3  ;;  %v1680_v53 = vadd.f32 %v8032_v44, %v1550_v15  ;;  %v3393_v44 = vadd.f32 %v3328_v42, %v7739_v18 }
 0x56f   :  { %v8113_v57 = vpop.f32.mrf.mxu2  ;;  %v3845_v0 = vadd.f32 %v3777_v24, %v3618_v28 }
 0x570   :  { %v4042_v31 = vadd.f32 %v7967_v59, %v4008_v29  ;;  %v3330_v21 = vpop.f32.mrf.mxu1  ;;  %1892 = vst.msk [vmem:[#allocation2 + $0x588] sm:$0xff] %vm1681_vm3, %v1680_v53  ;;  %v3620_v41 = vadd.f32 %v8086_v4, %v3393_v44  ;;  %v3220_v53 = vld [vmem:[#allocation2 + $0x568] sm:$0xff] }
 0x571   :  { %v3879_v16 = vadd.f32 %v7946_v48, %v3845_v0  ;;  %v3394_v24 = vadd.f32 %v3330_v21, %v7745_v49 }
 0x572   :  { %4126 = vst.msk [vmem:[#allocation3 + $0xa8] sm:$0xff] %vm4067_vm8, %v4042_v31 }
 0x573   :  { %vm3911_vm13 = vcmp.gt.f32.partialorder %v3879_v16, 0.0  ;;  %v3943_v47 = vmul.f32 0.2, %v3879_v16  ;;  %v3621_v4 = vadd.f32 %v8098_v33, %v3394_v24 }
 0x575   :  { %v3975_v34 = vsel %vm3911_vm13, %v3879_v16, %v3943_v47  ;;  %v3219_v47 = vld [vmem:[#allocation2 + $0x560] sm:$0xff] }
 0x576   :  { %v4009_v23 = vmul.f32 %v7958_v3, %v3975_v34  ;;  %v3779_v10 = vpop.f32.mrf.mxu3 }
 0x577   :  { %v8124_v5 = vpop.f32.mrf.mxu2  ;;  %v3846_v6 = vadd.f32 %v3779_v10, %v3619_v9  ;;  %v3236_v10 = vpack.c.bf16 %v3220_v53, %v3219_v47 }
 0x578   :  { %v4043_v60 = vadd.f32 %v7967_v59, %v4009_v23  ;;  %v3333_v22 = vpop.f32.mrf.mxu1 }
 0x579   :  { %v3880_v14 = vadd.f32 %v7946_v48, %v3846_v6  ;;  %v3395_v27 = vadd.f32 %v3333_v22, %v7763_v54 }
 0x57a   :  { %4127 = vst.msk [vmem:[#allocation3 + $0xd0] sm:$0xff] %vm4067_vm8, %v4043_v60 }
 0x57b   :  { %vm3912_vm14 = vcmp.gt.f32.partialorder %v3880_v14, 0.0  ;;  %v3944_v45 = vmul.f32 0.2, %v3880_v14  ;;  %5995 = vmatmul.msk.bf16.gmra.mxu1 %vm1681_vm3, %v3235_v63  ;;  %6038 = vmatmul.msk.bf16.gmra.mxu3 %vm1681_vm3, %v3235_v63  ;;  %v3622_v1 = vadd.f32 %v8113_v57, %v3395_v27 }
 0x57c   :  { %6018 = vmatmul.msk.bf16.gmra.mxu2 %vm1681_vm3, %v3463_v35 }
 0x57d   :  { %v3976_v2 = vsel %vm3912_vm14, %v3880_v14, %v3944_v45  ;;  %v6482_v45 = vld [vmem:[%s8735_s5 + $0x48] sm:$0xff] }
 0x57e   :  { %v4010_v7 = vmul.f32 %v7958_v3, %v3976_v2  ;;  %v3782_v37 = vpop.f32.mrf.mxu3  ;;  %v6484_v2 = vld [vmem:[%s8735_s5 + $0x58] sm:$0xff]  ;;  %4496 = vmatpush.bf16.msra.mxu2 %v6482_v45  ;;  %v4156_v45 = vld [vmem:[#allocation3 + $0xc8] sm:$0xff] }
 0x57f   :  { %v8135_v18 = vpop.f32.mrf.mxu2  ;;  %v3847_v42 = vadd.f32 %v3782_v37, %v3620_v41  ;;  %v4168_v41 = vld [vmem:[#allocation3 + $0x10] sm:$0xff]  ;;  %4575 = vmatpush.bf16.msra.mxu3 %v6484_v2 }
 0x580   :  { %v4044_v28 = vadd.f32 %v7967_v59, %v4010_v7  ;;  %v3335_v29 = vpop.f32.mrf.mxu1  ;;  %v4169_v7 = vld [vmem:[#allocation3 + $0x18] sm:$0xff] }
 0x581   :  { %v3881_v19 = vadd.f32 %v7946_v48, %v3847_v42  ;;  %v3396_v14 = vadd.f32 %v3335_v29, %v7769_v43  ;;  %v6480_v43 = vld [vmem:[%s8735_s5 + $0x38] sm:$0xff]  ;;  %v4154_v29 = vld [vmem:[#allocation3 + $0x28] sm:$0xff]  ;;  %v4176_v61 = vpack.c.bf16 %v4169_v7, %v4168_v41 }
 0x582   :  { %4128 = vst.msk [vmem:[#allocation3 + $0xd8] sm:$0xff] %vm4067_vm8, %v4044_v28  ;;  %v4153_v28 = vld [vmem:[#allocation3 + $0x20] sm:$0xff]  ;;  %4418 = vmatpush.bf16.msra.mxu1 %v6480_v43 }
 0x583   :  { %vm3913_vm15 = vcmp.gt.f32.partialorder %v3881_v19, 0.0  ;;  %v3945_v0 = vmul.f32 0.2, %v3881_v19  ;;  %v3623_v42 = vadd.f32 %v8124_v5, %v3396_v14  ;;  %v4160_v47 = vpack.c.bf16 %v4154_v29, %v4153_v28 }
 0x585   :  { %v3977_v31 = vsel %vm3913_vm15, %v3881_v19, %v3945_v0  ;;  %v3673_v0 = vld [vmem:[#allocation2 + $0x580] sm:$0xff] }
 0x586   :  { %v4011_v16 = vmul.f32 %v7958_v3, %v3977_v31  ;;  %v3784_v15 = vpop.f32.mrf.mxu3  ;;  %v3674_v31 = vld [vmem:[#allocation2 + $0x588] sm:$0xff] }
 0x587   :  { %v8143_v34 = vpop.f32.mrf.mxu2  ;;  %v3848_v9 = vadd.f32 %v3784_v15, %v3621_v4 }
 0x588   :  { %v4045_v49 = vadd.f32 %v7967_v59, %v4011_v16  ;;  %v3338_v21 = vpop.f32.mrf.mxu1 }
 0x589   :  { %v3882_v23 = vadd.f32 %v7946_v48, %v3848_v9  ;;  %v3397_v53 = vadd.f32 %v3338_v21, %v7778_v12  ;;  %v3690_v9 = vpack.c.bf16 %v3674_v31, %v3673_v0 }
 0x58a   :  { %4129 = vst.msk [vmem:[#allocation3 + $0xe0] sm:$0xff] %vm4067_vm8, %v4045_v49 }
 0x58b   :  { %vm3914_vm0 = vcmp.gt.f32.partialorder %v3882_v23, 0.0  ;;  %v3946_v33 = vmul.f32 0.2, %v3882_v23  ;;  %5996 = vmatmul.msk.bf16.gmra.mxu1 %vm1681_vm3, %v3236_v10  ;;  %6039 = vmatmul.msk.bf16.gmra.mxu3 %vm1681_vm3, %v3236_v10  ;;  %v3624_v27 = vadd.f32 %v8135_v18, %v3397_v53  ;;  %v6479_v53 = vld [vmem:[%s8735_s5 + $0x30] sm:$0xff] }
 0x58c   :  { %6065 = vmatmul.msk.bf16.vlgmr.msrb.gmra.mxu2 %vm4067_vm8, %v4159_v55  ;;  %4419 = vmatpush.bf16.msra.mxu1 %v6479_v53 }
 0x58d   :  { %v3978_v58 = vsel %vm3914_vm0, %v3882_v23, %v3946_v33 }
 0x58e   :  { %v4012_v6 = vmul.f32 %v7958_v3, %v3978_v58  ;;  %v3787_v60 = vpop.f32.mrf.mxu3 }
 0x58f   :  { %v8154_v54 = vpop.f32.mrf.mxu2  ;;  %v3849_v22 = vadd.f32 %v3787_v60, %v3622_v1 }
 0x590   :  { %v4046_v35 = vadd.f32 %v7967_v59, %v4012_v6  ;;  %v3340_v44 = vpop.f32.mrf.mxu1 }
 0x591   :  { %v3883_v63 = vadd.f32 %v7946_v48, %v3849_v22  ;;  %v3398_v1 = vadd.f32 %v3340_v44, %v7784_v26  ;;  %v4170_v22 = vld [vmem:[#allocation3 + $0x30] sm:$0xff] }
 0x592   :  { %4130 = vst.msk [vmem:[#allocation3 + $0xe8] sm:$0xff] %vm4067_vm8, %v4046_v35  ;;  %v4171_v35 = vld [vmem:[#allocation3 + $0x38] sm:$0xff] }
 0x593   :  { %vm3915_vm1 = vcmp.gt.f32.partialorder %v3883_v63, 0.0  ;;  %v3947_v57 = vmul.f32 0.2, %v3883_v63  ;;  %v3625_v14 = vadd.f32 %v8143_v34, %v3398_v1  ;;  %v4177_v26 = vpack.c.bf16 %v4171_v35, %v4170_v22  ;;  %v4172_v22 = vld [vmem:[#allocation3 + $0xd0] sm:$0xff] }
 0x595   :  { %v3979_v37 = vsel %vm3915_vm1, %v3883_v63, %v3947_v57  ;;  %v4155_v63 = vld [vmem:[#allocation3 + $0xc0] sm:$0xff] }
 0x596   :  { %v4013_v24 = vmul.f32 %v7958_v3, %v3979_v37  ;;  %v3789_v19 = vpop.f32.mrf.mxu3  ;;  %v8193_v37 = vpack.c.bf16 %v4156_v45, %v4155_v63 }
 0x597   :  { %v8171_v4 = vpop.f32.mrf.mxu2  ;;  %v3850_v51 = vadd.f32 %v3789_v19, %v3623_v42 }
 0x598   :  { %v4047_v16 = vadd.f32 %v7967_v59, %v4013_v24  ;;  %v3343_v15 = vpop.f32.mrf.mxu1 }
 0x599   :  { %v3884_v5 = vadd.f32 %v7946_v48, %v3850_v51  ;;  %v3399_v42 = vadd.f32 %v3343_v15, %v7793_v25 }
 0x59a   :  { %4131 = vst.msk [vmem:[#allocation3 + $0xf0] sm:$0xff] %vm4067_vm8, %v4047_v16 }
 0x59b   :  { %vm3916_vm2 = vcmp.gt.f32.partialorder %v3884_v5, 0.0  ;;  %v3948_v49 = vmul.f32 0.2, %v3884_v5  ;;  %6040 = vmatmul.msk.bf16.gmra.mxu3 %vm1681_vm3, %v3690_v9  ;;  %6053 = vmatmul.msk.bf16.vlgmr.msrb.gmra.mxu1 %vm4067_vm8, %v4176_v61  ;;  %v3626_v24 = vadd.f32 %v8154_v54, %v3399_v42  ;;  %v6483_v54 = vld [vmem:[%s8735_s5 + $0x50] sm:$0xff]  ;;  %v4294_v9 = vld [vmem:[#allocation3 + $0x40] sm:$0xff] }
 0x59c   :  { %6066 = vmatmul.msk.bf16.gmra.mxu2 %vm4067_vm8, %v4160_v47  ;;  %4576 = vmatpush.bf16.msra.mxu3 %v6483_v54 }
 0x59d   :  { %v3980_v55 = vsel %vm3916_vm2, %v3884_v5, %v3948_v49 }
 0x59e   :  { %v4014_v23 = vmul.f32 %v7958_v3, %v3980_v55  ;;  %v3792_v10 = vpop.f32.mrf.mxu3 }
 0x59f   :  { %v8182_v12 = vpop.f32.mrf.mxu2  ;;  %v3851_v21 = vadd.f32 %v3792_v10, %v3624_v27  ;;  %v4173_v10 = vld [vmem:[#allocation3 + $0xd8] sm:$0xff] }
 0x5a0   :  { %v4048_v33 = vadd.f32 %v7967_v59, %v4014_v23  ;;  %v3345_v58 = vpop.f32.mrf.mxu1 }
 0x5a1   :  { %v3885_v6 = vadd.f32 %v7946_v48, %v3851_v21  ;;  %v3400_v16 = vadd.f32 %v3345_v58, %v7799_v39  ;;  %v4295_v39 = vld [vmem:[#allocation3 + $0x48] sm:$0xff] }
 0x5a2   :  { %4132 = vst.msk [vmem:[#allocation3 + $0xf8] sm:$0xff] %vm4067_vm8, %v4048_v33  ;;  %v4158_v58 = vld [vmem:[#allocation3 + $0xe8] sm:$0xff]  ;;  %v4301_v1 = vpack.c.bf16 %v4295_v39, %v4294_v9  ;;  %v4449_v9 = vld [vmem:[#allocation3 + $0x70] sm:$0xff] }
 0x5a3   :  { %vm3917_vm3 = vcmp.gt.f32.partialorder %v3885_v6, 0.0  ;;  %v3949_v60 = vmul.f32 0.2, %v3885_v6  ;;  %v3627_v55 = vadd.f32 %v8171_v4, %v3400_v16  ;;  %v4157_v4 = vld [vmem:[#allocation3 + $0xe0] sm:$0xff] }
 0x5a4   :  { %v8229_v63 = vpack.c.bf16 %v4158_v58, %v4157_v4 }
 0x5a5   :  { %v3981_v18 = vsel %vm3917_vm3, %v3885_v6, %v3949_v60 }
 0x5a6   :  { %v4015_v57 = vmul.f32 %v7958_v3, %v3981_v18  ;;  %v3794_v2 = vpop.f32.mrf.mxu3 }
 0x5a7   :  { %v8190_v41 = vpop.f32.mrf.mxu2  ;;  %v3852_v7 = vadd.f32 %v3794_v2, %v3625_v14  ;;  %v8226_v14 = vpack.c.bf16 %v4173_v10, %v4172_v22  ;;  %v6486_v22 = vld [vmem:[%s8735_s5 + $0x68] sm:$0xff] }
 0x5a8   :  { %v4049_v44 = vadd.f32 %v7967_v59, %v4015_v57  ;;  %v3348_v43 = vpop.f32.mrf.mxu1  ;;  %4654 = vmatpush.bf16.msrb.mxu1 %v6486_v22 }
 0x5a9   :  { %v3886_v28 = vadd.f32 %v7946_v48, %v3852_v7  ;;  %v3401_v35 = vadd.f32 %v3348_v43, %v7808_v50 }
 0x5aa   :  { %4133 = vst.msk [vmem:[#allocation3 + $0x100] sm:$0xff] %vm4067_vm8, %v4049_v44 }
 0x5ab   :  { %vm3918_vm4 = vcmp.gt.f32.partialorder %v3886_v28, 0.0  ;;  %v3950_v34 = vmul.f32 0.2, %v3886_v28  ;;  %6054 = vmatmul.msk.bf16.gmra.mxu1 %vm4067_vm8, %v4177_v26  ;;  %6081 = vmatmul.msk.bf16.vlgmr.msrb.gmra.mxu3 %vm4067_vm8, %v4160_v47  ;;  %v6481_v47 = vld [vmem:[%s8735_s5 + $0x40] sm:$0xff]  ;;  %v3628_v57 = vadd.f32 %v8182_v12, %v3401_v35 }
 0x5ac   :  { %6067 = vmatmul.msk.bf16.gmra.mxu2 %vm4067_vm8, %v8193_v37 }
 0x5ad   :  { %v3982_v29 = vsel %vm3918_vm4, %v3886_v28, %v3950_v34  ;;  %4497 = vmatpush.bf16.msra.mxu2 %v6481_v47 }
 0x5ae   :  { %v4016_v19 = vmul.f32 %v7958_v3, %v3982_v29  ;;  %v3797_v0 = vpop.f32.mrf.mxu3 }
 0x5af   :  { %v8204_v25 = vpop.f32.mrf.mxu2  ;;  %v3853_v31 = vadd.f32 %v3797_v0, %v3626_v24 }
 0x5b0   :  { %v4050_v51 = vadd.f32 %v7967_v59, %v4016_v19  ;;  %v3350_v61 = vpop.f32.mrf.mxu1 }
 0x5b1   :  { %v3887_v15 = vadd.f32 %v7946_v48, %v3853_v31  ;;  %v3402_v28 = vadd.f32 %v3350_v61, %v7814_v62  ;;  %v4175_v31 = vld [vmem:[#allocation3 + $0xf8] sm:$0xff]  ;;  %v4174_v61 = vld [vmem:[#allocation3 + $0xf0] sm:$0xff] }
 0x5b2   :  { %4134 = vst.msk [vmem:[#allocation3 + $0x108] sm:$0xff] %vm4067_vm8, %v4050_v51 }
 0x5b3   :  { %vm3919_vm5 = vcmp.gt.f32.partialorder %v3887_v15, 0.0  ;;  %v3951_v5 = vmul.f32 0.2, %v3887_v15  ;;  %v3629_v12 = vadd.f32 %v8190_v41, %v3402_v28 }
 0x5b5   :  { %v3983_v49 = vsel %vm3919_vm5, %v3887_v15, %v3951_v5  ;;  %v4450_v15 = vld [vmem:[#allocation3 + $0x78] sm:$0xff]  ;;  %v8251_v5 = vpack.c.bf16 %v4175_v31, %v4174_v61 }
 0x5b6   :  { %v4017_v27 = vmul.f32 %v7958_v3, %v3983_v49  ;;  %v3799_v23 = vpop.f32.mrf.mxu3  ;;  %v4457_v41 = vpack.c.bf16 %v4450_v15, %v4449_v9  ;;  %v8299_v9 = vld [vmem:[%s8736_s4] ss:$0 sm:$0xff] }
 0x5b7   :  { %v8221_v21 = vpop.f32.mrf.mxu2  ;;  %v3854_v33 = vadd.f32 %v3799_v23, %v3627_v55 }
 0x5b8   :  { %v4051_v6 = vadd.f32 %v7967_v59, %v4017_v27  ;;  %v3353_v60 = vpop.f32.mrf.mxu1 }
 0x5b9   :  { %v3888_v18 = vadd.f32 %v7946_v48, %v3854_v33  ;;  %v3403_v54 = vadd.f32 %v3353_v60, %v7823_v38  ;;  %v6488_v60 = vld [vmem:[%s8735_s5 + $0x78] sm:$0xff] }
 0x5ba   :  { %4135 = vst.msk [vmem:[#allocation3 + $0x130] sm:$0xff] %vm4067_vm8, %v4051_v6  ;;  %4733 = vmatpush.bf16.msrb.mxu2 %v6488_v60 }
 0x5bb   :  { %vm3920_vm6 = vcmp.gt.f32.partialorder %v3888_v18, 0.0  ;;  %v3952_v45 = vmul.f32 0.2, %v3888_v18  ;;  %6055 = vmatmul.msk.bf16.gmra.mxu1 %vm4067_vm8, %v8226_v14  ;;  %6082 = vmatmul.msk.bf16.gmra.mxu3 %vm4067_vm8, %v4301_v1  ;;  %v3630_v38 = vadd.f32 %v8204_v25, %v3403_v54  ;;  %v6490_v25 = vld [vmem:[%s8735_s5 + $0x88] sm:$0xff] }
 0x5bc   :  { %6068 = vmatmul.msk.bf16.gmra.mxu2 %vm4067_vm8, %v8229_v63  ;;  %4812 = vmatpush.bf16.msrb.mxu3 %v6490_v25 }
 0x5bd   :  { %v3984_v50 = vsel %vm3920_vm6, %v3888_v18, %v3952_v45  ;;  %v4371_v18 = vld [vmem:[#allocation3 + $0x60] sm:$0xff] }
 0x5be   :  { %v4018_v2 = vmul.f32 %v7958_v3, %v3984_v50  ;;  %v3802_v7 = vpop.f32.mrf.mxu3 }
 0x5bf   :  { %v8238_v26 = vpop.f32.mrf.mxu2  ;;  %v3855_v44 = vadd.f32 %v3802_v7, %v3628_v57 }
 0x5c0   :  { %v4052_v43 = vadd.f32 %v7967_v59, %v4018_v2  ;;  %v3355_v42 = vpop.f32.mrf.mxu1  ;;  %v4299_v2 = vld [vmem:[#allocation3 + $0x108] sm:$0xff] }
 0x5c1   :  { %v3889_v34 = vadd.f32 %v7946_v48, %v3855_v44  ;;  %v3404_v1 = vadd.f32 %v3355_v42, %v7825_v46  ;;  %v4372_v46 = vld [vmem:[#allocation3 + $0x68] sm:$0xff]  ;;  %v4452_v42 = vld [vmem:[#allocation3 + $0x98] sm:$0xff]  ;;  %v4453_v22 = vld [vmem:[#allocation3 + $0x130] sm:$0xff] }
 0x5c2   :  { %4136 = vst.msk [vmem:[#allocation3 + $0x138] sm:$0xff] %vm4067_vm8, %v4052_v43  ;;  %v4379_v43 = vpack.c.bf16 %v4372_v46, %v4371_v18 }
 0x5c3   :  { %vm3921_vm7 = vcmp.gt.f32.partialorder %v3889_v34, 0.0  ;;  %v3953_v29 = vmul.f32 0.2, %v3889_v34  ;;  %v3631_v45 = vadd.f32 %v8221_v21, %v3404_v1  ;;  %v4451_v21 = vld [vmem:[#allocation3 + $0x90] sm:$0xff]  ;;  %v4373_v1 = vld [vmem:[#allocation3 + $0x80] sm:$0xff] }
 0x5c5   :  { %v3985_v24 = vsel %vm3921_vm7, %v3889_v34, %v3953_v29  ;;  %v4298_v29 = vld [vmem:[#allocation3 + $0x100] sm:$0xff] }
 0x5c6   :  { %v4019_v19 = vmul.f32 %v7958_v3, %v3985_v24  ;;  %v3804_v0 = vpop.f32.mrf.mxu3 }
 0x5c7   :  { %v8246_v51 = vpop.f32.mrf.mxu2  ;;  %v3856_v16 = vadd.f32 %v3804_v0, %v3629_v12  ;;  %v4458_v0 = vpack.c.bf16 %v4452_v42, %v4451_v21 }
 0x5c8   :  { %v4053_v47 = vadd.f32 %v7967_v59, %v4019_v19  ;;  %v3358_v62 = vpop.f32.mrf.mxu1  ;;  %v8283_v19 = vpack.c.bf16 %v4299_v2, %v4298_v29 }
 0x5c9   :  { %v3890_v53 = vadd.f32 %v7946_v48, %v3856_v16  ;;  %v3405_v24 = vadd.f32 %v3358_v62, %v7838_v30 }
 0x5ca   :  { %4137 = vst.msk [vmem:[#allocation3 + $0x140] sm:$0xff] %vm4067_vm8, %v4053_v47 }
 0x5cb   :  { %vm3922_vm9 = vcmp.gt.f32.partialorder %v3890_v53, 0.0  ;;  %v3954_v39 = vmul.f32 0.2, %v3890_v53  ;;  %6056 = vmatmul.msk.bf16.gmra.mxu1 %vm4067_vm8, %v8251_v5  ;;  %6083 = vmatmul.msk.bf16.gmra.mxu3 %vm4067_vm8, %v8229_v63  ;;  %v3632_v30 = vadd.f32 %v8238_v26, %v3405_v24  ;;  %v4375_v24 = vld [vmem:[#allocation3 + $0x120] sm:$0xff] }
 0x5cc   :  { %6113 = vmatmul.msk.bf16.vlgmr.msra.gmra.mxu2 %vm4067_vm8, %v4457_v41 }
 0x5cd   :  { %v3986_v49 = vsel %vm3922_vm9, %v3890_v53, %v3954_v39 }
 0x5ce   :  { %v4020_v55 = vmul.f32 %v7958_v3, %v3986_v49  ;;  %v3807_v27 = vpop.f32.mrf.mxu3 }
 0x5cf   :  { %v8261_v23 = vpop.f32.mrf.mxu2  ;;  %v3857_v10 = vadd.f32 %v3807_v27, %v3630_v38  ;;  %v4374_v38 = vld [vmem:[#allocation3 + $0x88] sm:$0xff] }
 0x5d0   :  { %v4054_v33 = vadd.f32 %v7967_v59, %v4020_v55  ;;  %v3360_v58 = vpop.f32.mrf.mxu1  ;;  %v4380_v25 = vpack.c.bf16 %v4374_v38, %v4373_v1 }
 0x5d1   :  { %v3891_v6 = vadd.f32 %v7946_v48, %v3857_v10  ;;  %v3406_v53 = vadd.f32 %v3360_v58, %v7842_v56  ;;  %v4454_v10 = vld [vmem:[#allocation3 + $0x138] sm:$0xff] }
 0x5d2   :  { %4138 = vst.msk [vmem:[#allocation3 + $0x148] sm:$0xff] %vm4067_vm8, %v4054_v33  ;;  %v8315_v33 = vld [vmem:[%s8736_s4 + $0x2] ss:$0 sm:$0xff] }
 0x5d3   :  { %vm3923_vm10 = vcmp.gt.f32.partialorder %v3891_v6, 0.0  ;;  %v3955_v35 = vmul.f32 0.2, %v3891_v6  ;;  %v3633_v39 = vadd.f32 %v8246_v51, %v3406_v53  ;;  %v4530_v53 = vld [vmem:[#allocation3 + $0xa0] sm:$0xff] }
 0x5d5   :  { %v3987_v4 = vsel %vm3923_vm10, %v3891_v6, %v3955_v35  ;;  %v4459_v35 = vpack.c.bf16 %v4454_v10, %v4453_v22 }
 0x5d6   :  { %v4021_v50 = vmul.f32 %v7958_v3, %v3987_v4  ;;  %v3809_v57 = vpop.f32.mrf.mxu3 }
 0x5d7   :  { %v8278_v7 = vpop.f32.mrf.mxu2  ;;  %v3858_v44 = vadd.f32 %v3809_v57, %v3631_v45 }
 0x5d8   :  { %v4055_v28 = vadd.f32 %v7967_v59, %v4021_v50  ;;  %v3363_v34 = vpop.f32.mrf.mxu1 }
 0x5d9   :  { %v3892_v12 = vadd.f32 %v7946_v48, %v3858_v44  ;;  %v3407_v6 = vadd.f32 %v3363_v34, %v7855_v36  ;;  %v6485_v34 = vld [vmem:[%s8735_s5 + $0x60] sm:$0xff] }
 0x5da   :  { %4139 = vst.msk [vmem:[#allocation3 + $0x150] sm:$0xff] %vm4067_vm8, %v4055_v28  ;;  %v6487_v28 = vld [vmem:[%s8735_s5 + $0x70] sm:$0xff]  ;;  %4655 = vmatpush.bf16.msrb.mxu1 %v6485_v34 }
 0x5db   :  { %vm3924_vm11 = vcmp.gt.f32.partialorder %v3892_v12, 0.0  ;;  %v3956_v31 = vmul.f32 0.2, %v3892_v12  ;;  %6084 = vmatmul.msk.bf16.gmra.mxu3 %vm4067_vm8, %v8283_v19  ;;  %6097 = vmatmul.msk.bf16.vlgmr.msra.gmra.mxu1 %vm4067_vm8, %v4379_v43  ;;  %v3634_v4 = vadd.f32 %v8261_v23, %v3407_v6  ;;  %v6489_v23 = vld [vmem:[%s8735_s5 + $0x80] sm:$0xff] }
 0x5dc   :  { %6114 = vmatmul.msk.bf16.gmra.mxu2 %vm4067_vm8, %v4458_v0  ;;  %4813 = vmatpush.bf16.msrb.mxu3 %v6489_v23 }
 0x5dd   :  { %v3988_v16 = vsel %vm3924_vm11, %v3892_v12, %v3956_v31  ;;  %4734 = vmatpush.bf16.msrb.mxu2 %v6487_v28 }
 0x5de   :  { %v4022_v48 = vmul.f32 %v7958_v3, %v3988_v16  ;;  %v3812_v15 = vpop.f32.mrf.mxu3  ;;  %v4531_v16 = vld [vmem:[#allocation3 + $0xa8] sm:$0xff] }
 0x5df   :  { %v8292_v47 = vpop.f32.mrf.mxu2  ;;  %v3859_v62 = vadd.f32 %v3812_v15, %v3632_v30 }
 0x5e0   :  { %v4056_v61 = vadd.f32 %v7967_v59, %v4022_v48  ;;  %v3365_v54 = vpop.f32.mrf.mxu1  ;;  %v8307_v59 = vld [vmem:[%s8736_s4 + $0x1] ss:$0 sm:$0xff] }
 0x5e1   :  { %v3893_v41 = vadd.f32 %v8299_v9, %v3859_v62  ;;  %v3408_v43 = vadd.f32 %v3365_v54, %v7861_v17  ;;  %v4376_v17 = vld [vmem:[#allocation3 + $0x128] sm:$0xff] }
 0x5e2   :  { %4140 = vst.msk [vmem:[#allocation3 + $0x158] sm:$0xff] %vm4067_vm8, %v4056_v61  ;;  %v4381_v15 = vpack.c.bf16 %v4376_v17, %v4375_v24 }
 0x5e3   :  { %vm3925_vm12 = vcmp.gt.f32.partialorder %v3893_v41, 0.0  ;;  %v3957_v3 = vmul.f32 0.2, %v3893_v41  ;;  %v3635_v21 = vadd.f32 %v8278_v7, %v3408_v43  ;;  %v4537_v7 = vpack.c.bf16 %v4531_v16, %v4530_v53 }
 0x5e5   :  { %v3989_v26 = vsel %vm3925_vm12, %v3893_v41, %v3957_v3 }
 0x5e6   :  { %v4023_v56 = vmul.f32 %v8307_v59, %v3989_v26  ;;  %v3814_v49 = vpop.f32.mrf.mxu3  ;;  %v4455_v26 = vld [vmem:[#allocation3 + $0x150] sm:$0xff] }
 0x5e7   :  { %v8310_v55 = vpop.f32.mrf.mxu2  ;;  %v3860_v27 = vadd.f32 %v3814_v49, %v3633_v39 }
 0x5e8   :  { %v4057_v51 = vadd.f32 %v8315_v33, %v4023_v56  ;;  %v3368_v58 = vpop.f32.mrf.mxu1 }
 0x5e9   :  { %v3894_v60 = vadd.f32 %v8299_v9, %v3860_v27  ;;  %v4456_v62 = vld [vmem:[#allocation3 + $0x158] sm:$0xff]  ;;  %v3409_v41 = vadd.f32 %v3368_v58, %v7874_v11 }
 0x5ea   :  { %4141 = vst.msk [vmem:[#allocation3 + $0x160] sm:$0xff] %vm4067_vm8, %v4057_v51  ;;  %v4460_v39 = vpack.c.bf16 %v4456_v62, %v4455_v26 }
 0x5eb   :  { %vm3926_vm13 = vcmp.gt.f32.partialorder %v3894_v60, 0.0  ;;  %v3958_v18 = vmul.f32 0.2, %v3894_v60  ;;  %6098 = vmatmul.msk.bf16.gmra.mxu1 %vm4067_vm8, %v4380_v25  ;;  %6129 = vmatmul.msk.bf16.vlgmr.msra.gmra.mxu3 %vm4067_vm8, %v4380_v25  ;;  %v3636_v38 = vadd.f32 %v8292_v47, %v3409_v41 }
 0x5ec   :  { %6115 = vmatmul.msk.bf16.gmra.mxu2 %vm4067_vm8, %v4459_v35 }
 0x5ed   :  { %v3990_v46 = vsel %vm3926_vm13, %v3894_v60, %v3958_v18 }
 0x5ee   :  { %v4024_v36 = vmul.f32 %v8307_v59, %v3990_v46  ;;  %v3817_v45 = vpop.f32.mrf.mxu3  ;;  %v4378_v46 = vld [vmem:[#allocation3 + $0x148] sm:$0xff] }
 0x5ef   :  { %v8326_v50 = vpop.f32.mrf.mxu2  ;;  %v3861_v57 = vadd.f32 %v3817_v45, %v3634_v4 }
 0x5f0   :  { %v4058_v2 = vadd.f32 %v8315_v33, %v4024_v36  ;;  %v3370_v44 = vpop.f32.mrf.mxu1 }
 0x5f1   :  { %v3895_v42 = vadd.f32 %v8299_v9, %v3861_v57  ;;  %v3410_v6 = vadd.f32 %v3370_v44, %v7880_v20 }
 0x5f2   :  { %4142 = vst.msk [vmem:[#allocation3 + $0x168] sm:$0xff] %vm4067_vm8, %v4058_v2  ;;  %v4377_v2 = vld [vmem:[#allocation3 + $0x140] sm:$0xff] }
 0x5f3   :  { %vm3927_vm14 = vcmp.gt.f32.partialorder %v3895_v42, 0.0  ;;  %v3959_v29 = vmul.f32 0.2, %v3895_v42  ;;  %v3637_v47 = vadd.f32 %v8310_v55, %v3410_v6  ;;  %v4382_v43 = vpack.c.bf16 %v4378_v46, %v4377_v2 }
 0x5f5   :  { %v3991_v12 = vsel %vm3927_vm14, %v3895_v42, %v3959_v29 }
 0x5f6   :  { %v4025_v0 = vmul.f32 %v8307_v59, %v3991_v12  ;;  %v3819_v31 = vpop.f32.mrf.mxu3 }
 0x5f7   :  { %v8343_v30 = vpop.f32.mrf.mxu2  ;;  %v3862_v48 = vadd.f32 %v3819_v31, %v3635_v21 }
 0x5f8   :  { %v4059_v61 = vadd.f32 %v8315_v33, %v4025_v0  ;;  %v3373_v54 = vpop.f32.mrf.mxu1 }
 0x5f9   :  { %v3896_v3 = vadd.f32 %v8299_v9, %v3862_v48  ;;  %v3411_v20 = vadd.f32 %v3373_v54, %v7899_v52  ;;  %v4535_v48 = vld [vmem:[#allocation3 + $0x168] sm:$0xff] }
 0x5fa   :  { %4143 = vst.msk [vmem:[#allocation3 + $0x190] sm:$0xff] %vm4067_vm8, %v4059_v61 }
 0x5fb   :  { %vm3928_vm15 = vcmp.gt.f32.partialorder %v3896_v3, 0.0  ;;  %v3960_v56 = vmul.f32 0.2, %v3896_v3  ;;  %6099 = vmatmul.msk.bf16.gmra.mxu1 %vm4067_vm8, %v4381_v15  ;;  %6130 = vmatmul.msk.bf16.gmra.mxu3 %vm4067_vm8, %v4537_v7  ;;  %v3638_v28 = vadd.f32 %v8326_v50, %v3411_v20 }
 0x5fc   :  { %6116 = vmatmul.msk.bf16.gmra.mxu2 %vm4067_vm8, %v4460_v39 }
 0x5fd   :  { %v3992_v49 = vsel %vm3928_vm15, %v3896_v3, %v3960_v56 }
 0x5fe   :  { %v4026_v11 = vmul.f32 %v8307_v59, %v3992_v49  ;;  %v3822_v27 = vpop.f32.mrf.mxu3 }
 0x5ff   :  { %v8354_v10 = vpop.f32.mrf.mxu2  ;;  %v3863_v51 = vadd.f32 %v3822_v27, %v3636_v38 }
 0x600   :  { %v4060_v58 = vadd.f32 %v8315_v33, %v4026_v11  ;;  %v3375_v1 = vpop.f32.mrf.mxu1 }
 0x601   :  { %v3897_v60 = vadd.f32 %v8299_v9, %v3863_v51  ;;  %v3412_v12 = vadd.f32 %v3375_v1, %v7904_v13  ;;  %v4534_v13 = vld [vmem:[#allocation3 + $0x160] sm:$0xff]  ;;  %v4690_v46 = vld [vmem:[#allocation3 + $0x190] sm:$0xff] }
 0x602   :  { %4144 = vst.msk [vmem:[#allocation3 + $0x198] sm:$0xff] %vm4067_vm8, %v4060_v58  ;;  %v4539_v26 = vpack.c.bf16 %v4535_v48, %v4534_v13 }
 0x603   :  { %vm3929_vm0 = vcmp.gt.f32.partialorder %v3897_v60, 0.0  ;;  %v3961_v25 = vmul.f32 0.2, %v3897_v60  ;;  %v3639_v31 = vadd.f32 %v8343_v30, %v3412_v12 }
 0x605   :  { %v3993_v22 = vsel %vm3929_vm0, %v3897_v60, %v3961_v25 }
 0x606   :  { %v4027_v35 = vmul.f32 %v8307_v59, %v3993_v22  ;;  %v3824_v18 = vpop.f32.mrf.mxu3 }
 0x607   :  { %v3607_v4 = vpop.f32.mrf.mxu2  ;;  %v3864_v36 = vadd.f32 %v3824_v18, %v3637_v47 }
 0x608   :  { %v4061_v45 = vadd.f32 %v8315_v33, %v4027_v35  ;;  %v3378_v57 = vpop.f32.mrf.mxu1 }
 0x609   :  { %v3898_v44 = vadd.f32 %v8299_v9, %v3864_v36  ;;  %v3413_v53 = vadd.f32 %v3378_v57, %v7923_v40  ;;  %v4691_v22 = vld [vmem:[#allocation3 + $0x198] sm:$0xff] }
 0x60a   :  { %4145 = vst.msk [vmem:[#allocation3 + $0x1a0] sm:$0xff] %vm4067_vm8, %v4061_v45  ;;  %v4696_v36 = vpack.c.bf16 %v4691_v22, %v4690_v46  ;;  %v6494_v22 = vld [vmem:[%s8738_s7 + $0x18] sm:$0xff] }
 0x60b   :  { %vm3930_vm1 = vcmp.gt.f32.partialorder %v3898_v44, 0.0  ;;  %v3962_v42 = vmul.f32 0.2, %v3898_v44  ;;  %6100 = vmatmul.msk.bf16.gmra.mxu1 %vm4067_vm8, %v4382_v43  ;;  %6131 = vmatmul.msk.bf16.gmra.mxu3 %vm4067_vm8, %v4382_v43  ;;  %v3640_v39 = vadd.f32 %v8354_v10, %v3413_v53 }
 0x60c   :  { %6161 = vmatmul.msk.bf16.vlgmr.msrb.gmra.mxu2 %vm4067_vm8, %v8226_v14 }
 0x60d   :  { %v3994_v55 = vsel %vm3930_vm1, %v3898_v44, %v3962_v42  ;;  %v4611_v42 = vld [vmem:[#allocation3 + $0x180] sm:$0xff]  ;;  %5037 = vmatpush.bf16.msra.mxu2 %v6494_v22 }
 0x60e   :  { %v4028_v23 = vmul.f32 %v8307_v59, %v3994_v55  ;;  %v3827_v52 = vpop.f32.mrf.mxu3  ;;  %v4612_v55 = vld [vmem:[#allocation3 + $0x188] sm:$0xff]  ;;  %v8562_v22 = vld [vmem:[%s8737_s6] ss:$0 sm:$0xff] }
 0x60f   :  { %v3865_v34 = vadd.f32 %v3827_v52, %v3638_v28  ;;  %v4271_v29 = vpop.f32.mrf.mxu2 }
 0x610   :  { %v4062_v24 = vadd.f32 %v8315_v33, %v4028_v23  ;;  %v3380_v17 = vpop.f32.mrf.mxu1  ;;  %v4617_v23 = vpack.c.bf16 %v4612_v55, %v4611_v42 }
 0x611   :  { %v3899_v21 = vadd.f32 %v8299_v9, %v3865_v34  ;;  %v3414_v51 = vadd.f32 %v3380_v17, %v7935_v8 }
 0x612   :  { %4146 = vst.msk [vmem:[#allocation3 + $0x1a8] sm:$0xff] %vm4067_vm8, %v4062_v24 }
 0x613   :  { %vm3931_vm2 = vcmp.gt.f32.partialorder %v3899_v21, 0.0  ;;  %v3963_v0 = vmul.f32 0.2, %v3899_v21  ;;  %v3641_v1 = vadd.f32 %v3607_v4, %v3414_v51 }
 0x615   :  { %v3995_v14 = vsel %vm3931_vm2, %v3899_v21, %v3963_v0 }
 0x616   :  { %v4029_v50 = vmul.f32 %v8307_v59, %v3995_v14  ;;  %v3829_v16 = vpop.f32.mrf.mxu3 }
 0x617   :  { %v3866_v15 = vadd.f32 %v3829_v16, %v3639_v31  ;;  %v8378_v62 = vpop.f32.mrf.mxu2  ;;  %v4613_v16 = vld [vmem:[#allocation3 + $0x1a0] sm:$0xff] }
 0x618   :  { %v4063_v61 = vadd.f32 %v8315_v33, %v4029_v50  ;;  %v4218_v54 = vpop.f32.mrf.mxu1 }
 0x619   :  { %v3900_v41 = vadd.f32 %v8299_v9, %v3866_v15  ;;  %v4272_v3 = vadd.f32 %v4271_v29, %v4218_v54  ;;  %v4614_v14 = vld [vmem:[#allocation3 + $0x1a8] sm:$0xff] }
 0x61a   :  { %4147 = vst.msk [vmem:[#allocation3 + $0x1b0] sm:$0xff] %vm4067_vm8, %v4063_v61  ;;  %v4618_v15 = vpack.c.bf16 %v4614_v14, %v4613_v16  ;;  %v6491_v14 = vld [vmem:[%s8738_s7] sm:$0xff] }
 0x61b   :  { %vm3932_vm3 = vcmp.gt.f32.partialorder %v3900_v41, 0.0  ;;  %v3964_v30 = vmul.f32 0.2, %v3900_v41  ;;  %6132 = vmatmul.msk.bf16.gmra.mxu3 %vm4067_vm8, %v4539_v26  ;;  %6145 = vmatmul.msk.bf16.vlgmr.msrb.gmra.mxu1 %vm4067_vm8, %v8193_v37 }
 0x61c   :  { %6162 = vmatmul.msk.bf16.gmra.mxu2 %vm4067_vm8, %v8251_v5 }
 0x61d   :  { %v3996_v7 = vsel %vm3932_vm3, %v3900_v41, %v3964_v30  ;;  %vm5510_vm3 = vcmask 7168  }
 0x61e   :  { %v4030_v40 = vmul.f32 %v8307_v59, %v3996_v7  ;;  %v3832_v56 = vpop.f32.mrf.mxu3 }
 0x61f   :  { %v3867_v49 = vadd.f32 %v3832_v56, %v3640_v39  ;;  %v4276_v38 = vpop.f32.mrf.mxu2 }
 0x620   :  { %v4064_v11 = vadd.f32 %v8315_v33, %v4030_v40  ;;  %v8392_v27 = vpop.f32.mrf.mxu1 }
 0x621   :  { %v3901_v58 = vadd.f32 %v8299_v9, %v3867_v49  ;;  %v4692_v29 = vld [vmem:[#allocation3 + $0x1b0] sm:$0xff]  ;;  %v4274_v16 = vadd.f32 %v8378_v62, %v8392_v27 }
 0x622   :  { %4148 = vst.msk [vmem:[#allocation3 + $0x1b8] sm:$0xff] %vm4067_vm8, %v4064_v11 }
 0x623   :  { %vm3933_vm4 = vcmp.gt.f32.partialorder %v3901_v58, 0.0  ;;  %v3965_v37 = vmul.f32 0.2, %v3901_v58 }
 0x625   :  { %v3997_v5 = vsel %vm3933_vm4, %v3901_v58, %v3965_v37 }
 0x626   :  { %v4031_v10 = vmul.f32 %v8307_v59, %v3997_v5  ;;  %v3834_v6 = vpop.f32.mrf.mxu3 }
 0x627   :  { %v3868_v60 = vadd.f32 %v3834_v6, %v3641_v1  ;;  %v8398_v25 = vpop.f32.mrf.mxu2 }
 0x628   :  { %v4065_v47 = vadd.f32 %v8315_v33, %v4031_v10  ;;  %v4223_v35 = vpop.f32.mrf.mxu1 }
 0x629   :  { %v3902_v8 = vadd.f32 %v8299_v9, %v3868_v60  ;;  %v4277_v18 = vadd.f32 %v4276_v38, %v4223_v35  ;;  %v4693_v52 = vld [vmem:[#allocation3 + $0x1b8] sm:$0xff] }
 0x62a   :  { %4149 = vst.msk [vmem:[#allocation3 + $0x1c0] sm:$0xff] %vm4067_vm8, %v4065_v47  ;;  %v4697_v24 = vpack.c.bf16 %v4693_v52, %v4692_v29  ;;  %v6502_v47 = vld [vmem:[%s8738_s7 + $0x58] sm:$0xff]  ;;  %v6497_v52 = vld [vmem:[%s8738_s7 + $0x30] sm:$0xff] }
 0x62b   :  { %vm3934_vm5 = vcmp.gt.f32.partialorder %v3902_v8, 0.0  ;;  %v3966_v45 = vmul.f32 0.2, %v3902_v8  ;;  %6146 = vmatmul.msk.bf16.gmra.mxu1 %vm4067_vm8, %v8229_v63  ;;  %6177 = vmatmul.msk.bf16.vlgmr.msrb.gmra.mxu3 %vm4067_vm8, %v8229_v63 }
 0x62c   :  { %6163 = vmatmul.msk.bf16.gmra.mxu2 %vm4067_vm8, %v4696_v36  ;;  %5091 = vmatpush.bf16.msra.mxu3 %v6502_v47  ;;  %v6508_v47 = vld [vmem:[%s8738_s7 + $0x88] sm:$0xff] }
 0x62d   :  { %v3998_v4 = vsel %vm3934_vm5, %v3902_v8, %v3966_v45  ;;  %v6498_v8 = vld [vmem:[%s8738_s7 + $0x38] sm:$0xff] }
 0x62e   :  { %v4032_v57 = vmul.f32 %v8307_v59, %v3998_v4  ;;  %v4342_v2 = vpop.f32.mrf.mxu3  ;;  %4996 = vmatpush.bf16.msra.mxu1 %v6498_v8  ;;  %v6493_v4 = vld [vmem:[%s8738_s7 + $0x10] sm:$0xff] }
 0x62f   :  { %v4281_v9 = vpop.f32.mrf.mxu2  ;;  %v8409_v20 = vadd.f32 %v4342_v2, %v4272_v3  ;;  %5038 = vmatpush.bf16.msra.mxu2 %v6493_v4 }
 0x630   :  { %v4066_v44 = vadd.f32 %v8315_v33, %v4032_v57  ;;  %v8412_v43 = vpop.f32.mrf.mxu1  ;;  %v6501_v57 = vld [vmem:[%s8738_s7 + $0x50] sm:$0xff] }
 0x631   :  { %v4771_v7 = vld [vmem:[#allocation3 + $0x1c0] sm:$0xff]  ;;  %5092 = vmatpush.bf16.msra.mxu3 %v6501_v57 }
 0x632   :  { %4150 = vst.msk [vmem:[#allocation3 + $0x1c8] sm:$0xff] %vm4067_vm8, %v4066_v44  ;;  %4997 = vmatpush.bf16.msra.mxu1 %v6497_v52 }
 0x636   :  { %v8415_v28 = vpop.f32.mrf.mxu3 }
 0x637   :  { %v8417_v63 = vpop.f32.mrf.mxu2 }
 0x638   :  { %v4228_v34 = vpop.f32.mrf.mxu1 }
 0x639   :  { %v4282_v59 = vadd.f32 %v4281_v9, %v4228_v34  ;;  %v4772_v3 = vld [vmem:[#allocation3 + $0x1c8] sm:$0xff] }
 0x63a   :  { %v4776_v39 = vpack.c.bf16 %v4772_v3, %v4771_v7  ;;  %v6492_v34 = vld [vmem:[%s8738_s7 + $0x8] sm:$0xff]  ;;  %v6509_v7 = vld [vmem:[%s8738_s7 + $0x90] sm:$0xff] }
 0x63b   :  { %6147 = vmatmul.msk.bf16.gmra.mxu1 %vm4067_vm8, %v4617_v23  ;;  %6178 = vmatmul.msk.bf16.gmra.mxu3 %vm4067_vm8, %v8283_v19 }
 0x63c   :  { %6164 = vmatmul.msk.bf16.gmra.mxu2 %vm4067_vm8, %v4697_v24 }
 0x63d   :  { %5039 = vmatpush.bf16.msra.mxu2 %v6492_v34  ;;  %v8575_v34 = vld [vmem:[%s8737_s6 + $0x1] ss:$0 sm:$0xff] }
 0x63e   :  { %v4347_v33 = vpop.f32.mrf.mxu3 }
 0x63f   :  { %v4286_v17 = vpop.f32.mrf.mxu2  ;;  %v8423_v12 = vadd.f32 %v4347_v33, %v4277_v18 }
 0x640   :  { %v8425_v21 = vpop.f32.mrf.mxu1 }
 0x641   :  { %5040 = vmatpush.bf16.msra.mxu2 %v6491_v14 }
 0x646   :  { %v8427_v0 = vpop.f32.mrf.mxu3 }
 0x647   :  { %v4288_v31 = vpop.f32.mrf.mxu2 }
 0x648   :  { %v4233_v50 = vpop.f32.mrf.mxu1 }
 0x649   :  { %v4287_v48 = vadd.f32 %v4286_v17, %v4233_v50  ;;  %v6496_v17 = vld [vmem:[%s8738_s7 + $0x28] sm:$0xff]  ;;  %v6510_v50 = vld [vmem:[%s8738_s7 + $0x98] sm:$0xff] }
 0x64a   :  { %4998 = vmatpush.bf16.msra.mxu1 %v6496_v17  ;;  %5202 = vmatpush.bf16.msrb.mxu2 %v6510_v50  ;;  %v6503_v50 = vld [vmem:[%s8738_s7 + $0x60] sm:$0xff] }
 0x64b   :  { %6148 = vmatmul.msk.bf16.gmra.mxu1 %vm4067_vm8, %v4618_v15  ;;  %6179 = vmatmul.msk.bf16.gmra.mxu3 %vm4067_vm8, %v4618_v15 }
 0x64e   :  { %v4352_v19 = vpop.f32.mrf.mxu3  ;;  %5203 = vmatpush.bf16.msrb.mxu2 %v6509_v7 }
 0x64f   :  { %v8431_v61 = vadd.f32 %v4352_v19, %v4282_v59  ;;  %v8433_v54 = vpop.f32.mrf.mxu2  ;;  %v4363_v19 = vadd.f32 %v8415_v28, %v4274_v16 }
 0x650   :  { %v4235_v13 = vpop.f32.mrf.mxu1 }
 0x651   :  { %v4289_v53 = vadd.f32 %v4288_v31, %v4235_v13  ;;  %v6500_v31 = vld [vmem:[%s8738_s7 + $0x48] sm:$0xff] }
 0x652   :  { %5093 = vmatpush.bf16.msra.mxu3 %v6500_v31  ;;  %5204 = vmatpush.bf16.msrb.mxu2 %v6508_v47 }
 0x656   :  { %v8435_v41 = vpop.f32.mrf.mxu3 }
 0x657   :  { %v8437_v26 = vpop.f32.mrf.mxu2 }
 0x658   :  { %v4421_v30 = vpop.f32.mrf.mxu1 }
 0x659   :  { %v4441_v24 = vadd.f32 %v4421_v30, %v8409_v20  ;;  %v6495_v20 = vld [vmem:[%s8738_s7 + $0x20] sm:$0xff] }
 0x65a   :  { %4999 = vmatpush.bf16.msra.mxu1 %v6495_v20  ;;  %v6514_v20 = vld [vmem:[%s8738_s7 + $0xb8] sm:$0xff] }
 0x65b   :  { %6180 = vmatmul.msk.bf16.gmra.mxu3 %vm4067_vm8, %v4776_v39  ;;  %vm4897_vm8 = vcmask 523264   ;;  %v6499_v39 = vld [vmem:[%s8738_s7 + $0x40] sm:$0xff] }
 0x65c   :  { %4898 = vst.msk [vmem:[#allocation4] sm:$0xff] %vm4897_vm8, %v8789_v32  ;;  %5094 = vmatpush.bf16.msra.mxu3 %v6499_v39 }
 0x65d   :  { %4899 = vst.msk [vmem:[#allocation4 + $0x8] sm:$0xff] %vm4897_vm8, %v8789_v32 }
 0x65e   :  { %v4357_v40 = vpop.f32.mrf.mxu3  ;;  %4900 = vst.msk [vmem:[#allocation4 + $0x10] sm:$0xff] %vm4897_vm8, %v8789_v32 }
 0x65f   :  { %v8440_v56 = vadd.f32 %v4357_v40, %v4287_v48  ;;  %v8444_v38 = vpop.f32.mrf.mxu2  ;;  %4901 = vst.msk [vmem:[#allocation4 + $0x18] sm:$0xff] %vm4897_vm8, %v8789_v32  ;;  %v4519_v48 = vadd.f32 %v8433_v54, %v4441_v24  ;;  %v6506_v54 = vld [vmem:[%s8738_s7 + $0x78] sm:$0xff] }
 0x660   :  { %v8442_v49 = vpop.f32.mrf.mxu1  ;;  %4902 = vst.msk [vmem:[#allocation4 + $0x20] sm:$0xff] %vm4897_vm8, %v8789_v32  ;;  %5147 = vmatpush.bf16.msrb.mxu1 %v6506_v54  ;;  %5258 = vmatpush.bf16.msrb.mxu3 %v6514_v20 }
 0x661   :  { %4903 = vst.msk [vmem:[#allocation4 + $0x28] sm:$0xff] %vm4897_vm8, %v8789_v32  ;;  %v4442_v3 = vadd.f32 %v8442_v49, %v4363_v19  ;;  %v6505_v49 = vld [vmem:[%s8738_s7 + $0x70] sm:$0xff] }
 0x662   :  { %4917 = vst.msk [vmem:[#allocation4 + $0x40] sm:$0xff] %vm4897_vm8, %v8789_v32 }
 0x663   :  { %4918 = vst.msk [vmem:[#allocation4 + $0x48] sm:$0xff] %vm4897_vm8, %v8789_v32 }
 0x664   :  { %4919 = vst.msk [vmem:[#allocation4 + $0x80] sm:$0xff] %vm4897_vm8, %v8789_v32  ;;  %5148 = vmatpush.bf16.msrb.mxu1 %v6505_v49 }
 0x665   :  { %v4953_v62 = vld [vmem:[#allocation4 + $0x10] sm:$0xff]  ;;  %4920 = vst.msk [vmem:[#allocation4 + $0x88] sm:$0xff] %vm4897_vm8, %v8789_v32 }
 0x666   :  { %v4359_v11 = vpop.f32.mrf.mxu3  ;;  %v4954_v27 = vld [vmem:[#allocation4 + $0x18] sm:$0xff]  ;;  %4915 = vst.msk [vmem:[#allocation4] sm:$0xff] %vm4897_vm8, %v8789_v32 }
 0x667   :  { %v8446_v51 = vadd.f32 %v4359_v11, %v4289_v53  ;;  %v8450_v37 = vpop.f32.mrf.mxu2  ;;  %v4955_v28 = vpack.c.bf16 %v4954_v27, %v4953_v62  ;;  %v4520_v11 = vadd.f32 %v8437_v26, %v4442_v3  ;;  %v5048_v24 = vld [vmem:[#allocation4 + $0x20] sm:$0xff]  ;;  %4916 = vst.msk [vmem:[#allocation4 + $0x8] sm:$0xff] %vm4897_vm8, %v8789_v32  ;;  %v6518_v32 = vld [vmem:[%s8738_s7 + $0xd8] sm:$0xff] }
 0x668   :  { %v8448_v58 = vpop.f32.mrf.mxu1  ;;  %v5049_v17 = vld [vmem:[#allocation4 + $0x28] sm:$0xff] }
 0x669   :  { %6205 = vmatmul.msk.bf16.vlgmr.msra.gmra.mxu1 %vm4897_vm8, %v4955_v28  ;;  %v4443_v26 = vadd.f32 %v8448_v58, %v8423_v12  ;;  %v5050_v31 = vpack.c.bf16 %v5049_v17, %v5048_v24  ;;  %v6507_v12 = vld [vmem:[%s8738_s7 + $0x80] sm:$0xff]  ;;  %v4279_v58 = vadd.f32 %v8398_v25, %v8412_v43 }
 0x66a   :  { %5205 = vmatpush.bf16.msrb.mxu2 %v6507_v12  ;;  %v5105_v28 = vld [vmem:[#allocation4 + $0x48] sm:$0xff]  ;;  %v4284_v12 = vadd.f32 %v8417_v63, %v8425_v21 }
 0x66b   :  { %v4521_v16 = vadd.f32 %v8444_v38, %v4443_v26  ;;  %6247 = vmatmul.msk.bf16.vlgmr.msra.gmra.mxu3 %vm4897_vm8, %v5050_v31  ;;  %v4365_v3 = vadd.f32 %v8427_v0, %v4279_v58  ;;  %v5104_v0 = vld [vmem:[#allocation4 + $0x40] sm:$0xff] }
 0x66c   :  { %v5106_v39 = vpack.c.bf16 %v5105_v28, %v5104_v0 }
 0x66e   :  { %v4578_v5 = vpop.f32.mrf.mxu3  ;;  %v4942_v26 = vld [vmem:[#allocation4 + $0x8] sm:$0xff] }
 0x66f   :  { %v8454_v10 = vpop.f32.mrf.mxu2  ;;  %v4598_v13 = vadd.f32 %v4578_v5, %v4519_v48 }
 0x670   :  { %v8452_v1 = vpop.f32.mrf.mxu1 }
 0x676   :  { %v8456_v6 = vpop.f32.mrf.mxu3 }
 0x677   :  { %v8471_v18 = vpop.f32.mrf.mxu2  ;;  %v4599_v4 = vadd.f32 %v8456_v6, %v4520_v11  ;;  %v6504_v6 = vld [vmem:[%s8738_s7 + $0x68] sm:$0xff] }
 0x678   :  { %v8458_v60 = vpop.f32.mrf.mxu1  ;;  %5149 = vmatpush.bf16.msrb.mxu1 %v6504_v6 }
 0x67c   :  { %5150 = vmatpush.bf16.msrb.mxu1 %v6503_v50 }
 0x67e   :  { %v8466_v35 = vpop.f32.mrf.mxu3 }
 0x67f   :  { %v8485_v2 = vpop.f32.mrf.mxu2  ;;  %6272 = vmatmul.msk.bf16.vlgmr.msrb.gmra.mxu1 %vm4897_vm8, %v5106_v39 }
 0x680   :  { %v8473_v46 = vpop.f32.mrf.mxu1  ;;  %5314 = vmatpush.bf16.msra.mxu1 %v6518_v32 }
 0x686   :  { %v8475_v36 = vpop.f32.mrf.mxu3 }
 0x687   :  { %v8491_v42 = vpop.f32.mrf.mxu2 }
 0x688   :  { %v8477_v45 = vpop.f32.mrf.mxu1 }
 0x68e   :  { %v8487_v9 = vpop.f32.mrf.mxu3 }
 0x68f   :  { %v4736_v59 = vpop.f32.mrf.mxu2 }
 0x690   :  { %v8489_v44 = vpop.f32.mrf.mxu1 }
 0x696   :  { %v8493_v55 = vpop.f32.mrf.mxu3 }
 0x697   :  { %v4738_v53 = vpop.f32.mrf.mxu2 }
 0x698   :  { %v4657_v23 = vpop.f32.mrf.mxu1 }
 0x699   :  { %v4677_v30 = vadd.f32 %v4657_v23, %v4598_v13 }
 0x69b   :  { %v4756_v5 = vadd.f32 %v4736_v59, %v4677_v30  ;;  %v4600_v30 = vadd.f32 %v8466_v35, %v4521_v16  ;;  %v6513_v35 = vld [vmem:[%s8738_s7 + $0xb0] sm:$0xff] }
 0x69c   :  { %5259 = vmatpush.bf16.msrb.mxu3 %v6513_v35 }
 0x69e   :  { %v8511_v29 = vpop.f32.mrf.mxu3 }
 0x69f   :  { %v4741_v59 = vpop.f32.mrf.mxu2 }
 0x6a0   :  { %v4659_v33 = vpop.f32.mrf.mxu1 }
 0x6a1   :  { %v4678_v23 = vadd.f32 %v4659_v33, %v4599_v4  ;;  %v8588_v33 = vld [vmem:[%s8737_s6 + $0x2] ss:$0 sm:$0xff] }
 0x6a3   :  { %v4757_v19 = vadd.f32 %v4738_v53, %v4678_v23  ;;  %v4444_v53 = vadd.f32 %v8452_v1, %v4365_v3  ;;  %v6512_v1 = vld [vmem:[%s8738_s7 + $0xa8] sm:$0xff] }
 0x6a4   :  { %5260 = vmatpush.bf16.msrb.mxu3 %v6512_v1 }
 0x6a6   :  { %v8534_v15 = vpop.f32.mrf.mxu3 }
 0x6a7   :  { %v4743_v49 = vpop.f32.mrf.mxu2 }
 0x6a8   :  { %v4662_v40 = vpop.f32.mrf.mxu1 }
 0x6a9   :  { %v4679_v27 = vadd.f32 %v4662_v40, %v4600_v30  ;;  %v4522_v40 = vadd.f32 %v8450_v37, %v4444_v53  ;;  %v4445_v37 = vadd.f32 %v8458_v60, %v8431_v61  ;;  %v6522_v61 = vld [vmem:[%s8738_s7 + $0xf8] sm:$0xff]  ;;  %v6516_v60 = vld [vmem:[%s8738_s7 + $0xc8] sm:$0xff] }
 0x6ab   :  { %v4523_v58 = vadd.f32 %v8454_v10, %v4445_v37 }
 0x6ae   :  { %v4815_v8 = vpop.f32.mrf.mxu3 }
 0x6af   :  { %v4835_v57 = vadd.f32 %v4815_v8, %v4756_v5  ;;  %v4758_v5 = vadd.f32 %v4741_v59, %v4679_v27  ;;  %v4941_v8 = vld [vmem:[#allocation4] sm:$0xff]  ;;  %v4746_v16 = vpop.f32.mrf.mxu2  ;;  %v5272_v27 = vld [vmem:[#allocation4 + $0x88] sm:$0xff] }
 0x6b0   :  { %v4664_v43 = vpop.f32.mrf.mxu1  ;;  %v4943_v17 = vpack.c.bf16 %v4942_v26, %v4941_v8 }
 0x6b1   :  { %v4845_v52 = vadd.f32 %v8562_v22, %v4835_v57  ;;  %v4601_v57 = vadd.f32 %v8475_v36, %v4522_v40  ;;  %v6511_v36 = vld [vmem:[%s8738_s7 + $0xa0] sm:$0xff] }
 0x6b2   :  { %6222 = vmatmul.msk.bf16.vlgmr.msra.gmra.mxu2 %vm4897_vm8, %v4943_v17  ;;  %5261 = vmatpush.bf16.msrb.mxu3 %v6511_v36  ;;  %v4448_v36 = vadd.f32 %v8489_v44, %v8446_v51 }
 0x6b3   :  { %vm4853_vm6 = vcmp.gt.f32.partialorder %v4845_v52, 0.0  ;;  %v4861_v14 = vmul.f32 0.2, %v4845_v52  ;;  %v4680_v59 = vadd.f32 %v4664_v43, %v4601_v57  ;;  %5370 = vmatpush.bf16.msra.mxu2 %v6522_v61  ;;  %v4602_v43 = vadd.f32 %v8487_v9, %v4523_v58  ;;  %v5271_v9 = vld [vmem:[#allocation4 + $0x80] sm:$0xff] }
 0x6b5   :  { %v4869_v48 = vsel %vm4853_vm6, %v4845_v52, %v4861_v14  ;;  %v6517_v14 = vld [vmem:[%s8738_s7 + $0xd0] sm:$0xff]  ;;  %v4759_v20 = vadd.f32 %v4743_v49, %v4680_v59 }
 0x6b6   :  { %v4879_v25 = vmul.f32 %v8575_v34, %v4869_v48  ;;  %v4817_v13 = vpop.f32.mrf.mxu3  ;;  %5315 = vmatpush.bf16.msra.mxu1 %v6517_v14 }
 0x6b7   :  { %v4836_v62 = vadd.f32 %v4817_v13, %v4757_v19 }
 0x6b8   :  { %v4889_v38 = vadd.f32 %v8588_v33, %v4879_v25  ;;  %v4667_v24 = vpop.f32.mrf.mxu1  ;;  %v4367_v25 = vadd.f32 %v8435_v41, %v4284_v12  ;;  %v6521_v41 = vld [vmem:[%s8738_s7 + $0xf0] sm:$0xff] }
 0x6b9   :  { %v4846_v54 = vadd.f32 %v8562_v22, %v4836_v62  ;;  %v4681_v63 = vadd.f32 %v4667_v24, %v4602_v43  ;;  %v6515_v62 = vld [vmem:[%s8738_s7 + $0xc0] sm:$0xff]  ;;  %5371 = vmatpush.bf16.msra.mxu2 %v6521_v41 }
 0x6ba   :  { %4933 = vst.msk [vmem:[#allocation4 + $0x50] sm:$0xff] %vm4897_vm8, %v4889_v38  ;;  %5316 = vmatpush.bf16.msra.mxu1 %v6516_v60  ;;  %v4446_v30 = vadd.f32 %v8473_v46, %v4367_v25  ;;  %v5273_v46 = vpack.c.bf16 %v5272_v27, %v5271_v9 }
 0x6bb   :  { %vm4854_vm7 = vcmp.gt.f32.partialorder %v4846_v54, 0.0  ;;  %v4862_v7 = vmul.f32 0.2, %v4846_v54 }
 0x6bc   :  { %v4524_v0 = vadd.f32 %v8471_v18, %v4446_v30 }
 0x6bd   :  { %v4870_v11 = vsel %vm4854_vm7, %v4846_v54, %v4862_v7  ;;  %v6520_v54 = vld [vmem:[%s8738_s7 + $0xe8] sm:$0xff]  ;;  %v4760_v7 = vadd.f32 %v4746_v16, %v4681_v63 }
 0x6be   :  { %v4880_v47 = vmul.f32 %v8575_v34, %v4870_v11  ;;  %v4820_v4 = vpop.f32.mrf.mxu3  ;;  %5317 = vmatpush.bf16.msra.mxu1 %v6515_v62  ;;  %v4603_v1 = vadd.f32 %v8493_v55, %v4524_v0  ;;  %v4748_v11 = vpop.f32.mrf.mxu2  ;;  %5372 = vmatpush.bf16.msra.mxu2 %v6520_v54  ;;  %v6519_v55 = vld [vmem:[%s8738_s7 + $0xe0] sm:$0xff] }
 0x6bf   :  { %v4837_v23 = vadd.f32 %v4820_v4, %v4758_v5  ;;  %v6526_v4 = vld [vmem:[%s8738_s7 + $0x118] sm:$0xff] }
 0x6c0   :  { %v4890_v52 = vadd.f32 %v8588_v33, %v4880_v47  ;;  %v4669_v10 = vpop.f32.mrf.mxu1  ;;  %v4447_v47 = vadd.f32 %v8477_v45, %v8440_v56  ;;  %5426 = vmatpush.bf16.msra.mxu3 %v6526_v4  ;;  %v6525_v56 = vld [vmem:[%s8738_s7 + $0x110] sm:$0xff] }
 0x6c1   :  { %v4847_v6 = vadd.f32 %v8562_v22, %v4837_v23  ;;  %v5159_v35 = vld [vmem:[#allocation4 + $0x50] sm:$0xff]  ;;  %6347 = vmatmul.msk.bf16.vlgmr.msra.gmra.mxu1 %vm4897_vm8, %v5273_v46  ;;  %v4682_v18 = vadd.f32 %v4669_v10, %v4603_v1 }
 0x6c2   :  { %4934 = vst.msk [vmem:[#allocation4 + $0x58] sm:$0xff] %vm4897_vm8, %v4890_v52  ;;  %5373 = vmatpush.bf16.msra.mxu2 %v6519_v55  ;;  %v4525_v45 = vadd.f32 %v8485_v2, %v4447_v47  ;;  %v6524_v2 = vld [vmem:[%s8738_s7 + $0x108] sm:$0xff] }
 0x6c3   :  { %vm4855_vm9 = vcmp.gt.f32.partialorder %v4847_v6, 0.0  ;;  %v4863_v31 = vmul.f32 0.2, %v4847_v6  ;;  %v4761_v52 = vadd.f32 %v4748_v11, %v4682_v18 }
 0x6c4   :  { %v4604_v37 = vadd.f32 %v8511_v29, %v4525_v45  ;;  %5427 = vmatpush.bf16.msra.mxu3 %v6525_v56  ;;  %v16_v56 = vstv %s8741_s10 }
 0x6c5   :  { %v4871_v50 = vsel %vm4855_vm9, %v4847_v6, %v4863_v31  ;;  %17 = vst [vmem:[#allocation5] sm:$0x1] %v16_v56 }
 0x6c6   :  { %v4881_v48 = vmul.f32 %v8575_v34, %v4871_v50  ;;  %v4822_v19 = vpop.f32.mrf.mxu3  ;;  %v4751_v12 = vpop.f32.mrf.mxu2  ;;  %v4526_v50 = vadd.f32 %v8491_v42, %v4448_v36 }
 0x6c7   :  { %v4838_v13 = vadd.f32 %v4822_v19, %v4759_v20  ;;  %v6523_v20 = vld [vmem:[%s8738_s7 + $0x100] sm:$0xff] }
 0x6c8   :  { %v4891_v3 = vadd.f32 %v8588_v33, %v4881_v48  ;;  %v4672_v26 = vpop.f32.mrf.mxu1  ;;  %5428 = vmatpush.bf16.msra.mxu3 %v6524_v2  ;;  %v4605_v25 = vadd.f32 %v8534_v15, %v4526_v50  ;;  %v6538_v50 = vld [vmem:[%s8739_s8 + $0x1] ss:$0 sm:$0xff] }
 0x6c9   :  { %v4848_v21 = vadd.f32 %v8562_v22, %v4838_v13  ;;  %v5160_v53 = vld [vmem:[#allocation4 + $0x58] sm:$0xff]  ;;  %v4683_v14 = vadd.f32 %v4672_v26, %v4604_v37 }
 0x6ca   :  { %4935 = vst.msk [vmem:[#allocation4 + $0x60] sm:$0xff] %vm4897_vm8, %v4891_v3  ;;  %v5161_v32 = vpack.c.bf16 %v5160_v53, %v5159_v35 }
 0x6cb   :  { %vm4856_vm10 = vcmp.gt.f32.partialorder %v4848_v21, 0.0  ;;  %v4864_v38 = vmul.f32 0.2, %v4848_v21  ;;  %v4762_v44 = vadd.f32 %v4751_v12, %v4683_v14 }
 0x6cc   :  { %6297 = vmatmul.msk.bf16.vlgmr.msrb.gmra.mxu2 %vm4897_vm8, %v5161_v32  ;;  %5429 = vmatpush.bf16.msra.mxu3 %v6523_v20  ;;  %v6539_v20 = vld [vmem:[%s8739_s8 + $0x2] ss:$0 sm:$0xff] }
 0x6cd   :  { %v4872_v28 = vsel %vm4856_vm10, %v4848_v21, %v4864_v38 }
 0x6ce   :  { %v4882_v39 = vmul.f32 %v8575_v34, %v4872_v28  ;;  %v4825_v49 = vpop.f32.mrf.mxu3  ;;  %v4753_v63 = vpop.f32.mrf.mxu2 }
 0x6cf   :  { %v4839_v40 = vadd.f32 %v4825_v49, %v4760_v7 }
 0x6d0   :  { %v4892_v5 = vadd.f32 %v8588_v33, %v4882_v39  ;;  %v4674_v16 = vpop.f32.mrf.mxu1 }
 0x6d1   :  { %v4849_v8 = vadd.f32 %v8562_v22, %v4839_v40  ;;  %v5215_v61 = vld [vmem:[#allocation4 + $0x60] sm:$0xff]  ;;  %v4684_v3 = vadd.f32 %v4674_v16, %v4605_v25 }
 0x6d2   :  { %4936 = vst.msk [vmem:[#allocation4 + $0x68] sm:$0xff] %vm4897_vm8, %v4892_v5 }
 0x6d3   :  { %vm4857_vm11 = vcmp.gt.f32.partialorder %v4849_v8, 0.0  ;;  %v4865_v57 = vmul.f32 0.2, %v4849_v8  ;;  %v4763_v10 = vadd.f32 %v4753_v63, %v4684_v3 }
 0x6d5   :  { %v4873_v23 = vsel %vm4857_vm11, %v4849_v8, %v4865_v57 }
 0x6d6   :  { %v4883_v24 = vmul.f32 %v8575_v34, %v4873_v23  ;;  %v4827_v17 = vpop.f32.mrf.mxu3 }
 0x6d7   :  { %v4840_v59 = vadd.f32 %v4827_v17, %v4761_v52 }
 0x6d8   :  { %v4893_v6 = vadd.f32 %v8588_v33, %v4883_v24 }
 0x6d9   :  { %v4850_v31 = vadd.f32 %v8562_v22, %v4840_v59  ;;  %v5216_v60 = vld [vmem:[#allocation4 + $0x68] sm:$0xff] }
 0x6da   :  { %4937 = vst.msk [vmem:[#allocation4 + $0x90] sm:$0xff] %vm4897_vm8, %v4893_v6  ;;  %v5217_v29 = vpack.c.bf16 %v5216_v60, %v5215_v61 }
 0x6db   :  { %vm4858_vm12 = vcmp.gt.f32.partialorder %v4850_v31, 0.0  ;;  %v4866_v58 = vmul.f32 0.2, %v4850_v31 }
 0x6dc   :  { %6322 = vmatmul.msk.bf16.vlgmr.msrb.gmra.mxu3 %vm4897_vm8, %v5217_v29 }
 0x6dd   :  { %v4874_v51 = vsel %vm4858_vm12, %v4850_v31, %v4866_v58  ;;  %v6537_v31 = vld [vmem:[%s8739_s8] ss:$0 sm:$0xff] }
 0x6de   :  { %v4884_v48 = vmul.f32 %v8575_v34, %v4874_v51  ;;  %v4830_v19 = vpop.f32.mrf.mxu3 }
 0x6df   :  { %v4841_v43 = vadd.f32 %v4830_v19, %v4762_v44 }
 0x6e0   :  { %v4894_v13 = vadd.f32 %v8588_v33, %v4884_v48 }
 0x6e1   :  { %v4851_v30 = vadd.f32 %v8562_v22, %v4841_v43  ;;  %v5327_v53 = vld [vmem:[#allocation4 + $0x90] sm:$0xff]  ;;  %v6540_v43 = vld [vmem:[%s8740_s9] ss:$0 sm:$0xff] }
 0x6e2   :  { %4938 = vst.msk [vmem:[#allocation4 + $0x98] sm:$0xff] %vm4897_vm8, %v4894_v13 }
 0x6e3   :  { %vm4859_vm13 = vcmp.gt.f32.partialorder %v4851_v30, 0.0  ;;  %v4867_v42 = vmul.f32 0.2, %v4851_v30 }
 0x6e5   :  { %v4875_v21 = vsel %vm4859_vm13, %v4851_v30, %v4867_v42 }
 0x6e6   :  { %v4885_v62 = vmul.f32 %v8575_v34, %v4875_v21  ;;  %v4832_v41 = vpop.f32.mrf.mxu3 }
 0x6e7   :  { %v4842_v9 = vadd.f32 %v4832_v41, %v4763_v10 }
 0x6e8   :  { %v4895_v15 = vadd.f32 %v8588_v33, %v4885_v62 }
 0x6e9   :  { %v4852_v38 = vadd.f32 %v8562_v22, %v4842_v9  ;;  %v5328_v27 = vld [vmem:[#allocation4 + $0x98] sm:$0xff]  ;;  %v5001_v22 = vpop.f32.mrf.mxu1  ;;  %v6541_v9 = vld [vmem:[#allocation5] ss:$0 sm:$0xff] }
 0x6ea   :  { %4939 = vst.msk [vmem:[#allocation4 + $0xa0] sm:$0xff] %vm4897_vm8, %v4895_v15  ;;  %v5329_v46 = vpack.c.bf16 %v5328_v27, %v5327_v53 }
 0x6eb   :  { %vm4860_vm14 = vcmp.gt.f32.partialorder %v4852_v38, 0.0  ;;  %v4868_v54 = vmul.f32 0.2, %v4852_v38 }
 0x6ec   :  { %6372 = vmatmul.msk.bf16.vlgmr.msra.gmra.mxu2 %vm4897_vm8, %v5329_v46 }
 0x6ed   :  { %v4876_v0 = vsel %vm4860_vm14, %v4852_v38, %v4868_v54 }
 0x6ee   :  { %v4886_v28 = vmul.f32 %v8575_v34, %v4876_v0  ;;  %v5096_v40 = vpop.f32.mrf.mxu3 }
 0x6f0   :  { %v4896_v35 = vadd.f32 %v8588_v33, %v4886_v28 }
 0x6f1   :  { %v5383_v7 = vld [vmem:[#allocation4 + $0xa0] sm:$0xff]  ;;  %v5003_v1 = vpop.f32.mrf.mxu1 }
 0x6f2   :  { %4940 = vst.msk [vmem:[#allocation4 + $0xa8] sm:$0xff] %vm4897_vm8, %v4896_v35 }
 0x6f6   :  { %v5098_v47 = vpop.f32.mrf.mxu3 }
 0x6f9   :  { %v5384_v39 = vld [vmem:[#allocation4 + $0xa8] sm:$0xff] }
 0x6fa   :  { %v5385_v32 = vpack.c.bf16 %v5384_v39, %v5383_v7 }
 0x6fc   :  { %6397 = vmatmul.msk.bf16.vlgmr.msra.gmra.mxu3 %vm4897_vm8, %v5385_v32  ;;  %v5152_v5 = vpop.f32.mrf.mxu1 }
 0x704   :  { %v5154_v4 = vpop.f32.mrf.mxu1 }
 0x735   :  { %v5042_v49 = vpop.f32.mrf.mxu2 }
 0x736   :  { %v5043_v8 = vadd.f32 %v5042_v49, %v5001_v22 }
 0x738   :  { %v5101_v34 = vadd.f32 %v5096_v40, %v5043_v8 }
 0x73a   :  { %v5157_v26 = vadd.f32 %v5152_v5, %v5101_v34 }
 0x73d   :  { %v5044_v11 = vpop.f32.mrf.mxu2 }
 0x73e   :  { %v5045_v57 = vadd.f32 %v5044_v11, %v5003_v1  ;;  %v5319_v52 = vpop.f32.mrf.mxu1 }
 0x740   :  { %v5102_v23 = vadd.f32 %v5098_v47, %v5045_v57 }
 0x742   :  { %v5158_v59 = vadd.f32 %v5154_v4, %v5102_v23 }
 0x746   :  { %v5321_v12 = vpop.f32.mrf.mxu1 }
 0x74f   :  { %v5207_v18 = vpop.f32.mrf.mxu2 }
 0x750   :  { %v5212_v45 = vadd.f32 %v5207_v18, %v5157_v26 }
 0x757   :  { %v5209_v33 = vpop.f32.mrf.mxu2 }
 0x758   :  { %v5213_v36 = vadd.f32 %v5209_v33, %v5158_v59 }
 0x75f   :  { %v5263_v55 = vpop.f32.mrf.mxu3 }
 0x760   :  { %v5268_v17 = vadd.f32 %v5263_v55, %v5212_v45 }
 0x762   :  { %v5324_v6 = vadd.f32 %v5319_v52, %v5268_v17 }
 0x767   :  { %v5265_v24 = vpop.f32.mrf.mxu3 }
 0x768   :  { %v5269_v60 = vadd.f32 %v5265_v24, %v5213_v36 }
 0x76a   :  { %v5325_v51 = vadd.f32 %v5321_v12, %v5269_v60 }
 0x76f   :  { %v5375_v37 = vpop.f32.mrf.mxu2 }
 0x770   :  { %v5380_v14 = vadd.f32 %v5375_v37, %v5324_v6 }
 0x777   :  { %v5377_v58 = vpop.f32.mrf.mxu2 }
 0x778   :  { %v5381_v16 = vadd.f32 %v5377_v58, %v5325_v51 }
 0x77f   :  { %v5431_v61 = vpop.f32.mrf.mxu3 }
 0x780   :  { %v5436_v2 = vadd.f32 %v5431_v61, %v5380_v14 }
 0x782   :  { %v5440_v29 = vadd.f32 %v6537_v31, %v5436_v2 }
 0x784   :  { %vm5442_vm15 = vcmp.gt.f32.partialorder %v5440_v29, 0.0  ;;  %v5444_v44 = vmul.f32 0.2, %v5440_v29 }
 0x786   :  { %v5446_v48 = vsel %vm5442_vm15, %v5440_v29, %v5444_v44 }
 0x787   :  { %v5433_v19 = vpop.f32.mrf.mxu3  ;;  %v5450_v25 = vmul.f32 %v6538_v50, %v5446_v48 }
 0x788   :  { %v5437_v13 = vadd.f32 %v5433_v19, %v5381_v16 }
 0x789   :  { %v5454_v3 = vadd.f32 %v6539_v20, %v5450_v25 }
 0x78a   :  { %v5441_v30 = vadd.f32 %v6537_v31, %v5437_v13 }
 0x78b   :  { %v5460_v42 = vmul.f32 %v6540_v43, %v5454_v3 }
 0x78c   :  { %vm5443_vm0 = vcmp.gt.f32.partialorder %v5441_v30, 0.0  ;;  %v5445_v63 = vmul.f32 0.2, %v5441_v30 }
 0x78d   :  { %5462 = vadd.xlane.f32.xlu0 %v5460_v42 }
 0x78e   :  { %v5447_v21 = vsel %vm5443_vm0, %v5441_v30, %v5445_v63 }
 0x78f   :  { %v5451_v10 = vmul.f32 %v6538_v50, %v5447_v21 }
 0x791   :  { %v5455_v62 = vadd.f32 %v6539_v20, %v5451_v10 }
 0x793   :  { %v5461_v41 = vmul.f32 %v6540_v43, %v5455_v62 }
 0x795   :  { %5464 = vadd.xlane.f32.xlu0 %v5461_v41 }
 0x800   :  { %v5463_v15 = vpop.xlane.xlu0 %5462 }
 0x801   :  { %v5470_v38 = vadd.f32 %v6541_v9, %v5463_v15 }
 0x803   :  { %v5472_v53 = vsub.f32 0.0, %v5470_v38 }
 0x805   :  { %v5474_v27 = vmul.f32 1.442695, %v5472_v53 }
 0x807   :  { %6542 = vpow2.f32 %v5474_v27 }
 0x808   :  { %v5465_v46 = vpop.xlane.xlu0 %5464 }
 0x809   :  { %v5471_v54 = vadd.f32 %v6541_v9, %v5465_v46 }
 0x80b   :  { %v5473_v0 = vsub.f32 0.0, %v5471_v54 }
 0x80d   :  { %v6543_v28 = vpop.eup %6542  ;;  %v5476_v35 = vmul.f32 1.442695, %v5473_v0 }
 0x80e   :  { %v5478_v7 = vadd.f32 1.0, %v6543_v28 }
 0x80f   :  { %6544 = vpow2.f32 %v5476_v35 }
 0x810   :  { %6546 = vrcp.f32 %v5478_v7  ;;  %v5491_v40 = vand.u32 2147483648, %v5478_v7  ;;  %v5489_v5 = vand.u32 2147483647, %v5478_v7  ;;  %vm5485_vm2 = vweird.f32 %v5478_v7 }
 0x812   :  { %v5492_v8 = vor.u32 1.1754944e-38, %v5491_v40  ;;  %vm5490_vm5 = vcmp.eq.f32.partialorder %v5489_v5, 8.507059e+37 }
 0x815   :  { %v6545_v39 = vpop.eup %6544 }
 0x816   :  { %v6547_v32 = vpop.eup %6546  ;;  %v5479_v22 = vadd.f32 1.0, %v6545_v39 }
 0x817   :  { %v5481_v49 = vmul.f32 %v6547_v32, %v5478_v7  ;;  %vm5486_vm1 = vweird.f32 %v6547_v32 }
 0x818   :  { %6548 = vrcp.f32 %v5479_v22  ;;  %vm5487_vm4 = vmor %vm5485_vm2, %vm5486_vm1  ;;  %v5506_v57 = vand.u32 2147483648, %v5479_v22  ;;  %v5504_v56 = vand.u32 2147483647, %v5479_v22  ;;  %vm5500_vm6 = vweird.f32 %v5479_v22 }
 0x819   :  { %v5482_v1 = vsub.f32 1.0, %v5481_v49 }
 0x81a   :  { %v5507_v23 = vor.u32 1.1754944e-38, %v5506_v57  ;;  %vm5505_vm9 = vcmp.eq.f32.partialorder %v5504_v56, 8.507059e+37 }
 0x81b   :  { %v5483_v11 = vmul.f32 %v6547_v32, %v5482_v1 }
 0x81d   :  { %v5484_v47 = vadd.f32 %v6547_v32, %v5483_v11 }
 0x81e   :  { %v6549_v18 = vpop.eup %6548 }
 0x81f   :  { %v5488_v55 = vsel %vm5487_vm4, %v6547_v32, %v5484_v47  ;;  %v5496_v34 = vmul.f32 %v6549_v18, %v5479_v22  ;;  %vm5501_vm8 = vweird.f32 %v6549_v18 }
 0x820   :  { %v5493_v4 = vsel %vm5490_vm5, %v5492_v8, %v5488_v55  ;;  %vm5502_vm7 = vmor %vm5500_vm6, %vm5501_vm8 }
 0x821   :  { %5511 = vst.msk [vmem:[%s8742_s11] sm:$0xff] %vm5510_vm3, %v5493_v4  ;;  %v5497_v33 = vsub.f32 1.0, %v5496_v34 }
 0x823   :  { %v5498_v26 = vmul.f32 %v6549_v18, %v5497_v33 }
 0x825   :  { %v5499_v45 = vadd.f32 %v6549_v18, %v5498_v26 }
 0x827   :  { %v5503_v52 = vsel %vm5502_vm7, %v6549_v18, %v5499_v45 }
 0x828   :  { %v5508_v24 = vsel %vm5505_vm9, %v5507_v23, %v5503_v52 }
 0x829   :  { %5512 = vst.msk [vmem:[%s8742_s11 + $0x8] sm:$0xff] %vm5510_vm3, %v5508_v24 }

</bundles_post_ra>
